<compile_context>
chip_gen: v5e
topology: v5e:2x2
jax: 0.10.0
libtpu: 0.0.40
codegen_flags: <defaults>
</compile_context>

<pallas_src>
import jax
import jax.numpy as jnp
from jax import lax
from jax.experimental import pallas as pl
from jax.experimental.pallas import tpu as pltpu

EPS = 1e-5


# ------------------------------ fused kernel ------------------------------- #

def _down_block_kernel(s_ref, dww_ref, pw3_ref, pwT_ref, b1_ref, b34_ref,
                       bT_ref, o_ref):
    # s_ref : (2, Hh, 2, Wh, Cin+1) bf16 -- (row-phase, row, col-phase, col, ch)
    #         stride-2 phase split of the zero-padded NHWC image; channel Cin is
    #         the validity mask (1 inside the image, 0 in the padding).
    # dww   : (9, Cin+mid) f32  -- [w1*s1 | w4*s4]   (depthwise, bn folded)
    # pw3   : (Cin, mid)   bf16 -- w3*s3             (1x1, bn folded)
    # pwT   : (Cin+mid, 2*mid) bf16 -- blockdiag(w2*s2, w5*s5)
    # b1    : (1, Cin) f32 ; b34 : (2, mid) f32 (rows b3, b4) ; bT : (1, 2*mid) f32
    # o_ref : (Ho, Wo, 2*mid) f32 -- [branch1 | branch2] on the channel axis
    Cp = s_ref.shape[-1]
    Cin = b1_ref.shape[-1]
    mid = b34_ref.shape[-1]
    Hh, Wh = s_ref.shape[1], s_ref.shape[3]
    Ho, Wo = o_ref.shape[0], o_ref.shape[1]

    s = s_ref[...]                                       # (2, Hh, 2, Wh, Cp) bf16

    # -- branch 2, stage 1: relu(x @ (w3*s3) + b3) over the WHOLE padded slab as
    #    one matmul (review: replace 9 tiny K=Cin dots with one large-M dot).
    flat = s.reshape(4 * Hh * Wh, Cp)
    t = jnp.dot(flat[:, :Cin], pw3_ref[...],
                preferred_element_type=jnp.float32)      # (4*Hh*Wh, mid) f32
    t = jnp.maximum(t + b34_ref[0:1, :], 0.0)
    # conv4's zero-padding taps must contribute 0 (not relu(b3)): multiply by the
    # validity channel carried in the slab.
    t = t * flat[:, Cin:Cin + 1].astype(jnp.float32)
    t = t.reshape(2, Hh, 2, Wh, mid)

    dw = dww_ref[...]                                    # (9, Cin+mid) f32

    # -- both depthwise 3x3/stride-2 convs: in-kernel tap formation.  Tap (kh,kw)
    #    of output (ho,wo) lives at phase (kh%2, kw%2), offset (kh//2, kw//2):
    #    all nine taps are unit-stride STATIC slices of the phase-split slab.
    PH = (0, 1, 0)   # phase of tap index 0/1/2
    OF = (0, 0, 1)   # half-resolution offset of tap index 0/1/2
    y1 = b1_ref[...].reshape(1, 1, Cin)                  # bn1 bias (f32 acc, bcast)
    a2 = b34_ref[1:2, :].reshape(1, 1, mid)              # bn4 bias (f32 acc, bcast)
    for kh in range(3):
        for kw in range(3):
            k = kh * 3 + kw
            rp, r0 = PH[kh], OF[kh]
            cp, c0 = PH[kw], OF[kw]
            x_tap = s[rp, r0:r0 + Ho, cp, c0:c0 + Wo, :Cin]   # (Ho, Wo, Cin) bf16
            t_tap = t[rp, r0:r0 + Ho, cp, c0:c0 + Wo, :]      # (Ho, Wo, mid) f32
            y1 = y1 + x_tap * dw[k:k + 1, :Cin].reshape(1, 1, Cin)
            a2 = a2 + t_tap * dw[k:k + 1, Cin:].reshape(1, 1, mid)

    # -- fused tail: relu([y1 | a2] @ blockdiag(w2*s2, w5*s5) + [b2 | b5]).
    #    One matmul + one store; the branch concat rides on the contraction axis.
    z = jnp.concatenate([y1, a2], axis=-1).reshape(Ho * Wo, Cin + mid)
    o = jnp.dot(z.astype(jnp.bfloat16), pwT_ref[...],
                preferred_element_type=jnp.float32) + bT_ref[...]
    o_ref[...] = jnp.maximum(o, 0.0).reshape(Ho, Wo, 2 * mid)


# ------------------------------ host wrapper ------------------------------- #

def down_block_forward(x_nchw, p):
    """Forward pass of DownBlock. Input/output are NCHW (PyTorch convention)."""
    x = jnp.transpose(x_nchw, (0, 2, 3, 1)).astype(jnp.float32)     # -> NHWC
    N, H, W, Cin = x.shape
    mid = p["w2"].shape[1]
    Ho, Wo = (H + 1) // 2, (W + 1) // 2
    Hh, Wh = Ho + 1, Wo + 1
    Cp = Cin + 1

    # --- fold BatchNorm (inference) into conv weights, once, on the host -----
    w1f = (p["w1"] * p["s1"]).reshape(9, Cin).astype(jnp.float32)
    w4f = (p["w4"] * p["s4"]).reshape(9, mid).astype(jnp.float32)
    dww = jnp.concatenate([w1f, w4f], axis=1)                       # (9, Cin+mid)
    pw3 = (p["w3"] * p["s3"][None, :]).astype(jnp.bfloat16)         # (Cin, mid)
    w2f = p["w2"] * p["s2"][None, :]
    w5f = p["w5"] * p["s5"][None, :]
    pwT = jnp.zeros((Cin + mid, 2 * mid), jnp.float32)
    pwT = pwT.at[:Cin, :mid].set(w2f).at[Cin:, mid:].set(w5f)
    pwT = pwT.astype(jnp.bfloat16)                                  # blockdiag
    b1 = p["b1"].reshape(1, Cin).astype(jnp.float32)
    b34 = jnp.stack([p["b3"], p["b4"]], axis=0).astype(jnp.float32)  # (2, mid)
    bT = jnp.concatenate([p["b2"], p["b5"]]).reshape(1, 2 * mid).astype(jnp.float32)

    # --- pad + validity channel + stride-2 phase split (bf16 stream) ---------
    ones = jnp.ones((N, H, W, 1), jnp.float32)
    xc = jnp.concatenate([x, ones], axis=-1)                        # (N,H,W,Cp)
    xp = jnp.pad(xc, ((0, 0), (1, 2 * Hh - (H + 1)), (1, 2 * Wh - (W + 1)), (0, 0)))
    s2d = xp.reshape(N, Hh, 2, Wh, 2, Cp).transpose(0, 2, 1, 4, 3, 5)
    s2d = s2d.astype(jnp.bfloat16)                                  # (N,2,Hh,2,Wh,Cp)

    def _full(shape):  # small weight/bias arrays: full block, same for every step
        nd = len(shape)
        return pl.BlockSpec(shape, lambda n, _nd=nd: (0,) * _nd)

    out = pl.pallas_call(
        _down_block_kernel,
        out_shape=jax.ShapeDtypeStruct((N, Ho, Wo, 2 * mid), jnp.float32),
        grid=(N,),
        in_specs=[
            pl.BlockSpec((None, 2, Hh, 2, Wh, Cp), lambda n: (n, 0, 0, 0, 0, 0)),
            _full((9, Cin + mid)),
            _full((Cin, mid)),
            _full((Cin + mid, 2 * mid)),
            _full((1, Cin)),
            _full((2, mid)),
            _full((1, 2 * mid)),
        ],
        out_specs=pl.BlockSpec((None, Ho, Wo, 2 * mid), lambda n: (n, 0, 0, 0)),
        compiler_params=pltpu.CompilerParams(
            dimension_semantics=("parallel",),
            vmem_limit_bytes=32 * 1024 * 1024),
    )(s2d, dww, pw3, pwT, b1, b34, bT)

    # concat([o1, o2], channel) + ShuffleBlock(groups=2) == channel interleave;
    # folded into the (mandatory) NHWC->NCHW conversion as a single transpose.
    out = out.reshape(N, Ho, Wo, 2, mid)
    return jnp.transpose(out, (0, 4, 3, 1, 2)).reshape(N, 2 * mid, Ho, Wo)


# ------------------------------ pure-JAX reference ------------------------- #

def _ref_forward(x_nchw, p):
    x = jnp.transpose(x_nchw, (0, 2, 3, 1))
    dn = ("NHWC", "HWIO", "NHWC")

    def dw(xx, w, s, b):
        C = xx.shape[-1]
        y = lax.conv_general_dilated(xx, w.reshape(3, 3, 1, C), (2, 2),
                                     [(1, 1), (1, 1)], dimension_numbers=dn,
                                     feature_group_count=C)
        return y * s + b

    def pw(xx, w, s, b, relu):
        y = lax.conv_general_dilated(xx, w.reshape(1, 1, *w.shape), (1, 1),
                                     "VALID", dimension_numbers=dn)
        y = y * s + b
        return jnp.maximum(y, 0.0) if relu else y

    o1 = pw(dw(x, p["w1"], p["s1"], p["b1"]), p["w2"], p["s2"], p["b2"], True)
    o2 = pw(x, p["w3"], p["s3"], p["b3"], True)
    o2 = dw(o2, p["w4"], p["s4"], p["b4"])
    o2 = pw(o2, p["w5"], p["s5"], p["b5"], True)
    N, Ho, Wo, mid = o1.shape
    out = jnp.stack([o1, o2], axis=-1).reshape(N, Ho, Wo, 2 * mid)
    return jnp.transpose(out, (0, 3, 1, 2))


# --------------------------------- params ---------------------------------- #

def make_bn_scale_bias(key, C):
    k1, k2, k3, k4 = jax.random.split(key, 4)
    gamma = 1.0 + 0.1 * jax.random.normal(k1, (C,), jnp.float32)
    beta = 0.1 * jax.random.normal(k2, (C,), jnp.float32)
    mean = 0.05 * jax.random.normal(k3, (C,), jnp.float32)
    var = 1.0 + 0.1 * jnp.abs(jax.random.normal(k4, (C,), jnp.float32))
    scale = gamma / jnp.sqrt(var + EPS)
    bias = beta - mean * scale
    return scale, bias


if __name__ == "__main__":
    key = jax.random.PRNGKey(0)
    in_channels, out_channels = 4, 8
    mid = out_channels // 2
    N, H, W = 2, 16, 16

    keys = jax.random.split(key, 12)
    x = jax.random.normal(keys[0], (N, in_channels, H, W), jnp.float32)

    params = {}
    params["w1"] = 0.2 * jax.random.normal(keys[1], (3, 3, in_channels), jnp.float32)
    params["s1"], params["b1"] = make_bn_scale_bias(keys[2], in_channels)
    params["w2"] = 0.2 * jax.random.normal(keys[3], (in_channels, mid), jnp.float32)
    params["s2"], params["b2"] = make_bn_scale_bias(keys[4], mid)
    params["w3"] = 0.2 * jax.random.normal(keys[5], (in_channels, mid), jnp.float32)
    params["s3"], params["b3"] = make_bn_scale_bias(keys[6], mid)
    params["w4"] = 0.2 * jax.random.normal(keys[7], (3, 3, mid), jnp.float32)
    params["s4"], params["b4"] = make_bn_scale_bias(keys[8], mid)
    params["w5"] = 0.2 * jax.random.normal(keys[9], (mid, mid), jnp.float32)
    params["s5"], params["b5"] = make_bn_scale_bias(keys[10], mid)

    out = jax.block_until_ready(down_block_forward(x, params))
    ref = jax.block_until_ready(_ref_forward(x, params))

    assert out.shape == (N, out_channels, H // 2, W // 2), out.shape
    # bf16 input/weight streaming (review item) -> relaxed tolerance vs f32 ref.
    err = float(jnp.max(jnp.abs(out - ref)))
    assert jnp.allclose(out, ref, atol=5e-2, rtol=5e-2), err
    print("KERNEL_OK")
</pallas_src>

<mosaic_0001>
module attributes {stable_mosaic.version = 11 : i64} {
  func.func @_down_block_kernel(%arg0: i32, %arg1: memref<1x2x9x2x9x5xbf16, #tpu.memory_space<vmem>>, %arg2: memref<9x8xf32, #tpu.memory_space<vmem>>, %arg3: memref<4x4xbf16, #tpu.memory_space<vmem>>, %arg4: memref<8x8xbf16, #tpu.memory_space<vmem>>, %arg5: memref<1x4xf32, #tpu.memory_space<vmem>>, %arg6: memref<2x4xf32, #tpu.memory_space<vmem>>, %arg7: memref<1x8xf32, #tpu.memory_space<vmem>>, %arg8: memref<1x8x8x8xf32, #tpu.memory_space<vmem>>) attributes {dimension_semantics = [#tpu.dimension_semantics<parallel>], iteration_bounds = array<i64: 2>, scalar_prefetch = 0 : i64, scratch_operands = 0 : i64, tpu.core_type = #tpu.core_type<tc>, window_params = [{transform_indices = @transform_0, window_bounds = array<i64: 1, 2, 9, 2, 9, 5>}, {pipeline_mode = #tpu.pipeline_mode<synchronous>, transform_indices = @transform_1, window_bounds = array<i64: 9, 8>}, {pipeline_mode = #tpu.pipeline_mode<synchronous>, transform_indices = @transform_2, window_bounds = array<i64: 4, 4>}, {pipeline_mode = #tpu.pipeline_mode<synchronous>, transform_indices = @transform_3, window_bounds = array<i64: 8, 8>}, {pipeline_mode = #tpu.pipeline_mode<synchronous>, transform_indices = @transform_4, window_bounds = array<i64: 1, 4>}, {pipeline_mode = #tpu.pipeline_mode<synchronous>, transform_indices = @transform_5, window_bounds = array<i64: 2, 4>}, {pipeline_mode = #tpu.pipeline_mode<synchronous>, transform_indices = @transform_6, window_bounds = array<i64: 1, 8>}, {transform_indices = @transform_7, window_bounds = array<i64: 1, 8, 8, 8>}]} {
    %c0 = arith.constant 0 : index
    %c0_0 = arith.constant 0 : index
    %c0_1 = arith.constant 0 : index
    %c0_2 = arith.constant 0 : index
    %c0_3 = arith.constant 0 : index
    %c0_4 = arith.constant 0 : index
    %0 = vector.load %arg1[%c0, %c0_0, %c0_1, %c0_2, %c0_3, %c0_4] : memref<1x2x9x2x9x5xbf16, #tpu.memory_space<vmem>>, vector<1x2x9x2x9x5xbf16>
    %1 = vector.shape_cast %0 : vector<1x2x9x2x9x5xbf16> to vector<2x9x2x9x5xbf16>
    %2 = vector.shape_cast %1 : vector<2x9x2x9x5xbf16> to vector<324x5xbf16>
    %3 = vector.extract_strided_slice %2 {offsets = [0, 0], sizes = [324, 4], strides = [1, 1]} : vector<324x5xbf16> to vector<324x4xbf16>
    %c0_5 = arith.constant 0 : index
    %c0_6 = arith.constant 0 : index
    %4 = vector.load %arg3[%c0_5, %c0_6] : memref<4x4xbf16, #tpu.memory_space<vmem>>, vector<4x4xbf16>
    %cst = arith.constant dense<0.000000e+00> : vector<324x4xf32>
    %5 = tpu.matmul %3, %4, %cst {dimension_numbers = #tpu.dot_dimension_numbers<[1], [0], [0], [1], [0, 0, 1, 1], [], []>} : vector<324x4xbf16>, vector<4x4xbf16>, vector<324x4xf32> -> vector<324x4xf32>
    %c0_7 = arith.constant 0 : index
    %c0_8 = arith.constant 0 : index
    %6 = vector.load %arg6[%c0_7, %c0_8] : memref<2x4xf32, #tpu.memory_space<vmem>>, vector<1x4xf32>
    %7 = vector.broadcast %6 : vector<1x4xf32> to vector<324x4xf32>
    %8 = arith.addf %5, %7 : vector<324x4xf32>
    %cst_9 = arith.constant 0.000000e+00 : f32
    %9 = vector.broadcast %cst_9 : f32 to vector<324x4xf32>
    %10 = arith.maximumf %8, %9 : vector<324x4xf32>
    %11 = vector.extract_strided_slice %2 {offsets = [0, 4], sizes = [324, 1], strides = [1, 1]} : vector<324x5xbf16> to vector<324x1xbf16>
    %12 = arith.extf %11 : vector<324x1xbf16> to vector<324x1xf32>
    %13 = vector.broadcast %12 : vector<324x1xf32> to vector<324x4xf32>
    %14 = arith.mulf %10, %13 : vector<324x4xf32>
    %15 = vector.shape_cast %14 : vector<324x4xf32> to vector<2x9x2x9x4xf32>
    %c0_10 = arith.constant 0 : index
    %c0_11 = arith.constant 0 : index
    %16 = vector.load %arg2[%c0_10, %c0_11] : memref<9x8xf32, #tpu.memory_space<vmem>>, vector<9x8xf32>
    %c0_12 = arith.constant 0 : index
    %c0_13 = arith.constant 0 : index
    %17 = vector.load %arg5[%c0_12, %c0_13] : memref<1x4xf32, #tpu.memory_space<vmem>>, vector<1x4xf32>
    %18 = vector.shape_cast %17 : vector<1x4xf32> to vector<1x1x4xf32>
    %c1 = arith.constant 1 : index
    %c0_14 = arith.constant 0 : index
    %19 = vector.load %arg6[%c1, %c0_14] : memref<2x4xf32, #tpu.memory_space<vmem>>, vector<1x4xf32>
    %20 = vector.shape_cast %19 : vector<1x4xf32> to vector<1x1x4xf32>
    %21 = vector.extract_strided_slice %1 {offsets = [0, 0, 0, 0, 0], sizes = [1, 8, 1, 8, 4], strides = [1, 1, 1, 1, 1]} : vector<2x9x2x9x5xbf16> to vector<1x8x1x8x4xbf16>
    %22 = vector.shape_cast %21 : vector<1x8x1x8x4xbf16> to vector<8x8x4xbf16>
    %23 = vector.extract_strided_slice %15 {offsets = [0, 0, 0, 0, 0], sizes = [1, 8, 1, 8, 4], strides = [1, 1, 1, 1, 1]} : vector<2x9x2x9x4xf32> to vector<1x8x1x8x4xf32>
    %24 = vector.shape_cast %23 : vector<1x8x1x8x4xf32> to vector<8x8x4xf32>
    %25 = vector.extract_strided_slice %16 {offsets = [0, 0], sizes = [1, 4], strides = [1, 1]} : vector<9x8xf32> to vector<1x4xf32>
    %26 = vector.shape_cast %25 : vector<1x4xf32> to vector<1x1x4xf32>
    %27 = arith.extf %22 : vector<8x8x4xbf16> to vector<8x8x4xf32>
    %28 = vector.broadcast %26 : vector<1x1x4xf32> to vector<8x8x4xf32>
    %29 = arith.mulf %27, %28 : vector<8x8x4xf32>
    %30 = vector.broadcast %18 : vector<1x1x4xf32> to vector<8x8x4xf32>
    %31 = arith.addf %30, %29 : vector<8x8x4xf32>
    %32 = vector.extract_strided_slice %16 {offsets = [0, 4], sizes = [1, 4], strides = [1, 1]} : vector<9x8xf32> to vector<1x4xf32>
    %33 = vector.shape_cast %32 : vector<1x4xf32> to vector<1x1x4xf32>
    %34 = vector.broadcast %33 : vector<1x1x4xf32> to vector<8x8x4xf32>
    %35 = arith.mulf %24, %34 : vector<8x8x4xf32>
    %36 = vector.broadcast %20 : vector<1x1x4xf32> to vector<8x8x4xf32>
    %37 = arith.addf %36, %35 : vector<8x8x4xf32>
    %38 = vector.extract_strided_slice %1 {offsets = [0, 0, 1, 0, 0], sizes = [1, 8, 1, 8, 4], strides = [1, 1, 1, 1, 1]} : vector<2x9x2x9x5xbf16> to vector<1x8x1x8x4xbf16>
    %39 = vector.shape_cast %38 : vector<1x8x1x8x4xbf16> to vector<8x8x4xbf16>
    %40 = vector.extract_strided_slice %15 {offsets = [0, 0, 1, 0, 0], sizes = [1, 8, 1, 8, 4], strides = [1, 1, 1, 1, 1]} : vector<2x9x2x9x4xf32> to vector<1x8x1x8x4xf32>
    %41 = vector.shape_cast %40 : vector<1x8x1x8x4xf32> to vector<8x8x4xf32>
    %42 = vector.extract_strided_slice %16 {offsets = [1, 0], sizes = [1, 4], strides = [1, 1]} : vector<9x8xf32> to vector<1x4xf32>
    %43 = vector.shape_cast %42 : vector<1x4xf32> to vector<1x1x4xf32>
    %44 = arith.extf %39 : vector<8x8x4xbf16> to vector<8x8x4xf32>
    %45 = vector.broadcast %43 : vector<1x1x4xf32> to vector<8x8x4xf32>
    %46 = arith.mulf %44, %45 : vector<8x8x4xf32>
    %47 = arith.addf %31, %46 : vector<8x8x4xf32>
    %48 = vector.extract_strided_slice %16 {offsets = [1, 4], sizes = [1, 4], strides = [1, 1]} : vector<9x8xf32> to vector<1x4xf32>
    %49 = vector.shape_cast %48 : vector<1x4xf32> to vector<1x1x4xf32>
    %50 = vector.broadcast %49 : vector<1x1x4xf32> to vector<8x8x4xf32>
    %51 = arith.mulf %41, %50 : vector<8x8x4xf32>
    %52 = arith.addf %37, %51 : vector<8x8x4xf32>
    %53 = vector.extract_strided_slice %1 {offsets = [0, 0, 0, 1, 0], sizes = [1, 8, 1, 8, 4], strides = [1, 1, 1, 1, 1]} : vector<2x9x2x9x5xbf16> to vector<1x8x1x8x4xbf16>
    %54 = vector.shape_cast %53 : vector<1x8x1x8x4xbf16> to vector<8x8x4xbf16>
    %55 = vector.extract_strided_slice %15 {offsets = [0, 0, 0, 1, 0], sizes = [1, 8, 1, 8, 4], strides = [1, 1, 1, 1, 1]} : vector<2x9x2x9x4xf32> to vector<1x8x1x8x4xf32>
    %56 = vector.shape_cast %55 : vector<1x8x1x8x4xf32> to vector<8x8x4xf32>
    %57 = vector.extract_strided_slice %16 {offsets = [2, 0], sizes = [1, 4], strides = [1, 1]} : vector<9x8xf32> to vector<1x4xf32>
    %58 = vector.shape_cast %57 : vector<1x4xf32> to vector<1x1x4xf32>
    %59 = arith.extf %54 : vector<8x8x4xbf16> to vector<8x8x4xf32>
    %60 = vector.broadcast %58 : vector<1x1x4xf32> to vector<8x8x4xf32>
    %61 = arith.mulf %59, %60 : vector<8x8x4xf32>
    %62 = arith.addf %47, %61 : vector<8x8x4xf32>
    %63 = vector.extract_strided_slice %16 {offsets = [2, 4], sizes = [1, 4], strides = [1, 1]} : vector<9x8xf32> to vector<1x4xf32>
    %64 = vector.shape_cast %63 : vector<1x4xf32> to vector<1x1x4xf32>
    %65 = vector.broadcast %64 : vector<1x1x4xf32> to vector<8x8x4xf32>
    %66 = arith.mulf %56, %65 : vector<8x8x4xf32>
    %67 = arith.addf %52, %66 : vector<8x8x4xf32>
    %68 = vector.extract_strided_slice %1 {offsets = [1, 0, 0, 0, 0], sizes = [1, 8, 1, 8, 4], strides = [1, 1, 1, 1, 1]} : vector<2x9x2x9x5xbf16> to vector<1x8x1x8x4xbf16>
    %69 = vector.shape_cast %68 : vector<1x8x1x8x4xbf16> to vector<8x8x4xbf16>
    %70 = vector.extract_strided_slice %15 {offsets = [1, 0, 0, 0, 0], sizes = [1, 8, 1, 8, 4], strides = [1, 1, 1, 1, 1]} : vector<2x9x2x9x4xf32> to vector<1x8x1x8x4xf32>
    %71 = vector.shape_cast %70 : vector<1x8x1x8x4xf32> to vector<8x8x4xf32>
    %72 = vector.extract_strided_slice %16 {offsets = [3, 0], sizes = [1, 4], strides = [1, 1]} : vector<9x8xf32> to vector<1x4xf32>
    %73 = vector.shape_cast %72 : vector<1x4xf32> to vector<1x1x4xf32>
    %74 = arith.extf %69 : vector<8x8x4xbf16> to vector<8x8x4xf32>
    %75 = vector.broadcast %73 : vector<1x1x4xf32> to vector<8x8x4xf32>
    %76 = arith.mulf %74, %75 : vector<8x8x4xf32>
    %77 = arith.addf %62, %76 : vector<8x8x4xf32>
    %78 = vector.extract_strided_slice %16 {offsets = [3, 4], sizes = [1, 4], strides = [1, 1]} : vector<9x8xf32> to vector<1x4xf32>
    %79 = vector.shape_cast %78 : vector<1x4xf32> to vector<1x1x4xf32>
    %80 = vector.broadcast %79 : vector<1x1x4xf32> to vector<8x8x4xf32>
    %81 = arith.mulf %71, %80 : vector<8x8x4xf32>
    %82 = arith.addf %67, %81 : vector<8x8x4xf32>
    %83 = vector.extract_strided_slice %1 {offsets = [1, 0, 1, 0, 0], sizes = [1, 8, 1, 8, 4], strides = [1, 1, 1, 1, 1]} : vector<2x9x2x9x5xbf16> to vector<1x8x1x8x4xbf16>
    %84 = vector.shape_cast %83 : vector<1x8x1x8x4xbf16> to vector<8x8x4xbf16>
    %85 = vector.extract_strided_slice %15 {offsets = [1, 0, 1, 0, 0], sizes = [1, 8, 1, 8, 4], strides = [1, 1, 1, 1, 1]} : vector<2x9x2x9x4xf32> to vector<1x8x1x8x4xf32>
    %86 = vector.shape_cast %85 : vector<1x8x1x8x4xf32> to vector<8x8x4xf32>
    %87 = vector.extract_strided_slice %16 {offsets = [4, 0], sizes = [1, 4], strides = [1, 1]} : vector<9x8xf32> to vector<1x4xf32>
    %88 = vector.shape_cast %87 : vector<1x4xf32> to vector<1x1x4xf32>
    %89 = arith.extf %84 : vector<8x8x4xbf16> to vector<8x8x4xf32>
    %90 = vector.broadcast %88 : vector<1x1x4xf32> to vector<8x8x4xf32>
    %91 = arith.mulf %89, %90 : vector<8x8x4xf32>
    %92 = arith.addf %77, %91 : vector<8x8x4xf32>
    %93 = vector.extract_strided_slice %16 {offsets = [4, 4], sizes = [1, 4], strides = [1, 1]} : vector<9x8xf32> to vector<1x4xf32>
    %94 = vector.shape_cast %93 : vector<1x4xf32> to vector<1x1x4xf32>
    %95 = vector.broadcast %94 : vector<1x1x4xf32> to vector<8x8x4xf32>
    %96 = arith.mulf %86, %95 : vector<8x8x4xf32>
    %97 = arith.addf %82, %96 : vector<8x8x4xf32>
    %98 = vector.extract_strided_slice %1 {offsets = [1, 0, 0, 1, 0], sizes = [1, 8, 1, 8, 4], strides = [1, 1, 1, 1, 1]} : vector<2x9x2x9x5xbf16> to vector<1x8x1x8x4xbf16>
    %99 = vector.shape_cast %98 : vector<1x8x1x8x4xbf16> to vector<8x8x4xbf16>
    %100 = vector.extract_strided_slice %15 {offsets = [1, 0, 0, 1, 0], sizes = [1, 8, 1, 8, 4], strides = [1, 1, 1, 1, 1]} : vector<2x9x2x9x4xf32> to vector<1x8x1x8x4xf32>
    %101 = vector.shape_cast %100 : vector<1x8x1x8x4xf32> to vector<8x8x4xf32>
    %102 = vector.extract_strided_slice %16 {offsets = [5, 0], sizes = [1, 4], strides = [1, 1]} : vector<9x8xf32> to vector<1x4xf32>
    %103 = vector.shape_cast %102 : vector<1x4xf32> to vector<1x1x4xf32>
    %104 = arith.extf %99 : vector<8x8x4xbf16> to vector<8x8x4xf32>
    %105 = vector.broadcast %103 : vector<1x1x4xf32> to vector<8x8x4xf32>
    %106 = arith.mulf %104, %105 : vector<8x8x4xf32>
    %107 = arith.addf %92, %106 : vector<8x8x4xf32>
    %108 = vector.extract_strided_slice %16 {offsets = [5, 4], sizes = [1, 4], strides = [1, 1]} : vector<9x8xf32> to vector<1x4xf32>
    %109 = vector.shape_cast %108 : vector<1x4xf32> to vector<1x1x4xf32>
    %110 = vector.broadcast %109 : vector<1x1x4xf32> to vector<8x8x4xf32>
    %111 = arith.mulf %101, %110 : vector<8x8x4xf32>
    %112 = arith.addf %97, %111 : vector<8x8x4xf32>
    %113 = vector.extract_strided_slice %1 {offsets = [0, 1, 0, 0, 0], sizes = [1, 8, 1, 8, 4], strides = [1, 1, 1, 1, 1]} : vector<2x9x2x9x5xbf16> to vector<1x8x1x8x4xbf16>
    %114 = vector.shape_cast %113 : vector<1x8x1x8x4xbf16> to vector<8x8x4xbf16>
    %115 = vector.extract_strided_slice %15 {offsets = [0, 1, 0, 0, 0], sizes = [1, 8, 1, 8, 4], strides = [1, 1, 1, 1, 1]} : vector<2x9x2x9x4xf32> to vector<1x8x1x8x4xf32>
    %116 = vector.shape_cast %115 : vector<1x8x1x8x4xf32> to vector<8x8x4xf32>
    %117 = vector.extract_strided_slice %16 {offsets = [6, 0], sizes = [1, 4], strides = [1, 1]} : vector<9x8xf32> to vector<1x4xf32>
    %118 = vector.shape_cast %117 : vector<1x4xf32> to vector<1x1x4xf32>
    %119 = arith.extf %114 : vector<8x8x4xbf16> to vector<8x8x4xf32>
    %120 = vector.broadcast %118 : vector<1x1x4xf32> to vector<8x8x4xf32>
    %121 = arith.mulf %119, %120 : vector<8x8x4xf32>
    %122 = arith.addf %107, %121 : vector<8x8x4xf32>
    %123 = vector.extract_strided_slice %16 {offsets = [6, 4], sizes = [1, 4], strides = [1, 1]} : vector<9x8xf32> to vector<1x4xf32>
    %124 = vector.shape_cast %123 : vector<1x4xf32> to vector<1x1x4xf32>
    %125 = vector.broadcast %124 : vector<1x1x4xf32> to vector<8x8x4xf32>
    %126 = arith.mulf %116, %125 : vector<8x8x4xf32>
    %127 = arith.addf %112, %126 : vector<8x8x4xf32>
    %128 = vector.extract_strided_slice %1 {offsets = [0, 1, 1, 0, 0], sizes = [1, 8, 1, 8, 4], strides = [1, 1, 1, 1, 1]} : vector<2x9x2x9x5xbf16> to vector<1x8x1x8x4xbf16>
    %129 = vector.shape_cast %128 : vector<1x8x1x8x4xbf16> to vector<8x8x4xbf16>
    %130 = vector.extract_strided_slice %15 {offsets = [0, 1, 1, 0, 0], sizes = [1, 8, 1, 8, 4], strides = [1, 1, 1, 1, 1]} : vector<2x9x2x9x4xf32> to vector<1x8x1x8x4xf32>
    %131 = vector.shape_cast %130 : vector<1x8x1x8x4xf32> to vector<8x8x4xf32>
    %132 = vector.extract_strided_slice %16 {offsets = [7, 0], sizes = [1, 4], strides = [1, 1]} : vector<9x8xf32> to vector<1x4xf32>
    %133 = vector.shape_cast %132 : vector<1x4xf32> to vector<1x1x4xf32>
    %134 = arith.extf %129 : vector<8x8x4xbf16> to vector<8x8x4xf32>
    %135 = vector.broadcast %133 : vector<1x1x4xf32> to vector<8x8x4xf32>
    %136 = arith.mulf %134, %135 : vector<8x8x4xf32>
    %137 = arith.addf %122, %136 : vector<8x8x4xf32>
    %138 = vector.extract_strided_slice %16 {offsets = [7, 4], sizes = [1, 4], strides = [1, 1]} : vector<9x8xf32> to vector<1x4xf32>
    %139 = vector.shape_cast %138 : vector<1x4xf32> to vector<1x1x4xf32>
    %140 = vector.broadcast %139 : vector<1x1x4xf32> to vector<8x8x4xf32>
    %141 = arith.mulf %131, %140 : vector<8x8x4xf32>
    %142 = arith.addf %127, %141 : vector<8x8x4xf32>
    %143 = vector.extract_strided_slice %1 {offsets = [0, 1, 0, 1, 0], sizes = [1, 8, 1, 8, 4], strides = [1, 1, 1, 1, 1]} : vector<2x9x2x9x5xbf16> to vector<1x8x1x8x4xbf16>
    %144 = vector.shape_cast %143 : vector<1x8x1x8x4xbf16> to vector<8x8x4xbf16>
    %145 = vector.extract_strided_slice %15 {offsets = [0, 1, 0, 1, 0], sizes = [1, 8, 1, 8, 4], strides = [1, 1, 1, 1, 1]} : vector<2x9x2x9x4xf32> to vector<1x8x1x8x4xf32>
    %146 = vector.shape_cast %145 : vector<1x8x1x8x4xf32> to vector<8x8x4xf32>
    %147 = vector.extract_strided_slice %16 {offsets = [8, 0], sizes = [1, 4], strides = [1, 1]} : vector<9x8xf32> to vector<1x4xf32>
    %148 = vector.shape_cast %147 : vector<1x4xf32> to vector<1x1x4xf32>
    %149 = arith.extf %144 : vector<8x8x4xbf16> to vector<8x8x4xf32>
    %150 = vector.broadcast %148 : vector<1x1x4xf32> to vector<8x8x4xf32>
    %151 = arith.mulf %149, %150 : vector<8x8x4xf32>
    %152 = arith.addf %137, %151 : vector<8x8x4xf32>
    %153 = vector.extract_strided_slice %16 {offsets = [8, 4], sizes = [1, 4], strides = [1, 1]} : vector<9x8xf32> to vector<1x4xf32>
    %154 = vector.shape_cast %153 : vector<1x4xf32> to vector<1x1x4xf32>
    %155 = vector.broadcast %154 : vector<1x1x4xf32> to vector<8x8x4xf32>
    %156 = arith.mulf %146, %155 : vector<8x8x4xf32>
    %157 = arith.addf %142, %156 : vector<8x8x4xf32>
    %158 = tpu.concatenate %152, %157 in 2 : vector<8x8x4xf32>, vector<8x8x4xf32> -> vector<8x8x8xf32>
    %159 = vector.shape_cast %158 : vector<8x8x8xf32> to vector<64x8xf32>
    %160 = arith.truncf %159 : vector<64x8xf32> to vector<64x8xbf16>
    %c0_15 = arith.constant 0 : index
    %c0_16 = arith.constant 0 : index
    %161 = vector.load %arg4[%c0_15, %c0_16] : memref<8x8xbf16, #tpu.memory_space<vmem>>, vector<8x8xbf16>
    %cst_17 = arith.constant dense<0.000000e+00> : vector<64x8xf32>
    %162 = tpu.matmul %160, %161, %cst_17 {dimension_numbers = #tpu.dot_dimension_numbers<[1], [0], [0], [1], [0, 0, 1, 1], [], []>} : vector<64x8xbf16>, vector<8x8xbf16>, vector<64x8xf32> -> vector<64x8xf32>
    %c0_18 = arith.constant 0 : index
    %c0_19 = arith.constant 0 : index
    %163 = vector.load %arg7[%c0_18, %c0_19] : memref<1x8xf32, #tpu.memory_space<vmem>>, vector<1x8xf32>
    %164 = vector.broadcast %163 : vector<1x8xf32> to vector<64x8xf32>
    %165 = arith.addf %162, %164 : vector<64x8xf32>
    %cst_20 = arith.constant 0.000000e+00 : f32
    %166 = vector.broadcast %cst_20 : f32 to vector<64x8xf32>
    %167 = arith.maximumf %165, %166 : vector<64x8xf32>
    %168 = vector.shape_cast %167 : vector<64x8xf32> to vector<8x8x8xf32>
    %c0_21 = arith.constant 0 : index
    %c0_22 = arith.constant 0 : index
    %c0_23 = arith.constant 0 : index
    %c0_24 = arith.constant 0 : index
    %169 = vector.load %arg8[%c0_21, %c0_22, %c0_23, %c0_24] : memref<1x8x8x8xf32, #tpu.memory_space<vmem>>, vector<1x8x8x8xf32>
    %170 = vector.shape_cast %169 : vector<1x8x8x8xf32> to vector<8x8x8xf32>
    %171 = vector.shape_cast %168 : vector<8x8x8xf32> to vector<1x8x8x8xf32>
    tpu.vector_store %arg8[%c0_21, %c0_22, %c0_23, %c0_24], %171 {strides = array<i32>} : memref<1x8x8x8xf32, #tpu.memory_space<vmem>>, vector<1x8x8x8xf32>,
    return
  }
  func.func @transform_0(%arg0: i32) -> (i32, i32, i32, i32, i32, i32) {
    %c0_i32 = arith.constant 0 : i32
    %c0_i32_0 = arith.constant 0 : i32
    %c0_i32_1 = arith.constant 0 : i32
    %c0_i32_2 = arith.constant 0 : i32
    %c0_i32_3 = arith.constant 0 : i32
    %c0_i32_4 = arith.constant 0 : i32
    return %arg0, %c0_i32, %c0_i32_0, %c0_i32_1, %c0_i32_2, %c0_i32_3 : i32, i32, i32, i32, i32, i32
  }
  func.func @transform_1(%arg0: i32) -> (i32, i32) {
    %c0_i32 = arith.constant 0 : i32
    %c0_i32_0 = arith.constant 0 : i32
    %c0_i32_1 = arith.constant 0 : i32
    return %c0_i32, %c0_i32_0 : i32, i32
  }
  func.func @transform_2(%arg0: i32) -> (i32, i32) {
    %c0_i32 = arith.constant 0 : i32
    %c0_i32_0 = arith.constant 0 : i32
    %c0_i32_1 = arith.constant 0 : i32
    return %c0_i32, %c0_i32_0 : i32, i32
  }
  func.func @transform_3(%arg0: i32) -> (i32, i32) {
    %c0_i32 = arith.constant 0 : i32
    %c0_i32_0 = arith.constant 0 : i32
    %c0_i32_1 = arith.constant 0 : i32
    return %c0_i32, %c0_i32_0 : i32, i32
  }
  func.func @transform_4(%arg0: i32) -> (i32, i32) {
    %c0_i32 = arith.constant 0 : i32
    %c0_i32_0 = arith.constant 0 : i32
    %c0_i32_1 = arith.constant 0 : i32
    return %c0_i32, %c0_i32_0 : i32, i32
  }
  func.func @transform_5(%arg0: i32) -> (i32, i32) {
    %c0_i32 = arith.constant 0 : i32
    %c0_i32_0 = arith.constant 0 : i32
    %c0_i32_1 = arith.constant 0 : i32
    return %c0_i32, %c0_i32_0 : i32, i32
  }
  func.func @transform_6(%arg0: i32) -> (i32, i32) {
    %c0_i32 = arith.constant 0 : i32
    %c0_i32_0 = arith.constant 0 : i32
    %c0_i32_1 = arith.constant 0 : i32
    return %c0_i32, %c0_i32_0 : i32, i32
  }
  func.func @transform_7(%arg0: i32) -> (i32, i32, i32, i32) {
    %c0_i32 = arith.constant 0 : i32
    %c0_i32_0 = arith.constant 0 : i32
    %c0_i32_1 = arith.constant 0 : i32
    %c0_i32_2 = arith.constant 0 : i32
    return %arg0, %c0_i32, %c0_i32_0, %c0_i32_1 : i32, i32, i32, i32
  }
}

</mosaic_0001>

<bundles_post_ra>
// kernel: tpu_custom_call.1
= control target key start
LH: loop header
LB: loop body
LE: loop exit
PB: predicated region body
PF: predicated region fallthrough
CT: control target
= control target key end

     0   :  { %12 = vsyncpa [#allocation3], 0  ;;  %s10623_s0 = inlined_call_operand.vmem [shape: bf16[2,2,9,2,9,5], index: 0, kind: input, shape index: {}]   ;;  %s10624_s1 = inlined_call_operand.vmem [shape: f32[9,8], index: 1, kind: input, shape index: {}]   ;;  %s10625_s2 = inlined_call_operand.vmem [shape: bf16[4,4], index: 2, kind: input, shape index: {}]   ;;  %s10626_s3 = inlined_call_operand.vmem [shape: bf16[8,8], index: 3, kind: input, shape index: {}]   ;;  %s10627_s4 = inlined_call_operand.vmem [shape: f32[1,4], index: 4, kind: input, shape index: {}]   ;;  %s10628_s5 = inlined_call_operand.vmem [shape: f32[2,4], index: 5, kind: input, shape index: {}]   ;;  %s10629_s6 = inlined_call_operand.vmem [shape: f32[1,8], index: 6, kind: input, shape index: {}]   ;;  %s10630_s7 = inlined_call_operand.hbm [shape: f32[2,8,8,8], index: 7, kind: output, shape index: {}]  }
   0x1   :  { %14 = vsyncpa [#allocation3 + $0x1], 0  ;;  %s6513_s24 = smov 0   ;;  %s6515_s25 = smov 0  }
   0x2   :  { %s6517_s26 = smov 0   ;;  %s6519_s27 = smov 0  }
   0x3 LB: > { %s6534_s28 = sadd.s32 4294967295, %s6466_s27   ;;  %s6071_s29 = sadd.s32 4294967294, %s6466_s27   ;;  %s6466_s27 = sphi %s6519_s27, %s11955_s27   ;;  %s6462_s26 = sphi %s6517_s26, %s11954_s26   ;;  %s6458_s25 = sphi %s6515_s25, %s11953_s25   ;;  %s6454_s24 = sphi %s6513_s24, %s11952_s24  }
   0x4   : > { %s6538_s30 = sadd.s32 1, %s6466_s27   ;;  %s179_s8 = sadd.s32 1, %s6462_s26 }
   0x5   : > { %s176_s9 = ssub.s32 %s6466_s27, %s6538_s30  ;;  %p189_p0 = scmp.ne.s32.totalorder %s6462_s26, %s6458_s25 }
   0x6   : > { %p177_p1 = scmp.eq.s32.totalorder %s176_s9, 0  ;;  %p190_p2 = scmp.eq.s32.totalorder %s6534_s28, 1 }
   0x7   : > { %p195_p3 = scmp.ne.s32.totalorder %s6458_s25, %s6454_s24  ;;  %p196_p4 = scmp.eq.s32.totalorder %s6071_s29, 1 }
   0x8   : > { %s6549_s10 = scalar_select %p177_p1, %s6462_s26, %s179_s8  }
   0x9   : > { %p6551_p5 = por %p190_p2, %p189_p0  ;;  %p6555_p6 = por %p196_p4, %p195_p3 }
   0xa   : > { %p6074_p7 = scmp.ge.s32.totalorder %s6466_s27, 1  ;;  %p240_p8 = scmp.lt.s32.totalorder %s6466_s27, 3 }
   0xc   : > { %p241_p9 = pnand %p6074_p7, %p240_p8 }
   0xe   : > { %244 = sbr.rel (%p241_p9) target bundleno = 2037 (0x7f5), region = 48 }
  0x13   : > { %v1434_v0 = vld [vmem:[%s10625_s2] sm:$0x3]  ;;  %vm1994_vm0 = vcmask 1041408   ;;  %p272_p10 = scmp.lt.s32.totalorder %s6534_s28, 1  ;;  %vm494_vm1 = vcmask 1040384   ;;  %vm499_vm2 = vcmask 1041409  }
  0x14   : > { %v1996_v1 = vsel %vm1994_vm0, %v1434_v0, 0  ;;  %vm503_vm3 = vcmask 1042434   ;;  %vm507_vm4 = vcmask 1043459   ;;  %vm1951_vm5 = vcmask 31744   ;;  %s6468_s22 = smov 124   ;;  %s6470_s29 = smov 4  }
  0x15   : > { %2005 = vmatpush.bf16.msra.mxu0 %v1996_v1  ;;  %s273_s15 = scalar_select %p272_p10, %s6534_s28, 1  ;;  %6198 = vmatpush.bf16.msra.mxu2 %v1996_v1  ;;  %vm5944_vm6 = vcmask 1043456   ;;  %vm3815_vm7 = vcmask 1046528   ;;  %vm5931_vm8 = vcmask 64512  }
  0x16   : > { %6199 = vmatpush.bf16.msra.mxu3 %v1996_v1  ;;  %s6424_s18 = scalar_lea.hbm %s10630_s7, 128 }
  0x17   : > { %s6200_s16 = smul.u32 288, %s273_s15 }
  0x19   : > { %s6569_s19 = scalar_lea.vmem %s10623_s0, %s6200_s16 }
  0x1a   : > { %v278_v2 = vld [vmem:[%s6569_s19] sm:$0xf]  ;;  %v279_v3 = vld [vmem:[%s6569_s19 + $0x4] sm:$0x1]  ;;  %v280_v4 = vld [vmem:[%s6569_s19 + $0x8] sm:$0xf] }
  0x1b   : > { %v422_v5 = vrot.slane %v278_v2, 3  ;;  %v423_v6 = vrot.slane %v279_v3, 3  ;;  %v424_v7 = vrot.slane %v280_v4, 3  ;;  %v284_v20 = vld [vmem:[%s6569_s19 + $0x18] sm:$0xf] }
  0x1c   : > { %v281_v26 = vld [vmem:[%s6569_s19 + $0xc] sm:$0x1]  ;;  %v282_v30 = vld [vmem:[%s6569_s19 + $0x10] sm:$0xf]  ;;  %v428_v31 = vrot.slane %v284_v20, 3 }
  0x1d   : > { %v6575_v8 = vsel %vm494_vm1, %v278_v2, %v422_v5  ;;  %v6578_v9 = vsel %vm499_vm2, %v278_v2, %v422_v5  ;;  %v6581_v10 = vsel %vm503_vm3, %v278_v2, %v422_v5  ;;  %v6584_v11 = vsel %vm507_vm4, %v278_v2, %v422_v5  ;;  %v283_v35 = vld [vmem:[%s6569_s19 + $0x14] sm:$0x1]  ;;  %v285_v60 = vld [vmem:[%s6569_s19 + $0x1c] sm:$0x1]  ;;  %v286_v62 = vld [vmem:[%s6569_s19 + $0x20] sm:$0xf] }
  0x1e   : > { %v10647_v12 = vrot.slane %v6578_v9, 1  ;;  %v10646_v13 = vrot.slane %v6581_v10, 2  ;;  %v10645_v14 = vrot.slane %v6584_v11, 3  ;;  %v513_v15 = vsel %vm494_vm1, %v279_v3, %v423_v6  ;;  %1600 = vst [vmem:[#allocation1] ss:$9 sm:$0xff] %v6575_v8 }
  0x1f   : > { %v517_v16 = vsel %vm494_vm1, %v280_v4, %v424_v7  ;;  %v519_v17 = vsel %vm499_vm2, %v280_v4, %v424_v7  ;;  %v522_v18 = vsel %vm503_vm3, %v280_v4, %v424_v7  ;;  %v525_v19 = vsel %vm507_vm4, %v280_v4, %v424_v7  ;;  %v288_v63 = vld [vmem:[%s6569_s19 + $0x28] sm:$0xf]  ;;  %v287_v2 = vld [vmem:[%s6569_s19 + $0x24] sm:$0x1] }
  0x20   : > { %v521_v21 = vrot.slane %v519_v17, 1  ;;  %v524_v22 = vrot.slane %v522_v18, 2  ;;  %v527_v23 = vrot.slane %v525_v19, 3  ;;  %v1120_v24 = vunpack.i.h.s16 %v517_v16  ;;  %1603 = vst [vmem:[#allocation1 + $0x1] ss:$9 sm:$0xff] %v10647_v12 }
  0x21   : > { %v6598_v25 = vpack.i.b16 %v517_v16, %v513_v15  ;;  %1606 = vst [vmem:[#allocation1 + $0x2] ss:$9 sm:$0xff] %v10646_v13  ;;  %v425_v34 = vrot.slane %v281_v26, 3  ;;  %v426_v36 = vrot.slane %v282_v30, 3  ;;  %v553_v37 = vsel %vm499_vm2, %v284_v20, %v428_v31 }
  0x22   : > { %v1122_v27 = vunpack.i.h.s16 %v521_v21  ;;  %v1124_v28 = vunpack.i.h.s16 %v524_v22  ;;  %v6603_v29 = vpack.i.b16 %v521_v21, %v1120_v24  ;;  %1609 = vst [vmem:[#allocation1 + $0x3] ss:$9 sm:$0xff] %v10645_v14  ;;  %v1126_v38 = vunpack.i.h.s16 %v527_v23 }
  0x23   : > { %1612 = vst [vmem:[#allocation1 + $0x4] ss:$9 sm:$0xff] %v6598_v25  ;;  %v530_v39 = vsel %vm494_vm1, %v281_v26, %v425_v34  ;;  %v427_v40 = vrot.slane %v283_v35, 3  ;;  %v6620_v41 = vsel %vm499_vm2, %v282_v30, %v426_v36  ;;  %v551_v42 = vsel %vm494_vm1, %v284_v20, %v428_v31 }
  0x24   : > { %v6609_v32 = vpack.i.b16 %v524_v22, %v1122_v27  ;;  %v6611_v33 = vpack.i.b16 %v527_v23, %v1124_v28  ;;  %1615 = vst [vmem:[#allocation1 + $0x5] ss:$9 sm:$0xff] %v6603_v29  ;;  %v555_v43 = vrot.slane %v553_v37, 1  ;;  %v6624_v44 = vsel %vm503_vm3, %v282_v30, %v426_v36 }
  0x25   : > { %v556_v45 = vsel %vm503_vm3, %v284_v20, %v428_v31  ;;  %v6627_v46 = vpack.i.b16 %v530_v39, %v1126_v38  ;;  %v6630_v47 = vsel %vm507_vm4, %v282_v30, %v426_v36  ;;  %v6633_v48 = vsel %vm494_vm1, %v282_v30, %v426_v36  ;;  %v3206_v36 = vld [vmem:[%s10624_s1] sm:$0xff] }
  0x26   : > { %1618 = vst [vmem:[#allocation1 + $0x6] ss:$9 sm:$0xff] %v6609_v32  ;;  %v10642_v49 = vrot.slane %v6620_v41, 1  ;;  %v547_v50 = vsel %vm494_vm1, %v283_v35, %v427_v40  ;;  %v1138_v51 = vunpack.i.h.s16 %v551_v42  ;;  %v10641_v53 = vrot.slane %v6624_v44, 2 }
  0x27   : > { %1621 = vst [vmem:[#allocation1 + $0x7] ss:$9 sm:$0xff] %v6611_v33  ;;  %v558_v54 = vrot.slane %v556_v45, 2  ;;  %v1140_v55 = vunpack.i.h.s16 %v555_v43  ;;  %v10644_v56 = vrot.slane %v6630_v47, 3  ;;  %v6641_v57 = vpack.i.b16 %v551_v42, %v547_v50  ;;  %v289_v42 = vld [vmem:[%s6569_s19 + $0x2c] sm:$0x1] }
  0x28   : > { %v559_v58 = vsel %vm507_vm4, %v284_v20, %v428_v31  ;;  %v6645_v59 = vpack.i.b16 %v555_v43, %v1138_v51  ;;  %v429_v1 = vrot.slane %v285_v60, 3  ;;  %v430_v3 = vrot.slane %v286_v62, 3  ;;  %v290_v50 = vld [vmem:[%s6569_s19 + $0x30] sm:$0xf] }
  0x29   : > { %v6650_v61 = vpack.i.b16 %v558_v54, %v1140_v55  ;;  %v561_v0 = vrot.slane %v559_v58, 3  ;;  %v432_v4 = vrot.slane %v288_v63, 3  ;;  %v1142_v5 = vunpack.i.h.s16 %v558_v54  ;;  %v291_v55 = vld [vmem:[%s6569_s19 + $0x34] sm:$0x1]  ;;  %v292_v58 = vld [vmem:[%s6569_s19 + $0x38] sm:$0xf] }
  0x2a   : > { %v564_v7 = vsel %vm494_vm1, %v285_v60, %v429_v1  ;;  %v431_v15 = vrot.slane %v287_v2, 3  ;;  %v6664_v16 = vsel %vm499_vm2, %v286_v62, %v430_v3  ;;  %v6671_v20 = vsel %vm503_vm3, %v286_v62, %v430_v3 }
  0x2b   : > { %v1144_v6 = vunpack.i.h.s16 %v561_v0  ;;  %v585_v17 = vsel %vm494_vm1, %v288_v63, %v432_v4  ;;  %v587_v18 = vsel %vm499_vm2, %v288_v63, %v432_v4  ;;  %v6668_v19 = vpack.i.b16 %v561_v0, %v1142_v5 }
  0x2c   : > { %v6676_v22 = vsel %vm494_vm1, %v286_v62, %v430_v3  ;;  %v6679_v23 = vsel %vm507_vm4, %v286_v62, %v430_v3  ;;  %v10637_v26 = vrot.slane %v6664_v16, 1  ;;  %v581_v27 = vsel %vm494_vm1, %v287_v2, %v431_v15 }
  0x2d   : > { %v6673_v21 = vpack.i.b16 %v564_v7, %v1144_v6  ;;  %v589_v28 = vrot.slane %v587_v18, 1  ;;  %v1156_v30 = vunpack.i.h.s16 %v585_v17  ;;  %v10639_v31 = vrot.slane %v6671_v20, 2 }
  0x2e   : > { %v1622_v52 = vld [vmem:[#allocation1] sm:$0xff]  ;;  %v10638_v34 = vrot.slane %v6679_v23, 3  ;;  %v590_v35 = vsel %vm503_vm3, %v288_v63, %v432_v4  ;;  %v6692_v37 = vpack.i.b16 %v585_v17, %v581_v27  ;;  %v593_v38 = vsel %vm507_vm4, %v288_v63, %v432_v4 }
  0x2f   : > { %6167 = vmatmul.msk.bf16.vlgmr.msra.gmra.mxu0 %vm1951_vm5, %v1622_v52  ;;  %1624 = vst [vmem:[#allocation1] ss:$9 sm:$0xff] %v6627_v46  ;;  %v6696_v39 = vperm.slane %v3206_v36, 0  ;;  %v6698_v40 = vpack.i.b16 %v589_v28, %v1156_v30  ;;  %v592_v43 = vrot.slane %v590_v35, 2  ;;  %v595_v51 = vrot.slane %v593_v38, 3 }
  0x30   : > { %1626 = vst [vmem:[#allocation1 + $0x1] ss:$9 sm:$0xff] %v6633_v48  ;;  %v433_v52 = vrot.slane %v289_v42, 3  ;;  %v1158_v54 = vunpack.i.h.s16 %v589_v28  ;;  %v434_v60 = vrot.slane %v290_v50, 3  ;;  %v435_v3 = vrot.slane %v291_v55, 3 }
  0x31   : > { %1628 = vst [vmem:[#allocation1 + $0x2] ss:$9 sm:$0xff] %v10642_v49  ;;  %3246 = vrot.lane.b32.xlu0 %v6696_v39, %s6468_s22  ;;  %v3239_v45 = vrot.slane %v6696_v39, 1  ;;  %v1160_v62 = vunpack.i.h.s16 %v592_v43  ;;  %v3243_v63 = vrot.slane %v6696_v39, 5  ;;  %v1162_v0 = vunpack.i.h.s16 %v595_v51 }
  0x32   : > { %1630 = vst [vmem:[#allocation1 + $0x3] ss:$9 sm:$0xff] %v10641_v53  ;;  %v598_v1 = vsel %vm494_vm1, %v289_v42, %v433_v52  ;;  %v3240_v2 = vrot.slane %v6696_v39, 2  ;;  %v436_v4 = vrot.slane %v292_v58, 3  ;;  %v6719_v5 = vpack.i.b16 %v592_v43, %v1158_v54  ;;  %v293_v52 = vld [vmem:[%s6569_s19 + $0x3c] sm:$0x1] }
  0x33   : > { %1632 = vst [vmem:[#allocation1 + $0x4] ss:$9 sm:$0xff] %v10644_v56  ;;  %3248 = vrot.lane.b32.xlu1 %v3239_v45, %s6468_s22  ;;  %v6722_v6 = vsel %vm499_vm2, %v290_v50, %v434_v60  ;;  %v6724_v7 = vpack.i.b16 %v595_v51, %v1160_v62  ;;  %v6728_v15 = vsel %vm503_vm3, %v290_v50, %v434_v60  ;;  %v6469_v51 = vmov 4  }
  0x34   : > { %1634 = vst [vmem:[#allocation1 + $0x5] ss:$9 sm:$0xff] %v6641_v57  ;;  %v6730_v17 = vpack.i.b16 %v598_v1, %v1162_v0  ;;  %v6737_v27 = vsel %vm494_vm1, %v290_v50, %v434_v60  ;;  %v10636_v28 = vrot.slane %v6722_v6, 1  ;;  %v615_v30 = vsel %vm494_vm1, %v291_v55, %v435_v3  ;;  %6245 = vset.pattern.permute.xlu0 %v6469_v51 }
  0x35   : > { %1636 = vst [vmem:[#allocation1 + $0x6] ss:$9 sm:$0xff] %v6645_v59  ;;  %v619_v35 = vsel %vm494_vm1, %v292_v58, %v436_v4  ;;  %v10635_v36 = vrot.slane %v6728_v15, 2  ;;  %v621_v38 = vsel %vm499_vm2, %v292_v58, %v436_v4  ;;  %v624_v43 = vsel %vm503_vm3, %v292_v58, %v436_v4  ;;  %6251 = vset.pattern.permute.xlu1 %v6469_v51 }
  0x36   : > { %1638 = vst [vmem:[#allocation1 + $0x7] ss:$9 sm:$0xff] %v6650_v61  ;;  %v6750_v45 = vpack.i.b16 %v619_v35, %v615_v30  ;;  %v623_v54 = vrot.slane %v621_v38, 1  ;;  %v626_v55 = vrot.slane %v624_v43, 2  ;;  %6257 = vset.pattern.permute.xlu2 %v6469_v51 }
  0x37   : > { %11072 = vst [vmem:[#allocation5_spill] sm:$0xff] %v6696_v39 }
  0x38   : > { %v1176_v0 = vunpack.i.h.s16 %v623_v54 }
  0x39   : > { %3256 = vrot.lane.b32.xlu0 %v3243_v63, %s6468_s22  ;;  %v1174_v63 = vunpack.i.h.s16 %v619_v35 }
  0x3a   : > { %v6766_v30 = vpack.i.b16 %v626_v55, %v1176_v0 }
  0x3b   : > { %3250 = vrot.lane.b32.xlu1 %v3240_v2, %s6468_s22  ;;  %v1178_v2 = vunpack.i.h.s16 %v626_v55 }
  0x3d   : > { %v1639_v24 = vld [vmem:[#allocation1] sm:$0xff] }
  0x3e   : > { %1641 = vst [vmem:[#allocation1] ss:$9 sm:$0xff] %v6668_v19 }
  0x3f   : > { %6168 = vmatmul.msk.bf16.gmra.mxu0 %vm1951_vm5, %v1639_v24  ;;  %1643 = vst [vmem:[#allocation1 + $0x1] ss:$9 sm:$0xff] %v6673_v21  ;;  %v6733_v24 = vsel %vm507_vm4, %v290_v50, %v434_v60  ;;  %v627_v50 = vsel %vm507_vm4, %v292_v58, %v436_v4  ;;  %v294_v60 = vld [vmem:[%s6569_s19 + $0x40] sm:$0xf]  ;;  %v437_v58 = vrot.slane %v293_v52, 3 }
  0x40   : > { %1645 = vst [vmem:[#allocation1 + $0x2] ss:$9 sm:$0xff] %v6676_v22  ;;  %v10631_v42 = vrot.slane %v6733_v24, 3  ;;  %v629_v62 = vrot.slane %v627_v50, 3  ;;  %v438_v1 = vrot.slane %v294_v60, 3 }
  0x41   : > { %1647 = vst [vmem:[#allocation1 + $0x3] ss:$9 sm:$0xff] %v10637_v26  ;;  %v632_v4 = vsel %vm494_vm1, %v293_v52, %v437_v58  ;;  %v297_v26 = vld [vmem:[%s6569_s19 + $0x4c] sm:$0x1] }
  0x42   : > { %1649 = vst [vmem:[#allocation1 + $0x4] ss:$9 sm:$0xff] %v10639_v31  ;;  %v1180_v3 = vunpack.i.h.s16 %v629_v62  ;;  %v6769_v38 = vsel %vm499_vm2, %v294_v60, %v438_v1  ;;  %v6771_v43 = vpack.i.b16 %v629_v62, %v1178_v2  ;;  %v6774_v51 = vsel %vm503_vm3, %v294_v60, %v438_v1  ;;  %v298_v62 = vld [vmem:[%s6569_s19 + $0x50] sm:$0xf] }
  0x43   : > { %1651 = vst [vmem:[#allocation1 + $0x5] ss:$9 sm:$0xff] %v10638_v34  ;;  %v6783_v52 = vsel %vm494_vm1, %v294_v60, %v438_v1  ;;  %v10633_v55 = vrot.slane %v6774_v51, 2  ;;  %v441_v56 = vrot.slane %v297_v26, 3 }
  0x44   : > { %1653 = vst [vmem:[#allocation1 + $0x6] ss:$9 sm:$0xff] %v6692_v37  ;;  %v6776_v35 = vpack.i.b16 %v632_v4, %v1180_v3 }
  0x45   : > { %1655 = vst [vmem:[#allocation1 + $0x7] ss:$9 sm:$0xff] %v6698_v40 }
  0x46   : > { %11073 = vst [vmem:[#allocation6_spill] sm:$0xff] %v6771_v43 }
  0x47   : > { %11074 = vst [vmem:[#allocation7_spill] sm:$0xff] %v6776_v35 }
  0x4c   : > { %v1656_v18 = vld [vmem:[#allocation1] sm:$0xff] }
  0x4d   : > { %1658 = vst [vmem:[#allocation1] ss:$9 sm:$0xff] %v6719_v5 }
  0x4e   : > { %1660 = vst [vmem:[#allocation1 + $0x1] ss:$9 sm:$0xff] %v6724_v7 }
  0x4f   : > { %6169 = vmatmul.msk.bf16.gmra.mxu0 %vm1951_vm5, %v1656_v18  ;;  %1662 = vst [vmem:[#allocation1 + $0x2] ss:$9 sm:$0xff] %v6730_v17  ;;  %v6764_v18 = vpack.i.b16 %v623_v54, %v1174_v63  ;;  %v10634_v54 = vrot.slane %v6769_v38, 1 }
  0x50   : > { %1664 = vst [vmem:[#allocation1 + $0x3] ss:$9 sm:$0xff] %v6737_v27 }
  0x51   : > { %1666 = vst [vmem:[#allocation1 + $0x4] ss:$9 sm:$0xff] %v10636_v28 }
  0x52   : > { %1668 = vst [vmem:[#allocation1 + $0x5] ss:$9 sm:$0xff] %v10635_v36 }
  0x53   : > { %1670 = vst [vmem:[#allocation1 + $0x6] ss:$9 sm:$0xff] %v10631_v42  ;;  %v6779_v42 = vsel %vm507_vm4, %v294_v60, %v438_v1  ;;  %v442_v60 = vrot.slane %v298_v62, 3 }
  0x54   : > { %1672 = vst [vmem:[#allocation1 + $0x7] ss:$9 sm:$0xff] %v6750_v45  ;;  %v10632_v58 = vrot.slane %v6779_v42, 3 }
  0x55   : > { %v6801_v63 = vsel %vm499_vm2, %v298_v62, %v442_v60  ;;  %v6804_v0 = vsel %vm503_vm3, %v298_v62, %v442_v60  ;;  %v6807_v1 = vsel %vm494_vm1, %v298_v62, %v442_v60 }
  0x56   : > { %11075 = vst [vmem:[#allocation8_spill] sm:$0xff] %v6801_v63  ;;  %v10640_v2 = vrot.slane %v6801_v63, 1  ;;  %v10643_v3 = vrot.slane %v6804_v0, 2 }
  0x57   : > { %11076 = vst [vmem:[#allocation9_spill] sm:$0xff] %v6804_v0 }
  0x58   : > { %11077 = vst [vmem:[#allocation10_spill] sm:$0xff] %v6807_v1 }
  0x5b   : > { %v1673_v50 = vld [vmem:[#allocation1] sm:$0xff] }
  0x5c   : > { %1675 = vst [vmem:[#allocation1] ss:$9 sm:$0xff] %v6764_v18 }
  0x5d   : > { %1677 = vst [vmem:[#allocation1 + $0x1] ss:$9 sm:$0xff] %v6766_v30 }
  0x5e   : > { %1679 = vst [vmem:[#allocation1 + $0x2] ss:$9 sm:$0xff] %v6771_v43 }
  0x5f   : > { %6170 = vmatmul.msk.bf16.gmra.mxu0 %vm1951_vm5, %v1673_v50  ;;  %1681 = vst [vmem:[#allocation1 + $0x3] ss:$9 sm:$0xff] %v6776_v35  ;;  %v296_v50 = vld [vmem:[%s6569_s19 + $0x48] sm:$0xf] }
  0x60   : > { %1683 = vst [vmem:[#allocation1 + $0x4] ss:$9 sm:$0xff] %v6783_v52 }
  0x61   : > { %1685 = vst [vmem:[#allocation1 + $0x5] ss:$9 sm:$0xff] %v10634_v54  ;;  %v295_v54 = vld [vmem:[%s6569_s19 + $0x44] sm:$0x1] }
  0x62   : > { %1687 = vst [vmem:[#allocation1 + $0x6] ss:$9 sm:$0xff] %v10633_v55  ;;  %v439_v31 = vrot.slane %v295_v54, 3 }
  0x63   : > { %1689 = vst [vmem:[#allocation1 + $0x7] ss:$9 sm:$0xff] %v10632_v58  ;;  %v440_v58 = vrot.slane %v296_v50, 3 }
  0x64   : > { %v649_v13 = vsel %vm494_vm1, %v295_v54, %v439_v31 }
  0x65   : > { %v655_v55 = vsel %vm499_vm2, %v296_v50, %v440_v58  ;;  %v658_v36 = vsel %vm503_vm3, %v296_v50, %v440_v58  ;;  %v661_v28 = vsel %vm507_vm4, %v296_v50, %v440_v58 }
  0x66   : > { %v657_v34 = vrot.slane %v655_v55, 1  ;;  %v660_v53 = vrot.slane %v658_v36, 2  ;;  %v663_v49 = vrot.slane %v661_v28, 3  ;;  %v299_v36 = vld [vmem:[%s6569_s19 + $0x54] sm:$0x1] }
  0x68   : > { %v1194_v14 = vunpack.i.h.s16 %v657_v34  ;;  %v1196_v12 = vunpack.i.h.s16 %v660_v53  ;;  %v1198_v63 = vunpack.i.h.s16 %v663_v49 }
  0x6a   : > { %v1690_v4 = vld [vmem:[#allocation1] sm:$0xff]  ;;  %v6831_v43 = vpack.i.b16 %v660_v53, %v1194_v14  ;;  %v6834_v28 = vpack.i.b16 %v663_v49, %v1196_v12  ;;  %v301_v14 = vld [vmem:[%s6569_s19 + $0x5c] sm:$0x1] }
  0x6b   : > { %1702 = vst [vmem:[#allocation1 + $0x5] ss:$9 sm:$0xff] %v6807_v1  ;;  %v666_v1 = vsel %vm494_vm1, %v297_v26, %v441_v56  ;;  %v302_v26 = vld [vmem:[%s6569_s19 + $0x60] sm:$0xf] }
  0x6c   : > { %1704 = vst [vmem:[#allocation1 + $0x6] ss:$9 sm:$0xff] %v10640_v2  ;;  %v653_v2 = vsel %vm494_vm1, %v296_v50, %v440_v58  ;;  %v6837_v50 = vpack.i.b16 %v666_v1, %v1198_v63  ;;  %v445_v63 = vrot.slane %v301_v14, 3 }
  0x6d   : > { %1706 = vst [vmem:[#allocation1 + $0x7] ss:$9 sm:$0xff] %v10643_v3  ;;  %v300_v3 = vld [vmem:[%s6569_s19 + $0x58] sm:$0xf]  ;;  %v6827_v35 = vpack.i.b16 %v653_v2, %v649_v13  ;;  %v443_v13 = vrot.slane %v299_v36, 3 }
  0x6e   : > { %v444_v0 = vrot.slane %v300_v3, 3  ;;  %11080 = vst [vmem:[#allocation13_spill] sm:$0xff] %v6831_v43 }
  0x6f   : > { %6171 = vmatmul.msk.bf16.gmra.mxu0 %vm1951_vm5, %v1690_v4  ;;  %v1192_v4 = vunpack.i.h.s16 %v653_v2  ;;  %11078 = vst [vmem:[#allocation11_spill] sm:$0xff] %v6827_v35  ;;  %v683_v1 = vsel %vm494_vm1, %v299_v36, %v443_v13 }
  0x70   : > { %11081 = vst [vmem:[#allocation14_spill] sm:$0xff] %v6834_v28  ;;  %v689_v58 = vsel %vm499_vm2, %v300_v3, %v444_v0  ;;  %v692_v31 = vsel %vm503_vm3, %v300_v3, %v444_v0  ;;  %v695_v56 = vsel %vm507_vm4, %v300_v3, %v444_v0  ;;  %v687_v12 = vsel %vm494_vm1, %v300_v3, %v444_v0  ;;  %v304_v3 = vld [vmem:[%s6569_s19 + $0x68] sm:$0xf] }
  0x71   : > { %v6829_v55 = vpack.i.b16 %v657_v34, %v1192_v4  ;;  %11082 = vst [vmem:[#allocation15_spill] sm:$0xff] %v6837_v50  ;;  %v691_v49 = vrot.slane %v689_v58, 1  ;;  %v694_v53 = vrot.slane %v692_v31, 2  ;;  %v6850_v34 = vsel %vm507_vm4, %v298_v62, %v442_v60 }
  0x72   : > { %1692 = vst [vmem:[#allocation1] ss:$9 sm:$0xff] %v6827_v35  ;;  %v697_v54 = vrot.slane %v695_v56, 3  ;;  %v1210_v2 = vunpack.i.h.s16 %v687_v12  ;;  %v6855_v31 = vpack.i.b16 %v687_v12, %v683_v1  ;;  %v448_v56 = vrot.slane %v304_v3, 3  ;;  %v305_v1 = vld [vmem:[%s6569_s19 + $0x6c] sm:$0x1] }
  0x73   : > { %11079 = vst [vmem:[#allocation12_spill] sm:$0xff] %v6829_v55  ;;  %v1212_v4 = vunpack.i.h.s16 %v691_v49  ;;  %v1214_v0 = vunpack.i.h.s16 %v694_v53 }
  0x74   : > { %1694 = vst [vmem:[#allocation1 + $0x1] ss:$9 sm:$0xff] %v6829_v55  ;;  %v10658_v55 = vrot.slane %v6850_v34, 3  ;;  %v1216_v58 = vunpack.i.h.s16 %v697_v54  ;;  %v6858_v35 = vpack.i.b16 %v691_v49, %v1210_v2  ;;  %v721_v2 = vsel %vm494_vm1, %v304_v3, %v448_v56 }
  0x75   : > { %1696 = vst [vmem:[#allocation1 + $0x2] ss:$9 sm:$0xff] %v6831_v43  ;;  %v446_v43 = vrot.slane %v302_v26, 3  ;;  %v6860_v62 = vpack.i.b16 %v694_v53, %v1212_v4  ;;  %v6865_v13 = vpack.i.b16 %v697_v54, %v1214_v0  ;;  %v723_v53 = vsel %vm499_vm2, %v304_v3, %v448_v56 }
  0x76   : > { %1698 = vst [vmem:[#allocation1 + $0x3] ss:$9 sm:$0xff] %v6834_v28  ;;  %v700_v28 = vsel %vm494_vm1, %v301_v14, %v445_v63  ;;  %v303_v14 = vld [vmem:[%s6569_s19 + $0x64] sm:$0x1]  ;;  %v729_v63 = vsel %vm507_vm4, %v304_v3, %v448_v56  ;;  %v725_v4 = vrot.slane %v723_v53, 1 }
  0x77   : > { %1700 = vst [vmem:[#allocation1 + $0x4] ss:$9 sm:$0xff] %v6837_v50  ;;  %v6863_v36 = vsel %vm499_vm2, %v302_v26, %v446_v43  ;;  %v6869_v50 = vpack.i.b16 %v700_v28, %v1216_v58  ;;  %v6875_v12 = vsel %vm494_vm1, %v302_v26, %v446_v43  ;;  %v726_v28 = vsel %vm503_vm3, %v304_v3, %v448_v56  ;;  %v306_v3 = vld [vmem:[%s6569_s19 + $0x70] sm:$0xf] }
  0x78   : > { %11083 = vst [vmem:[#allocation16_spill] sm:$0xff] %v6850_v34  ;;  %v10664_v49 = vrot.slane %v6863_v36, 1  ;;  %v447_v54 = vrot.slane %v303_v14, 3  ;;  %v6891_v0 = vsel %vm503_vm3, %v302_v26, %v446_v43  ;;  %v728_v58 = vrot.slane %v726_v28, 2 }
  0x79   : > { %11084 = vst [vmem:[#allocation17_spill] sm:$0xff] %v6855_v31  ;;  %v10669_v34 = vrot.slane %v6891_v0, 2 }
  0x7a   : > { %11085 = vst [vmem:[#allocation18_spill] sm:$0xff] %v6858_v35  ;;  %v1232_v53 = vunpack.i.h.s16 %v728_v58 }
  0x7b   : > { %11086 = vst [vmem:[#allocation19_spill] sm:$0xff] %v6860_v62 }
  0x7c   : > { %11087 = vst [vmem:[#allocation20_spill] sm:$0xff] %v6863_v36 }
  0x7d   : > { %11088 = vst [vmem:[#allocation21_spill] sm:$0xff] %v6865_v13 }
  0x7e   : > { %v1707_v60 = vld [vmem:[#allocation1] sm:$0xff]  ;;  %11089 = vst [vmem:[#allocation22_spill] sm:$0xff] %v6869_v50 }
  0x7f   : > { %1709 = vst [vmem:[#allocation1] ss:$9 sm:$0xff] %v10658_v55  ;;  %6172 = vmatmul.msk.bf16.gmra.mxu0 %vm1951_vm5, %v1707_v60  ;;  %v6894_v60 = vsel %vm507_vm4, %v302_v26, %v446_v43  ;;  %v731_v55 = vrot.slane %v729_v63, 3  ;;  %v450_v63 = vrot.slane %v306_v3, 3 }
  0x80   : > { %1711 = vst [vmem:[#allocation1 + $0x1] ss:$9 sm:$0xff] %v6855_v31  ;;  %v1228_v31 = vunpack.i.h.s16 %v721_v2  ;;  %v10668_v56 = vrot.slane %v6894_v60, 3 }
  0x81   : > { %1713 = vst [vmem:[#allocation1 + $0x2] ss:$9 sm:$0xff] %v6858_v35  ;;  %v717_v35 = vsel %vm494_vm1, %v303_v14, %v447_v54  ;;  %v1234_v36 = vunpack.i.h.s16 %v731_v55 }
  0x82   : > { %11090 = vst [vmem:[#allocation23_spill] sm:$0xff] %v6875_v12  ;;  %v6904_v26 = vpack.i.b16 %v725_v4, %v1228_v31  ;;  %v307_v31 = vld [vmem:[%s6569_s19 + $0x74] sm:$0x1] }
  0x83   : > { %1715 = vst [vmem:[#allocation1 + $0x3] ss:$9 sm:$0xff] %v6860_v62  ;;  %v449_v62 = vrot.slane %v305_v1, 3 }
  0x84   : > { %1717 = vst [vmem:[#allocation1 + $0x4] ss:$9 sm:$0xff] %v6865_v13  ;;  %v6910_v13 = vpack.i.b16 %v731_v55, %v1232_v53 }
  0x85   : > { %1719 = vst [vmem:[#allocation1 + $0x5] ss:$9 sm:$0xff] %v6869_v50  ;;  %v6901_v50 = vpack.i.b16 %v721_v2, %v717_v35  ;;  %v734_v43 = vsel %vm494_vm1, %v305_v1, %v449_v62  ;;  %v6920_v62 = vsel %vm494_vm1, %v306_v3, %v450_v63  ;;  %v309_v2 = vld [vmem:[%s6569_s19 + $0x7c] sm:$0x1] }
  0x86   : > { %1721 = vst [vmem:[#allocation1 + $0x6] ss:$9 sm:$0xff] %v6875_v12  ;;  %v1230_v12 = vunpack.i.h.s16 %v725_v4  ;;  %v6914_v35 = vpack.i.b16 %v734_v43, %v1234_v36  ;;  %v451_v36 = vrot.slane %v307_v31, 3  ;;  %v6932_v4 = vsel %vm499_vm2, %v306_v3, %v450_v63 }
  0x87   : > { %1723 = vst [vmem:[#allocation1 + $0x7] ss:$9 sm:$0xff] %v10664_v49  ;;  %v308_v49 = vld [vmem:[%s6569_s19 + $0x78] sm:$0xf]  ;;  %v6936_v43 = vsel %vm503_vm3, %v306_v3, %v450_v63 }
  0x88   : > { %11091 = vst [vmem:[#allocation24_spill] sm:$0xff] %v6891_v0  ;;  %v6906_v14 = vpack.i.b16 %v728_v58, %v1230_v12  ;;  %v452_v54 = vrot.slane %v308_v49, 3 }
  0x89   : > { %11092 = vst [vmem:[#allocation25_spill] sm:$0xff] %v6894_v60  ;;  %v751_v60 = vsel %vm494_vm1, %v307_v31, %v451_v36  ;;  %v310_v36 = vld [vmem:[%s6569_s19 + $0x80] sm:$0xf] }
  0x8a   : > { %11093 = vst [vmem:[#allocation26_spill] sm:$0xff] %v6901_v50  ;;  %v757_v55 = vsel %vm499_vm2, %v308_v49, %v452_v54  ;;  %v760_v12 = vsel %vm503_vm3, %v308_v49, %v452_v54  ;;  %v763_v1 = vsel %vm507_vm4, %v308_v49, %v452_v54  ;;  %v755_v58 = vsel %vm494_vm1, %v308_v49, %v452_v54 }
  0x8b   : > { %11094 = vst [vmem:[#allocation27_spill] sm:$0xff] %v6904_v26  ;;  %v759_v53 = vrot.slane %v757_v55, 1  ;;  %v1246_v0 = vunpack.i.h.s16 %v755_v58  ;;  %v312_v55 = vld [vmem:[%s6569_s19 + $0x88] sm:$0xf] }
  0x8c   : > { %11095 = vst [vmem:[#allocation28_spill] sm:$0xff] %v6906_v14  ;;  %v456_v49 = vrot.slane %v312_v55, 3 }
  0x8d   : > { %11096 = vst [vmem:[#allocation29_spill] sm:$0xff] %v6910_v13 }
  0x8e   : > { %v1724_v28 = vld [vmem:[#allocation1] sm:$0xff]  ;;  %11097 = vst [vmem:[#allocation30_spill] sm:$0xff] %v6914_v35 }
  0x8f   : > { %1726 = vst [vmem:[#allocation1] ss:$9 sm:$0xff] %v10669_v34  ;;  %6173 = vmatmul.msk.bf16.gmra.mxu0 %vm1951_vm5, %v1724_v28  ;;  %v762_v28 = vrot.slane %v760_v12, 2  ;;  %v765_v34 = vrot.slane %v763_v1, 3  ;;  %v6946_v12 = vpack.i.b16 %v755_v58, %v751_v60  ;;  %v6949_v1 = vpack.i.b16 %v759_v53, %v1246_v0  ;;  %v311_v0 = vld [vmem:[%s6569_s19 + $0x84] sm:$0x1] }
  0x90   : > { %1728 = vst [vmem:[#allocation1 + $0x1] ss:$9 sm:$0xff] %v10668_v56  ;;  %v6939_v56 = vsel %vm507_vm4, %v306_v3, %v450_v63  ;;  %v455_v58 = vrot.slane %v311_v0, 3 }
  0x91   : > { %1730 = vst [vmem:[#allocation1 + $0x2] ss:$9 sm:$0xff] %v6901_v50  ;;  %v10679_v50 = vrot.slane %v6932_v4, 1  ;;  %v1250_v54 = vunpack.i.h.s16 %v762_v28  ;;  %v11106_v60 = vrot.slane %v6939_v56, 3 }
  0x92   : > { %1732 = vst [vmem:[#allocation1 + $0x3] ss:$9 sm:$0xff] %v6904_v26  ;;  %v453_v26 = vrot.slane %v309_v2, 3 }
  0x93   : > { %11098 = vst [vmem:[#allocation31_spill] sm:$0xff] %v6920_v62 }
  0x94   : > { %1734 = vst [vmem:[#allocation1 + $0x4] ss:$9 sm:$0xff] %v6906_v14  ;;  %v768_v63 = vsel %vm494_vm1, %v309_v2, %v453_v26  ;;  %v6959_v14 = vpack.i.b16 %v765_v34, %v1250_v54  ;;  %v454_v2 = vrot.slane %v310_v36, 3 }
  0x95   : > { %1736 = vst [vmem:[#allocation1 + $0x5] ss:$9 sm:$0xff] %v6910_v13  ;;  %v1252_v13 = vunpack.i.h.s16 %v765_v34  ;;  %v794_v34 = vsel %vm503_vm3, %v312_v55, %v456_v49 }
  0x96   : > { %1738 = vst [vmem:[#allocation1 + $0x6] ss:$9 sm:$0xff] %v6914_v35  ;;  %v1248_v35 = vunpack.i.h.s16 %v759_v53  ;;  %v789_v53 = vsel %vm494_vm1, %v312_v55, %v456_v49  ;;  %v6978_v54 = vsel %vm503_vm3, %v310_v36, %v454_v2 }
  0x97   : > { %1740 = vst [vmem:[#allocation1 + $0x7] ss:$9 sm:$0xff] %v6920_v62  ;;  %v10678_v62 = vrot.slane %v6936_v43, 2  ;;  %v6963_v26 = vpack.i.b16 %v768_v63, %v1252_v13  ;;  %v6974_v13 = vsel %vm499_vm2, %v310_v36, %v454_v2  ;;  %v6981_v63 = vsel %vm507_vm4, %v310_v36, %v454_v2 }
  0x98   : > { %11099 = vst [vmem:[#allocation32_spill] sm:$0xff] %v6932_v4  ;;  %v6954_v31 = vpack.i.b16 %v762_v28, %v1248_v35  ;;  %v791_v35 = vsel %vm499_vm2, %v312_v55, %v456_v49 }
  0x99   : > { %11100 = vst [vmem:[#allocation33_spill] sm:$0xff] %v6936_v43  ;;  %v793_v28 = vrot.slane %v791_v35, 1  ;;  %v10688_v35 = vrot.slane %v6978_v54, 2 }
  0x9a   : > { %11101 = vst [vmem:[#allocation34_spill] sm:$0xff] %v6939_v56  ;;  %v1264_v56 = vunpack.i.h.s16 %v789_v53 }
  0x9b   : > { %11102 = vst [vmem:[#allocation35_spill] sm:$0xff] %v6946_v12  ;;  %v1266_v43 = vunpack.i.h.s16 %v793_v28 }
  0x9c   : > { %11103 = vst [vmem:[#allocation36_spill] sm:$0xff] %v6949_v1 }
  0x9d   : > { %11104 = vst [vmem:[#allocation37_spill] sm:$0xff] %v6954_v31 }
  0x9e   : > { %v1741_v3 = vld [vmem:[#allocation1] sm:$0xff]  ;;  %11105 = vst [vmem:[#allocation38_spill] sm:$0xff] %v6959_v14 }
  0x9f   : > { %1743 = vst [vmem:[#allocation1] ss:$9 sm:$0xff] %v10679_v50  ;;  %6174 = vmatmul.msk.bf16.vlgmr.msra.gmra.mxu2 %vm1951_vm5, %v1741_v3  ;;  %v796_v3 = vrot.slane %v794_v34, 2  ;;  %v10689_v50 = vrot.slane %v6974_v13, 1  ;;  %v10687_v34 = vrot.slane %v6981_v63, 3 }
  0xa0   : > { %1745 = vst [vmem:[#allocation1 + $0x1] ss:$9 sm:$0xff] %v10678_v62  ;;  %v6985_v62 = vsel %vm494_vm1, %v310_v36, %v454_v2  ;;  %v6996_v36 = vpack.i.b16 %v793_v28, %v1264_v56  ;;  %v314_v2 = vld [vmem:[%s6569_s19 + $0x90] sm:$0xf]  ;;  %v315_v56 = vld [vmem:[%s6569_s19 + $0x94] sm:$0x1] }
  0xa1   : > { %1747 = vst [vmem:[#allocation1 + $0x2] ss:$9 sm:$0xff] %v11106_v60  ;;  %v797_v60 = vsel %vm507_vm4, %v312_v55, %v456_v49  ;;  %v313_v55 = vld [vmem:[%s6569_s19 + $0x8c] sm:$0x1]  ;;  %v459_v28 = vrot.slane %v315_v56, 3 }
  0xa2   : > { %11107 = vst [vmem:[#allocation39_spill] sm:$0xff] %v6963_v26  ;;  %v799_v4 = vrot.slane %v797_v60, 3 }
  0xa3   : > { %1749 = vst [vmem:[#allocation1 + $0x3] ss:$9 sm:$0xff] %v6946_v12  ;;  %v785_v12 = vsel %vm494_vm1, %v311_v0, %v455_v58  ;;  %v7001_v0 = vpack.i.b16 %v796_v3, %v1266_v43 }
  0xa4   : > { %1751 = vst [vmem:[#allocation1 + $0x4] ss:$9 sm:$0xff] %v6949_v1  ;;  %v6992_v49 = vpack.i.b16 %v789_v53, %v785_v12  ;;  %v457_v12 = vrot.slane %v313_v55, 3  ;;  %v458_v53 = vrot.slane %v314_v2, 3  ;;  %v1270_v43 = vunpack.i.h.s16 %v799_v4 }
  0xa5   : > { %1753 = vst [vmem:[#allocation1 + $0x5] ss:$9 sm:$0xff] %v6954_v31  ;;  %v316_v31 = vld [vmem:[%s6569_s19 + $0x98] sm:$0xf] }
  0xa6   : > { %1755 = vst [vmem:[#allocation1 + $0x6] ss:$9 sm:$0xff] %v6959_v14  ;;  %v460_v58 = vrot.slane %v316_v31, 3 }
  0xa7   : > { %1757 = vst [vmem:[#allocation1 + $0x7] ss:$9 sm:$0xff] %v6963_v26  ;;  %v1268_v26 = vunpack.i.h.s16 %v796_v3  ;;  %v7018_v3 = vsel %vm499_vm2, %v314_v2, %v458_v53 }
  0xa8   : > { %11108 = vst [vmem:[#allocation40_spill] sm:$0xff] %v6974_v13  ;;  %v819_v13 = vsel %vm494_vm1, %v315_v56, %v459_v28 }
  0xa9   : > { %11109 = vst [vmem:[#allocation41_spill] sm:$0xff] %v6978_v54  ;;  %v7006_v60 = vpack.i.b16 %v799_v4, %v1268_v26  ;;  %v802_v26 = vsel %vm494_vm1, %v313_v55, %v457_v12  ;;  %v7028_v4 = vsel %vm507_vm4, %v314_v2, %v458_v53  ;;  %v7031_v55 = vsel %vm494_vm1, %v314_v2, %v458_v53 }
  0xaa   : > { %11110 = vst [vmem:[#allocation42_spill] sm:$0xff] %v6981_v63  ;;  %v828_v63 = vsel %vm503_vm3, %v316_v31, %v460_v58  ;;  %v7025_v54 = vpack.i.b16 %v802_v26, %v1270_v43  ;;  %v10697_v12 = vrot.slane %v7018_v3, 1  ;;  %v10699_v43 = vrot.slane %v7028_v4, 3 }
  0xab   : > { %11111 = vst [vmem:[#allocation43_spill] sm:$0xff] %v6985_v62  ;;  %v831_v26 = vsel %vm507_vm4, %v316_v31, %v460_v58 }
  0xac   : > { %11112 = vst [vmem:[#allocation44_spill] sm:$0xff] %v6992_v49 }
  0xad   : > { %11113 = vst [vmem:[#allocation45_spill] sm:$0xff] %v6996_v36 }
  0xae   : > { %v1758_v14 = vld [vmem:[#allocation1] sm:$0xff]  ;;  %11114 = vst [vmem:[#allocation46_spill] sm:$0xff] %v7001_v0 }
  0xaf   : > { %1760 = vst [vmem:[#allocation1] ss:$9 sm:$0xff] %v6985_v62  ;;  %6175 = vmatmul.msk.bf16.gmra.mxu2 %vm1951_vm5, %v1758_v14  ;;  %v825_v14 = vsel %vm499_vm2, %v316_v31, %v460_v58 }
  0xb0   : > { %1762 = vst [vmem:[#allocation1 + $0x1] ss:$9 sm:$0xff] %v10689_v50  ;;  %v7022_v50 = vsel %vm503_vm3, %v314_v2, %v458_v53  ;;  %v317_v53 = vld [vmem:[%s6569_s19 + $0x9c] sm:$0x1] }
  0xb1   : > { %1764 = vst [vmem:[#allocation1 + $0x2] ss:$9 sm:$0xff] %v10688_v35  ;;  %v827_v35 = vrot.slane %v825_v14, 1  ;;  %v10698_v62 = vrot.slane %v7022_v50, 2 }
  0xb2   : > { %11115 = vst [vmem:[#allocation47_spill] sm:$0xff] %v7006_v60 }
  0xb3   : > { %1766 = vst [vmem:[#allocation1 + $0x3] ss:$9 sm:$0xff] %v10687_v34  ;;  %v823_v34 = vsel %vm494_vm1, %v316_v31, %v460_v58  ;;  %v320_v31 = vld [vmem:[%s6569_s19 + $0xa8] sm:$0xf]  ;;  %v833_v58 = vrot.slane %v831_v26, 3 }
  0xb4   : > { %1768 = vst [vmem:[#allocation1 + $0x4] ss:$9 sm:$0xff] %v6992_v49  ;;  %v1282_v14 = vunpack.i.h.s16 %v823_v34  ;;  %v7039_v2 = vpack.i.b16 %v823_v34, %v819_v13  ;;  %v461_v13 = vrot.slane %v317_v53, 3 }
  0xb5   : > { %1770 = vst [vmem:[#allocation1 + $0x5] ss:$9 sm:$0xff] %v6996_v36 }
  0xb6   : > { %1772 = vst [vmem:[#allocation1 + $0x6] ss:$9 sm:$0xff] %v7001_v0  ;;  %v1284_v0 = vunpack.i.h.s16 %v827_v35  ;;  %v7043_v56 = vpack.i.b16 %v827_v35, %v1282_v14  ;;  %v319_v35 = vld [vmem:[%s6569_s19 + $0xa4] sm:$0x1]  ;;  %v464_v14 = vrot.slane %v320_v31, 3 }
  0xb7   : > { %1774 = vst [vmem:[#allocation1 + $0x7] ss:$9 sm:$0xff] %v7006_v60  ;;  %v830_v60 = vrot.slane %v828_v63, 2  ;;  %v318_v63 = vld [vmem:[%s6569_s19 + $0xa0] sm:$0xf] }
  0xb8   : > { %11116 = vst [vmem:[#allocation48_spill] sm:$0xff] %v7018_v3  ;;  %v462_v34 = vrot.slane %v318_v63, 3 }
  0xb9   : > { %11117 = vst [vmem:[#allocation49_spill] sm:$0xff] %v7022_v50  ;;  %v7049_v28 = vpack.i.b16 %v830_v60, %v1284_v0  ;;  %v1288_v0 = vunpack.i.h.s16 %v833_v58  ;;  %v859_v50 = vsel %vm499_vm2, %v320_v31, %v464_v14 }
  0xba   : > { %11118 = vst [vmem:[#allocation50_spill] sm:$0xff] %v7025_v54  ;;  %v7062_v26 = vsel %vm499_vm2, %v318_v63, %v462_v34 }
  0xbb   : > { %11119 = vst [vmem:[#allocation51_spill] sm:$0xff] %v7028_v4 }
  0xbc   : > { %11120 = vst [vmem:[#allocation52_spill] sm:$0xff] %v7031_v55 }
  0xbd   : > { %11121 = vst [vmem:[#allocation53_spill] sm:$0xff] %v7039_v2 }
  0xbe   : > { %v1775_v36 = vld [vmem:[#allocation1] sm:$0xff]  ;;  %11122 = vst [vmem:[#allocation54_spill] sm:$0xff] %v7043_v56 }
  0xbf   : > { %1777 = vst [vmem:[#allocation1] ss:$9 sm:$0xff] %v7025_v54  ;;  %6176 = vmatmul.msk.bf16.gmra.mxu2 %vm1951_vm5, %v1775_v36  ;;  %v1286_v36 = vunpack.i.h.s16 %v830_v60  ;;  %v7074_v60 = vsel %vm494_vm1, %v318_v63, %v462_v34 }
  0xc0   : > { %1779 = vst [vmem:[#allocation1 + $0x1] ss:$9 sm:$0xff] %v7031_v55  ;;  %v7069_v55 = vsel %vm503_vm3, %v318_v63, %v462_v34 }
  0xc1   : > { %1781 = vst [vmem:[#allocation1 + $0x2] ss:$9 sm:$0xff] %v10697_v12  ;;  %v836_v12 = vsel %vm494_vm1, %v317_v53, %v461_v13  ;;  %v7066_v3 = vpack.i.b16 %v833_v58, %v1286_v36  ;;  %v7077_v53 = vsel %vm507_vm4, %v318_v63, %v462_v34  ;;  %v10708_v13 = vrot.slane %v7062_v26, 1 }
  0xc2   : > { %11123 = vst [vmem:[#allocation55_spill] sm:$0xff] %v7049_v28  ;;  %v7071_v54 = vpack.i.b16 %v836_v12, %v1288_v0  ;;  %v10711_v36 = vrot.slane %v7069_v55, 2  ;;  %v862_v0 = vsel %vm503_vm3, %v320_v31, %v464_v14  ;;  %v865_v63 = vsel %vm507_vm4, %v320_v31, %v464_v14  ;;  %v322_v12 = vld [vmem:[%s6569_s19 + $0xb0] sm:$0xf] }
  0xc3   : > { %1783 = vst [vmem:[#allocation1 + $0x3] ss:$9 sm:$0xff] %v10698_v62  ;;  %v463_v62 = vrot.slane %v319_v35, 3 }
  0xc4   : > { %1785 = vst [vmem:[#allocation1 + $0x4] ss:$9 sm:$0xff] %v10699_v43  ;;  %v857_v43 = vsel %vm494_vm1, %v320_v31, %v464_v14  ;;  %v867_v31 = vrot.slane %v865_v63, 3 }
  0xc5   : > { %1787 = vst [vmem:[#allocation1 + $0x5] ss:$9 sm:$0xff] %v7039_v2  ;;  %v1300_v2 = vunpack.i.h.s16 %v857_v43 }
  0xc6   : > { %1789 = vst [vmem:[#allocation1 + $0x6] ss:$9 sm:$0xff] %v7043_v56  ;;  %v861_v56 = vrot.slane %v859_v50, 1  ;;  %v321_v50 = vld [vmem:[%s6569_s19 + $0xac] sm:$0x1] }
  0xc7   : > { %1791 = vst [vmem:[#allocation1 + $0x7] ss:$9 sm:$0xff] %v7049_v28  ;;  %v853_v28 = vsel %vm494_vm1, %v319_v35, %v463_v62  ;;  %v864_v35 = vrot.slane %v862_v0, 2 }
  0xc8   : > { %11124 = vst [vmem:[#allocation56_spill] sm:$0xff] %v7062_v26  ;;  %v7087_v34 = vpack.i.b16 %v857_v43, %v853_v28  ;;  %v7091_v62 = vpack.i.b16 %v861_v56, %v1300_v2  ;;  %v11132_v43 = vrot.slane %v7077_v53, 3  ;;  %v465_v28 = vrot.slane %v321_v50, 3  ;;  %v323_v2 = vld [vmem:[%s6569_s19 + $0xb4] sm:$0x1] }
  0xc9   : > { %11125 = vst [vmem:[#allocation57_spill] sm:$0xff] %v7066_v3  ;;  %v1302_v14 = vunpack.i.h.s16 %v861_v56  ;;  %v324_v26 = vld [vmem:[%s6569_s19 + $0xb8] sm:$0xf] }
  0xca   : > { %11126 = vst [vmem:[#allocation58_spill] sm:$0xff] %v7069_v55  ;;  %v870_v0 = vsel %vm494_vm1, %v321_v50, %v465_v28 }
  0xcb   : > { %11127 = vst [vmem:[#allocation59_spill] sm:$0xff] %v7071_v54 }
  0xcc   : > { %11128 = vst [vmem:[#allocation60_spill] sm:$0xff] %v7074_v60 }
  0xcd   : > { %11129 = vst [vmem:[#allocation61_spill] sm:$0xff] %v7077_v53 }
  0xce   : > { %v1792_v58 = vld [vmem:[#allocation1] sm:$0xff]  ;;  %11130 = vst [vmem:[#allocation62_spill] sm:$0xff] %v7087_v34 }
  0xcf   : > { %1794 = vst [vmem:[#allocation1] ss:$9 sm:$0xff] %v7066_v3  ;;  %6177 = vmatmul.msk.bf16.gmra.mxu2 %vm1951_vm5, %v1792_v58  ;;  %v1306_v58 = vunpack.i.h.s16 %v867_v31  ;;  %v7106_v3 = vpack.i.b16 %v864_v35, %v1302_v14 }
  0xd0   : > { %1796 = vst [vmem:[#allocation1 + $0x1] ss:$9 sm:$0xff] %v7071_v54  ;;  %v467_v54 = vrot.slane %v323_v2, 3 }
  0xd1   : > { %1798 = vst [vmem:[#allocation1 + $0x2] ss:$9 sm:$0xff] %v7074_v60  ;;  %v1304_v60 = vunpack.i.h.s16 %v864_v35 }
  0xd2   : > { %11131 = vst [vmem:[#allocation63_spill] sm:$0xff] %v7091_v62  ;;  %v887_v28 = vsel %vm494_vm1, %v323_v2, %v467_v54  ;;  %v325_v2 = vld [vmem:[%s6569_s19 + $0xbc] sm:$0x1] }
  0xd3   : > { %1800 = vst [vmem:[#allocation1 + $0x3] ss:$9 sm:$0xff] %v10708_v13  ;;  %v466_v13 = vrot.slane %v322_v12, 3 }
  0xd4   : > { %1802 = vst [vmem:[#allocation1 + $0x4] ss:$9 sm:$0xff] %v10711_v36  ;;  %v468_v36 = vrot.slane %v324_v26, 3 }
  0xd5   : > { %1804 = vst [vmem:[#allocation1 + $0x5] ss:$9 sm:$0xff] %v11132_v43  ;;  %v7109_v63 = vsel %vm499_vm2, %v322_v12, %v466_v13  ;;  %v7111_v43 = vpack.i.b16 %v867_v31, %v1304_v60  ;;  %v7114_v56 = vsel %vm503_vm3, %v322_v12, %v466_v13  ;;  %v7122_v50 = vsel %vm494_vm1, %v322_v12, %v466_v13 }
  0xd6   : > { %1806 = vst [vmem:[#allocation1 + $0x6] ss:$9 sm:$0xff] %v7087_v34  ;;  %v7119_v34 = vsel %vm507_vm4, %v322_v12, %v466_v13  ;;  %v10720_v35 = vrot.slane %v7109_v63, 1  ;;  %v891_v60 = vsel %vm494_vm1, %v324_v26, %v468_v36  ;;  %v893_v14 = vsel %vm499_vm2, %v324_v26, %v468_v36 }
  0xd7   : > { %1808 = vst [vmem:[#allocation1 + $0x7] ss:$9 sm:$0xff] %v7091_v62  ;;  %v7116_v62 = vpack.i.b16 %v870_v0, %v1306_v58  ;;  %v896_v13 = vsel %vm503_vm3, %v324_v26, %v468_v36  ;;  %v899_v12 = vsel %vm507_vm4, %v324_v26, %v468_v36  ;;  %v7135_v54 = vpack.i.b16 %v891_v60, %v887_v28 }
  0xd8   : > { %11133 = vst [vmem:[#allocation64_spill] sm:$0xff] %v7106_v3  ;;  %v895_v0 = vrot.slane %v893_v14, 1  ;;  %v898_v31 = vrot.slane %v896_v13, 2  ;;  %v11141_v58 = vrot.slane %v7114_v56, 2  ;;  %v11142_v26 = vrot.slane %v7119_v34, 3 }
  0xd9   : > { %11134 = vst [vmem:[#allocation65_spill] sm:$0xff] %v7109_v63  ;;  %v469_v36 = vrot.slane %v325_v2, 3  ;;  %v1318_v28 = vunpack.i.h.s16 %v891_v60 }
  0xda   : > { %11135 = vst [vmem:[#allocation66_spill] sm:$0xff] %v7111_v43 }
  0xdb   : > { %11136 = vst [vmem:[#allocation67_spill] sm:$0xff] %v7114_v56  ;;  %v7150_v13 = vpack.i.b16 %v895_v0, %v1318_v28  ;;  %v329_v28 = vld [vmem:[%s6569_s19 + $0xcc] sm:$0x1] }
  0xdc   : > { %11137 = vst [vmem:[#allocation68_spill] sm:$0xff] %v7116_v62 }
  0xdd   : > { %11138 = vst [vmem:[#allocation69_spill] sm:$0xff] %v7119_v34 }
  0xde   : > { %v1809_v53 = vld [vmem:[#allocation1] sm:$0xff]  ;;  %11139 = vst [vmem:[#allocation70_spill] sm:$0xff] %v7122_v50 }
  0xdf   : > { %1811 = vst [vmem:[#allocation1] ss:$9 sm:$0xff] %v7106_v3  ;;  %6178 = vmatmul.msk.bf16.gmra.mxu2 %vm1951_vm5, %v1809_v53  ;;  %v1322_v3 = vunpack.i.h.s16 %v898_v31  ;;  %v904_v53 = vsel %vm494_vm1, %v325_v2, %v469_v36 }
  0xe0   : > { %1813 = vst [vmem:[#allocation1 + $0x1] ss:$9 sm:$0xff] %v7111_v43  ;;  %v326_v43 = vld [vmem:[%s6569_s19 + $0xc0] sm:$0xf] }
  0xe1   : > { %1815 = vst [vmem:[#allocation1 + $0x2] ss:$9 sm:$0xff] %v7116_v62  ;;  %v901_v62 = vrot.slane %v899_v12, 3  ;;  %v470_v14 = vrot.slane %v326_v43, 3 }
  0xe2   : > { %11140 = vst [vmem:[#allocation71_spill] sm:$0xff] %v7135_v54 }
  0xe3   : > { %1817 = vst [vmem:[#allocation1 + $0x3] ss:$9 sm:$0xff] %v7122_v50  ;;  %v1320_v50 = vunpack.i.h.s16 %v895_v0  ;;  %v1324_v63 = vunpack.i.h.s16 %v901_v62  ;;  %v7155_v34 = vsel %vm499_vm2, %v326_v43, %v470_v14  ;;  %v7160_v60 = vsel %vm503_vm3, %v326_v43, %v470_v14 }
  0xe4   : > { %1819 = vst [vmem:[#allocation1 + $0x4] ss:$9 sm:$0xff] %v10720_v35  ;;  %v328_v35 = vld [vmem:[%s6569_s19 + $0xc8] sm:$0xf]  ;;  %v7165_v55 = vsel %vm507_vm4, %v326_v43, %v470_v14  ;;  %v10732_v2 = vrot.slane %v7155_v34, 1 }
  0xe5   : > { %1821 = vst [vmem:[#allocation1 + $0x5] ss:$9 sm:$0xff] %v11141_v58  ;;  %v7152_v58 = vpack.i.b16 %v898_v31, %v1320_v50  ;;  %v472_v12 = vrot.slane %v328_v35, 3  ;;  %v327_v50 = vld [vmem:[%s6569_s19 + $0xc4] sm:$0x1]  ;;  %v7170_v31 = vsel %vm494_vm1, %v326_v43, %v470_v14 }
  0xe6   : > { %1823 = vst [vmem:[#allocation1 + $0x6] ss:$9 sm:$0xff] %v11142_v26  ;;  %v7157_v26 = vpack.i.b16 %v901_v62, %v1322_v3  ;;  %v10734_v3 = vrot.slane %v7160_v60, 2  ;;  %v471_v36 = vrot.slane %v327_v50, 3 }
  0xe7   : > { %1825 = vst [vmem:[#allocation1 + $0x7] ss:$9 sm:$0xff] %v7135_v54  ;;  %v7162_v54 = vpack.i.b16 %v904_v53, %v1324_v63  ;;  %v927_v62 = vsel %vm499_vm2, %v328_v35, %v472_v12  ;;  %v930_v0 = vsel %vm503_vm3, %v328_v35, %v472_v12  ;;  %v933_v43 = vsel %vm507_vm4, %v328_v35, %v472_v12 }
  0xe8   : > { %11143 = vst [vmem:[#allocation72_spill] sm:$0xff] %v7150_v13  ;;  %v925_v14 = vsel %vm494_vm1, %v328_v35, %v472_v12  ;;  %v929_v53 = vrot.slane %v927_v62, 1  ;;  %v932_v63 = vrot.slane %v930_v0, 2 }
  0xe9   : > { %11144 = vst [vmem:[#allocation73_spill] sm:$0xff] %v7152_v58  ;;  %v1336_v4 = vunpack.i.h.s16 %v925_v14 }
  0xea   : > { %11145 = vst [vmem:[#allocation74_spill] sm:$0xff] %v7155_v34  ;;  %v1338_v35 = vunpack.i.h.s16 %v929_v53  ;;  %v1340_v62 = vunpack.i.h.s16 %v932_v63 }
  0xeb   : > { %11146 = vst [vmem:[#allocation75_spill] sm:$0xff] %v7157_v26 }
  0xec   : > { %11147 = vst [vmem:[#allocation76_spill] sm:$0xff] %v7160_v60 }
  0xed   : > { %11148 = vst [vmem:[#allocation77_spill] sm:$0xff] %v7162_v54 }
  0xee   : > { %v1826_v56 = vld [vmem:[#allocation1] sm:$0xff]  ;;  %11149 = vst [vmem:[#allocation78_spill] sm:$0xff] %v7165_v55 }
  0xef   : > { %1828 = vst [vmem:[#allocation1] ss:$9 sm:$0xff] %v7150_v13  ;;  %6179 = vmatmul.msk.bf16.gmra.mxu2 %vm1951_vm5, %v1826_v56  ;;  %v473_v13 = vrot.slane %v329_v28, 3 }
  0xf0   : > { %11150 = vst [vmem:[#allocation79_spill] sm:$0xff] %v7170_v31 }
  0xf1   : > { %1830 = vst [vmem:[#allocation1 + $0x1] ss:$9 sm:$0xff] %v7152_v58  ;;  %v11151_v58 = vrot.slane %v7165_v55, 3  ;;  %v938_v0 = vsel %vm494_vm1, %v329_v28, %v473_v13 }
  0xf2   : > { %1832 = vst [vmem:[#allocation1 + $0x2] ss:$9 sm:$0xff] %v7157_v26  ;;  %v935_v26 = vrot.slane %v933_v43, 3  ;;  %v7199_v43 = vpack.i.b16 %v932_v63, %v1338_v35 }
  0xf3   : > { %1834 = vst [vmem:[#allocation1 + $0x3] ss:$9 sm:$0xff] %v7162_v54  ;;  %v330_v54 = vld [vmem:[%s6569_s19 + $0xd0] sm:$0xf] }
  0xf4   : > { %1836 = vst [vmem:[#allocation1 + $0x4] ss:$9 sm:$0xff] %v7170_v31  ;;  %v921_v31 = vsel %vm494_vm1, %v327_v50, %v471_v36  ;;  %v474_v12 = vrot.slane %v330_v54, 3  ;;  %v1342_v34 = vunpack.i.h.s16 %v935_v26  ;;  %v7204_v50 = vpack.i.b16 %v935_v26, %v1340_v62 }
  0xf5   : > { %1838 = vst [vmem:[#allocation1 + $0x5] ss:$9 sm:$0xff] %v10732_v2  ;;  %v332_v2 = vld [vmem:[%s6569_s19 + $0xd8] sm:$0xf]  ;;  %v7194_v56 = vpack.i.b16 %v925_v14, %v921_v31 }
  0xf6   : > { %1840 = vst [vmem:[#allocation1 + $0x6] ss:$9 sm:$0xff] %v10734_v3  ;;  %v7197_v3 = vpack.i.b16 %v929_v53, %v1336_v4  ;;  %v476_v55 = vrot.slane %v332_v2, 3  ;;  %v7207_v60 = vsel %vm503_vm3, %v330_v54, %v474_v12  ;;  %v7209_v49 = vpack.i.b16 %v938_v0, %v1342_v34  ;;  %v331_v4 = vld [vmem:[%s6569_s19 + $0xd4] sm:$0x1] }
  0xf7   : > { %1842 = vst [vmem:[#allocation1 + $0x7] ss:$9 sm:$0xff] %v11151_v58  ;;  %v7202_v58 = vsel %vm499_vm2, %v330_v54, %v474_v12  ;;  %v7215_v13 = vsel %vm494_vm1, %v330_v54, %v474_v12  ;;  %v10746_v26 = vrot.slane %v7207_v60, 2  ;;  %v475_v28 = vrot.slane %v331_v4, 3  ;;  %v333_v53 = vld [vmem:[%s6569_s19 + $0xdc] sm:$0x1] }
  0xf8   : > { %11152 = vst [vmem:[#allocation80_spill] sm:$0xff] %v7194_v56  ;;  %v10744_v31 = vrot.slane %v7202_v58, 1  ;;  %v961_v63 = vsel %vm499_vm2, %v332_v2, %v476_v55  ;;  %v964_v34 = vsel %vm503_vm3, %v332_v2, %v476_v55  ;;  %v967_v14 = vsel %vm507_vm4, %v332_v2, %v476_v55 }
  0xf9   : > { %11153 = vst [vmem:[#allocation81_spill] sm:$0xff] %v7197_v3  ;;  %v959_v35 = vsel %vm494_vm1, %v332_v2, %v476_v55  ;;  %v963_v62 = vrot.slane %v961_v63, 1  ;;  %v966_v0 = vrot.slane %v964_v34, 2 }
  0xfa   : > { %11154 = vst [vmem:[#allocation82_spill] sm:$0xff] %v7199_v43  ;;  %v1354_v55 = vunpack.i.h.s16 %v959_v35 }
  0xfb   : > { %11155 = vst [vmem:[#allocation83_spill] sm:$0xff] %v7202_v58  ;;  %v1356_v2 = vunpack.i.h.s16 %v963_v62 }
  0xfc   : > { %11156 = vst [vmem:[#allocation84_spill] sm:$0xff] %v7204_v50 }
  0xfd   : > { %11157 = vst [vmem:[#allocation85_spill] sm:$0xff] %v7207_v60  ;;  %v7243_v60 = vpack.i.b16 %v963_v62, %v1354_v55 }
  0xfe   : > { %v1843_v36 = vld [vmem:[#allocation1] sm:$0xff]  ;;  %11158 = vst [vmem:[#allocation86_spill] sm:$0xff] %v7209_v49 }
  0xff   : > { %1845 = vst [vmem:[#allocation1] ss:$9 sm:$0xff] %v7194_v56  ;;  %6180 = vmatmul.msk.bf16.gmra.mxu2 %vm1951_vm5, %v1843_v36  ;;  %v477_v56 = vrot.slane %v333_v53, 3  ;;  %v336_v36 = vld [vmem:[%s6569_s19 + $0xe8] sm:$0xf] }
 0x100   : > { %1847 = vst [vmem:[#allocation1 + $0x1] ss:$9 sm:$0xff] %v7197_v3  ;;  %v969_v3 = vrot.slane %v967_v14, 3  ;;  %v480_v14 = vrot.slane %v336_v36, 3 }
 0x101   : > { %11159 = vst [vmem:[#allocation87_spill] sm:$0xff] %v7215_v13 }
 0x102   : > { %1849 = vst [vmem:[#allocation1 + $0x2] ss:$9 sm:$0xff] %v7199_v43  ;;  %v7235_v43 = vsel %vm507_vm4, %v330_v54, %v474_v12  ;;  %v1360_v34 = vunpack.i.h.s16 %v969_v3  ;;  %v7245_v54 = vpack.i.b16 %v966_v0, %v1356_v2  ;;  %v1001_v62 = vsel %vm507_vm4, %v336_v36, %v480_v14 }
 0x103   : > { %1851 = vst [vmem:[#allocation1 + $0x3] ss:$9 sm:$0xff] %v7204_v50  ;;  %v334_v50 = vld [vmem:[%s6569_s19 + $0xe0] sm:$0xf]  ;;  %v10748_v58 = vrot.slane %v7235_v43, 3  ;;  %v993_v55 = vsel %vm494_vm1, %v336_v36, %v480_v14 }
 0x104   : > { %1853 = vst [vmem:[#allocation1 + $0x4] ss:$9 sm:$0xff] %v7209_v49  ;;  %v478_v63 = vrot.slane %v334_v50, 3 }
 0x105   : > { %1855 = vst [vmem:[#allocation1 + $0x5] ss:$9 sm:$0xff] %v7215_v13  ;;  %v955_v13 = vsel %vm494_vm1, %v331_v4, %v475_v28 }
 0x106   : > { %1857 = vst [vmem:[#allocation1 + $0x6] ss:$9 sm:$0xff] %v10744_v31  ;;  %v1358_v31 = vunpack.i.h.s16 %v966_v0  ;;  %v7240_v49 = vpack.i.b16 %v959_v35, %v955_v13  ;;  %v7248_v4 = vsel %vm499_vm2, %v334_v50, %v478_v63  ;;  %v337_v0 = vld [vmem:[%s6569_s19 + $0xec] sm:$0x1] }
 0x107   : > { %1859 = vst [vmem:[#allocation1 + $0x7] ss:$9 sm:$0xff] %v10746_v26  ;;  %v972_v26 = vsel %vm494_vm1, %v333_v53, %v477_v56  ;;  %v335_v56 = vld [vmem:[%s6569_s19 + $0xe4] sm:$0x1]  ;;  %v7261_v53 = vsel %vm494_vm1, %v334_v50, %v478_v63  ;;  %v10755_v35 = vrot.slane %v7248_v4, 1 }
 0x108   : > { %11160 = vst [vmem:[#allocation88_spill] sm:$0xff] %v7235_v43  ;;  %v7250_v28 = vpack.i.b16 %v969_v3, %v1358_v31  ;;  %v7255_v13 = vpack.i.b16 %v972_v26, %v1360_v34  ;;  %v995_v3 = vsel %vm499_vm2, %v336_v36, %v480_v14  ;;  %v998_v31 = vsel %vm503_vm3, %v336_v36, %v480_v14  ;;  %v338_v36 = vld [vmem:[%s6569_s19 + $0xf0] sm:$0xf] }
 0x109   : > { %11161 = vst [vmem:[#allocation89_spill] sm:$0xff] %v7240_v49  ;;  %v479_v26 = vrot.slane %v335_v56, 3  ;;  %v997_v2 = vrot.slane %v995_v3, 1  ;;  %v7276_v34 = vsel %vm503_vm3, %v334_v50, %v478_v63  ;;  %v1372_v43 = vunpack.i.h.s16 %v993_v55 }
 0x10a   : > { %11162 = vst [vmem:[#allocation90_spill] sm:$0xff] %v7243_v60 }
 0x10b   : > { %11163 = vst [vmem:[#allocation91_spill] sm:$0xff] %v7245_v54 }
 0x10c   : > { %11164 = vst [vmem:[#allocation92_spill] sm:$0xff] %v7248_v4 }
 0x10d   : > { %11165 = vst [vmem:[#allocation93_spill] sm:$0xff] %v7250_v28 }
 0x10e   : > { %v1860_v12 = vld [vmem:[#allocation1] sm:$0xff]  ;;  %11166 = vst [vmem:[#allocation94_spill] sm:$0xff] %v7255_v13 }
 0x10f   : > { %1862 = vst [vmem:[#allocation1] ss:$9 sm:$0xff] %v10748_v58  ;;  %6181 = vmatmul.msk.bf16.vlgmr.msra.gmra.mxu3 %vm1951_vm5, %v1860_v12  ;;  %v1000_v12 = vrot.slane %v998_v31, 2  ;;  %v7279_v58 = vsel %vm507_vm4, %v334_v50, %v478_v63  ;;  %v7289_v63 = vpack.i.b16 %v997_v2, %v1372_v43 }
 0x110   : > { %1864 = vst [vmem:[#allocation1 + $0x1] ss:$9 sm:$0xff] %v7240_v49  ;;  %v989_v49 = vsel %vm494_vm1, %v335_v56, %v479_v26  ;;  %v10759_v14 = vrot.slane %v7279_v58, 3 }
 0x111   : > { %1866 = vst [vmem:[#allocation1 + $0x2] ss:$9 sm:$0xff] %v7243_v60  ;;  %v481_v60 = vrot.slane %v337_v0, 3  ;;  %v1376_v3 = vunpack.i.h.s16 %v1000_v12 }
 0x112   : > { %11167 = vst [vmem:[#allocation95_spill] sm:$0xff] %v7261_v53 }
 0x113   : > { %1868 = vst [vmem:[#allocation1 + $0x3] ss:$9 sm:$0xff] %v7245_v54  ;;  %v1003_v54 = vrot.slane %v1001_v62, 3  ;;  %v1006_v50 = vsel %vm494_vm1, %v337_v0, %v481_v60  ;;  %v482_v62 = vrot.slane %v338_v36, 3  ;;  %v339_v60 = vld [vmem:[%s6569_s19 + $0xf4] sm:$0x1] }
 0x114   : > { %1870 = vst [vmem:[#allocation1 + $0x4] ss:$9 sm:$0xff] %v7250_v28  ;;  %v7286_v28 = vpack.i.b16 %v993_v55, %v989_v49  ;;  %v341_v55 = vld [vmem:[%s6569_s19 + $0xfc] sm:$0x1] }
 0x115   : > { %1872 = vst [vmem:[#allocation1 + $0x5] ss:$9 sm:$0xff] %v7255_v13  ;;  %v1374_v13 = vunpack.i.h.s16 %v997_v2  ;;  %v1378_v4 = vunpack.i.h.s16 %v1003_v54  ;;  %v7295_v1 = vpack.i.b16 %v1003_v54, %v1376_v3  ;;  %v7306_v43 = vsel %vm494_vm1, %v338_v36, %v482_v62 }
 0x116   : > { %1874 = vst [vmem:[#allocation1 + $0x6] ss:$9 sm:$0xff] %v7261_v53  ;;  %v10760_v53 = vrot.slane %v7276_v34, 2  ;;  %v7317_v2 = vsel %vm499_vm2, %v338_v36, %v482_v62 }
 0x117   : > { %1876 = vst [vmem:[#allocation1 + $0x7] ss:$9 sm:$0xff] %v10755_v35  ;;  %v340_v35 = vld [vmem:[%s6569_s19 + $0xf8] sm:$0xf]  ;;  %v7291_v56 = vpack.i.b16 %v1000_v12, %v1374_v13  ;;  %v7300_v49 = vpack.i.b16 %v1006_v50, %v1378_v4  ;;  %v483_v4 = vrot.slane %v339_v60, 3  ;;  %v7321_v50 = vsel %vm503_vm3, %v338_v36, %v482_v62 }
 0x118   : > { %11168 = vst [vmem:[#allocation96_spill] sm:$0xff] %v7276_v34  ;;  %v484_v26 = vrot.slane %v340_v35, 3 }
 0x119   : > { %11169 = vst [vmem:[#allocation97_spill] sm:$0xff] %v7279_v58  ;;  %v1023_v58 = vsel %vm494_vm1, %v339_v60, %v483_v4  ;;  %v342_v4 = vld [vmem:[%s6569_s19 + $0x100] sm:$0xf] }
 0x11a   : > { %11170 = vst [vmem:[#allocation98_spill] sm:$0xff] %v7286_v28  ;;  %v1029_v54 = vsel %vm499_vm2, %v340_v35, %v484_v26  ;;  %v1032_v13 = vsel %vm503_vm3, %v340_v35, %v484_v26  ;;  %v1035_v0 = vsel %vm507_vm4, %v340_v35, %v484_v26  ;;  %v1027_v12 = vsel %vm494_vm1, %v340_v35, %v484_v26 }
 0x11b   : > { %11171 = vst [vmem:[#allocation99_spill] sm:$0xff] %v7289_v63  ;;  %v1031_v3 = vrot.slane %v1029_v54, 1  ;;  %v1390_v34 = vunpack.i.h.s16 %v1027_v12  ;;  %v344_v54 = vld [vmem:[%s6569_s19 + $0x108] sm:$0xf] }
 0x11c   : > { %11172 = vst [vmem:[#allocation100_spill] sm:$0xff] %v7291_v56  ;;  %v488_v35 = vrot.slane %v344_v54, 3 }
 0x11d   : > { %11173 = vst [vmem:[#allocation101_spill] sm:$0xff] %v7295_v1 }
 0x11e   : > { %v1877_v31 = vld [vmem:[#allocation1] sm:$0xff]  ;;  %11174 = vst [vmem:[#allocation102_spill] sm:$0xff] %v7300_v49 }
 0x11f   : > { %1879 = vst [vmem:[#allocation1] ss:$9 sm:$0xff] %v10760_v53  ;;  %6182 = vmatmul.msk.bf16.gmra.mxu3 %vm1951_vm5, %v1877_v31  ;;  %v1034_v31 = vrot.slane %v1032_v13, 2  ;;  %v1037_v53 = vrot.slane %v1035_v0, 3  ;;  %v7331_v13 = vpack.i.b16 %v1027_v12, %v1023_v58  ;;  %v7334_v0 = vpack.i.b16 %v1031_v3, %v1390_v34  ;;  %v343_v34 = vld [vmem:[%s6569_s19 + $0x104] sm:$0x1] }
 0x120   : > { %1881 = vst [vmem:[#allocation1 + $0x1] ss:$9 sm:$0xff] %v10759_v14  ;;  %v7324_v14 = vsel %vm507_vm4, %v338_v36, %v482_v62  ;;  %v487_v12 = vrot.slane %v343_v34, 3 }
 0x121   : > { %1883 = vst [vmem:[#allocation1 + $0x2] ss:$9 sm:$0xff] %v7286_v28  ;;  %v10770_v28 = vrot.slane %v7317_v2, 1  ;;  %v1394_v26 = vunpack.i.h.s16 %v1034_v31  ;;  %v11182_v58 = vrot.slane %v7324_v14, 3 }
 0x122   : > { %1885 = vst [vmem:[#allocation1 + $0x3] ss:$9 sm:$0xff] %v7289_v63  ;;  %v485_v63 = vrot.slane %v341_v55, 3 }
 0x123   : > { %11175 = vst [vmem:[#allocation103_spill] sm:$0xff] %v7306_v43 }
 0x124   : > { %1887 = vst [vmem:[#allocation1 + $0x4] ss:$9 sm:$0xff] %v7291_v56  ;;  %v1040_v62 = vsel %vm494_vm1, %v341_v55, %v485_v63  ;;  %v7343_v56 = vpack.i.b16 %v1037_v53, %v1394_v26  ;;  %v1063_v55 = vsel %vm499_vm2, %v344_v54, %v488_v35 }
 0x125   : > { %1889 = vst [vmem:[#allocation1 + $0x5] ss:$9 sm:$0xff] %v7295_v1  ;;  %v1396_v1 = vunpack.i.h.s16 %v1037_v53  ;;  %v1066_v53 = vsel %vm503_vm3, %v344_v54, %v488_v35 }
 0x126   : > { %1891 = vst [vmem:[#allocation1 + $0x6] ss:$9 sm:$0xff] %v7300_v49  ;;  %v1392_v49 = vunpack.i.h.s16 %v1031_v3  ;;  %v1061_v3 = vsel %vm494_vm1, %v344_v54, %v488_v35 }
 0x127   : > { %1893 = vst [vmem:[#allocation1 + $0x7] ss:$9 sm:$0xff] %v7306_v43  ;;  %v10769_v43 = vrot.slane %v7321_v50, 2  ;;  %v7348_v63 = vpack.i.b16 %v1040_v62, %v1396_v1 }
 0x128   : > { %11176 = vst [vmem:[#allocation104_spill] sm:$0xff] %v7317_v2  ;;  %v7338_v60 = vpack.i.b16 %v1034_v31, %v1392_v49  ;;  %v486_v49 = vrot.slane %v342_v4, 3  ;;  %v1065_v31 = vrot.slane %v1063_v55, 1 }
 0x129   : > { %11177 = vst [vmem:[#allocation105_spill] sm:$0xff] %v7321_v50 }
 0x12a   : > { %11178 = vst [vmem:[#allocation106_spill] sm:$0xff] %v7324_v14  ;;  %v7359_v1 = vsel %vm499_vm2, %v342_v4, %v486_v49  ;;  %v7363_v26 = vsel %vm503_vm3, %v342_v4, %v486_v49  ;;  %v7366_v62 = vsel %vm507_vm4, %v342_v4, %v486_v49  ;;  %v1408_v14 = vunpack.i.h.s16 %v1061_v3 }
 0x12b   : > { %11179 = vst [vmem:[#allocation107_spill] sm:$0xff] %v7331_v13  ;;  %v10779_v55 = vrot.slane %v7363_v26, 2  ;;  %v1410_v50 = vunpack.i.h.s16 %v1065_v31 }
 0x12c   : > { %11180 = vst [vmem:[#allocation108_spill] sm:$0xff] %v7338_v60 }
 0x12d   : > { %11181 = vst [vmem:[#allocation109_spill] sm:$0xff] %v7343_v56 }
 0x12e   : > { %v1894_v36 = vld [vmem:[#allocation1] sm:$0xff]  ;;  %11183 = vst [vmem:[#allocation110_spill] sm:$0xff] %v7348_v63 }
 0x12f   : > { %1896 = vst [vmem:[#allocation1] ss:$9 sm:$0xff] %v10770_v28  ;;  %6183 = vmatmul.msk.bf16.gmra.mxu3 %vm1951_vm5, %v1894_v36  ;;  %v1068_v36 = vrot.slane %v1066_v53, 2  ;;  %v10780_v28 = vrot.slane %v7359_v1, 1  ;;  %v10778_v53 = vrot.slane %v7366_v62, 3 }
 0x130   : > { %1898 = vst [vmem:[#allocation1 + $0x1] ss:$9 sm:$0xff] %v10769_v43  ;;  %v7370_v43 = vsel %vm494_vm1, %v342_v4, %v486_v49  ;;  %v7381_v4 = vpack.i.b16 %v1065_v31, %v1408_v14  ;;  %v346_v49 = vld [vmem:[%s6569_s19 + $0x110] sm:$0xf]  ;;  %v347_v14 = vld [vmem:[%s6569_s19 + $0x114] sm:$0x1] }
 0x131   : > { %1900 = vst [vmem:[#allocation1 + $0x2] ss:$9 sm:$0xff] %v11182_v58  ;;  %v1069_v58 = vsel %vm507_vm4, %v344_v54, %v488_v35  ;;  %v345_v54 = vld [vmem:[%s6569_s19 + $0x10c] sm:$0x1] }
 0x132   : > { %1902 = vst [vmem:[#allocation1 + $0x3] ss:$9 sm:$0xff] %v7331_v13  ;;  %v1057_v13 = vsel %vm494_vm1, %v343_v34, %v487_v12  ;;  %v1071_v2 = vrot.slane %v1069_v58, 3  ;;  %v7385_v34 = vpack.i.b16 %v1068_v36, %v1410_v50  ;;  %v490_v50 = vrot.slane %v346_v49, 3 }
 0x133   : > { %1904 = vst [vmem:[#allocation1 + $0x4] ss:$9 sm:$0xff] %v7334_v0  ;;  %v7377_v35 = vpack.i.b16 %v1061_v3, %v1057_v13  ;;  %v489_v13 = vrot.slane %v345_v54, 3 }
 0x134   : > { %1906 = vst [vmem:[#allocation1 + $0x5] ss:$9 sm:$0xff] %v7338_v60  ;;  %v348_v60 = vld [vmem:[%s6569_s19 + $0x118] sm:$0xf]  ;;  %v1414_v31 = vunpack.i.h.s16 %v1071_v2 }
 0x135   : > { %1908 = vst [vmem:[#allocation1 + $0x6] ss:$9 sm:$0xff] %v7343_v56  ;;  %v492_v12 = vrot.slane %v348_v60, 3 }
 0x136   : > { %1910 = vst [vmem:[#allocation1 + $0x7] ss:$9 sm:$0xff] %v7348_v63  ;;  %v1412_v63 = vunpack.i.h.s16 %v1068_v36  ;;  %v491_v36 = vrot.slane %v347_v14, 3 }
 0x137   : > { %11184 = vst [vmem:[#allocation111_spill] sm:$0xff] %v7359_v1  ;;  %v1097_v3 = vsel %vm499_vm2, %v348_v60, %v492_v12 }
 0x138   : > { %11185 = vst [vmem:[#allocation112_spill] sm:$0xff] %v7363_v26  ;;  %v7390_v58 = vpack.i.b16 %v1071_v2, %v1412_v63  ;;  %v1074_v63 = vsel %vm494_vm1, %v345_v54, %v489_v13  ;;  %v7413_v2 = vsel %vm507_vm4, %v346_v49, %v490_v50  ;;  %v7416_v54 = vsel %vm494_vm1, %v346_v49, %v490_v50 }
 0x139   : > { %11186 = vst [vmem:[#allocation113_spill] sm:$0xff] %v7366_v62  ;;  %v1100_v62 = vsel %vm503_vm3, %v348_v60, %v492_v12  ;;  %v7410_v26 = vpack.i.b16 %v1074_v63, %v1414_v31  ;;  %v1091_v1 = vsel %vm494_vm1, %v347_v14, %v491_v36  ;;  %v1103_v31 = vsel %vm507_vm4, %v348_v60, %v492_v12 }
 0x13a   : > { %11187 = vst [vmem:[#allocation114_spill] sm:$0xff] %v7370_v43 }
 0x13b   : > { %11188 = vst [vmem:[#allocation115_spill] sm:$0xff] %v7377_v35 }
 0x13c   : > { %11189 = vst [vmem:[#allocation116_spill] sm:$0xff] %v7381_v4 }
 0x13d   : > { %v1911_v56 = vld [vmem:[#allocation1] sm:$0xff]  ;;  %11190 = vst [vmem:[#allocation117_spill] sm:$0xff] %v7385_v34 }
 0x13e   : > { %1913 = vst [vmem:[#allocation1] ss:$9 sm:$0xff] %v7370_v43 }
 0x13f   : > { %1915 = vst [vmem:[#allocation1 + $0x1] ss:$9 sm:$0xff] %v10780_v28  ;;  %6184 = vmatmul.msk.bf16.gmra.mxu3 %vm1951_vm5, %v1911_v56  ;;  %v1095_v56 = vsel %vm494_vm1, %v348_v60, %v492_v12  ;;  %v7407_v28 = vsel %vm503_vm3, %v346_v49, %v490_v50 }
 0x140   : > { %1917 = vst [vmem:[#allocation1 + $0x2] ss:$9 sm:$0xff] %v10779_v55  ;;  %v1099_v55 = vrot.slane %v1097_v3, 1  ;;  %v1426_v43 = vunpack.i.h.s16 %v1095_v56  ;;  %v1085_v3 = vrot.slane %v7407_v28, 2  ;;  %v7424_v63 = vpack.i.b16 %v1095_v56, %v1091_v1 }
 0x141   : > { %11191 = vst [vmem:[#allocation118_spill] sm:$0xff] %v7390_v58  ;;  %v3241_v1 = vrot.slane %v6696_v39, 3 }
 0x142   : > { %1919 = vst [vmem:[#allocation1 + $0x3] ss:$9 sm:$0xff] %v10778_v53  ;;  %v7403_v53 = vsel %vm499_vm2, %v346_v49, %v490_v50  ;;  %v349_v49 = vld [vmem:[%s6569_s19 + $0x11c] sm:$0x1]  ;;  %v7428_v50 = vpack.i.b16 %v1099_v55, %v1426_v43  ;;  %v3244_v43 = vrot.slane %v6696_v39, 6 }
 0x143   : > { %1921 = vst [vmem:[#allocation1 + $0x4] ss:$9 sm:$0xff] %v7377_v35  ;;  %v1082_v13 = vrot.slane %v7403_v53, 1  ;;  %v1088_v35 = vrot.slane %v7413_v2, 3  ;;  %v493_v60 = vrot.slane %v349_v49, 3  ;;  %3252 = vrot.lane.b32.xlu2 %v3241_v1, %s6468_s22 }
 0x144   : > { %1923 = vst [vmem:[#allocation1 + $0x5] ss:$9 sm:$0xff] %v7381_v4  ;;  %3258 = vrot.lane.b32.xlu1 %v3244_v43, %s6468_s22  ;;  %v11209_v43 = vld [vmem:[#allocation15_spill] sm:$0xff] }
 0x145   : > { %1925 = vst [vmem:[#allocation1 + $0x6] ss:$9 sm:$0xff] %v7385_v34  ;;  %v1428_v34 = vunpack.i.h.s16 %v1099_v55  ;;  %v1108_v12 = vsel %vm494_vm1, %v349_v49, %v493_v60  ;;  %v11192_v49 = vrot.slane %v6578_v9, 1 }
 0x146   : > { %1927 = vst [vmem:[#allocation1 + $0x7] ss:$9 sm:$0xff] %v7390_v58  ;;  %v1102_v58 = vrot.slane %v1100_v62, 2  ;;  %v1105_v62 = vrot.slane %v1103_v31, 3 }
 0x148   : > { %v7432_v14 = vpack.i.b16 %v1102_v58, %v1428_v34  ;;  %v1430_v55 = vunpack.i.h.s16 %v1102_v58  ;;  %v1432_v34 = vunpack.i.h.s16 %v1105_v62  ;;  %v3242_v58 = vrot.slane %v6696_v39, 4 }
 0x14a   : > { %v7449_v36 = vpack.i.b16 %v1108_v12, %v1432_v34  ;;  %v11216_v12 = vld [vmem:[#allocation12_spill] sm:$0xff] }
 0x14b   : > { %3254 = vrot.lane.b32.xlu2 %v3242_v58, %s6468_s22  ;;  %v11217_v58 = vld [vmem:[#allocation13_spill] sm:$0xff] }
 0x14d   : > { %v1928_v4 = vld [vmem:[#allocation1] sm:$0xff] }
 0x14e   : > { %1930 = vst [vmem:[#allocation1] ss:$9 sm:$0xff] %v7410_v26 }
 0x14f   : > { %1932 = vst [vmem:[#allocation1 + $0x1] ss:$9 sm:$0xff] %v7416_v54  ;;  %6185 = vmatmul.msk.bf16.gmra.mxu3 %vm1951_vm5, %v1928_v4  ;;  %v7447_v4 = vpack.i.b16 %v1105_v62, %v1430_v55  ;;  %v11213_v55 = vld [vmem:[#allocation9_spill] sm:$0xff] }
 0x150   : > { %1934 = vst [vmem:[#allocation1 + $0x2] ss:$9 sm:$0xff] %v1082_v13  ;;  %v11214_v34 = vrot.slane %v11213_v55, 2 }
 0x151   : > { %1936 = vst [vmem:[#allocation1 + $0x3] ss:$9 sm:$0xff] %v1085_v3 }
 0x152   : > { %1938 = vst [vmem:[#allocation1 + $0x4] ss:$9 sm:$0xff] %v1088_v35 }
 0x153   : > { %1940 = vst [vmem:[#allocation1 + $0x5] ss:$9 sm:$0xff] %v7424_v63 }
 0x154   : > { %1942 = vst [vmem:[#allocation1 + $0x6] ss:$9 sm:$0xff] %v7428_v50 }
 0x155   : > { %1944 = vst [vmem:[#allocation1 + $0x7] ss:$9 sm:$0xff] %v7432_v14 }
 0x15c   : > { %v1945_v56 = vld [vmem:[#allocation1] sm:$0xff] }
 0x15d   : > { %1947 = vst [vmem:[#allocation1] ss:$9 sm:$0xff] %v7447_v4 }
 0x15e   : > { %1949 = vst [vmem:[#allocation1 + $0x1] ss:$9 sm:$0xff] %v7449_v36 }
 0x15f   : > { %2156 = vst [vmem:[#allocation1 + $0x20] ss:$4 sm:$0xff] %v6598_v25  ;;  %6186 = vmatmul.msk.bf16.gmra.mxu3 %vm1951_vm5, %v1945_v56  ;;  %v11193_v25 = vrot.slane %v6581_v10, 2  ;;  %v11196_v10 = vrot.slane %v6620_v41, 1 }
 0x160   : > { %2158 = vst [vmem:[#allocation1 + $0x21] ss:$4 sm:$0xff] %v6603_v29  ;;  %v11194_v29 = vrot.slane %v6584_v11, 3  ;;  %v11197_v11 = vrot.slane %v6624_v44, 2  ;;  %v11200_v44 = vrot.slane %v6664_v16, 1 }
 0x161   : > { %2160 = vst [vmem:[#allocation1 + $0x22] ss:$4 sm:$0xff] %v6609_v32  ;;  %v11195_v32 = vrot.slane %v6630_v47, 3 }
 0x162   : > { %2162 = vst [vmem:[#allocation1 + $0x23] ss:$4 sm:$0xff] %v6611_v33  ;;  %v3245_v33 = vrot.slane %v6696_v39, 7 }
 0x164   : > { %3260 = vrot.lane.b32.xlu2 %v3245_v33, %s6468_s22 }
 0x165   : > { %v1950_v31 = vld [vmem:[#allocation1] sm:$0xff] }
 0x166   : > { %2148 = vst [vmem:[#allocation1] ss:$4 sm:$0xff] %v6575_v8 }
 0x167   : > { %2150 = vst [vmem:[#allocation1 + $0x1] ss:$4 sm:$0xff] %v11192_v49  ;;  %v11218_v49 = vld [vmem:[#allocation14_spill] sm:$0xff] }
 0x168   : > { %2152 = vst [vmem:[#allocation1 + $0x2] ss:$4 sm:$0xff] %v11193_v25 }
 0x169   : > { %2154 = vst [vmem:[#allocation1 + $0x3] ss:$4 sm:$0xff] %v11194_v29  ;;  %v7467_v62 = vld [vmem:[#allocation1 + $0x20] sm:$0xf]  ;;  %v11219_v29 = vld [vmem:[#allocation21_spill] sm:$0xff] }
 0x16a   : > { %2169 = vst [vmem:[#allocation1 + $0x20] ss:$4 sm:$0xff] %v11195_v32  ;;  %v11220_v32 = vld [vmem:[#allocation22_spill] sm:$0xff] }
 0x16b   : > { %2170 = vst [vmem:[#allocation1 + $0x21] ss:$4 sm:$0xff] %v6641_v57  ;;  %v11198_v57 = vrot.slane %v6671_v20, 2 }
 0x16c   : > { %2171 = vst [vmem:[#allocation1 + $0x22] ss:$4 sm:$0xff] %v6645_v59  ;;  %v11199_v59 = vrot.slane %v6679_v23, 3  ;;  %v11201_v23 = vrot.slane %v6722_v6, 1  ;;  %v11204_v6 = vrot.slane %v6769_v38, 1 }
 0x16d   : > { %2172 = vst [vmem:[#allocation1 + $0x23] ss:$4 sm:$0xff] %v6650_v61 }
 0x16f   : > { %6187 = vmatmul.msk.bf16.gmra.mxu3 %vm1951_vm5, %v1950_v31 }
 0x170   : > { %v2163_v8 = vld [vmem:[#allocation1] sm:$0xf] }
 0x171   : > { %v2395_v9 = vunpack.c.l.bf16 %v2163_v8  ;;  %2165 = vst [vmem:[#allocation1] ss:$4 sm:$0xff] %v6627_v46  ;;  %v11221_v8 = vld [vmem:[#allocation23_spill] sm:$0xff] }
 0x172   : > { %2166 = vst [vmem:[#allocation1 + $0x1] ss:$4 sm:$0xff] %v6633_v48 }
 0x173   : > { %2436 = vperm.xlu0 %6245, %v2395_v9   ;;  %2167 = vst [vmem:[#allocation1 + $0x2] ss:$4 sm:$0xff] %v11196_v10  ;;  %v11222_v9 = vld [vmem:[#allocation20_spill] sm:$0xff] }
 0x174   : > { %2168 = vst [vmem:[#allocation1 + $0x3] ss:$4 sm:$0xff] %v11197_v11  ;;  %v2174_v47 = vld [vmem:[#allocation1 + $0x20] sm:$0xf]  ;;  %v11223_v10 = vrot.slane %v11222_v9, 1 }
 0x175   : > { %2179 = vst [vmem:[#allocation1 + $0x20] ss:$4 sm:$0xff] %v11198_v57  ;;  %v2398_v46 = vunpack.c.l.bf16 %v2174_v47  ;;  %v11224_v47 = vld [vmem:[#allocation16_spill] sm:$0xff] }
 0x176   : > { %2180 = vst [vmem:[#allocation1 + $0x21] ss:$4 sm:$0xff] %v11199_v59  ;;  %v11225_v57 = vrot.slane %v11224_v47, 3  ;;  %v11226_v59 = vld [vmem:[#allocation17_spill] sm:$0xff] }
 0x177   : > { %2181 = vst [vmem:[#allocation1 + $0x22] ss:$4 sm:$0xff] %v6692_v37  ;;  %v11202_v37 = vrot.slane %v6728_v15, 2  ;;  %v11205_v15 = vrot.slane %v6774_v51, 2  ;;  %v11210_v51 = vld [vmem:[#allocation10_spill] sm:$0xff] }
 0x178   : > { %2182 = vst [vmem:[#allocation1 + $0x23] ss:$4 sm:$0xff] %v6698_v40  ;;  %v11203_v40 = vrot.slane %v6733_v24, 3  ;;  %v11206_v24 = vrot.slane %v6779_v42, 3  ;;  %v11211_v42 = vld [vmem:[#allocation8_spill] sm:$0xff] }
 0x179   : > { %v11212_v1 = vrot.slane %v11211_v42, 1 }
 0x17b   : > { %v2173_v48 = vld [vmem:[#allocation1] sm:$0xf] }
 0x17c   : > { %v2397_v61 = vunpack.c.l.bf16 %v2173_v48  ;;  %2175 = vst [vmem:[#allocation1] ss:$4 sm:$0xff] %v6668_v19  ;;  %v11228_v48 = vld [vmem:[#allocation19_spill] sm:$0xff] }
 0x17d   : > { %2176 = vst [vmem:[#allocation1 + $0x1] ss:$4 sm:$0xff] %v6673_v21 }
 0x17e   : > { %v6246_v41 = vpack.i.bf16 %v2398_v46, %v2397_v61  ;;  %2177 = vst [vmem:[#allocation1 + $0x2] ss:$4 sm:$0xff] %v6676_v22  ;;  %v11227_v46 = vld [vmem:[#allocation18_spill] sm:$0xff] }
 0x17f   : > { %2178 = vst [vmem:[#allocation1 + $0x3] ss:$4 sm:$0xff] %v11200_v44  ;;  %v2184_v20 = vld [vmem:[#allocation1 + $0x20] sm:$0xf]  ;;  %v11230_v44 = vld [vmem:[#allocation29_spill] sm:$0xff] }
 0x180   : > { %6247 = vperm.xlu0 %6245, %v6246_v41   ;;  %2189 = vst [vmem:[#allocation1 + $0x20] ss:$4 sm:$0xff] %v11201_v23  ;;  %v2400_v19 = vunpack.c.l.bf16 %v2184_v20  ;;  %v11229_v41 = vld [vmem:[#allocation28_spill] sm:$0xff]  ;;  %v11231_v20 = vld [vmem:[#allocation30_spill] sm:$0xff]  ;;  %v11232_v23 = vld [vmem:[#allocation31_spill] sm:$0xff] }
 0x181   : > { %2190 = vst [vmem:[#allocation1 + $0x21] ss:$4 sm:$0xff] %v11202_v37 }
 0x182   : > { %2191 = vst [vmem:[#allocation1 + $0x22] ss:$4 sm:$0xff] %v11203_v40 }
 0x183   : > { %2192 = vst [vmem:[#allocation1 + $0x23] ss:$4 sm:$0xff] %v6750_v45 }
 0x186   : > { %v2183_v21 = vld [vmem:[#allocation1] sm:$0xf] }
 0x187   : > { %v2399_v60 = vunpack.c.l.bf16 %v2183_v21  ;;  %2185 = vst [vmem:[#allocation1] ss:$4 sm:$0xff] %v6719_v5  ;;  %v11233_v21 = vld [vmem:[#allocation24_spill] sm:$0xff] }
 0x188   : > { %2186 = vst [vmem:[#allocation1 + $0x1] ss:$4 sm:$0xff] %v6724_v7 }
 0x189   : > { %v6252_v16 = vpack.i.bf16 %v2400_v19, %v2399_v60  ;;  %2187 = vst [vmem:[#allocation1 + $0x2] ss:$4 sm:$0xff] %v6730_v17  ;;  %v11234_v60 = vrot.slane %v11233_v21, 2 }
 0x18a   : > { %2188 = vst [vmem:[#allocation1 + $0x3] ss:$4 sm:$0xff] %v6737_v27  ;;  %v2194_v22 = vld [vmem:[#allocation1 + $0x20] sm:$0xf]  ;;  %v11207_v27 = vld [vmem:[#allocation6_spill] sm:$0xff] }
 0x18b   : > { %6253 = vperm.xlu1 %6251, %v6252_v16   ;;  %2199 = vst [vmem:[#allocation1 + $0x20] ss:$4 sm:$0xff] %v6783_v52  ;;  %v2402_v5 = vunpack.c.l.bf16 %v2194_v22  ;;  %v11208_v52 = vld [vmem:[#allocation7_spill] sm:$0xff]  ;;  %v11235_v16 = vld [vmem:[#allocation25_spill] sm:$0xff] }
 0x18c   : > { %2200 = vst [vmem:[#allocation1 + $0x21] ss:$4 sm:$0xff] %v11204_v6  ;;  %v11236_v22 = vrot.slane %v11235_v16, 3  ;;  %v11265_v16 = vld [vmem:[#allocation54_spill] sm:$0xff] }
 0x18d   : > { %2201 = vst [vmem:[#allocation1 + $0x22] ss:$4 sm:$0xff] %v11205_v15  ;;  %v11237_v15 = vld [vmem:[#allocation26_spill] sm:$0xff] }
 0x18e   : > { %2202 = vst [vmem:[#allocation1 + $0x23] ss:$4 sm:$0xff] %v11206_v24  ;;  %v11238_v24 = vld [vmem:[#allocation27_spill] sm:$0xff] }
 0x191   : > { %v2193_v7 = vld [vmem:[#allocation1] sm:$0xf] }
 0x192   : > { %v2401_v45 = vunpack.c.l.bf16 %v2193_v7  ;;  %2195 = vst [vmem:[#allocation1] ss:$4 sm:$0xff] %v6764_v18  ;;  %v11239_v7 = vld [vmem:[#allocation36_spill] sm:$0xff] }
 0x193   : > { %2196 = vst [vmem:[#allocation1 + $0x1] ss:$4 sm:$0xff] %v6766_v30  ;;  %v11215_v30 = vld [vmem:[#allocation11_spill] sm:$0xff] }
 0x194   : > { %v6258_v17 = vpack.i.bf16 %v2402_v5, %v2401_v45  ;;  %2197 = vst [vmem:[#allocation1 + $0x2] ss:$4 sm:$0xff] %v11207_v27  ;;  %v11240_v45 = vld [vmem:[#allocation37_spill] sm:$0xff]  ;;  %v11242_v27 = vld [vmem:[#allocation39_spill] sm:$0xff] }
 0x195   : > { %2198 = vst [vmem:[#allocation1 + $0x3] ss:$4 sm:$0xff] %v11208_v52  ;;  %v2204_v38 = vld [vmem:[#allocation1 + $0x20] sm:$0xf] }
 0x196   : > { %6259 = vperm.xlu2 %6257, %v6258_v17   ;;  %2209 = vst [vmem:[#allocation1 + $0x20] ss:$4 sm:$0xff] %v11209_v43  ;;  %v2404_v56 = vunpack.c.l.bf16 %v2204_v38  ;;  %v11241_v17 = vld [vmem:[#allocation38_spill] sm:$0xff]  ;;  %v7557_v52 = vld [vmem:[%s10624_s1] sm:$0xff] }
 0x197   : > { %2210 = vst [vmem:[#allocation1 + $0x21] ss:$4 sm:$0xff] %v11210_v51  ;;  %v7560_v38 = vperm.slane %v7557_v52, 1 }
 0x198   : > { %2211 = vst [vmem:[#allocation1 + $0x22] ss:$4 sm:$0xff] %v11212_v1  ;;  %v11244_v1 = vld [vmem:[#allocation32_spill] sm:$0xff] }
 0x199   : > { %2212 = vst [vmem:[#allocation1 + $0x23] ss:$4 sm:$0xff] %v11214_v34  ;;  %v11245_v55 = vrot.slane %v11244_v1, 1  ;;  %v11246_v34 = vld [vmem:[#allocation33_spill] sm:$0xff]  ;;  %v3520_v9 = vrot.slane %v7560_v38, 1  ;;  %v3523_v21 = vrot.slane %v7560_v38, 4 }
 0x19a   : > { %11243 = vst [vmem:[#allocation6_spill] sm:$0xff] %v7560_v38  ;;  %v11274_v1 = vld [vmem:[#allocation58_spill] sm:$0xff] }
 0x19c   : > { %v7522_v18 = vld [vmem:[#allocation1] sm:$0xf] }
 0x19d   : > { %2205 = vst [vmem:[#allocation1] ss:$4 sm:$0xff] %v11215_v30  ;;  %v11247_v30 = vrot.slane %v11246_v34, 2  ;;  %v3524_v34 = vrot.slane %v7560_v38, 5  ;;  %v7799_v2 = vpop.permute.xlu2 %3252 }
 0x19e   : > { %2206 = vst [vmem:[#allocation1 + $0x1] ss:$4 sm:$0xff] %v11216_v12 }
 0x19f   : > { %2207 = vst [vmem:[#allocation1 + $0x2] ss:$4 sm:$0xff] %v11217_v58 }
 0x1a0   : > { %v2214_v31 = vld [vmem:[#allocation1 + $0x20] sm:$0xf]  ;;  %2208 = vst [vmem:[#allocation1 + $0x3] ss:$4 sm:$0xff] %v11218_v49 }
 0x1a1   : > { %v2406_v25 = vunpack.c.l.bf16 %v2214_v31  ;;  %2219 = vst [vmem:[#allocation1 + $0x20] ss:$4 sm:$0xff] %v11219_v29  ;;  %v11250_v31 = vld [vmem:[#allocation35_spill] sm:$0xff]  ;;  %v3522_v29 = vrot.slane %v7560_v38, 3 }
 0x1a2   : > { %2220 = vst [vmem:[#allocation1 + $0x21] ss:$4 sm:$0xff] %v11220_v32  ;;  %v11252_v32 = vld [vmem:[#allocation45_spill] sm:$0xff] }
 0x1a3   : > { %v6263_v33 = vpack.i.bf16 %v2406_v25, %v2404_v56  ;;  %2221 = vst [vmem:[#allocation1 + $0x22] ss:$4 sm:$0xff] %v11221_v8  ;;  %v11248_v56 = vld [vmem:[#allocation34_spill] sm:$0xff]  ;;  %v11251_v25 = vld [vmem:[#allocation44_spill] sm:$0xff]  ;;  %v11254_v8 = vld [vmem:[#allocation47_spill] sm:$0xff] }
 0x1a4   : > { %2222 = vst [vmem:[#allocation1 + $0x23] ss:$4 sm:$0xff] %v11223_v10  ;;  %v11249_v58 = vrot.slane %v11248_v56, 3  ;;  %v2396_v10 = vunpack.c.l.bf16 %v7467_v62  ;;  %v11262_v62 = vld [vmem:[#allocation51_spill] sm:$0xff]  ;;  %v11278_v56 = vld [vmem:[#allocation62_spill] sm:$0xff] }
 0x1a5   : > { %6264 = vperm.xlu0 %6245, %v6263_v33   ;;  %v11253_v33 = vld [vmem:[#allocation46_spill] sm:$0xff] }
 0x1a7   : > { %v7533_v11 = vld [vmem:[#allocation1] sm:$0xf] }
 0x1a8   : > { %2215 = vst [vmem:[#allocation1] ss:$4 sm:$0xff] %v11225_v57 }
 0x1a9   : > { %2216 = vst [vmem:[#allocation1 + $0x1] ss:$4 sm:$0xff] %v11226_v59  ;;  %v11255_v59 = vld [vmem:[#allocation43_spill] sm:$0xff] }
 0x1aa   : > { %2217 = vst [vmem:[#allocation1 + $0x2] ss:$4 sm:$0xff] %v11227_v46  ;;  %v11256_v46 = vld [vmem:[#allocation40_spill] sm:$0xff] }
 0x1ab   : > { %2218 = vst [vmem:[#allocation1 + $0x3] ss:$4 sm:$0xff] %v11228_v48  ;;  %v2224_v61 = vld [vmem:[#allocation1 + $0x20] sm:$0xf]  ;;  %v11257_v48 = vrot.slane %v11256_v46, 1 }
 0x1ac   : > { %2229 = vst [vmem:[#allocation1 + $0x20] ss:$4 sm:$0xff] %v11229_v41  ;;  %v2408_v37 = vunpack.c.l.bf16 %v2224_v61  ;;  %v11258_v41 = vld [vmem:[#allocation41_spill] sm:$0xff] }
 0x1ad   : > { %2230 = vst [vmem:[#allocation1 + $0x21] ss:$4 sm:$0xff] %v11230_v44  ;;  %v11259_v44 = vrot.slane %v11258_v41, 2  ;;  %v11289_v41 = vld [vmem:[#allocation69_spill] sm:$0xff] }
 0x1ae   : > { %2231 = vst [vmem:[#allocation1 + $0x22] ss:$4 sm:$0xff] %v11231_v20  ;;  %v3525_v20 = vrot.slane %v7560_v38, 6 }
 0x1af   : > { %2232 = vst [vmem:[#allocation1 + $0x23] ss:$4 sm:$0xff] %v11232_v23  ;;  %v11260_v23 = vld [vmem:[#allocation42_spill] sm:$0xff] }
 0x1b2   : > { %v2223_v40 = vld [vmem:[#allocation1] sm:$0xf] }
 0x1b3   : > { %v2407_v19 = vunpack.c.l.bf16 %v2223_v40  ;;  %2225 = vst [vmem:[#allocation1] ss:$4 sm:$0xff] %v11234_v60  ;;  %v11264_v60 = vld [vmem:[#allocation53_spill] sm:$0xff] }
 0x1b4   : > { %2226 = vst [vmem:[#allocation1 + $0x1] ss:$4 sm:$0xff] %v11236_v22  ;;  %v11266_v22 = vld [vmem:[#allocation55_spill] sm:$0xff] }
 0x1b5   : > { %v6268_v6 = vpack.i.bf16 %v2408_v37, %v2407_v19  ;;  %2227 = vst [vmem:[#allocation1 + $0x2] ss:$4 sm:$0xff] %v11237_v15  ;;  %v11261_v37 = vrot.slane %v11260_v23, 3  ;;  %v11263_v19 = vrot.slane %v11262_v62, 3  ;;  %v2405_v15 = vunpack.c.l.bf16 %v7533_v11 }
 0x1b6   : > { %2228 = vst [vmem:[#allocation1 + $0x3] ss:$4 sm:$0xff] %v11238_v24  ;;  %v2234_v5 = vld [vmem:[#allocation1 + $0x20] sm:$0xf] }
 0x1b7   : > { %6269 = vperm.xlu1 %6251, %v6268_v6   ;;  %2239 = vst [vmem:[#allocation1 + $0x20] ss:$4 sm:$0xff] %v11239_v7  ;;  %v2410_v43 = vunpack.c.l.bf16 %v2234_v5  ;;  %v3521_v6 = vrot.slane %v7560_v38, 2  ;;  %v11267_v5 = vld [vmem:[#allocation50_spill] sm:$0xff]  ;;  %v11268_v7 = vld [vmem:[#allocation52_spill] sm:$0xff] }
 0x1b8   : > { %2240 = vst [vmem:[#allocation1 + $0x21] ss:$4 sm:$0xff] %v11240_v45  ;;  %v3526_v45 = vrot.slane %v7560_v38, 7 }
 0x1b9   : > { %2241 = vst [vmem:[#allocation1 + $0x22] ss:$4 sm:$0xff] %v11241_v17  ;;  %v11269_v17 = vld [vmem:[#allocation48_spill] sm:$0xff] }
 0x1ba   : > { %2242 = vst [vmem:[#allocation1 + $0x23] ss:$4 sm:$0xff] %v11242_v27  ;;  %v11270_v27 = vrot.slane %v11269_v17, 1 }
 0x1bd   : > { %v2233_v51 = vld [vmem:[#allocation1] sm:$0xf] }
 0x1be   : > { %v2409_v42 = vunpack.c.l.bf16 %v2233_v51  ;;  %2235 = vst [vmem:[#allocation1] ss:$4 sm:$0xff] %v11245_v55  ;;  %v11272_v51 = vld [vmem:[#allocation49_spill] sm:$0xff]  ;;  %v11275_v55 = vrot.slane %v11274_v1, 2 }
 0x1bf   : > { %3527 = vrot.lane.b32.xlu1 %v7560_v38, %s6468_s22  ;;  %2236 = vst [vmem:[#allocation1 + $0x1] ss:$4 sm:$0xff] %v11247_v30  ;;  %v11276_v30 = vld [vmem:[#allocation61_spill] sm:$0xff] }
 0x1c0   : > { %v6273_v12 = vpack.i.bf16 %v2410_v43, %v2409_v42  ;;  %2237 = vst [vmem:[#allocation1 + $0x2] ss:$4 sm:$0xff] %v11249_v58  ;;  %v7609_v43 = vperm.slane %v7557_v52, 2  ;;  %v11273_v42 = vrot.slane %v11272_v51, 2  ;;  %v11302_v51 = vld [vmem:[#allocation78_spill] sm:$0xff] }
 0x1c1   : > { %2238 = vst [vmem:[#allocation1 + $0x3] ss:$4 sm:$0xff] %v11250_v31  ;;  %v2244_v49 = vld [vmem:[#allocation1 + $0x20] sm:$0xf]  ;;  %v11279_v31 = vld [vmem:[#allocation63_spill] sm:$0xff] }
 0x1c2   : > { %6274 = vperm.xlu2 %6257, %v6273_v12   ;;  %2249 = vst [vmem:[#allocation1 + $0x20] ss:$4 sm:$0xff] %v11251_v25  ;;  %v11277_v12 = vrot.slane %v11276_v30, 3  ;;  %v3857_v58 = vrot.slane %v7609_v43, 1  ;;  %v2412_v25 = vunpack.c.l.bf16 %v2244_v49  ;;  %v3860_v49 = vrot.slane %v7609_v43, 4 }
 0x1c3   : > { %2250 = vst [vmem:[#allocation1 + $0x21] ss:$4 sm:$0xff] %v11252_v32  ;;  %v11280_v32 = vld [vmem:[#allocation57_spill] sm:$0xff]  ;;  %v3863_v62 = vrot.slane %v7609_v43, 7 }
 0x1c4   : > { %2251 = vst [vmem:[#allocation1 + $0x22] ss:$4 sm:$0xff] %v11253_v33  ;;  %v11281_v33 = vld [vmem:[#allocation59_spill] sm:$0xff] }
 0x1c5   : > { %2252 = vst [vmem:[#allocation1 + $0x23] ss:$4 sm:$0xff] %v11254_v8  ;;  %v2403_v8 = vunpack.c.l.bf16 %v7522_v18  ;;  %v3858_v18 = vrot.slane %v7609_v43, 2 }
 0x1c6   : > { %11271 = vst [vmem:[#allocation7_spill] sm:$0xff] %v7609_v43 }
 0x1c7   : > { %3533 = vrot.lane.b32.xlu1 %v3522_v29, %s6468_s22 }
 0x1c8   : > { %v2243_v47 = vld [vmem:[#allocation1] sm:$0xf] }
 0x1c9   : > { %v2411_v57 = vunpack.c.l.bf16 %v2243_v47  ;;  %2245 = vst [vmem:[#allocation1] ss:$4 sm:$0xff] %v11255_v59  ;;  %v11285_v59 = vld [vmem:[#allocation65_spill] sm:$0xff] }
 0x1ca   : > { %3529 = vrot.lane.b32.xlu2 %v3520_v9, %s6468_s22  ;;  %2246 = vst [vmem:[#allocation1 + $0x1] ss:$4 sm:$0xff] %v11257_v48  ;;  %v11282_v9 = vld [vmem:[#allocation60_spill] sm:$0xff]  ;;  %v11286_v46 = vrot.slane %v11285_v59, 1  ;;  %v11287_v48 = vld [vmem:[#allocation67_spill] sm:$0xff] }
 0x1cb   : > { %v6278_v61 = vpack.i.bf16 %v2396_v10, %v2411_v57  ;;  %2247 = vst [vmem:[#allocation1 + $0x2] ss:$4 sm:$0xff] %v11259_v44  ;;  %v11283_v10 = vld [vmem:[#allocation56_spill] sm:$0xff]  ;;  %v11290_v44 = vrot.slane %v11289_v41, 3 }
 0x1cc   : > { %2248 = vst [vmem:[#allocation1 + $0x3] ss:$4 sm:$0xff] %v11261_v37  ;;  %v7588_v40 = vld [vmem:[#allocation1 + $0x20] sm:$0xf]  ;;  %v11284_v47 = vrot.slane %v11283_v10, 1 }
 0x1cd   : > { %6279 = vperm.xlu0 %6245, %v6278_v61   ;;  %2259 = vst [vmem:[#allocation1 + $0x20] ss:$4 sm:$0xff] %v11263_v19  ;;  %v11288_v61 = vrot.slane %v11287_v48, 2  ;;  %v11292_v37 = vld [vmem:[#allocation64_spill] sm:$0xff]  ;;  %v11293_v19 = vld [vmem:[#allocation66_spill] sm:$0xff] }
 0x1ce   : > { %2260 = vst [vmem:[#allocation1 + $0x21] ss:$4 sm:$0xff] %v11264_v60  ;;  %v11314_v48 = vld [vmem:[#allocation80_spill] sm:$0xff] }
 0x1cf   : > { %3539 = vrot.lane.b32.xlu1 %v3525_v20, %s6468_s22  ;;  %2261 = vst [vmem:[#allocation1 + $0x22] ss:$4 sm:$0xff] %v11265_v16  ;;  %v11291_v20 = vld [vmem:[#allocation71_spill] sm:$0xff]  ;;  %v11295_v16 = vld [vmem:[#allocation70_spill] sm:$0xff] }
 0x1d0   : > { %2262 = vst [vmem:[#allocation1 + $0x23] ss:$4 sm:$0xff] %v11266_v22  ;;  %v3861_v22 = vrot.slane %v7609_v43, 5 }
 0x1d2   : > { %3535 = vrot.lane.b32.xlu2 %v3523_v21, %s6468_s22  ;;  %v11294_v21 = vld [vmem:[#allocation68_spill] sm:$0xff] }
 0x1d3   : > { %v7600_v24 = vld [vmem:[#allocation1] sm:$0xf] }
 0x1d4   : > { %2255 = vst [vmem:[#allocation1] ss:$4 sm:$0xff] %v11267_v5  ;;  %v11298_v5 = vld [vmem:[#allocation74_spill] sm:$0xff] }
 0x1d5   : > { %3531 = vrot.lane.b32.xlu0 %v3521_v6, %s6468_s22  ;;  %2256 = vst [vmem:[#allocation1 + $0x1] ss:$4 sm:$0xff] %v11268_v7  ;;  %v11296_v6 = vld [vmem:[#allocation79_spill] sm:$0xff]  ;;  %v11299_v7 = vrot.slane %v11298_v5, 1 }
 0x1d6   : > { %2257 = vst [vmem:[#allocation1 + $0x2] ss:$4 sm:$0xff] %v11270_v27  ;;  %v3859_v27 = vrot.slane %v7609_v43, 3 }
 0x1d7   : > { %2486 = vperm.xlu1 %6251, %v2405_v15   ;;  %2258 = vst [vmem:[#allocation1 + $0x3] ss:$4 sm:$0xff] %v11273_v42  ;;  %v7613_v11 = vld [vmem:[#allocation1 + $0x20] sm:$0xf]  ;;  %v7662_v15 = vperm.slane %v7557_v52, 3  ;;  %v11303_v42 = vrot.slane %v11302_v51, 3 }
 0x1d8   : > { %2269 = vst [vmem:[#allocation1 + $0x20] ss:$4 sm:$0xff] %v11275_v55 }
 0x1d9   : > { %2270 = vst [vmem:[#allocation1 + $0x21] ss:$4 sm:$0xff] %v11277_v12  ;;  %v4137_v1 = vrot.slane %v7662_v15, 1  ;;  %v4138_v30 = vrot.slane %v7662_v15, 2  ;;  %v11305_v12 = vld [vmem:[#allocation73_spill] sm:$0xff]  ;;  %v4141_v59 = vrot.slane %v7662_v15, 5 }
 0x1da   : > { %3541 = vrot.lane.b32.xlu2 %v3526_v45, %s6468_s22  ;;  %2271 = vst [vmem:[#allocation1 + $0x22] ss:$4 sm:$0xff] %v11278_v56  ;;  %v11300_v45 = vld [vmem:[#allocation76_spill] sm:$0xff]  ;;  %v11306_v56 = vld [vmem:[#allocation75_spill] sm:$0xff] }
 0x1db   : > { %2272 = vst [vmem:[#allocation1 + $0x23] ss:$4 sm:$0xff] %v11279_v31  ;;  %v11301_v17 = vrot.slane %v11300_v45, 2  ;;  %v11307_v31 = vld [vmem:[#allocation77_spill] sm:$0xff]  ;;  %v4139_v45 = vrot.slane %v7662_v15, 3 }
 0x1dc   : > { %11297 = vst [vmem:[#allocation15_spill] sm:$0xff] %v7662_v15 }
 0x1dd   : > { %3537 = vrot.lane.b32.xlu0 %v3524_v34, %s6468_s22  ;;  %v11304_v34 = vld [vmem:[#allocation72_spill] sm:$0xff] }
 0x1de   : > { %v7625_v29 = vld [vmem:[#allocation1] sm:$0xf] }
 0x1df   : > { %3866 = vrot.lane.b32.xlu1 %v3857_v58, %s6468_s22  ;;  %2265 = vst [vmem:[#allocation1] ss:$4 sm:$0xff] %v11280_v32  ;;  %v11308_v32 = vld [vmem:[#allocation86_spill] sm:$0xff]  ;;  %v2415_v41 = vunpack.c.l.bf16 %v7625_v29 }
 0x1e0   : > { %2266 = vst [vmem:[#allocation1 + $0x1] ss:$4 sm:$0xff] %v11281_v33  ;;  %v11309_v33 = vld [vmem:[#allocation87_spill] sm:$0xff] }
 0x1e1   : > { %2267 = vst [vmem:[#allocation1 + $0x2] ss:$4 sm:$0xff] %v11282_v9  ;;  %v11310_v9 = vld [vmem:[#allocation83_spill] sm:$0xff] }
 0x1e2   : > { %2521 = vperm.xlu2 %6257, %v2412_v25   ;;  %2268 = vst [vmem:[#allocation1 + $0x3] ss:$4 sm:$0xff] %v11284_v47  ;;  %v7634_v57 = vld [vmem:[#allocation1 + $0x20] sm:$0xf]  ;;  %v3862_v25 = vrot.slane %v7609_v43, 6  ;;  %v11311_v10 = vrot.slane %v11310_v9, 1 }
 0x1e3   : > { %2279 = vst [vmem:[#allocation1 + $0x20] ss:$4 sm:$0xff] %v11286_v46  ;;  %v11312_v47 = vld [vmem:[#allocation85_spill] sm:$0xff] }
 0x1e4   : > { %2280 = vst [vmem:[#allocation1 + $0x21] ss:$4 sm:$0xff] %v11288_v61  ;;  %v11315_v61 = vld [vmem:[#allocation81_spill] sm:$0xff] }
 0x1e5   : > { %2476 = vperm.xlu0 %6245, %v2403_v8   ;;  %2281 = vst [vmem:[#allocation1 + $0x22] ss:$4 sm:$0xff] %v11290_v44  ;;  %v4140_v8 = vrot.slane %v7662_v15, 4  ;;  %v2416_v44 = vunpack.c.l.bf16 %v7613_v11 }
 0x1e6   : > { %2282 = vst [vmem:[#allocation1 + $0x23] ss:$4 sm:$0xff] %v11291_v20  ;;  %v4143_v20 = vrot.slane %v7662_v15, 7 }
 0x1e7   : > { %3872 = vrot.lane.b32.xlu1 %v3860_v49, %s6468_s22  ;;  %v11313_v49 = vrot.slane %v11312_v47, 2 }
 0x1e9   : > { %v7646_v23 = vld [vmem:[#allocation1] sm:$0xf] }
 0x1ea   : > { %3868 = vrot.lane.b32.xlu2 %v3858_v18, %s6468_s22  ;;  %2275 = vst [vmem:[#allocation1] ss:$4 sm:$0xff] %v11292_v37  ;;  %v11316_v18 = vld [vmem:[#allocation82_spill] sm:$0xff] }
 0x1eb   : > { %2276 = vst [vmem:[#allocation1 + $0x1] ss:$4 sm:$0xff] %v11293_v19  ;;  %v11318_v19 = vld [vmem:[#allocation93_spill] sm:$0xff] }
 0x1ec   : > { %2277 = vst [vmem:[#allocation1 + $0x2] ss:$4 sm:$0xff] %v11294_v21  ;;  %v11319_v21 = vld [vmem:[#allocation94_spill] sm:$0xff] }
 0x1ed   : > { %3864 = vrot.lane.b32.xlu0 %v7609_v43, %s6468_s22  ;;  %v7655_v60 = vld [vmem:[#allocation1 + $0x20] sm:$0xf]  ;;  %2278 = vst [vmem:[#allocation1 + $0x3] ss:$4 sm:$0xff] %v11295_v16  ;;  %v6283_v16 = vpack.i.bf16 %v2416_v44, %v2415_v41  ;;  %v11334_v41 = vld [vmem:[#allocation97_spill] sm:$0xff] }
 0x1ee   : > { %2289 = vst [vmem:[#allocation1 + $0x20] ss:$4 sm:$0xff] %v11296_v6  ;;  %v11321_v6 = vld [vmem:[#allocation92_spill] sm:$0xff]  ;;  %v2420_v47 = vunpack.c.l.bf16 %v7655_v60  ;;  %v11335_v44 = vrot.slane %v11334_v41, 3  ;;  %v11339_v60 = vld [vmem:[#allocation109_spill] sm:$0xff] }
 0x1ef   : > { %3878 = vrot.lane.b32.xlu1 %v3863_v62, %s6468_s22  ;;  %2290 = vst [vmem:[#allocation1 + $0x21] ss:$4 sm:$0xff] %v11299_v7  ;;  %v11317_v62 = vld [vmem:[#allocation84_spill] sm:$0xff]  ;;  %v11322_v5 = vrot.slane %v11321_v6, 1  ;;  %v7712_v7 = vpop.f32.mrf.mxu0 }
 0x1f0   : > { %2291 = vst [vmem:[#allocation1 + $0x22] ss:$4 sm:$0xff] %v11301_v17  ;;  %v2417_v17 = vunpack.c.l.bf16 %v7646_v23  ;;  %v11328_v23 = vld [vmem:[#allocation100_spill] sm:$0xff] }
 0x1f1   : > { %2292 = vst [vmem:[#allocation1 + $0x23] ss:$4 sm:$0xff] %v11303_v42  ;;  %v11342_v6 = vld [vmem:[#allocation104_spill] sm:$0xff] }
 0x1f2   : > { %3874 = vrot.lane.b32.xlu2 %v3861_v22, %s6468_s22  ;;  %v11320_v22 = vld [vmem:[#allocation95_spill] sm:$0xff] }
 0x1f4   : > { %v7673_v55 = vld [vmem:[#allocation1] sm:$0xf] }
 0x1f5   : > { %3870 = vrot.lane.b32.xlu0 %v3859_v27, %s6468_s22  ;;  %2285 = vst [vmem:[#allocation1] ss:$4 sm:$0xff] %v11304_v34  ;;  %v2418_v27 = vunpack.c.l.bf16 %v7634_v57  ;;  %v11329_v57 = vld [vmem:[#allocation101_spill] sm:$0xff] }
 0x1f6   : > { %2286 = vst [vmem:[#allocation1 + $0x1] ss:$4 sm:$0xff] %v11305_v12  ;;  %v11326_v12 = vld [vmem:[#allocation90_spill] sm:$0xff] }
 0x1f7   : > { %4146 = vrot.lane.b32.xlu1 %v4137_v1, %s6468_s22  ;;  %2287 = vst [vmem:[#allocation1 + $0x2] ss:$4 sm:$0xff] %v11306_v56  ;;  %v11323_v1 = vld [vmem:[#allocation88_spill] sm:$0xff]  ;;  %v6288_v56 = vpack.i.bf16 %v2418_v27, %v2417_v17  ;;  %v11344_v17 = vld [vmem:[#allocation105_spill] sm:$0xff]  ;;  %v11346_v27 = vld [vmem:[#allocation106_spill] sm:$0xff] }
 0x1f8   : > { %v2294_v58 = vld [vmem:[#allocation1 + $0x20] sm:$0xf]  ;;  %2288 = vst [vmem:[#allocation1 + $0x3] ss:$4 sm:$0xff] %v11307_v31  ;;  %v11324_v34 = vrot.slane %v11323_v1, 3 }
 0x1f9   : > { %2299 = vst [vmem:[#allocation1 + $0x20] ss:$4 sm:$0xff] %v11308_v32  ;;  %v2422_v11 = vunpack.c.l.bf16 %v2294_v58  ;;  %v11327_v58 = vld [vmem:[#allocation91_spill] sm:$0xff]  ;;  %v11330_v32 = vld [vmem:[#allocation102_spill] sm:$0xff] }
 0x1fa   : > { %4148 = vrot.lane.b32.xlu2 %v4138_v30, %s6468_s22  ;;  %2300 = vst [vmem:[#allocation1 + $0x21] ss:$4 sm:$0xff] %v11309_v33  ;;  %v11325_v30 = vld [vmem:[#allocation89_spill] sm:$0xff]  ;;  %v11331_v33 = vld [vmem:[#allocation103_spill] sm:$0xff] }
 0x1fb   : > { %2301 = vst [vmem:[#allocation1 + $0x22] ss:$4 sm:$0xff] %v11311_v10  ;;  %v2419_v10 = vunpack.c.l.bf16 %v7673_v55  ;;  %v11338_v55 = vld [vmem:[#allocation108_spill] sm:$0xff] }
 0x1fc   : > { %2302 = vst [vmem:[#allocation1 + $0x23] ss:$4 sm:$0xff] %v11313_v49 }
 0x1fd   : > { %3876 = vrot.lane.b32.xlu0 %v3862_v25, %s6468_s22  ;;  %v4142_v25 = vrot.slane %v7662_v15, 6 }
 0x1ff   : > { %4152 = vrot.lane.b32.xlu1 %v4140_v8, %s6468_s22  ;;  %v7694_v46 = vld [vmem:[#allocation1] sm:$0xf]  ;;  %v7730_v8 = vpop.f32.mrf.mxu0 }
 0x200   : > { %2295 = vst [vmem:[#allocation1] ss:$4 sm:$0xff] %v11314_v48  ;;  %v11332_v48 = vld [vmem:[#allocation96_spill] sm:$0xff] }
 0x201   : > { %2296 = vst [vmem:[#allocation1 + $0x1] ss:$4 sm:$0xff] %v11315_v61  ;;  %v11333_v61 = vrot.slane %v11332_v48, 2  ;;  %v11356_v48 = vld [vmem:[#allocation112_spill] sm:$0xff] }
 0x202   : > { %4154 = vrot.lane.b32.xlu2 %v4141_v59, %s6468_s22  ;;  %2297 = vst [vmem:[#allocation1 + $0x2] ss:$4 sm:$0xff] %v11316_v18 }
 0x203   : > { %v2304_v37 = vld [vmem:[#allocation1 + $0x20] sm:$0xf]  ;;  %2298 = vst [vmem:[#allocation1 + $0x3] ss:$4 sm:$0xff] %v11317_v62  ;;  %v11337_v62 = vld [vmem:[#allocation99_spill] sm:$0xff] }
 0x204   : > { %2309 = vst [vmem:[#allocation1 + $0x20] ss:$4 sm:$0xff] %v11318_v19  ;;  %v2424_v29 = vunpack.c.l.bf16 %v2304_v37  ;;  %v6293_v37 = vpack.i.bf16 %v2420_v47, %v2419_v10  ;;  %v11353_v10 = vld [vmem:[#allocation114_spill] sm:$0xff]  ;;  %v11354_v47 = vld [vmem:[#allocation111_spill] sm:$0xff] }
 0x205   : > { %4144 = vrot.lane.b32.xlu0 %v7662_v15, %s6468_s22  ;;  %2310 = vst [vmem:[#allocation1 + $0x21] ss:$4 sm:$0xff] %v11319_v21 }
 0x206   : > { %2311 = vst [vmem:[#allocation1 + $0x22] ss:$4 sm:$0xff] %v11320_v22  ;;  %v6298_v42 = vpack.i.bf16 %v2424_v29, %v2422_v11  ;;  %v7748_v29 = vperm.slane %v7557_v52, 4 }
 0x207   : > { %4158 = vrot.lane.b32.xlu1 %v4143_v20, %s6468_s22  ;;  %2312 = vst [vmem:[#allocation1 + $0x23] ss:$4 sm:$0xff] %v11322_v5  ;;  %v11336_v20 = vld [vmem:[#allocation98_spill] sm:$0xff]  ;;  %v7744_v21 = vpop.f32.mrf.mxu0  ;;  %v11343_v5 = vrot.slane %v11342_v6, 1 }
 0x208   : > { %11341 = vst [vmem:[#allocation10_spill] sm:$0xff] %v7748_v29  ;;  %v4422_v41 = vrot.slane %v7748_v29, 6 }
 0x20a   : > { %6284 = vperm.xlu2 %6257, %v6283_v16   ;;  %v7717_v51 = vld [vmem:[#allocation1] sm:$0xf]  ;;  %v11340_v16 = vld [vmem:[#allocation110_spill] sm:$0xff] }
 0x20b   : > { %2305 = vst [vmem:[#allocation1] ss:$4 sm:$0xff] %v11324_v34  ;;  %v7758_v34 = vpop.permute.xlu0 %3246 }
 0x20c   : > { %2306 = vst [vmem:[#allocation1 + $0x1] ss:$4 sm:$0xff] %v11325_v30  ;;  %v11348_v30 = vld [vmem:[#allocation107_spill] sm:$0xff] }
 0x20d   : > { %4150 = vrot.lane.b32.xlu0 %v4139_v45, %s6468_s22  ;;  %2307 = vst [vmem:[#allocation1 + $0x2] ss:$4 sm:$0xff] %v11326_v12 }
 0x20e   : > { %2308 = vst [vmem:[#allocation1 + $0x3] ss:$4 sm:$0xff] %v11327_v58  ;;  %v2314_v31 = vld [vmem:[#allocation1 + $0x20] sm:$0xf]  ;;  %v4419_v58 = vrot.slane %v7748_v29, 3 }
 0x20f   : > { %6299 = vperm.xlu1 %6251, %v6298_v42   ;;  %2319 = vst [vmem:[#allocation1 + $0x20] ss:$4 sm:$0xff] %v11328_v23  ;;  %v2426_v9 = vunpack.c.l.bf16 %v2314_v31  ;;  %v11347_v42 = vrot.slane %v11346_v27, 3  ;;  %v11350_v31 = vld [vmem:[#allocation116_spill] sm:$0xff]  ;;  %v7764_v23 = vpop.f32.mrf.mxu0 }
 0x210   : > { %2320 = vst [vmem:[#allocation1 + $0x21] ss:$4 sm:$0xff] %v11329_v57  ;;  %v11351_v57 = vld [vmem:[#allocation117_spill] sm:$0xff] }
 0x211   : > { %2321 = vst [vmem:[#allocation1 + $0x22] ss:$4 sm:$0xff] %v11330_v32  ;;  %v4417_v32 = vrot.slane %v7748_v29, 1 }
 0x212   : > { %6289 = vperm.xlu2 %6257, %v6288_v56   ;;  %2322 = vst [vmem:[#allocation1 + $0x23] ss:$4 sm:$0xff] %v11331_v33  ;;  %v11349_v56 = vld [vmem:[#allocation115_spill] sm:$0xff] }
 0x215   : > { %4156 = vrot.lane.b32.xlu0 %v4142_v25, %s6468_s22  ;;  %v2313_v49 = vld [vmem:[#allocation1] sm:$0xf]  ;;  %v11352_v25 = vld [vmem:[#allocation118_spill] sm:$0xff] }
 0x216   : > { %v2425_v59 = vunpack.c.l.bf16 %v2313_v49  ;;  %2315 = vst [vmem:[#allocation1] ss:$4 sm:$0xff] %v11333_v61  ;;  %v11355_v49 = vrot.slane %v11354_v47, 1  ;;  %v11357_v61 = vrot.slane %v11356_v48, 2 }
 0x217   : > { %2316 = vst [vmem:[#allocation1 + $0x1] ss:$4 sm:$0xff] %v11335_v44  ;;  %v11358_v44 = vld [vmem:[#allocation113_spill] sm:$0xff] }
 0x218   : > { %v6303_v18 = vpack.i.bf16 %v2426_v9, %v2425_v59  ;;  %2317 = vst [vmem:[#allocation1 + $0x2] ss:$4 sm:$0xff] %v11336_v20  ;;  %v7770_v9 = vpop.permute.xlu1 %3248  ;;  %v7776_v59 = vpop.permute.xlu0 %3256 }
 0x219   : > { %2318 = vst [vmem:[#allocation1 + $0x3] ss:$4 sm:$0xff] %v11337_v62  ;;  %v2324_v19 = vld [vmem:[#allocation1 + $0x20] sm:$0xf]  ;;  %v7790_v62 = vpop.f32.mrf.mxu0 }
 0x21a   : > { %6304 = vperm.xlu2 %6257, %v6303_v18   ;;  %2329 = vst [vmem:[#allocation1 + $0x20] ss:$4 sm:$0xff] %v7334_v0  ;;  %v2428_v22 = vunpack.c.l.bf16 %v2324_v19  ;;  %v11345_v0 = vrot.slane %v11344_v17, 2  ;;  %v11359_v18 = vrot.slane %v11358_v44, 3  ;;  %v4420_v19 = vrot.slane %v7748_v29, 4 }
 0x21b   : > { %2330 = vst [vmem:[#allocation1 + $0x21] ss:$4 sm:$0xff] %v11338_v55 }
 0x21c   : > { %2331 = vst [vmem:[#allocation1 + $0x22] ss:$4 sm:$0xff] %v11339_v60 }
 0x21d   : > { %6294 = vperm.xlu0 %6245, %v6293_v37   ;;  %2332 = vst [vmem:[#allocation1 + $0x23] ss:$4 sm:$0xff] %v11340_v16  ;;  %v7788_v37 = vld [vmem:[%s10628_s5] ss:$0 sm:$0xff] }
 0x220   : > { %v2323_v11 = vld [vmem:[#allocation1] sm:$0xf]  ;;  %v7802_v60 = vpop.permute.xlu1 %3250 }
 0x221   : > { %2325 = vst [vmem:[#allocation1] ss:$4 sm:$0xff] %v11343_v5  ;;  %v2427_v45 = vunpack.c.l.bf16 %v2323_v11  ;;  %v2437_v11 = vpop.permute.xlu0 %2436  ;;  %v7812_v6 = vpop.f32.mrf.mxu0 }
 0x222   : > { %2326 = vst [vmem:[#allocation1 + $0x1] ss:$4 sm:$0xff] %v11345_v0  ;;  %4424 = vrot.lane.b32.xlu2 %v7748_v29, %s6468_s22 }
 0x223   : > { %2327 = vst [vmem:[#allocation1 + $0x2] ss:$4 sm:$0xff] %v11347_v42  ;;  %v6308_v1 = vpack.i.bf16 %v2428_v22, %v2427_v45  ;;  %v7822_v45 = vperm.slane %v7557_v52, 5 }
 0x224   : > { %2328 = vst [vmem:[#allocation1 + $0x3] ss:$4 sm:$0xff] %v11348_v30  ;;  %v2334_v12 = vld [vmem:[#allocation1 + $0x20] sm:$0xf] }
 0x225   : > { %6309 = vperm.xlu0 %6245, %v6308_v1   ;;  %2339 = vst [vmem:[#allocation1 + $0x20] ss:$4 sm:$0xff] %v11349_v56 }
 0x226   : > { %2340 = vst [vmem:[#allocation1 + $0x21] ss:$4 sm:$0xff] %v11350_v31 }
 0x227   : > { %2341 = vst [vmem:[#allocation1 + $0x22] ss:$4 sm:$0xff] %v11351_v57 }
 0x228   : > { %2342 = vst [vmem:[#allocation1 + $0x23] ss:$4 sm:$0xff] %v11352_v25  ;;  %v7824_v28 = vpop.permute.xlu1 %3258 }
 0x229   : > { %11360 = vst [vmem:[#allocation8_spill] sm:$0xff] %v7822_v45  ;;  %v7848_v57 = vpop.f32.mrf.mxu0 }
 0x22a   : > { %4430 = vrot.lane.b32.xlu2 %v4419_v58, %s6468_s22  ;;  %v2013_v58 = vadd.f32 %v7788_v37, %v7744_v21 }
 0x22b   : > { %v2333_v33 = vld [vmem:[#allocation1] sm:$0xf] }
 0x22c   : > { %2335 = vst [vmem:[#allocation1] ss:$4 sm:$0xff] %v11353_v10  ;;  %v2429_v55 = vunpack.c.l.bf16 %v2333_v33  ;;  %v4421_v10 = vrot.slane %v7748_v29, 5 }
 0x22d   : > { %2336 = vst [vmem:[#allocation1 + $0x1] ss:$4 sm:$0xff] %v11355_v49  ;;  %4426 = vrot.lane.b32.xlu0 %v4417_v32, %s6468_s22  ;;  %v4755_v32 = vrot.slane %v7822_v45, 3  ;;  %v2111_v49 = vmax.f32 %v2013_v58, 0.0 }
 0x22e   : > { %2337 = vst [vmem:[#allocation1 + $0x2] ss:$4 sm:$0xff] %v11357_v61 }
 0x22f   : > { %2338 = vst [vmem:[#allocation1 + $0x3] ss:$4 sm:$0xff] %v11359_v18  ;;  %v2344_v20 = vld [vmem:[#allocation1 + $0x20] sm:$0xf] }
 0x230   : > { %2349 = vst [vmem:[#allocation1 + $0x20] ss:$4 sm:$0xff] %v1088_v35  ;;  %v2008_v35 = vadd.f32 %v7788_v37, %v7712_v7  ;;  %v4423_v7 = vrot.slane %v7748_v29, 7 }
 0x231   : > { %2350 = vst [vmem:[#allocation1 + $0x21] ss:$4 sm:$0xff] %v7424_v63  ;;  %v2423_v63 = vunpack.c.l.bf16 %v7717_v51  ;;  %v7817_v51 = vpop.permute.xlu2 %3254 }
 0x232   : > { %4436 = vrot.lane.b32.xlu2 %v4422_v41, %s6468_s22  ;;  %2351 = vst [vmem:[#allocation1 + $0x22] ss:$4 sm:$0xff] %v7428_v50  ;;  %v2109_v50 = vmax.f32 %v2008_v35, 0.0  ;;  %v4753_v41 = vrot.slane %v7822_v45, 1 }
 0x233   : > { %2352 = vst [vmem:[#allocation1 + $0x23] ss:$4 sm:$0xff] %v7432_v14 }
 0x234   : > { %v7814_v5 = vmul.f32 %v2437_v11, %v2109_v50 }
 0x235   : > { %4432 = vrot.lane.b32.xlu0 %v4420_v19, %s6468_s22 }
 0x236   : > { %v2343_v16 = vld [vmem:[#allocation1] sm:$0xf]  ;;  %v10793_v53 = vrot.slane %v7814_v5, 6  ;;  %v10797_v27 = vrot.slane %v7814_v5, 2  ;;  %v3270_v42 = vmul.f32 %v7758_v34, %v7814_v5  ;;  %v10794_v1 = vrot.slane %v7814_v5, 5 }
 0x237   : > { %v2431_v22 = vunpack.c.l.bf16 %v2343_v16  ;;  %2345 = vst [vmem:[#allocation1] ss:$4 sm:$0xff] %v7410_v26  ;;  %v2430_v26 = vunpack.c.l.bf16 %v2334_v12  ;;  %v6248_v12 = vpop.permute.xlu0 %6247  ;;  %v10798_v56 = vrot.slane %v7814_v5, 1  ;;  %v10795_v31 = vrot.slane %v7814_v5, 4 }
 0x238   : > { %2346 = vst [vmem:[#allocation1 + $0x1] ss:$4 sm:$0xff] %v7416_v54  ;;  %v2432_v54 = vunpack.c.l.bf16 %v2344_v20  ;;  %v3276_v30 = vmul.f32 %v7824_v28, %v10793_v53  ;;  %v6249_v25 = vunpack.i.l.bf16 %v6248_v12  ;;  %v3275_v21 = vmul.f32 %v7776_v59, %v10794_v1 }
 0x239   : > { %v6313_v14 = vpack.i.bf16 %v2431_v22, %v2429_v55  ;;  %2347 = vst [vmem:[#allocation1 + $0x2] ss:$4 sm:$0xff] %v1082_v13  ;;  %v4418_v13 = vrot.slane %v7748_v29, 2  ;;  %v10791_v33 = vrot.slane %v7814_v5, 7  ;;  %v3271_v47 = vmul.f32 %v7770_v9, %v10798_v56  ;;  %v7865_v61 = vpop.permute.xlu2 %3260  ;;  %v7879_v55 = vpop.f32.mrf.mxu0 }
 0x23a   : > { %2348 = vst [vmem:[#allocation1 + $0x3] ss:$4 sm:$0xff] %v1085_v3  ;;  %2576 = vperm.xlu2 %6257, %v2423_v63   ;;  %v10796_v3 = vrot.slane %v7814_v5, 3  ;;  %v6318_v0 = vpack.i.bf16 %v2432_v54, %v2430_v26  ;;  %v3274_v48 = vmul.f32 %v7817_v51, %v10795_v31  ;;  %v7868_v44 = vmul.f32 %v6249_v25, %v2111_v49 }
 0x23b   : > { %6314 = vperm.xlu1 %6251, %v6313_v14   ;;  %v3277_v18 = vmul.f32 %v7865_v61, %v10791_v33  ;;  %v2015_v20 = vadd.f32 %v7788_v37, %v7764_v23  ;;  %v6250_v19 = vunpack.i.h.bf16 %v6248_v12  ;;  %v2421_v16 = vunpack.c.l.bf16 %v7694_v46 }
 0x23c   : > { %11361 = vst [vmem:[#allocation9_spill] sm:$0xff] %v7868_v44  ;;  %v10790_v35 = vrot.slane %v7868_v44, 2  ;;  %v7883_v63 = vrot.slane %v7868_v44, 3  ;;  %v7886_v11 = vrot.slane %v7868_v44, 4  ;;  %v7891_v23 = vrot.slane %v7868_v44, 5 }
 0x23d   : > { %4438 = vrot.lane.b32.xlu0 %v4423_v7, %s6468_s22  ;;  %v2112_v22 = vmax.f32 %v2015_v20, 0.0  ;;  %v6254_v7 = vpop.permute.xlu1 %6253  ;;  %v4758_v46 = vrot.slane %v7822_v45, 6  ;;  %v4756_v26 = vrot.slane %v7822_v45, 4  ;;  %v7899_v54 = vrot.slane %v7868_v44, 6 }
 0x23e   : > { %11362 = vst [vmem:[#allocation11_spill] sm:$0xff] %v7886_v11  ;;  %v3278_v14 = vmul.f32 %v7758_v34, %v10790_v35  ;;  %v3280_v12 = vmul.f32 %v7802_v60, %v7886_v11  ;;  %v6255_v58 = vunpack.i.l.bf16 %v6254_v7  ;;  %v2020_v49 = vadd.f32 %v7788_v37, %v7812_v6 }
 0x23f   : > { %v7888_v50 = vmul.f32 %v6250_v19, %v2112_v22  ;;  %11364 = vst [vmem:[#allocation13_spill] sm:$0xff] %v7891_v23  ;;  %v6256_v19 = vunpack.i.h.bf16 %v6254_v7 }
 0x240   : > { %11365 = vst [vmem:[#allocation14_spill] sm:$0xff] %v7899_v54  ;;  %v2114_v6 = vmax.f32 %v2020_v49, 0.0 }
 0x241   : > { %v7827_v17 = vld [vmem:[#allocation1] sm:$0xf]  ;;  %11363 = vst [vmem:[#allocation12_spill] sm:$0xff] %v7888_v50 }
 0x242   : > { %2354 = vst [vmem:[#allocation1] ss:$4 sm:$0xff] %v7447_v4  ;;  %4760 = vrot.lane.b32.xlu2 %v7822_v45, %s6468_s22  ;;  %v3273_v4 = vmul.f32 %v7799_v2, %v10796_v3  ;;  %v2433_v25 = vunpack.c.l.bf16 %v7827_v17  ;;  %v3284_v17 = vmul.f32 %v7824_v28, %v7888_v50  ;;  %v7944_v22 = vmul.f32 %v6256_v19, %v2114_v6 }
 0x243   : > { %4428 = vrot.lane.b32.xlu1 %v4418_v13, %s6468_s22  ;;  %2355 = vst [vmem:[#allocation1 + $0x1] ss:$4 sm:$0xff] %v7449_v36  ;;  %v3272_v36 = vmul.f32 %v7802_v60, %v10797_v27  ;;  %v4757_v6 = vrot.slane %v7822_v45, 5 }
 0x244   : > { %3399 = vst [vmem:[#allocation1] ss:$9 sm:$0xff] %v3270_v42  ;;  %v7906_v42 = vrot.slane %v7868_v44, 7  ;;  %v7976_v49 = vrot.slane %v7944_v22, 2  ;;  %v7986_v19 = vrot.slane %v7944_v22, 3 }
 0x245   : > { %6319 = vperm.xlu0 %6245, %v6318_v0   ;;  %3411 = vst [vmem:[#allocation1 + $0x6] ss:$9 sm:$0xff] %v3276_v30  ;;  %v2018_v0 = vadd.f32 %v7788_v37, %v7790_v62  ;;  %v3279_v30 = vmul.f32 %v7770_v9, %v7883_v63  ;;  %v7917_v62 = vrot.slane %v7888_v50, 1 }
 0x246   : > { %3405 = vst [vmem:[#allocation1 + $0x3] ss:$9 sm:$0xff] %v3273_v4  ;;  %v3281_v4 = vmul.f32 %v7799_v2, %v7891_v23 }
 0x247   : > { %3403 = vst [vmem:[#allocation1 + $0x2] ss:$9 sm:$0xff] %v3272_v36  ;;  %v7919_v36 = vpop.permute.xlu2 %6259  ;;  %v3285_v20 = vmul.f32 %v7865_v61, %v7917_v62 }
 0x248   : > { %3409 = vst [vmem:[#allocation1 + $0x5] ss:$9 sm:$0xff] %v3275_v21  ;;  %v3282_v21 = vmul.f32 %v7817_v51, %v7899_v54 }
 0x249   : > { %3401 = vst [vmem:[#allocation1 + $0x1] ss:$9 sm:$0xff] %v3271_v47  ;;  %v3283_v47 = vmul.f32 %v7776_v59, %v7906_v42 }
 0x24a   : > { %4766 = vrot.lane.b32.xlu2 %v4755_v32, %s6468_s22  ;;  %3407 = vst [vmem:[#allocation1 + $0x4] ss:$9 sm:$0xff] %v3274_v48  ;;  %v7923_v32 = vperm.slane %v7557_v52, 6  ;;  %v7931_v48 = vpop.f32.mrf.mxu0 }
 0x24b   : > { %4434 = vrot.lane.b32.xlu1 %v4421_v10, %s6468_s22  ;;  %3413 = vst [vmem:[#allocation1 + $0x7] ss:$9 sm:$0xff] %v3277_v18  ;;  %v2113_v10 = vmax.f32 %v2018_v0, 0.0  ;;  %v2023_v0 = vadd.f32 %v7788_v37, %v7848_v57 }
 0x24c   : > { %11367 = vst [vmem:[#allocation22_spill] sm:$0xff] %v7906_v42  ;;  %v5026_v52 = vrot.slane %v7923_v32, 1 }
 0x24d   : > { %4762 = vrot.lane.b32.xlu0 %v4753_v41, %s6468_s22  ;;  %11368 = vst [vmem:[#allocation23_spill] sm:$0xff] %v7917_v62  ;;  %v4759_v41 = vrot.slane %v7822_v45, 7  ;;  %v7937_v18 = vmul.f32 %v6255_v58, %v2113_v10  ;;  %v5027_v58 = vrot.slane %v7923_v32, 2  ;;  %v2414_v62 = vunpack.c.l.bf16 %v7588_v40 }
 0x24e   : > { %11369 = vst [vmem:[#allocation20_spill] sm:$0xff] %v7923_v32 }
 0x24f   : > { %11370 = vst [vmem:[#allocation16_spill] sm:$0xff] %v7937_v18  ;;  %v7953_v7 = vrot.slane %v7937_v18, 6 }
 0x250   : > { %11371 = vst [vmem:[#allocation17_spill] sm:$0xff] %v7944_v22 }
 0x251   : > { %11373 = vst [vmem:[#allocation19_spill] sm:$0xff] %v7953_v7 }
 0x252   : > { %v7901_v13 = vld [vmem:[#allocation1] sm:$0xff]  ;;  %4772 = vrot.lane.b32.xlu2 %v4758_v46, %s6468_s22  ;;  %v4754_v46 = vrot.slane %v7822_v45, 2  ;;  %11377 = vst [vmem:[#allocation31_spill] sm:$0xff] %v7976_v49  ;;  %v5028_v45 = vrot.slane %v7923_v32, 3 }
 0x253   : > { %2566 = vperm.xlu1 %6251, %v2421_v16   ;;  %11366 = vst [vmem:[#allocation21_spill] sm:$0xff] %v7901_v13  ;;  %v10789_v16 = vrot.slane %v7937_v18, 4 }
 0x254   : > { %3415 = vst [vmem:[#allocation1] ss:$9 sm:$0xff] %v3278_v14  ;;  %v7946_v14 = vpop.permute.xlu2 %6274 }
 0x255   : > { %4768 = vrot.lane.b32.xlu0 %v4756_v26, %s6468_s22  ;;  %3416 = vst [vmem:[#allocation1 + $0x1] ss:$9 sm:$0xff] %v3279_v30  ;;  %v7950_v26 = vrot.slane %v7937_v18, 5  ;;  %v7958_v30 = vrot.slane %v7937_v18, 7 }
 0x256   : > { %3417 = vst [vmem:[#allocation1 + $0x2] ss:$9 sm:$0xff] %v3280_v12  ;;  %v5029_v12 = vrot.slane %v7923_v32, 4 }
 0x257   : > { %3418 = vst [vmem:[#allocation1 + $0x3] ss:$9 sm:$0xff] %v3281_v4  ;;  %v3286_v4 = vmul.f32 %v7758_v34, %v10789_v16  ;;  %v3287_v57 = vmul.f32 %v7770_v9, %v7950_v26  ;;  %v8015_v16 = vpop.permute.xlu1 %6269 }
 0x258   : > { %3419 = vst [vmem:[#allocation1 + $0x4] ss:$9 sm:$0xff] %v3282_v21  ;;  %v7967_v21 = vrot.slane %v7944_v22, 1 }
 0x259   : > { %3420 = vst [vmem:[#allocation1 + $0x5] ss:$9 sm:$0xff] %v3283_v47  ;;  %v2025_v47 = vadd.f32 %v7788_v37, %v7879_v55  ;;  %v3290_v55 = vmul.f32 %v7817_v51, %v7944_v22 }
 0x25a   : > { %3421 = vst [vmem:[#allocation1 + $0x6] ss:$9 sm:$0xff] %v3284_v17  ;;  %5035 = vrot.lane.b32.xlu2 %v5026_v52, %s6468_s22  ;;  %v3288_v17 = vmul.f32 %v7802_v60, %v7953_v7  ;;  %v2115_v52 = vmax.f32 %v2023_v0, 0.0 }
 0x25b   : > { %2626 = vperm.xlu1 %6251, %v2433_v25   ;;  %3422 = vst [vmem:[#allocation1 + $0x7] ss:$9 sm:$0xff] %v3285_v20  ;;  %v2029_v25 = vpop.f32.mrf.mxu0  ;;  %v3289_v20 = vmul.f32 %v7799_v2, %v7958_v30  ;;  %v2116_v0 = vmax.f32 %v2025_v47, 0.0 }
 0x25c   : > { %11372 = vst [vmem:[#allocation18_spill] sm:$0xff] %v7950_v26 }
 0x25d   : > { %4774 = vrot.lane.b32.xlu0 %v4759_v41, %s6468_s22  ;;  %11374 = vst [vmem:[#allocation28_spill] sm:$0xff] %v7958_v30  ;;  %v6261_v41 = vunpack.i.l.bf16 %v7919_v36 }
 0x25e   : > { %11375 = vst [vmem:[#allocation29_spill] sm:$0xff] %v7967_v21 }
 0x25f   : > { %11378 = vst [vmem:[#allocation24_spill] sm:$0xff] %v7986_v19 }
 0x262   : > { %v7971_v10 = vld [vmem:[#allocation1] sm:$0xff]  ;;  %5041 = vrot.lane.b32.xlu2 %v5029_v12, %s6468_s22  ;;  %v3292_v12 = vmul.f32 %v7824_v28, %v7976_v49 }
 0x263   : > { %4764 = vrot.lane.b32.xlu1 %v4754_v46, %s6468_s22  ;;  %11376 = vst [vmem:[#allocation30_spill] sm:$0xff] %v7971_v10  ;;  %v3291_v46 = vmul.f32 %v7776_v59, %v7967_v21  ;;  %v8005_v47 = vpop.f32.mrf.mxu0 }
 0x264   : > { %3424 = vst [vmem:[#allocation1] ss:$9 sm:$0xff] %v3286_v4  ;;  %v6262_v4 = vunpack.i.h.bf16 %v7919_v36 }
 0x265   : > { %5037 = vrot.lane.b32.xlu0 %v5027_v58, %s6468_s22  ;;  %3425 = vst [vmem:[#allocation1 + $0x1] ss:$9 sm:$0xff] %v3287_v57  ;;  %v7996_v58 = vmul.f32 %v6261_v41, %v2115_v52  ;;  %v7998_v57 = vpop.permute.xlu2 %3529  ;;  %v2030_v41 = vadd.f32 %v7788_v37, %v2029_v25 }
 0x266   : > { %3426 = vst [vmem:[#allocation1 + $0x2] ss:$9 sm:$0xff] %v3288_v17  ;;  %v3293_v17 = vmul.f32 %v7865_v61, %v7986_v19 }
 0x267   : > { %3427 = vst [vmem:[#allocation1 + $0x3] ss:$9 sm:$0xff] %v3289_v20  ;;  %v8003_v20 = vmul.f32 %v6262_v4, %v2116_v0  ;;  %v10792_v36 = vrot.slane %v7996_v58, 6  ;;  %v6265_v0 = vpop.permute.xlu0 %6264  ;;  %v2118_v1 = vmax.f32 %v2030_v41, 0.0  ;;  %v10922_v54 = vrot.slane %v7996_v58, 2 }
 0x268   : > { %3428 = vst [vmem:[#allocation1 + $0x4] ss:$9 sm:$0xff] %v3290_v55  ;;  %v8009_v55 = vrot.slane %v7996_v58, 7  ;;  %v6266_v31 = vunpack.i.l.bf16 %v6265_v0  ;;  %v6267_v10 = vunpack.i.h.bf16 %v6265_v0  ;;  %v10923_v40 = vrot.slane %v7996_v58, 3 }
 0x269   : > { %11379 = vst [vmem:[#allocation25_spill] sm:$0xff] %v7996_v58  ;;  %v8012_v52 = vrot.slane %v8003_v20, 1  ;;  %v8024_v4 = vrot.slane %v8003_v20, 3  ;;  %v3296_v25 = vmul.f32 %v7802_v60, %v8003_v20  ;;  %v8035_v33 = vrot.slane %v8003_v20, 4 }
 0x26a   : > { %3429 = vst [vmem:[#allocation1 + $0x5] ss:$9 sm:$0xff] %v3291_v46  ;;  %v8018_v46 = vrot.slane %v8003_v20, 2  ;;  %v8042_v53 = vrot.slane %v8003_v20, 5  ;;  %v8053_v41 = vmul.f32 %v6266_v31, %v2118_v1  ;;  %v5031_v1 = vrot.slane %v7923_v32, 6 }
 0x26b   : > { %3430 = vst [vmem:[#allocation1 + $0x6] ss:$9 sm:$0xff] %v3292_v12  ;;  %4770 = vrot.lane.b32.xlu1 %v4757_v6, %s6468_s22  ;;  %v3294_v6 = vmul.f32 %v7758_v34, %v10792_v36  ;;  %v3295_v12 = vmul.f32 %v7770_v9, %v8009_v55  ;;  %v3297_v36 = vmul.f32 %v7799_v2, %v8012_v52  ;;  %v2034_v56 = vpop.f32.mrf.mxu0 }
 0x26c   : > { %3431 = vst [vmem:[#allocation1 + $0x7] ss:$9 sm:$0xff] %v3293_v17  ;;  %v3298_v3 = vmul.f32 %v7817_v51, %v8018_v46  ;;  %v3299_v27 = vmul.f32 %v7776_v59, %v8024_v4  ;;  %v8061_v29 = vrot.slane %v8053_v41, 1  ;;  %v8064_v15 = vrot.slane %v8053_v41, 2 }
 0x26d   : > { %11380 = vst [vmem:[#allocation26_spill] sm:$0xff] %v8003_v20  ;;  %v8032_v35 = vpop.permute.xlu2 %3535  ;;  %v3302_v31 = vmul.f32 %v7758_v34, %v8053_v41 }
 0x26e   : > { %11381 = vst [vmem:[#allocation27_spill] sm:$0xff] %v8009_v55  ;;  %v3303_v43 = vmul.f32 %v7770_v9, %v8061_v29  ;;  %v3304_v39 = vmul.f32 %v7802_v60, %v8064_v15 }
 0x26f   : > { %11382 = vst [vmem:[#allocation36_spill] sm:$0xff] %v8012_v52 }
 0x270   : > { %11383 = vst [vmem:[#allocation37_spill] sm:$0xff] %v8018_v46  ;;  %v6272_v46 = vunpack.i.h.bf16 %v8015_v16 }
 0x271   : > { %11384 = vst [vmem:[#allocation38_spill] sm:$0xff] %v8024_v4 }
 0x272   : > { %11386 = vst [vmem:[#allocation32_spill] sm:$0xff] %v8035_v33 }
 0x273   : > { %v8028_v17 = vld [vmem:[#allocation1] sm:$0xff]  ;;  %5033 = vrot.lane.b32.xlu1 %v7923_v32, %s6468_s22  ;;  %11387 = vst [vmem:[#allocation33_spill] sm:$0xff] %v8042_v53 }
 0x274   : > { %11385 = vst [vmem:[#allocation39_spill] sm:$0xff] %v8028_v17 }
 0x275   : > { %3433 = vst [vmem:[#allocation1] ss:$9 sm:$0xff] %v3294_v6  ;;  %v3300_v6 = vmul.f32 %v7824_v28, %v8035_v33  ;;  %v8098_v33 = vpop.permute.xlu0 %6279 }
 0x276   : > { %3434 = vst [vmem:[#allocation1 + $0x1] ss:$9 sm:$0xff] %v3295_v12  ;;  %v3301_v12 = vmul.f32 %v7865_v61, %v8042_v53  ;;  %v8092_v53 = vrot.slane %v8053_v41, 7 }
 0x277   : > { %3435 = vst [vmem:[#allocation1 + $0x2] ss:$9 sm:$0xff] %v3296_v25  ;;  %v8055_v25 = vpop.permute.xlu1 %3527 }
 0x278   : > { %3436 = vst [vmem:[#allocation1 + $0x3] ss:$9 sm:$0xff] %v3297_v36  ;;  %v8058_v36 = vpop.permute.xlu2 %3541 }
 0x279   : > { %3437 = vst [vmem:[#allocation1 + $0x4] ss:$9 sm:$0xff] %v3298_v3  ;;  %v2035_v3 = vadd.f32 %v7788_v37, %v2034_v56  ;;  %v8084_v56 = vrot.slane %v8053_v41, 6 }
 0x27a   : > { %3438 = vst [vmem:[#allocation1 + $0x5] ss:$9 sm:$0xff] %v3299_v27  ;;  %v8068_v27 = vrot.slane %v8053_v41, 3 }
 0x27b   : > { %11388 = vst [vmem:[#allocation34_spill] sm:$0xff] %v8053_v41  ;;  %5039 = vrot.lane.b32.xlu1 %v5028_v45, %s6468_s22  ;;  %v8074_v45 = vrot.slane %v8053_v41, 4  ;;  %v2120_v17 = vmax.f32 %v2035_v3, 0.0 }
 0x27c   : > { %3439 = vst [vmem:[#allocation1 + $0x6] ss:$9 sm:$0xff] %v3300_v6  ;;  %v2037_v6 = vpop.f32.mrf.mxu0  ;;  %v3305_v13 = vmul.f32 %v7799_v2, %v8068_v27 }
 0x27d   : > { %3440 = vst [vmem:[#allocation1 + $0x7] ss:$9 sm:$0xff] %v3301_v12  ;;  %v8077_v12 = vrot.slane %v8053_v41, 5  ;;  %v2038_v3 = vadd.f32 %v7788_v37, %v2037_v6 }
 0x27e   : > { %11389 = vst [vmem:[#allocation35_spill] sm:$0xff] %v8061_v29 }
 0x27f   : > { %11390 = vst [vmem:[#allocation44_spill] sm:$0xff] %v8064_v15  ;;  %v8096_v29 = vpop.permute.xlu1 %3533  ;;  %v3307_v0 = vmul.f32 %v7776_v59, %v8077_v12  ;;  %v2121_v41 = vmax.f32 %v2038_v3, 0.0 }
 0x280   : > { %11391 = vst [vmem:[#allocation45_spill] sm:$0xff] %v8068_v27  ;;  %v3570_v42 = vmul.f32 %v8096_v29, %v7996_v58 }
 0x281   : > { %11392 = vst [vmem:[#allocation46_spill] sm:$0xff] %v8074_v45 }
 0x282   : > { %11393 = vst [vmem:[#allocation47_spill] sm:$0xff] %v8077_v12  ;;  %v6271_v12 = vunpack.i.l.bf16 %v8015_v16 }
 0x283   : > { %11395 = vst [vmem:[#allocation40_spill] sm:$0xff] %v8084_v56  ;;  %5045 = vrot.lane.b32.xlu1 %v5031_v1, %s6468_s22  ;;  %v3308_v1 = vmul.f32 %v7824_v28, %v8084_v56 }
 0x284   : > { %v8081_v38 = vld [vmem:[#allocation1] sm:$0xff]  ;;  %11396 = vst [vmem:[#allocation41_spill] sm:$0xff] %v8092_v53  ;;  %v8120_v56 = vmul.f32 %v6271_v12, %v2121_v41 }
 0x285   : > { %11394 = vst [vmem:[#allocation43_spill] sm:$0xff] %v8081_v38  ;;  %v3306_v38 = vmul.f32 %v7817_v51, %v8074_v45 }
 0x286   : > { %3442 = vst [vmem:[#allocation1] ss:$9 sm:$0xff] %v3302_v31  ;;  %v8105_v31 = vmul.f32 %v6267_v10, %v2120_v17  ;;  %v8150_v52 = vrot.slane %v8120_v56, 1 }
 0x287   : > { %3443 = vst [vmem:[#allocation1 + $0x1] ss:$9 sm:$0xff] %v3303_v43  ;;  %v8107_v43 = vpop.permute.xlu2 %2521  ;;  %v8125_v3 = vpop.permute.xlu1 %3539 }
 0x288   : > { %3444 = vst [vmem:[#allocation1 + $0x2] ss:$9 sm:$0xff] %v3304_v39  ;;  %v3309_v39 = vmul.f32 %v7865_v61, %v8092_v53  ;;  %v10834_v6 = vrot.slane %v8105_v31, 2  ;;  %v8114_v45 = vrot.slane %v8105_v31, 3  ;;  %v8117_v10 = vrot.slane %v8105_v31, 4 }
 0x289   : > { %3445 = vst [vmem:[#allocation1 + $0x3] ss:$9 sm:$0xff] %v3305_v13  ;;  %v2039_v13 = vpop.f32.mrf.mxu0  ;;  %v8136_v27 = vrot.slane %v8105_v31, 7 }
 0x28a   : > { %3446 = vst [vmem:[#allocation1 + $0x4] ss:$9 sm:$0xff] %v3306_v38  ;;  %v2042_v38 = vpop.f32.mrf.mxu2  ;;  %v2040_v17 = vadd.f32 %v7788_v37, %v2039_v13  ;;  %v3310_v53 = vmul.f32 %v7758_v34, %v10834_v6  ;;  %v3311_v41 = vmul.f32 %v7770_v9, %v8114_v45  ;;  %v3312_v15 = vmul.f32 %v7802_v60, %v8117_v10 }
 0x28b   : > { %11397 = vst [vmem:[#allocation42_spill] sm:$0xff] %v8105_v31 }
 0x28c   : > { %3447 = vst [vmem:[#allocation1 + $0x5] ss:$9 sm:$0xff] %v3307_v0  ;;  %v8123_v0 = vrot.slane %v8105_v31, 5  ;;  %v2122_v4 = vmax.f32 %v2040_v17, 0.0  ;;  %v3317_v17 = vmul.f32 %v7865_v61, %v8150_v52 }
 0x28d   : > { %3448 = vst [vmem:[#allocation1 + $0x6] ss:$9 sm:$0xff] %v3308_v1  ;;  %v8127_v1 = vpop.permute.xlu0 %3531 }
 0x28e   : > { %3449 = vst [vmem:[#allocation1 + $0x7] ss:$9 sm:$0xff] %v3309_v39  ;;  %v8130_v39 = vrot.slane %v8105_v31, 6  ;;  %v3313_v6 = vmul.f32 %v7799_v2, %v8123_v0  ;;  %v8159_v16 = vmul.f32 %v6272_v46, %v2122_v4 }
 0x28f   : > { %11398 = vst [vmem:[#allocation51_spill] sm:$0xff] %v8114_v45  ;;  %v8142_v13 = vpop.permute.xlu2 %3868  ;;  %v2043_v45 = vadd.f32 %v7788_v37, %v2042_v38 }
 0x290   : > { %11399 = vst [vmem:[#allocation53_spill] sm:$0xff] %v8117_v10  ;;  %v3315_v10 = vmul.f32 %v7776_v59, %v8136_v27 }
 0x291   : > { %11400 = vst [vmem:[#allocation54_spill] sm:$0xff] %v8120_v56 }
 0x292   : > { %11401 = vst [vmem:[#allocation55_spill] sm:$0xff] %v8123_v0  ;;  %v2044_v38 = vpop.f32.mrf.mxu2  ;;  %v6276_v0 = vunpack.i.l.bf16 %v7946_v14 }
 0x293   : > { %11402 = vst [vmem:[#allocation50_spill] sm:$0xff] %v8130_v39 }
 0x294   : > { %11403 = vst [vmem:[#allocation52_spill] sm:$0xff] %v8136_v27 }
 0x295   : > { %v8140_v12 = vld [vmem:[#allocation1] sm:$0xff]  ;;  %11405 = vst [vmem:[#allocation49_spill] sm:$0xff] %v8150_v52 }
 0x296   : > { %11404 = vst [vmem:[#allocation48_spill] sm:$0xff] %v8140_v12  ;;  %v3314_v12 = vmul.f32 %v7817_v51, %v8130_v39  ;;  %v8164_v39 = vpop.f32.mrf.mxu3 }
 0x297   : > { %3451 = vst [vmem:[#allocation1] ss:$9 sm:$0xff] %v3310_v53  ;;  %v3316_v53 = vmul.f32 %v7824_v28, %v8120_v56  ;;  %v8173_v4 = vpop.permute.xlu2 %3874 }
 0x298   : > { %3452 = vst [vmem:[#allocation1 + $0x1] ss:$9 sm:$0xff] %v3311_v41  ;;  %v2123_v41 = vmax.f32 %v2043_v45, 0.0  ;;  %v8179_v45 = vrot.slane %v8159_v16, 6 }
 0x299   : > { %3453 = vst [vmem:[#allocation1 + $0x2] ss:$9 sm:$0xff] %v3312_v15  ;;  %v8166_v15 = vpop.permute.xlu1 %2486 }
 0x29a   : > { %3454 = vst [vmem:[#allocation1 + $0x3] ss:$9 sm:$0xff] %v3313_v6  ;;  %v8168_v6 = vpop.permute.xlu0 %3537  ;;  %v8171_v46 = vmul.f32 %v6276_v0, %v2123_v41  ;;  %v2047_v52 = vpop.f32.mrf.mxu2  ;;  %v3320_v19 = vmul.f32 %v7802_v60, %v8179_v45 }
 0x29b   : > { %3455 = vst [vmem:[#allocation1 + $0x4] ss:$9 sm:$0xff] %v3314_v12  ;;  %v10855_v12 = vrot.slane %v8159_v16, 4  ;;  %v2048_v55 = vadd.f32 %v7788_v37, %v2047_v52 }
 0x29c   : > { %11406 = vst [vmem:[#allocation58_spill] sm:$0xff] %v8159_v16  ;;  %v8189_v0 = vrot.slane %v8171_v46, 1  ;;  %v3322_v52 = vmul.f32 %v7817_v51, %v8171_v46 }
 0x29d   : > { %3456 = vst [vmem:[#allocation1 + $0x5] ss:$9 sm:$0xff] %v3315_v10  ;;  %v8176_v10 = vrot.slane %v8159_v16, 5 }
 0x29e   : > { %11407 = vst [vmem:[#allocation61_spill] sm:$0xff] %v8164_v39  ;;  %v2045_v39 = vadd.f32 %v7788_v37, %v2044_v38  ;;  %v8197_v38 = vrot.slane %v8171_v46, 2  ;;  %v8204_v30 = vpop.f32.mrf.mxu3 }
 0x29f   : > { %3457 = vst [vmem:[#allocation1 + $0x6] ss:$9 sm:$0xff] %v3316_v53  ;;  %v8183_v53 = vrot.slane %v8159_v16, 7  ;;  %v3319_v41 = vmul.f32 %v7770_v9, %v8176_v10  ;;  %v8222_v7 = vpop.permute.xlu2 %4148 }
 0x2a0   : > { %3458 = vst [vmem:[#allocation1 + $0x7] ss:$9 sm:$0xff] %v3317_v17  ;;  %v3318_v17 = vmul.f32 %v7758_v34, %v10855_v12  ;;  %v2124_v49 = vmax.f32 %v2045_v39, 0.0  ;;  %v6277_v12 = vunpack.i.h.bf16 %v7946_v14  ;;  %v3323_v14 = vmul.f32 %v7776_v59, %v8189_v0 }
 0x2a1   : > { %11408 = vst [vmem:[#allocation62_spill] sm:$0xff] %v8171_v46  ;;  %v3321_v21 = vmul.f32 %v7799_v2, %v8183_v53  ;;  %v2125_v39 = vmax.f32 %v2048_v55, 0.0 }
 0x2a2   : > { %11409 = vst [vmem:[#allocation63_spill] sm:$0xff] %v8176_v10  ;;  %v8207_v10 = vrot.slane %v8171_v46, 3 }
 0x2a3   : > { %11410 = vst [vmem:[#allocation57_spill] sm:$0xff] %v8179_v45  ;;  %v8213_v45 = vpop.permute.xlu0 %2476 }
 0x2a4   : > { %11411 = vst [vmem:[#allocation59_spill] sm:$0xff] %v8183_v53  ;;  %v3324_v53 = vmul.f32 %v7824_v28, %v8197_v38 }
 0x2a5   : > { %11412 = vst [vmem:[#allocation60_spill] sm:$0xff] %v8189_v0 }
 0x2a6   : > { %11414 = vst [vmem:[#allocation65_spill] sm:$0xff] %v8197_v38  ;;  %v8232_v0 = vpop.f32.mrf.mxu3 }
 0x2a7   : > { %v8193_v27 = vld [vmem:[#allocation1] sm:$0xff]  ;;  %11415 = vst [vmem:[#allocation67_spill] sm:$0xff] %v8207_v10 }
 0x2a8   : > { %11413 = vst [vmem:[#allocation56_spill] sm:$0xff] %v8193_v27  ;;  %v8211_v27 = vpop.permute.xlu1 %3866 }
 0x2a9   : > { %3460 = vst [vmem:[#allocation1] ss:$9 sm:$0xff] %v3318_v17  ;;  %v6281_v17 = vunpack.i.l.bf16 %v8098_v33 }
 0x2aa   : > { %3461 = vst [vmem:[#allocation1 + $0x1] ss:$9 sm:$0xff] %v3319_v41  ;;  %v8220_v41 = vmul.f32 %v6277_v12, %v2124_v49 }
 0x2ab   : > { %3462 = vst [vmem:[#allocation1 + $0x2] ss:$9 sm:$0xff] %v3320_v19  ;;  %v3325_v19 = vmul.f32 %v7865_v61, %v8207_v10  ;;  %v8226_v26 = vmul.f32 %v6281_v17, %v2125_v39  ;;  %v2010_v39 = vadd.f32 %v7788_v37, %v7730_v8 }
 0x2ac   : > { %3463 = vst [vmem:[#allocation1 + $0x3] ss:$9 sm:$0xff] %v3321_v21  ;;  %v10875_v21 = vrot.slane %v8220_v41, 6  ;;  %v8230_v55 = vrot.slane %v8220_v41, 7 }
 0x2ad   : > { %3464 = vst [vmem:[#allocation1 + $0x4] ss:$9 sm:$0xff] %v3322_v52  ;;  %v8235_v49 = vrot.slane %v8226_v26, 1  ;;  %v8239_v52 = vpop.permute.xlu0 %3864  ;;  %v8250_v17 = vrot.slane %v8226_v26, 3  ;;  %v8259_v10 = vrot.slane %v8226_v26, 4  ;;  %v8267_v38 = vrot.slane %v8226_v26, 5 }
 0x2ae   : > { %11416 = vst [vmem:[#allocation69_spill] sm:$0xff] %v8220_v41 }
 0x2af   : > { %11417 = vst [vmem:[#allocation71_spill] sm:$0xff] %v8222_v7  ;;  %v3328_v7 = vmul.f32 %v7802_v60, %v8226_v26  ;;  %v3329_v8 = vmul.f32 %v7799_v2, %v8235_v49  ;;  %v2110_v60 = vmax.f32 %v2010_v39, 0.0  ;;  %v3333_v2 = vmul.f32 %v7865_v61, %v8267_v38 }
 0x2b0   : > { %3465 = vst [vmem:[#allocation1 + $0x5] ss:$9 sm:$0xff] %v3323_v14  ;;  %v8237_v12 = vpop.permute.xlu1 %3872  ;;  %v8245_v14 = vrot.slane %v8226_v26, 2 }
 0x2b1   : > { %3466 = vst [vmem:[#allocation1 + $0x6] ss:$9 sm:$0xff] %v3324_v53  ;;  %v3326_v53 = vmul.f32 %v7758_v34, %v10875_v21  ;;  %v8261_v34 = vpop.permute.xlu2 %4154  ;;  %v6282_v21 = vunpack.i.h.bf16 %v8098_v33 }
 0x2b2   : > { %3467 = vst [vmem:[#allocation1 + $0x7] ss:$9 sm:$0xff] %v3325_v19  ;;  %v3327_v19 = vmul.f32 %v7770_v9, %v8230_v55  ;;  %v3330_v9 = vmul.f32 %v7817_v51, %v8245_v14 }
 0x2b3   : > { %11418 = vst [vmem:[#allocation64_spill] sm:$0xff] %v8226_v26  ;;  %v8275_v33 = vmul.f32 %v6282_v21, %v2110_v60 }
 0x2b4   : > { %11419 = vst [vmem:[#allocation66_spill] sm:$0xff] %v8230_v55 }
 0x2b5   : > { %11420 = vst [vmem:[#allocation68_spill] sm:$0xff] %v8232_v0  ;;  %v2714_v39 = vrot.slane %v8275_v33, 2  ;;  %v2716_v21 = vrot.slane %v8275_v33, 4 }
 0x2b6   : > { %11421 = vst [vmem:[#allocation70_spill] sm:$0xff] %v8235_v49 }
 0x2b7   : > { %11422 = vst [vmem:[#allocation79_spill] sm:$0xff] %v8245_v14 }
 0x2b8   : > { %11423 = vst [vmem:[#allocation74_spill] sm:$0xff] %v8250_v17  ;;  %v8281_v51 = vpop.permute.xlu1 %3878 }
 0x2b9   : > { %v8254_v0 = vld [vmem:[#allocation1] sm:$0xff]  ;;  %11425 = vst [vmem:[#allocation78_spill] sm:$0xff] %v8259_v10 }
 0x2ba   : > { %11424 = vst [vmem:[#allocation76_spill] sm:$0xff] %v8254_v0  ;;  %v3331_v0 = vmul.f32 %v7776_v59, %v8250_v17  ;;  %v2713_v59 = vrot.slane %v8275_v33, 1 }
 0x2bb   : > { %11426 = vst [vmem:[#allocation72_spill] sm:$0xff] %v8261_v34 }
 0x2bc   : > { %3469 = vst [vmem:[#allocation1] ss:$9 sm:$0xff] %v3326_v53  ;;  %v3332_v53 = vmul.f32 %v7824_v28, %v8259_v10  ;;  %v8287_v28 = vpop.permute.xlu2 %6284  ;;  %v3551_v61 = vmul.f32 %v8055_v25, %v2713_v59  ;;  %v3554_v59 = vmul.f32 %v8096_v29, %v2716_v21  ;;  %v2718_v10 = vrot.slane %v8275_v33, 6 }
 0x2bd   : > { %11427 = vst [vmem:[#allocation73_spill] sm:$0xff] %v8267_v38  ;;  %v6349_v38 = vld [vmem:[%s10624_s1] sm:$0xff] }
 0x2be   : > { %3470 = vst [vmem:[#allocation1 + $0x1] ss:$9 sm:$0xff] %v3327_v19  ;;  %v8279_v19 = vpop.f32.mrf.mxu3 }
 0x2bf   : > { %3471 = vst [vmem:[#allocation1 + $0x2] ss:$9 sm:$0xff] %v3328_v7  ;;  %v8283_v7 = vpop.permute.xlu0 %3870 }
 0x2c0   : > { %3472 = vst [vmem:[#allocation1 + $0x3] ss:$9 sm:$0xff] %v3329_v8  ;;  %v2717_v8 = vrot.slane %v8275_v33, 5  ;;  %v8315_v21 = vpop.permute.xlu1 %4146 }
 0x2c1   : > { %3473 = vst [vmem:[#allocation1 + $0x4] ss:$9 sm:$0xff] %v3330_v9  ;;  %v3552_v9 = vmul.f32 %v7998_v57, %v2714_v39 }
 0x2c2   : > { %3474 = vst [vmem:[#allocation1 + $0x5] ss:$9 sm:$0xff] %v3331_v0  ;;  %v2715_v0 = vrot.slane %v8275_v33, 3 }
 0x2c3   : > { %3475 = vst [vmem:[#allocation1 + $0x6] ss:$9 sm:$0xff] %v3332_v53  ;;  %v5032_v53 = vrot.slane %v7923_v32, 7 }
 0x2c4   : > { %3476 = vst [vmem:[#allocation1 + $0x7] ss:$9 sm:$0xff] %v3333_v2  ;;  %v5030_v2 = vrot.slane %v7923_v32, 5  ;;  %v3553_v34 = vmul.f32 %v8127_v1, %v2715_v0  ;;  %v3555_v0 = vmul.f32 %v8032_v35, %v2717_v8  ;;  %v3558_v8 = vmul.f32 %v8058_v36, %v7868_v44 }
 0x2c5   : > { %11428 = vst [vmem:[#allocation75_spill] sm:$0xff] %v8287_v28  ;;  %v8302_v28 = vperm.slane %v6349_v38, 7  ;;  %5047 = vrot.lane.b32.xlu2 %v5032_v53, %s6468_s22  ;;  %v3556_v38 = vmul.f32 %v8168_v6, %v2718_v10  ;;  %v8320_v53 = vpop.permute.xlu2 %6289  ;;  %v2413_v10 = vunpack.c.l.bf16 %v7600_v24  ;;  %v10897_v44 = vrot.slane %v7888_v50, 7 }
 0x2c6   : > { %v8306_v39 = vpop.f32.mrf.mxu3  ;;  %5043 = vrot.lane.b32.xlu0 %v5030_v2, %s6468_s22  ;;  %11431 = vst [vmem:[#allocation87_spill] sm:$0xff] %v8315_v21 }
 0x2c7   : > { %11430 = vst [vmem:[#allocation86_spill] sm:$0xff] %v8302_v28  ;;  %5306 = vrot.lane.b32.xlu1 %v8302_v28, %s6468_s22  ;;  %v5301_v2 = vrot.slane %v8302_v28, 3  ;;  %v5302_v17 = vrot.slane %v8302_v28, 4  ;;  %v5303_v55 = vrot.slane %v8302_v28, 5 }
 0x2c8   : > { %11432 = vst [vmem:[#allocation83_spill] sm:$0xff] %v8320_v53 }
 0x2cb   : > { %v8294_v60 = vld [vmem:[#allocation1] sm:$0xff] }
 0x2cc   : > { %11429 = vst [vmem:[#allocation77_spill] sm:$0xff] %v8294_v60  ;;  %v10896_v60 = vrot.slane %v7888_v50, 5 }
 0x2cd   : > { %3679 = vst [vmem:[#allocation1] ss:$9 sm:$0xff] %v3551_v61  ;;  %v2719_v61 = vrot.slane %v8275_v33, 7 }
 0x2ce   : > { %3681 = vst [vmem:[#allocation1 + $0x1] ss:$9 sm:$0xff] %v3552_v9  ;;  %v8317_v9 = vpop.permute.xlu0 %3876  ;;  %2526 = vperm.xlu0 %6245, %v2413_v10   ;;  %v10898_v10 = vrot.slane %v7888_v50, 6  ;;  %v3561_v53 = vmul.f32 %v8127_v1, %v10896_v60  ;;  %v10901_v60 = vrot.slane %v7937_v18, 2 }
 0x2cf   : > { %3683 = vst [vmem:[#allocation1 + $0x2] ss:$9 sm:$0xff] %v3553_v34  ;;  %v3557_v32 = vmul.f32 %v8125_v3, %v2719_v61  ;;  %v5299_v34 = vrot.slane %v8302_v28, 1  ;;  %5312 = vrot.lane.b32.xlu1 %v5301_v2, %s6468_s22  ;;  %v8332_v61 = vpop.permute.xlu1 %4152 }
 0x2d0   : > { %3685 = vst [vmem:[#allocation1 + $0x3] ss:$9 sm:$0xff] %v3554_v59  ;;  %v8327_v59 = vpop.f32.mrf.mxu3  ;;  %v3562_v14 = vmul.f32 %v8096_v29, %v10898_v10 }
 0x2d1   : > { %3687 = vst [vmem:[#allocation1 + $0x4] ss:$9 sm:$0xff] %v3555_v0  ;;  %5308 = vrot.lane.b32.xlu2 %v5299_v34, %s6468_s22  ;;  %v10890_v0 = vrot.slane %v7888_v50, 3 }
 0x2d2   : > { %3689 = vst [vmem:[#allocation1 + $0x5] ss:$9 sm:$0xff] %v3556_v38 }
 0x2d3   : > { %3691 = vst [vmem:[#allocation1 + $0x6] ss:$9 sm:$0xff] %v3557_v32  ;;  %v10893_v32 = vrot.slane %v7888_v50, 4  ;;  %v3559_v24 = vmul.f32 %v8055_v25, %v10890_v0  ;;  %v5300_v0 = vrot.slane %v8302_v28, 2  ;;  %v10921_v50 = vrot.slane %v7996_v58, 1 }
 0x2d4   : > { %3693 = vst [vmem:[#allocation1 + $0x7] ss:$9 sm:$0xff] %v3558_v8  ;;  %v8337_v8 = vpop.permute.xlu2 %6304 }
 0x2d5   : > { %11433 = vst [vmem:[#allocation85_spill] sm:$0xff] %v8332_v61  ;;  %v3560_v34 = vmul.f32 %v7998_v57, %v10893_v32  ;;  %v3563_v32 = vmul.f32 %v8032_v35, %v10897_v44 }
 0x2d6   : > { %v8334_v38 = vpop.permute.xlu0 %4144  ;;  %11435 = vst [vmem:[#allocation81_spill] sm:$0xff] %v8337_v8  ;;  %5310 = vrot.lane.b32.xlu0 %v5300_v0, %s6468_s22  ;;  %v3566_v0 = vmul.f32 %v8058_v36, %v10901_v60 }
 0x2d7   : > { %11434 = vst [vmem:[#allocation80_spill] sm:$0xff] %v8334_v38 }
 0x2d8   : > { %v8362_v49 = vpop.f32.mrf.mxu3 }
 0x2d9   : > { %5314 = vrot.lane.b32.xlu2 %v5302_v17, %s6468_s22 }
 0x2db   : > { %v8347_v2 = vld [vmem:[#allocation1] sm:$0xff] }
 0x2dc   : > { %11436 = vst [vmem:[#allocation82_spill] sm:$0xff] %v8347_v2  ;;  %v10902_v2 = vrot.slane %v7937_v18, 1  ;;  %v8381_v10 = vpop.permute.xlu2 %4424 }
 0x2dd   : > { %3695 = vst [vmem:[#allocation1] ss:$9 sm:$0xff] %v3559_v24  ;;  %v5304_v24 = vrot.slane %v8302_v28, 6 }
 0x2de   : > { %3696 = vst [vmem:[#allocation1 + $0x1] ss:$9 sm:$0xff] %v3560_v34  ;;  %v3564_v34 = vmul.f32 %v8168_v6, %v7937_v18  ;;  %v3565_v44 = vmul.f32 %v8125_v3, %v10902_v2  ;;  %v8376_v17 = vpop.permute.xlu0 %4150  ;;  %5316 = vrot.lane.b32.xlu0 %v5303_v55, %s6468_s22 }
 0x2df   : > { %3697 = vst [vmem:[#allocation1 + $0x2] ss:$9 sm:$0xff] %v3561_v53  ;;  %5318 = vrot.lane.b32.xlu1 %v5304_v24, %s6468_s22  ;;  %v8374_v53 = vpop.permute.xlu1 %4158 }
 0x2e0   : > { %3698 = vst [vmem:[#allocation1 + $0x3] ss:$9 sm:$0xff] %v3562_v14  ;;  %v5305_v14 = vrot.slane %v8302_v28, 7  ;;  %v8390_v24 = vpop.f32.mrf.mxu3  ;;  %v10920_v28 = vrot.slane %v7944_v22, 7 }
 0x2e1   : > { %3699 = vst [vmem:[#allocation1 + $0x4] ss:$9 sm:$0xff] %v3563_v32  ;;  %v8388_v32 = vld [vmem:[%s10624_s1 + $0x8] ss:$0 sm:$0xff] }
 0x2e2   : > { %3700 = vst [vmem:[#allocation1 + $0x5] ss:$9 sm:$0xff] %v3564_v34  ;;  %5320 = vrot.lane.b32.xlu2 %v5305_v14, %s6468_s22  ;;  %v10912_v34 = vrot.slane %v7944_v22, 5 }
 0x2e3   : > { %11437 = vst [vmem:[#allocation84_spill] sm:$0xff] %v8381_v10  ;;  %v5628_v10 = vrot.slane %v8388_v32, 1 }
 0x2e4   : > { %3701 = vst [vmem:[#allocation1 + $0x6] ss:$9 sm:$0xff] %v3565_v44  ;;  %v10917_v44 = vrot.slane %v7944_v22, 6  ;;  %v3567_v2 = vmul.f32 %v8055_v25, %v10912_v34  ;;  %v8406_v14 = vpop.permute.xlu2 %4430  ;;  %v3569_v34 = vmul.f32 %v8127_v1, %v10920_v28  ;;  %v2028_v22 = vadd.f32 %v7788_v37, %v7931_v48 }
 0x2e5   : > { %3702 = vst [vmem:[#allocation1 + $0x7] ss:$9 sm:$0xff] %v3566_v0  ;;  %v3572_v28 = vmul.f32 %v8168_v6, %v10922_v54 }
 0x2e6   : > { %v8400_v0 = vpop.permute.xlu0 %4156  ;;  %v3568_v55 = vmul.f32 %v7998_v57, %v10917_v44  ;;  %v5630_v44 = vrot.slane %v8388_v32, 3  ;;  %2531 = vperm.xlu0 %6245, %v2414_v62  }
 0x2e7   : > { %5635 = vrot.lane.b32.xlu1 %v8388_v32, %s6468_s22  ;;  %v8398_v60 = vpop.permute.xlu1 %6299 }
 0x2e8   : > { %11438 = vst [vmem:[#allocation93_spill] sm:$0xff] %v8398_v60 }
 0x2ea   : > { %5637 = vrot.lane.b32.xlu2 %v5628_v10, %s6468_s22 }
 0x2ec   : > { %v8411_v18 = vld [vmem:[#allocation1] sm:$0xff]  ;;  %v8446_v10 = vpop.permute.xlu2 %4436 }
 0x2ed   : > { %11439 = vst [vmem:[#allocation94_spill] sm:$0xff] %v8411_v18  ;;  %v3571_v18 = vmul.f32 %v8032_v35, %v10921_v50  ;;  %v3573_v50 = vmul.f32 %v8125_v3, %v10923_v40 }
 0x2ee   : > { %3704 = vst [vmem:[#allocation1] ss:$9 sm:$0xff] %v3567_v2  ;;  %v10926_v2 = vrot.slane %v7996_v58, 4  ;;  %v8442_v54 = vpop.permute.xlu0 %6294  ;;  %v5629_v58 = vrot.slane %v8388_v32, 2 }
 0x2ef   : > { %3705 = vst [vmem:[#allocation1 + $0x1] ss:$9 sm:$0xff] %v3568_v55  ;;  %v2097_v55 = vpop.f32.mrf.mxu3  ;;  %5641 = vrot.lane.b32.xlu1 %v5630_v44, %s6468_s22 }
 0x2f0   : > { %3706 = vst [vmem:[#allocation1 + $0x2] ss:$9 sm:$0xff] %v3569_v34  ;;  %v2098_v34 = vadd.f32 %v7788_v37, %v2097_v55  ;;  %v3574_v48 = vmul.f32 %v8058_v36, %v10926_v2  ;;  %v5631_v55 = vrot.slane %v8388_v32, 4  ;;  %5639 = vrot.lane.b32.xlu0 %v5629_v58, %s6468_s22 }
 0x2f1   : > { %3707 = vst [vmem:[#allocation1 + $0x3] ss:$9 sm:$0xff] %v3570_v42  ;;  %v8444_v42 = vpop.permute.xlu1 %6314 }
 0x2f2   : > { %3708 = vst [vmem:[#allocation1 + $0x4] ss:$9 sm:$0xff] %v3571_v18  ;;  %v2145_v62 = vmax.f32 %v2098_v34, 0.0  ;;  %v6317_v40 = vunpack.i.h.bf16 %v8444_v42  ;;  %v2117_v18 = vmax.f32 %v2028_v22, 0.0  ;;  %v5633_v34 = vrot.slane %v8388_v32, 6  ;;  %5643 = vrot.lane.b32.xlu2 %v5631_v55, %s6468_s22 }
 0x2f3   : > { %3709 = vst [vmem:[#allocation1 + $0x5] ss:$9 sm:$0xff] %v3572_v28  ;;  %v2090_v28 = vadd.f32 %v7788_v37, %v8327_v59  ;;  %v2080_v22 = vadd.f32 %v7788_v37, %v8204_v30 }
 0x2f4   : > { %11440 = vst [vmem:[#allocation95_spill] sm:$0xff] %v8442_v54  ;;  %v8453_v44 = vmul.f32 %v6317_v40, %v2145_v62  ;;  %v8456_v2 = vmul.f32 %v8213_v45, %v2117_v18  ;;  %v10933_v45 = vrot.slane %v8003_v20, 7  ;;  %v8485_v54 = vpop.permute.xlu2 %2576  ;;  %v5632_v20 = vrot.slane %v8388_v32, 5 }
 0x2f5   : > { %3710 = vst [vmem:[#allocation1 + $0x6] ss:$9 sm:$0xff] %v3573_v50  ;;  %v2085_v50 = vadd.f32 %v7788_v37, %v8279_v19  ;;  %v2142_v40 = vmax.f32 %v2090_v28, 0.0  ;;  %v6307_v37 = vunpack.i.h.bf16 %v8337_v8  ;;  %v2138_v55 = vmax.f32 %v2080_v22, 0.0  ;;  %v8499_v22 = vld [vmem:[%s10628_s5] ss:$0 sm:$0xff] }
 0x2f6   : > { %3711 = vst [vmem:[#allocation1 + $0x7] ss:$9 sm:$0xff] %v3574_v48  ;;  %v8465_v48 = vmul.f32 %v8334_v38, %v8453_v44  ;;  %v2942_v19 = vrot.slane %v8453_v44, 1  ;;  %v3576_v62 = vmul.f32 %v7998_v57, %v8456_v2  ;;  %v6310_v30 = vpop.permute.xlu0 %6309  ;;  %v3575_v58 = vmul.f32 %v8055_v25, %v10933_v45 }
 0x2f7   : > { %11441 = vst [vmem:[#allocation92_spill] sm:$0xff] %v8456_v2  ;;  %v8469_v59 = vpop.f32.mrf.mxu3  ;;  %v2140_v18 = vmax.f32 %v2085_v50, 0.0  ;;  %5647 = vrot.lane.b32.xlu1 %v5633_v34, %s6468_s22  ;;  %v6302_v28 = vunpack.i.h.bf16 %v8398_v60  ;;  %v6312_v23 = vunpack.i.h.bf16 %v6310_v30  ;;  %v5634_v50 = vrot.slane %v8388_v32, 7 }
 0x2f8   : > { %11442 = vst [vmem:[#allocation88_spill] sm:$0xff] %v8465_v48  ;;  %v8489_v34 = vmul.f32 %v8315_v21, %v2942_v19  ;;  %5645 = vrot.lane.b32.xlu0 %v5632_v20, %s6468_s22 }
 0x2f9   : > { %11443 = vst [vmem:[#allocation89_spill] sm:$0xff] %v8469_v59  ;;  %v8477_v48 = vpop.permute.xlu1 %4428  ;;  %v8491_v8 = vmul.f32 %v6312_v23, %v2142_v40  ;;  %v8494_v45 = vmul.f32 %v6307_v37, %v2140_v18 }
 0x2fa   : > { %11445 = vst [vmem:[#allocation91_spill] sm:$0xff] %v8485_v54  ;;  %5649 = vrot.lane.b32.xlu2 %v5634_v50, %s6468_s22  ;;  %s6197_s22 = sshll.u32 %s6534_s28, 6 }
 0x2fb   : > { %11446 = vst [vmem:[#allocation100_spill] sm:$0xff] %v8489_v34  ;;  %v2925_v54 = vrot.slane %v8491_v8, 3  ;;  %v8509_v23 = vmul.f32 %v8406_v14, %v8491_v8  ;;  %v2924_v60 = vrot.slane %v8491_v8, 2  ;;  %s6005_s8 = scalar_lea.hbm %s10630_s7, %s6197_s22 }
 0x2fc   : > { %v8526_v34 = vpop.permute.xlu2 %4760  ;;  %s6008_s13 = sshll.u32 %s6005_s8, 4  ;;  %s6009_s13 = int_to_ptr.hbm [resolvable:$true] %s6008_s13 }
 0x2fd   : > { %v8482_v59 = vld [vmem:[#allocation1] sm:$0xff]  ;;  %11447 = vst [vmem:[#allocation101_spill] sm:$0xff] %v8509_v23  ;;  %v8516_v18 = vmul.f32 %v8446_v10, %v2925_v54  ;;  %v6316_v23 = vunpack.i.l.bf16 %v8444_v42  ;;  %s6418_s28 = sshra.s32 %s6009_s13, 4  ;;  %s6419_s28 = int_to_ptr.hbm [resolvable:$true] %s6418_s28 }
 0x2fe   : > { %11444 = vst [vmem:[#allocation90_spill] sm:$0xff] %v8482_v59  ;;  %v8503_v59 = vmul.f32 %v6302_v28, %v2138_v55  ;;  %v8520_v37 = vpop.permute.xlu0 %4426  ;;  %s6420_s15 = scalar_lea.hbm %s6419_s28, 64  ;;  %p6425_p0 = scmp.lt.s32.totalorder %s6419_s28, %s10630_s7 }
 0x2ff   : > { %3714 = vst [vmem:[#allocation1 + $0x1] ss:$9 sm:$0xff] %v3576_v62  ;;  %v2093_v62 = vadd.f32 %v8499_v22, %v8362_v49  ;;  %v2102_v32 = vpop.f32.mrf.mxu3  ;;  %v2928_v49 = vrot.slane %v8491_v8, 7  ;;  %p6421_p11 = scmp.ne.s32.totalorder %s6419_s28, %s6420_s15  ;;  %p6426_p1 = scmp.lt.s32.totalorder %s6424_s18, %s6420_s15 }
 0x300   : > { %3713 = vst [vmem:[#allocation1] ss:$9 sm:$0xff] %v3575_v58  ;;  %v2927_v58 = vrot.slane %v8491_v8, 6  ;;  %v10935_v50 = vrot.slane %v8503_v59, 3 }
 0x301   : > { %11449 = vst [vmem:[#allocation103_spill] sm:$0xff] %v8516_v18  ;;  %v8522_v55 = vpop.permute.xlu1 %4434  ;;  %v2143_v28 = vmax.f32 %v2093_v62, 0.0  ;;  %v8530_v54 = vmul.f32 %v8315_v21, %v2928_v49  ;;  %v8543_v42 = vmul.f32 %v8526_v34, %v2928_v49  ;;  %v8546_v18 = vmul.f32 %v8526_v34, %v2942_v19  ;;  %p6422_p12 = pnand %p6421_p11, %p6551_p5  ;;  %p6427_p2 = por %p6426_p1, %p6425_p0 }
 0x302   : > { %v8513_v40 = vmul.f32 %v8334_v38, %v2927_v58  ;;  %11450 = vst [vmem:[#allocation96_spill] sm:$0xff] %v8526_v34  ;;  %v10938_v58 = vrot.slane %v8494_v45, 5  ;;  %v8535_v20 = vmul.f32 %v8526_v34, %v10935_v50  ;;  %v2945_v50 = vrot.slane %v8453_v44, 4 }
 0x303   : > { %11451 = vst [vmem:[#allocation97_spill] sm:$0xff] %v8530_v54  ;;  %v8550_v54 = vmul.f32 %v6316_v23, %v2143_v28  ;;  %v8555_v21 = vmul.f32 %v8522_v55, %v2924_v60  ;;  %p6423_p13 = pneg %p6422_p12 }
 0x304   : > { %11448 = vst [vmem:[#allocation102_spill] sm:$0xff] %v8513_v40  ;;  %v8540_v62 = vmul.f32 %v8526_v34, %v10938_v58  ;;  %v2088_v40 = vadd.f32 %v8499_v22, %v8306_v39  ;;  %v8558_v58 = vmul.f32 %v8332_v61, %v2945_v50  ;;  %v10941_v39 = vrot.slane %v8503_v59, 6  ;;  %v8565_v23 = vpop.permute.xlu2 %4766 }
 0x305   : > { %11452 = vst [vmem:[#allocation98_spill] sm:$0xff] %v8535_v20  ;;  %v10946_v28 = vrot.slane %v8550_v54, 2  ;;  %p6428_p3 = pnand %p6427_p2, %p6423_p13 }
 0x306   : > { %11453 = vst [vmem:[#allocation99_spill] sm:$0xff] %v8540_v62  ;;  %v8560_v49 = vpop.permute.xlu0 %4432  ;;  %v8572_v60 = vmul.f32 %v8565_v23, %v10941_v39 }
 0x307   : > { %11454 = vst [vmem:[#allocation108_spill] sm:$0xff] %v8543_v42  ;;  %v2104_v20 = vpop.f32.mrf.mxu3  ;;  %v6311_v42 = vunpack.i.l.bf16 %v6310_v30  ;;  %v8577_v62 = vmul.f32 %v8565_v23, %v10946_v28  ;;  %v8580_v30 = vmul.f32 %v8565_v23, %v2945_v50  ;;  %v10950_v50 = vrot.slane %v8550_v54, 5 }
 0x308   : > { %11455 = vst [vmem:[#allocation109_spill] sm:$0xff] %v8546_v18  ;;  %v2141_v18 = vmax.f32 %v2088_v40, 0.0  ;;  %v2923_v20 = vrot.slane %v8491_v8, 1 }
 0x309   : > { %11456 = vst [vmem:[#allocation110_spill] sm:$0xff] %v8555_v21  ;;  %v8562_v19 = vpop.permute.xlu1 %2566  ;;  %v2103_v21 = vadd.f32 %v8499_v22, %v2102_v32 }
 0x30a   : > { %11457 = vst [vmem:[#allocation104_spill] sm:$0xff] %v8558_v58  ;;  %v8583_v40 = vmul.f32 %v8560_v49, %v2923_v20  ;;  %v8585_v34 = vmul.f32 %v6311_v42, %v2141_v18  ;;  %v2095_v42 = vadd.f32 %v8499_v22, %v8390_v24  ;;  %v10954_v24 = vrot.slane %v8503_v59, 5 }
 0x30b   : > { %11458 = vst [vmem:[#allocation105_spill] sm:$0xff] %v8562_v19  ;;  %v2948_v19 = vrot.slane %v8453_v44, 7  ;;  %v2147_v61 = vmax.f32 %v2103_v21, 0.0 }
 0x30c   : > { %11459 = vst [vmem:[#allocation106_spill] sm:$0xff] %v8565_v23  ;;  %v8591_v38 = vpop.permute.xlu2 %4772  ;;  %v10947_v28 = vrot.slane %v8585_v34, 3 }
 0x30d   : > { %11460 = vst [vmem:[#allocation107_spill] sm:$0xff] %v8572_v60  ;;  %v8596_v20 = vmul.f32 %v8374_v53, %v2948_v19  ;;  %v8606_v18 = vmul.f32 %v8591_v38, %v10950_v50  ;;  %v8609_v21 = vmul.f32 %v8591_v38, %v2948_v19  ;;  %v2144_v50 = vmax.f32 %v2095_v42, 0.0 }
 0x30e   : > { %11461 = vst [vmem:[#allocation115_spill] sm:$0xff] %v8577_v62  ;;  %v8589_v39 = vpop.permute.xlu0 %4438  ;;  %v8601_v32 = vmul.f32 %v8591_v38, %v10947_v28  ;;  %v2944_v28 = vrot.slane %v8453_v44, 3 }
 0x30f   : > { %11462 = vst [vmem:[#allocation116_spill] sm:$0xff] %v8580_v30  ;;  %v2106_v58 = vpop.f32.mrf.mxu3 }
 0x310   : > { %11463 = vst [vmem:[#allocation117_spill] sm:$0xff] %v8583_v40  ;;  %v2926_v58 = vrot.slane %v8491_v8, 4  ;;  %v8624_v19 = vmul.f32 %v8376_v17, %v2944_v28 }
 0x311   : > { %v2627_v60 = vpop.permute.xlu1 %2626  ;;  %11464 = vst [vmem:[#allocation118_spill] sm:$0xff] %v8591_v38 }
 0x312   : > { %11465 = vst [vmem:[#allocation114_spill] sm:$0xff] %v8601_v32  ;;  %v8615_v30 = vmul.f32 %v8589_v39, %v2926_v58  ;;  %v2667_v62 = vmul.f32 %v2627_v60, %v2147_v61 }
 0x313   : > { %11466 = vst [vmem:[#allocation111_spill] sm:$0xff] %v8606_v18 }
 0x314   : > { %11467 = vst [vmem:[#allocation112_spill] sm:$0xff] %v8609_v21  ;;  %v8619_v23 = vmul.f32 %v8589_v39, %v2667_v62 }
 0x315   : > { %11468 = vst [vmem:[#allocation113_spill] sm:$0xff] %v8615_v30 }
 0x316   : > { %11469 = vst [vmem:[#allocation119_spill] sm:$0xff] %v8619_v23  ;;  %v8621_v18 = vpop.permute.xlu0 %6319 }
 0x317   : > { %v2107_v32 = vpop.f32.mrf.mxu3  ;;  %11470 = vst [vmem:[#allocation120_spill] sm:$0xff] %v8621_v18  ;;  %v6321_v8 = vunpack.i.l.bf16 %v8621_v18 }
 0x319   : > { %v8627_v21 = vpop.permute.xlu1 %4764  ;;  %v2664_v58 = vmul.f32 %v6321_v8, %v2144_v50 }
 0x31a   : > { %11471 = vst [vmem:[#allocation121_spill] sm:$0xff] %v8627_v21  ;;  %v8633_v61 = vmul.f32 %v8627_v21, %v10954_v24  ;;  %v10955_v24 = vrot.slane %v8550_v54, 1 }
 0x31b   : > { %v2936_v62 = vrot.slane %v2664_v58, 1  ;;  %v2937_v60 = vrot.slane %v2664_v58, 2  ;;  %v2938_v32 = vrot.slane %v2664_v58, 3  ;;  %v2939_v42 = vrot.slane %v2664_v58, 4 }
 0x31c   : > { %11472 = vst [vmem:[#allocation122_spill] sm:$0xff] %v8633_v61  ;;  %v2940_v38 = vrot.slane %v2664_v58, 5  ;;  %v2941_v23 = vrot.slane %v2664_v58, 6  ;;  %v8636_v30 = vmul.f32 %v8520_v37, %v2664_v58 }
 0x31d   : > { %v8639_v18 = vmul.f32 %v8477_v48, %v2936_v62  ;;  %v8642_v40 = vmul.f32 %v8406_v14, %v2937_v60  ;;  %v8645_v50 = vmul.f32 %v8560_v49, %v2938_v32  ;;  %v8648_v8 = vmul.f32 %v8522_v55, %v2939_v42 }
 0x31e   : > { %v8652_v61 = vmul.f32 %v8446_v10, %v2940_v38  ;;  %v8655_v58 = vmul.f32 %v8589_v39, %v2941_v23  ;;  %v8660_v62 = vmul.f32 %v8627_v21, %v10955_v24  ;;  %v8663_v60 = vmul.f32 %v8627_v21, %v2944_v28  ;;  %v8665_v32 = vpop.permute.xlu0 %4762 }
 0x31f   : > { %11473 = vst [vmem:[#allocation123_spill] sm:$0xff] %v8645_v50  ;;  %v10958_v42 = vrot.slane %v8503_v59, 4  ;;  %v10960_v38 = vrot.slane %v8453_v44, 2  ;;  %v10963_v21 = vrot.slane %v8585_v34, 2 }
 0x320   : > { %11474 = vst [vmem:[#allocation124_spill] sm:$0xff] %v8648_v8  ;;  %v10959_v8 = vrot.slane %v8494_v45, 6 }
 0x321   : > { %11475 = vst [vmem:[#allocation125_spill] sm:$0xff] %v8652_v61  ;;  %v8673_v23 = vmul.f32 %v8665_v32, %v10958_v42  ;;  %v8683_v28 = vmul.f32 %v8665_v32, %v10960_v38  ;;  %v2033_v61 = vadd.f32 %v8499_v22, %v8005_v47 }
 0x322   : > { %11476 = vst [vmem:[#allocation126_spill] sm:$0xff] %v8655_v58  ;;  %v8678_v24 = vmul.f32 %v8665_v32, %v10959_v8  ;;  %v10964_v58 = vrot.slane %v8550_v54, 4 }
 0x323   : > { %11477 = vst [vmem:[#allocation127_spill] sm:$0xff] %v8660_v62  ;;  %v8686_v62 = vpop.permute.xlu1 %4770  ;;  %v2119_v47 = vmax.f32 %v2033_v61, 0.0 }
 0x324   : > { %11478 = vst [vmem:[#allocation128_spill] sm:$0xff] %v8663_v60  ;;  %v2947_v60 = vrot.slane %v8453_v44, 6  ;;  %v8696_v8 = vmul.f32 %v8686_v62, %v10963_v21  ;;  %v8701_v38 = vmul.f32 %v8686_v62, %v10964_v58  ;;  %v10969_v21 = vrot.slane %v8456_v2, 4 }
 0x325   : > { %11479 = vst [vmem:[#allocation129_spill] sm:$0xff] %v8665_v32  ;;  %v10979_v32 = vrot.slane %v8456_v2, 3 }
 0x326   : > { %11480 = vst [vmem:[#allocation130_spill] sm:$0xff] %v8673_v23  ;;  %v8691_v42 = vmul.f32 %v8400_v0, %v2947_v60  ;;  %v10968_v23 = vrot.slane %v8456_v2, 2 }
 0x327   : > { %11481 = vst [vmem:[#allocation131_spill] sm:$0xff] %v8678_v24  ;;  %v10967_v24 = vrot.slane %v8456_v2, 1 }
 0x328   : > { %11482 = vst [vmem:[#allocation132_spill] sm:$0xff] %v8683_v28  ;;  %v8704_v28 = vmul.f32 %v8686_v62, %v2947_v60  ;;  %v8730_v60 = vmul.f32 %v8166_v15, %v2119_v47 }
 0x329   : > { %11483 = vst [vmem:[#allocation133_spill] sm:$0xff] %v8686_v62  ;;  %v3577_v58 = vmul.f32 %v8127_v1, %v10967_v24  ;;  %v11487_v62 = vrot.slane %v8456_v2, 5 }
 0x32a   : > { %11484 = vst [vmem:[#allocation134_spill] sm:$0xff] %v8696_v8  ;;  %v3580_v8 = vmul.f32 %v8168_v6, %v10969_v21  ;;  %v10970_v61 = vrot.slane %v8730_v60, 1  ;;  %v10977_v21 = vrot.slane %v8730_v60, 4 }
 0x32b   : > { %11485 = vst [vmem:[#allocation135_spill] sm:$0xff] %v8701_v38  ;;  %v3579_v38 = vmul.f32 %v8032_v35, %v10979_v32  ;;  %v3581_v24 = vmul.f32 %v8125_v3, %v11487_v62  ;;  %v10973_v62 = vrot.slane %v8730_v60, 5  ;;  %v3596_v32 = vmul.f32 %v8168_v6, %v8159_v16 }
 0x32c   : > { %11486 = vst [vmem:[#allocation136_spill] sm:$0xff] %v8704_v28  ;;  %v3578_v28 = vmul.f32 %v8096_v29, %v10968_v23  ;;  %v11489_v23 = vrot.slane %v8456_v2, 6  ;;  %v3583_v15 = vmul.f32 %v8055_v25, %v10970_v61  ;;  %v3586_v47 = vmul.f32 %v8096_v29, %v10977_v21 }
 0x32d   : > { %3715 = vst [vmem:[#allocation1 + $0x2] ss:$9 sm:$0xff] %v3577_v58  ;;  %v10971_v58 = vrot.slane %v8730_v60, 2  ;;  %v3587_v61 = vmul.f32 %v8032_v35, %v10973_v62  ;;  %v10980_v62 = vrot.slane %v8120_v56, 7  ;;  %v10982_v21 = vrot.slane %v8159_v16, 1 }
 0x32e   : > { %3716 = vst [vmem:[#allocation1 + $0x3] ss:$9 sm:$0xff] %v3578_v28  ;;  %v3582_v50 = vmul.f32 %v8058_v36, %v11489_v23  ;;  %v10972_v28 = vrot.slane %v8730_v60, 3 }
 0x32f   : > { %3717 = vst [vmem:[#allocation1 + $0x4] ss:$9 sm:$0xff] %v3579_v38  ;;  %v10974_v38 = vrot.slane %v8730_v60, 6 }
 0x330   : > { %11488 = vst [vmem:[#allocation137_spill] sm:$0xff] %v8730_v60  ;;  %v3585_v23 = vmul.f32 %v8127_v1, %v10972_v28 }
 0x331   : > { %3718 = vst [vmem:[#allocation1 + $0x5] ss:$9 sm:$0xff] %v3580_v8  ;;  %v10975_v8 = vrot.slane %v8730_v60, 7 }
 0x332   : > { %3719 = vst [vmem:[#allocation1 + $0x6] ss:$9 sm:$0xff] %v3581_v24  ;;  %v3584_v24 = vmul.f32 %v7998_v57, %v10971_v58  ;;  %v3588_v58 = vmul.f32 %v8168_v6, %v10974_v38  ;;  %v10984_v38 = vrot.slane %v8120_v56, 5 }
 0x333   : > { %3720 = vst [vmem:[#allocation1 + $0x7] ss:$9 sm:$0xff] %v3582_v50  ;;  %v3589_v28 = vmul.f32 %v8125_v3, %v10975_v8 }
 0x33a   : > { %v8747_v50 = vld [vmem:[#allocation1] sm:$0xff] }
 0x33b   : > { %11490 = vst [vmem:[#allocation138_spill] sm:$0xff] %v8747_v50  ;;  %v11519_v50 = vld [vmem:[#allocation26_spill] sm:$0xff] }
 0x33c   : > { %3722 = vst [vmem:[#allocation1] ss:$9 sm:$0xff] %v3583_v15  ;;  %v3590_v15 = vmul.f32 %v8058_v36, %v8105_v31 }
 0x33d   : > { %3723 = vst [vmem:[#allocation1 + $0x1] ss:$9 sm:$0xff] %v3584_v24  ;;  %v10978_v24 = vrot.slane %v8120_v56, 4 }
 0x33e   : > { %3724 = vst [vmem:[#allocation1 + $0x2] ss:$9 sm:$0xff] %v3585_v23  ;;  %v10976_v23 = vrot.slane %v8120_v56, 3 }
 0x33f   : > { %3725 = vst [vmem:[#allocation1 + $0x3] ss:$9 sm:$0xff] %v3586_v47 }
 0x340   : > { %3726 = vst [vmem:[#allocation1 + $0x4] ss:$9 sm:$0xff] %v3587_v61  ;;  %v3591_v47 = vmul.f32 %v8055_v25, %v10976_v23  ;;  %v10981_v61 = vrot.slane %v8120_v56, 6  ;;  %v3595_v23 = vmul.f32 %v8032_v35, %v10980_v62  ;;  %v10986_v62 = vrot.slane %v8171_v46, 6 }
 0x341   : > { %3727 = vst [vmem:[#allocation1 + $0x5] ss:$9 sm:$0xff] %v3588_v58  ;;  %v3592_v58 = vmul.f32 %v7998_v57, %v10978_v24  ;;  %v10983_v24 = vrot.slane %v8159_v16, 2  ;;  %v11525_v16 = vld [vmem:[#allocation33_spill] sm:$0xff] }
 0x342   : > { %3728 = vst [vmem:[#allocation1 + $0x6] ss:$9 sm:$0xff] %v3589_v28  ;;  %v3594_v8 = vmul.f32 %v8096_v29, %v10981_v61  ;;  %v10988_v61 = vrot.slane %v8220_v41, 2 }
 0x343   : > { %3729 = vst [vmem:[#allocation1 + $0x7] ss:$9 sm:$0xff] %v3590_v15  ;;  %v3593_v15 = vmul.f32 %v8127_v1, %v10984_v38  ;;  %v10989_v38 = vrot.slane %v8220_v41, 4 }
 0x34a   : > { %v8778_v28 = vld [vmem:[#allocation1] sm:$0xff] }
 0x34b   : > { %11491 = vst [vmem:[#allocation139_spill] sm:$0xff] %v8778_v28 }
 0x34c   : > { %3731 = vst [vmem:[#allocation1] ss:$9 sm:$0xff] %v3591_v47  ;;  %v3597_v47 = vmul.f32 %v8125_v3, %v10982_v21  ;;  %v10987_v21 = vrot.slane %v8171_v46, 7 }
 0x34d   : > { %3732 = vst [vmem:[#allocation1 + $0x1] ss:$9 sm:$0xff] %v3592_v58  ;;  %v3598_v58 = vmul.f32 %v8058_v36, %v10983_v24  ;;  %v2049_v24 = vpop.f32.mrf.mxu2 }
 0x34e   : > { %3733 = vst [vmem:[#allocation1 + $0x2] ss:$9 sm:$0xff] %v3593_v15  ;;  %v10985_v15 = vrot.slane %v8171_v46, 5 }
 0x34f   : > { %3734 = vst [vmem:[#allocation1 + $0x3] ss:$9 sm:$0xff] %v3594_v8 }
 0x350   : > { %3735 = vst [vmem:[#allocation1 + $0x4] ss:$9 sm:$0xff] %v3595_v23  ;;  %v3599_v8 = vmul.f32 %v8055_v25, %v10985_v15  ;;  %v3600_v23 = vmul.f32 %v7998_v57, %v10986_v62  ;;  %v3602_v15 = vmul.f32 %v8096_v29, %v8220_v41  ;;  %v11493_v62 = vrot.slane %v8220_v41, 1 }
 0x351   : > { %3736 = vst [vmem:[#allocation1 + $0x5] ss:$9 sm:$0xff] %v3596_v32 }
 0x352   : > { %3737 = vst [vmem:[#allocation1 + $0x6] ss:$9 sm:$0xff] %v3597_v47  ;;  %v2050_v47 = vadd.f32 %v8499_v22, %v2049_v24  ;;  %v3603_v28 = vmul.f32 %v8032_v35, %v11493_v62  ;;  %v3604_v24 = vmul.f32 %v8168_v6, %v10988_v61 }
 0x353   : > { %3738 = vst [vmem:[#allocation1 + $0x7] ss:$9 sm:$0xff] %v3598_v58  ;;  %v3601_v58 = vmul.f32 %v8127_v1, %v10987_v21 }
 0x35a   : > { %v8809_v32 = vld [vmem:[#allocation1] sm:$0xff] }
 0x35b   : > { %11492 = vst [vmem:[#allocation140_spill] sm:$0xff] %v8809_v32  ;;  %v10998_v32 = vrot.slane %v8220_v41, 3  ;;  %v11010_v41 = vrot.slane %v11519_v50, 6 }
 0x35c   : > { %3740 = vst [vmem:[#allocation1] ss:$9 sm:$0xff] %v3599_v8  ;;  %v2126_v8 = vmax.f32 %v2050_v47, 0.0 }
 0x35d   : > { %3741 = vst [vmem:[#allocation1 + $0x1] ss:$9 sm:$0xff] %v3600_v23  ;;  %v3605_v21 = vmul.f32 %v8125_v3, %v10998_v32  ;;  %v3606_v23 = vmul.f32 %v8058_v36, %v10989_v38 }
 0x35e   : > { %3742 = vst [vmem:[#allocation1 + $0x2] ss:$9 sm:$0xff] %v3601_v58  ;;  %v8833_v62 = vmul.f32 %v8107_v43, %v2126_v8  ;;  %v10996_v58 = vrot.slane %v8226_v26, 7 }
 0x35f   : > { %3743 = vst [vmem:[#allocation1 + $0x3] ss:$9 sm:$0xff] %v3602_v15 }
 0x360   : > { %3744 = vst [vmem:[#allocation1 + $0x4] ss:$9 sm:$0xff] %v3603_v28  ;;  %v10994_v15 = vrot.slane %v8833_v62, 2  ;;  %v10995_v47 = vrot.slane %v8833_v62, 1  ;;  %v10993_v61 = vrot.slane %v8833_v62, 3  ;;  %v3607_v28 = vmul.f32 %v8055_v25, %v10996_v58 }
 0x361   : > { %3745 = vst [vmem:[#allocation1 + $0x5] ss:$9 sm:$0xff] %v3604_v24  ;;  %v3608_v24 = vmul.f32 %v7998_v57, %v8833_v62  ;;  %v10992_v8 = vrot.slane %v8833_v62, 4  ;;  %v10991_v25 = vrot.slane %v8833_v62, 5 }
 0x362   : > { %3746 = vst [vmem:[#allocation1 + $0x6] ss:$9 sm:$0xff] %v3605_v21  ;;  %v3609_v43 = vmul.f32 %v8127_v1, %v10995_v47  ;;  %v3610_v38 = vmul.f32 %v8096_v29, %v10994_v15  ;;  %v3611_v57 = vmul.f32 %v8032_v35, %v10993_v61  ;;  %v11496_v35 = vrot.slane %v7814_v5, 1 }
 0x363   : > { %3747 = vst [vmem:[#allocation1 + $0x7] ss:$9 sm:$0xff] %v3606_v23  ;;  %v10990_v23 = vrot.slane %v8833_v62, 6  ;;  %v3612_v1 = vmul.f32 %v8168_v6, %v10992_v8  ;;  %v11511_v8 = vld [vmem:[#allocation19_spill] sm:$0xff] }
 0x364   : > { %11494 = vst [vmem:[#allocation141_spill] sm:$0xff] %v8833_v62  ;;  %v3905_v61 = vmul.f32 %v8211_v27, %v11511_v8 }
 0x365   : > { %v3614_v29 = vmul.f32 %v8058_v36, %v10990_v23  ;;  %v11500_v36 = vrot.slane %v7814_v5, 4  ;;  %v11503_v23 = vrot.slane %v7814_v5, 7 }
 0x36a   : > { %v8844_v21 = vld [vmem:[#allocation1] sm:$0xff] }
 0x36b   : > { %11495 = vst [vmem:[#allocation142_spill] sm:$0xff] %v8844_v21 }
 0x36c   : > { %3749 = vst [vmem:[#allocation1] ss:$9 sm:$0xff] %v3607_v28  ;;  %v3613_v28 = vmul.f32 %v8125_v3, %v10991_v25  ;;  %v11499_v3 = vrot.slane %v7814_v5, 3 }
 0x36d   : > { %3750 = vst [vmem:[#allocation1 + $0x1] ss:$9 sm:$0xff] %v3608_v24  ;;  %v3888_v24 = vmul.f32 %v8239_v52, %v11496_v35  ;;  %v11502_v35 = vrot.slane %v7814_v5, 6 }
 0x36e   : > { %3751 = vst [vmem:[#allocation1 + $0x2] ss:$9 sm:$0xff] %v3609_v43  ;;  %v11497_v43 = vrot.slane %v7814_v5, 2 }
 0x36f   : > { %3752 = vst [vmem:[#allocation1 + $0x3] ss:$9 sm:$0xff] %v3610_v38 }
 0x370   : > { %3753 = vst [vmem:[#allocation1 + $0x4] ss:$9 sm:$0xff] %v3611_v57  ;;  %v3889_v6 = vmul.f32 %v8211_v27, %v11497_v43  ;;  %v3890_v57 = vmul.f32 %v8142_v13, %v11499_v3  ;;  %v3893_v43 = vmul.f32 %v8173_v4, %v11502_v35  ;;  %v3894_v3 = vmul.f32 %v8317_v9, %v11503_v23  ;;  %v11506_v23 = vld [vmem:[#allocation14_spill] sm:$0xff]  ;;  %v11508_v35 = vld [vmem:[#allocation12_spill] sm:$0xff] }
 0x371   : > { %3754 = vst [vmem:[#allocation1 + $0x5] ss:$9 sm:$0xff] %v3612_v1  ;;  %v3891_v1 = vmul.f32 %v8283_v7, %v11500_v36 }
 0x372   : > { %3755 = vst [vmem:[#allocation1 + $0x6] ss:$9 sm:$0xff] %v3613_v28  ;;  %v11501_v28 = vrot.slane %v7814_v5, 5 }
 0x373   : > { %3756 = vst [vmem:[#allocation1 + $0x7] ss:$9 sm:$0xff] %v3614_v29 }
 0x374   : > { %v3892_v29 = vmul.f32 %v8237_v12, %v11501_v28  ;;  %v3899_v28 = vmul.f32 %v8283_v7, %v11506_v23 }
 0x37a   : > { %v8873_v38 = vld [vmem:[#allocation1] sm:$0xff] }
 0x37b   : > { %11498 = vst [vmem:[#allocation143_spill] sm:$0xff] %v8873_v38  ;;  %v11517_v38 = vld [vmem:[#allocation24_spill] sm:$0xff] }
 0x37c   : > { %4016 = vst [vmem:[#allocation1] ss:$9 sm:$0xff] %v3888_v24  ;;  %v3895_v24 = vmul.f32 %v8281_v51, %v8275_v33  ;;  %v11507_v33 = vld [vmem:[#allocation22_spill] sm:$0xff]  ;;  %v3910_v21 = vmul.f32 %v8317_v9, %v11517_v38 }
 0x37d   : > { %4018 = vst [vmem:[#allocation1 + $0x1] ss:$9 sm:$0xff] %v3889_v6  ;;  %v3896_v6 = vmul.f32 %v8239_v52, %v7883_v63 }
 0x37e   : > { %4020 = vst [vmem:[#allocation1 + $0x2] ss:$9 sm:$0xff] %v3890_v57  ;;  %v3897_v57 = vmul.f32 %v8211_v27, %v7886_v11 }
 0x37f   : > { %4022 = vst [vmem:[#allocation1 + $0x3] ss:$9 sm:$0xff] %v3891_v1  ;;  %v11505_v1 = vld [vmem:[#allocation13_spill] sm:$0xff] }
 0x380   : > { %4024 = vst [vmem:[#allocation1 + $0x4] ss:$9 sm:$0xff] %v3892_v29  ;;  %v3898_v5 = vmul.f32 %v8142_v13, %v11505_v1  ;;  %v3900_v29 = vmul.f32 %v8237_v12, %v11507_v33 }
 0x381   : > { %4026 = vst [vmem:[#allocation1 + $0x5] ss:$9 sm:$0xff] %v3893_v43  ;;  %v3901_v43 = vmul.f32 %v8173_v4, %v11508_v35 }
 0x382   : > { %4028 = vst [vmem:[#allocation1 + $0x6] ss:$9 sm:$0xff] %v3894_v3  ;;  %v10997_v3 = vrot.slane %v11508_v35, 2 }
 0x383   : > { %4030 = vst [vmem:[#allocation1 + $0x7] ss:$9 sm:$0xff] %v3895_v24  ;;  %v11509_v24 = vld [vmem:[#allocation23_spill] sm:$0xff] }
 0x384   : > { %v3902_v25 = vmul.f32 %v8317_v9, %v11509_v24  ;;  %v11574_v24 = vld [vmem:[#allocation93_spill] sm:$0xff] }
 0x38a   : > { %v8896_v36 = vld [vmem:[#allocation1] sm:$0xff] }
 0x38b   : > { %11504 = vst [vmem:[#allocation144_spill] sm:$0xff] %v8896_v36 }
 0x38c   : > { %4032 = vst [vmem:[#allocation1] ss:$9 sm:$0xff] %v3896_v6  ;;  %v3903_v6 = vmul.f32 %v8281_v51, %v10997_v3  ;;  %v11515_v3 = vld [vmem:[#allocation29_spill] sm:$0xff] }
 0x38d   : > { %4033 = vst [vmem:[#allocation1 + $0x1] ss:$9 sm:$0xff] %v3897_v57  ;;  %v11510_v57 = vld [vmem:[#allocation18_spill] sm:$0xff] }
 0x38e   : > { %4034 = vst [vmem:[#allocation1 + $0x2] ss:$9 sm:$0xff] %v3898_v5  ;;  %v3904_v5 = vmul.f32 %v8239_v52, %v11510_v57 }
 0x38f   : > { %4035 = vst [vmem:[#allocation1 + $0x3] ss:$9 sm:$0xff] %v3899_v28  ;;  %v11513_v28 = vld [vmem:[#allocation28_spill] sm:$0xff] }
 0x390   : > { %4036 = vst [vmem:[#allocation1 + $0x4] ss:$9 sm:$0xff] %v3900_v29  ;;  %v3906_v47 = vmul.f32 %v8142_v13, %v11513_v28  ;;  %v11514_v29 = vld [vmem:[#allocation17_spill] sm:$0xff] }
 0x391   : > { %4037 = vst [vmem:[#allocation1 + $0x5] ss:$9 sm:$0xff] %v3901_v43  ;;  %v3907_v58 = vmul.f32 %v8283_v7, %v11514_v29  ;;  %v11516_v43 = vld [vmem:[#allocation31_spill] sm:$0xff]  ;;  %v11003_v32 = vrot.slane %v11514_v29, 4 }
 0x392   : > { %4038 = vst [vmem:[#allocation1 + $0x6] ss:$9 sm:$0xff] %v3902_v25  ;;  %v3908_v25 = vmul.f32 %v8237_v12, %v11515_v3  ;;  %v11568_v3 = vld [vmem:[#allocation95_spill] sm:$0xff] }
 0x393   : > { %4039 = vst [vmem:[#allocation1 + $0x7] ss:$9 sm:$0xff] %v3903_v6  ;;  %v3909_v6 = vmul.f32 %v8173_v4, %v11516_v43  ;;  %v6297_v28 = vunpack.i.h.bf16 %v11568_v3 }
 0x39a   : > { %v8916_v15 = vld [vmem:[#allocation1] sm:$0xff] }
 0x39b   : > { %11512 = vst [vmem:[#allocation145_spill] sm:$0xff] %v8916_v15  ;;  %v3913_v15 = vmul.f32 %v8211_v27, %v11519_v50 }
 0x39c   : > { %4041 = vst [vmem:[#allocation1] ss:$9 sm:$0xff] %v3904_v5  ;;  %v3911_v5 = vmul.f32 %v8281_v51, %v11003_v32  ;;  %v11523_v32 = vld [vmem:[#allocation38_spill] sm:$0xff] }
 0x39d   : > { %4042 = vst [vmem:[#allocation1 + $0x1] ss:$9 sm:$0xff] %v3905_v61  ;;  %v11518_v61 = vld [vmem:[#allocation27_spill] sm:$0xff] }
 0x39e   : > { %4043 = vst [vmem:[#allocation1 + $0x2] ss:$9 sm:$0xff] %v3906_v47  ;;  %v3912_v47 = vmul.f32 %v8239_v52, %v11518_v61 }
 0x39f   : > { %4044 = vst [vmem:[#allocation1 + $0x3] ss:$9 sm:$0xff] %v3907_v58  ;;  %v11521_v58 = vld [vmem:[#allocation36_spill] sm:$0xff] }
 0x3a0   : > { %4045 = vst [vmem:[#allocation1 + $0x4] ss:$9 sm:$0xff] %v3908_v25  ;;  %v3914_v62 = vmul.f32 %v8142_v13, %v11521_v58  ;;  %v11522_v25 = vld [vmem:[#allocation37_spill] sm:$0xff] }
 0x3a1   : > { %4046 = vst [vmem:[#allocation1 + $0x5] ss:$9 sm:$0xff] %v3909_v6  ;;  %v3915_v2 = vmul.f32 %v8283_v7, %v11522_v25  ;;  %v11524_v6 = vld [vmem:[#allocation32_spill] sm:$0xff]  ;;  %v11529_v25 = vld [vmem:[#allocation45_spill] sm:$0xff] }
 0x3a2   : > { %4047 = vst [vmem:[#allocation1 + $0x6] ss:$9 sm:$0xff] %v3910_v21  ;;  %v3916_v21 = vmul.f32 %v8237_v12, %v11523_v32  ;;  %v11533_v58 = vld [vmem:[#allocation41_spill] sm:$0xff] }
 0x3a3   : > { %4048 = vst [vmem:[#allocation1 + $0x7] ss:$9 sm:$0xff] %v3911_v5  ;;  %v3917_v5 = vmul.f32 %v8173_v4, %v11524_v6  ;;  %v11527_v6 = vld [vmem:[#allocation44_spill] sm:$0xff] }
 0x3a4   : > { %v3921_v32 = vmul.f32 %v8211_v27, %v11527_v6  ;;  %v3926_v6 = vmul.f32 %v8317_v9, %v11533_v58 }
 0x3aa   : > { %v8936_v36 = vld [vmem:[#allocation1] sm:$0xff] }
 0x3ab   : > { %11520 = vst [vmem:[#allocation146_spill] sm:$0xff] %v8936_v36  ;;  %v3918_v36 = vmul.f32 %v8317_v9, %v11525_v16  ;;  %v11530_v16 = vld [vmem:[#allocation46_spill] sm:$0xff] }
 0x3ac   : > { %4050 = vst [vmem:[#allocation1] ss:$9 sm:$0xff] %v3912_v47  ;;  %v3919_v47 = vmul.f32 %v8281_v51, %v11010_v41  ;;  %v3923_v41 = vmul.f32 %v8283_v7, %v11530_v16 }
 0x3ad   : > { %4051 = vst [vmem:[#allocation1 + $0x1] ss:$9 sm:$0xff] %v3913_v15  ;;  %v8952_v15 = vpop.f32.mrf.mxu2 }
 0x3ae   : > { %4052 = vst [vmem:[#allocation1 + $0x2] ss:$9 sm:$0xff] %v3914_v62  ;;  %v11526_v62 = vld [vmem:[#allocation35_spill] sm:$0xff] }
 0x3af   : > { %4053 = vst [vmem:[#allocation1 + $0x3] ss:$9 sm:$0xff] %v3915_v2  ;;  %v3920_v31 = vmul.f32 %v8239_v52, %v11526_v62 }
 0x3b0   : > { %4054 = vst [vmem:[#allocation1 + $0x4] ss:$9 sm:$0xff] %v3916_v21  ;;  %v3922_v21 = vmul.f32 %v8142_v13, %v11529_v25  ;;  %v11538_v25 = vld [vmem:[#allocation50_spill] sm:$0xff] }
 0x3b1   : > { %4055 = vst [vmem:[#allocation1 + $0x5] ss:$9 sm:$0xff] %v3917_v5  ;;  %v3931_v50 = vmul.f32 %v8283_v7, %v11538_v25  ;;  %v11542_v25 = vld [vmem:[#allocation57_spill] sm:$0xff] }
 0x3b2   : > { %4056 = vst [vmem:[#allocation1 + $0x6] ss:$9 sm:$0xff] %v3918_v36  ;;  %v11531_v36 = vld [vmem:[#allocation47_spill] sm:$0xff] }
 0x3b3   : > { %4057 = vst [vmem:[#allocation1 + $0x7] ss:$9 sm:$0xff] %v3919_v47  ;;  %v3924_v5 = vmul.f32 %v8237_v12, %v11531_v36  ;;  %v11532_v47 = vld [vmem:[#allocation40_spill] sm:$0xff] }
 0x3b4   : > { %v3925_v62 = vmul.f32 %v8173_v4, %v11532_v47 }
 0x3ba   : > { %v8958_v2 = vld [vmem:[#allocation1] sm:$0xff] }
 0x3bb   : > { %11528 = vst [vmem:[#allocation147_spill] sm:$0xff] %v8958_v2  ;;  %v8970_v2 = vpop.f32.mrf.mxu2 }
 0x3bc   : > { %4059 = vst [vmem:[#allocation1] ss:$9 sm:$0xff] %v3920_v31  ;;  %v3927_v31 = vmul.f32 %v8281_v51, %v8730_v60  ;;  %v11014_v60 = vrot.slane %v8120_v56, 2 }
 0x3bd   : > { %4060 = vst [vmem:[#allocation1 + $0x1] ss:$9 sm:$0xff] %v3921_v32  ;;  %v11534_v32 = vld [vmem:[#allocation51_spill] sm:$0xff] }
 0x3be   : > { %4061 = vst [vmem:[#allocation1 + $0x2] ss:$9 sm:$0xff] %v3922_v21  ;;  %v3928_v36 = vmul.f32 %v8239_v52, %v11534_v32  ;;  %v11535_v21 = vld [vmem:[#allocation53_spill] sm:$0xff] }
 0x3bf   : > { %4062 = vst [vmem:[#allocation1 + $0x3] ss:$9 sm:$0xff] %v3923_v41  ;;  %v3929_v16 = vmul.f32 %v8211_v27, %v11535_v21  ;;  %v11537_v41 = vld [vmem:[#allocation55_spill] sm:$0xff] }
 0x3c0   : > { %4063 = vst [vmem:[#allocation1 + $0x4] ss:$9 sm:$0xff] %v3924_v5  ;;  %v3930_v58 = vmul.f32 %v8142_v13, %v11537_v41  ;;  %v3937_v41 = vmul.f32 %v8211_v27, %v11542_v25  ;;  %v11547_v25 = vld [vmem:[#allocation67_spill] sm:$0xff] }
 0x3c1   : > { %4064 = vst [vmem:[#allocation1 + $0x5] ss:$9 sm:$0xff] %v3925_v62  ;;  %v11539_v62 = vld [vmem:[#allocation52_spill] sm:$0xff] }
 0x3c2   : > { %4065 = vst [vmem:[#allocation1 + $0x6] ss:$9 sm:$0xff] %v3926_v6  ;;  %v3932_v6 = vmul.f32 %v8237_v12, %v11539_v62  ;;  %v11541_v62 = vld [vmem:[#allocation63_spill] sm:$0xff] }
 0x3c3   : > { %4066 = vst [vmem:[#allocation1 + $0x7] ss:$9 sm:$0xff] %v3927_v31  ;;  %v2057_v5 = vpop.f32.mrf.mxu2  ;;  %v3933_v31 = vmul.f32 %v8173_v4, %v8120_v56 }
 0x3ca   : > { %v8978_v47 = vld [vmem:[#allocation1] sm:$0xff] }
 0x3cb   : > { %11536 = vst [vmem:[#allocation148_spill] sm:$0xff] %v8978_v47  ;;  %v11540_v47 = vld [vmem:[#allocation49_spill] sm:$0xff] }
 0x3cc   : > { %4068 = vst [vmem:[#allocation1] ss:$9 sm:$0xff] %v3928_v36  ;;  %v3934_v21 = vmul.f32 %v8317_v9, %v11540_v47  ;;  %v3935_v36 = vmul.f32 %v8281_v51, %v11014_v60 }
 0x3cd   : > { %4069 = vst [vmem:[#allocation1 + $0x1] ss:$9 sm:$0xff] %v3929_v16  ;;  %v2059_v16 = vpop.f32.mrf.mxu2 }
 0x3ce   : > { %4070 = vst [vmem:[#allocation1 + $0x2] ss:$9 sm:$0xff] %v3930_v58  ;;  %v3936_v58 = vmul.f32 %v8239_v52, %v11541_v62  ;;  %v11019_v62 = vrot.slane %v8171_v46, 4 }
 0x3cf   : > { %4071 = vst [vmem:[#allocation1 + $0x3] ss:$9 sm:$0xff] %v3931_v50  ;;  %v11544_v50 = vld [vmem:[#allocation59_spill] sm:$0xff] }
 0x3d0   : > { %4072 = vst [vmem:[#allocation1 + $0x4] ss:$9 sm:$0xff] %v3932_v6  ;;  %v3938_v47 = vmul.f32 %v8142_v13, %v11544_v50  ;;  %v3939_v6 = vmul.f32 %v8283_v7, %v8171_v46  ;;  %v9023_v46 = vpop.permute.xlu2 %5035 }
 0x3d1   : > { %4073 = vst [vmem:[#allocation1 + $0x5] ss:$9 sm:$0xff] %v3933_v31  ;;  %v11545_v31 = vld [vmem:[#allocation60_spill] sm:$0xff] }
 0x3d2   : > { %4074 = vst [vmem:[#allocation1 + $0x6] ss:$9 sm:$0xff] %v3934_v21  ;;  %v3940_v21 = vmul.f32 %v8237_v12, %v11545_v31 }
 0x3d3   : > { %4075 = vst [vmem:[#allocation1 + $0x7] ss:$9 sm:$0xff] %v3935_v36  ;;  %v11546_v36 = vld [vmem:[#allocation65_spill] sm:$0xff] }
 0x3d4   : > { %v3941_v60 = vmul.f32 %v8173_v4, %v11546_v36  ;;  %v2058_v36 = vadd.f32 %v8499_v22, %v2057_v5 }
 0x3d5   : > { %v2062_v50 = vpop.f32.mrf.mxu2 }
 0x3d6   : > { %v2129_v5 = vmax.f32 %v2058_v36, 0.0 }
 0x3da   : > { %v8998_v32 = vld [vmem:[#allocation1] sm:$0xff] }
 0x3db   : > { %11543 = vst [vmem:[#allocation149_spill] sm:$0xff] %v8998_v32  ;;  %v3942_v32 = vmul.f32 %v8317_v9, %v11547_v25  ;;  %v11550_v25 = vld [vmem:[#allocation70_spill] sm:$0xff] }
 0x3dc   : > { %4077 = vst [vmem:[#allocation1] ss:$9 sm:$0xff] %v3936_v58  ;;  %v3943_v58 = vmul.f32 %v8281_v51, %v11019_v62  ;;  %v11553_v62 = vld [vmem:[#allocation78_spill] sm:$0xff] }
 0x3dd   : > { %4078 = vst [vmem:[#allocation1 + $0x1] ss:$9 sm:$0xff] %v3937_v41  ;;  %v11548_v41 = vld [vmem:[#allocation66_spill] sm:$0xff]  ;;  %v2064_v56 = vpop.f32.mrf.mxu2 }
 0x3de   : > { %4079 = vst [vmem:[#allocation1 + $0x2] ss:$9 sm:$0xff] %v3938_v47  ;;  %v3944_v47 = vmul.f32 %v8239_v52, %v11548_v41  ;;  %v11554_v41 = vld [vmem:[#allocation75_spill] sm:$0xff] }
 0x3df   : > { %4080 = vst [vmem:[#allocation1 + $0x3] ss:$9 sm:$0xff] %v3939_v6  ;;  %v3945_v6 = vmul.f32 %v8211_v27, %v8226_v26  ;;  %v3949_v27 = vmul.f32 %v8173_v4, %v11553_v62  ;;  %v11560_v62 = vld [vmem:[#allocation71_spill] sm:$0xff] }
 0x3e0   : > { %4081 = vst [vmem:[#allocation1 + $0x4] ss:$9 sm:$0xff] %v3940_v21  ;;  %v3946_v21 = vmul.f32 %v8142_v13, %v11550_v25  ;;  %v6286_v13 = vunpack.i.l.bf16 %v11554_v41  ;;  %v11555_v25 = vld [vmem:[#allocation73_spill] sm:$0xff] }
 0x3e1   : > { %4082 = vst [vmem:[#allocation1 + $0x5] ss:$9 sm:$0xff] %v3941_v60  ;;  %v11551_v60 = vld [vmem:[#allocation79_spill] sm:$0xff] }
 0x3e2   : > { %4083 = vst [vmem:[#allocation1 + $0x6] ss:$9 sm:$0xff] %v3942_v32  ;;  %v3947_v32 = vmul.f32 %v8283_v7, %v11551_v60  ;;  %v9039_v36 = vmul.f32 %v6286_v13, %v2129_v5  ;;  %v11558_v5 = vld [vmem:[#allocation87_spill] sm:$0xff] }
 0x3e3   : > { %4084 = vst [vmem:[#allocation1 + $0x7] ss:$9 sm:$0xff] %v3943_v58  ;;  %v11552_v58 = vld [vmem:[#allocation74_spill] sm:$0xff] }
 0x3e4   : > { %v3948_v52 = vmul.f32 %v8237_v12, %v11552_v58  ;;  %v2060_v12 = vadd.f32 %v8499_v22, %v2059_v16 }
 0x3e6   : > { %v2130_v4 = vmax.f32 %v2060_v12, 0.0 }
 0x3ea   : > { %v9019_v31 = vld [vmem:[#allocation1] sm:$0xff] }
 0x3eb   : > { %11549 = vst [vmem:[#allocation150_spill] sm:$0xff] %v9019_v31  ;;  %v11020_v31 = vrot.slane %v8226_v26, 6 }
 0x3ec   : > { %4086 = vst [vmem:[#allocation1] ss:$9 sm:$0xff] %v3944_v47  ;;  %v3950_v47 = vmul.f32 %v8317_v9, %v11555_v25  ;;  %v2838_v9 = vrot.slane %v9039_v36, 2  ;;  %v11021_v25 = vrot.slane %v9039_v36, 3 }
 0x3ed   : > { %4087 = vst [vmem:[#allocation1 + $0x1] ss:$9 sm:$0xff] %v3945_v6  ;;  %v3951_v7 = vmul.f32 %v8281_v51, %v11020_v31  ;;  %v6287_v6 = vunpack.i.h.bf16 %v11554_v41  ;;  %v2063_v51 = vadd.f32 %v8499_v22, %v2062_v50  ;;  %v11025_v41 = vrot.slane %v9039_v36, 5 }
 0x3ee   : > { %4088 = vst [vmem:[#allocation1 + $0x2] ss:$9 sm:$0xff] %v3946_v21  ;;  %v2067_v21 = vpop.f32.mrf.mxu2  ;;  %v4169_v13 = vmul.f32 %v11558_v5, %v11021_v25  ;;  %v11026_v31 = vrot.slane %v9039_v36, 6  ;;  %v11561_v25 = vld [vmem:[#allocation83_spill] sm:$0xff] }
 0x3ef   : > { %4089 = vst [vmem:[#allocation1 + $0x3] ss:$9 sm:$0xff] %v3947_v32  ;;  %v9042_v32 = vpop.permute.xlu2 %5041  ;;  %v6291_v58 = vunpack.i.l.bf16 %v11561_v25 }
 0x3f0   : > { %4090 = vst [vmem:[#allocation1 + $0x4] ss:$9 sm:$0xff] %v3948_v52  ;;  %v11022_v52 = vrot.slane %v9039_v36, 4 }
 0x3f1   : > { %4091 = vst [vmem:[#allocation1 + $0x5] ss:$9 sm:$0xff] %v3949_v27  ;;  %v11557_v27 = vld [vmem:[#allocation80_spill] sm:$0xff] }
 0x3f2   : > { %4092 = vst [vmem:[#allocation1 + $0x6] ss:$9 sm:$0xff] %v3950_v47  ;;  %v4168_v16 = vmul.f32 %v11557_v27, %v2838_v9  ;;  %v9049_v47 = vmul.f32 %v6287_v6, %v2130_v4  ;;  %v4170_v50 = vmul.f32 %v11560_v62, %v11022_v52  ;;  %v4171_v4 = vmul.f32 %v8376_v17, %v11025_v41 }
 0x3f3   : > { %4093 = vst [vmem:[#allocation1 + $0x7] ss:$9 sm:$0xff] %v3951_v7  ;;  %v2131_v6 = vmax.f32 %v2063_v51, 0.0  ;;  %v2065_v9 = vadd.f32 %v8499_v22, %v2064_v56  ;;  %v11562_v7 = vld [vmem:[#allocation85_spill] sm:$0xff]  ;;  %v11563_v52 = vrot.slane %v9039_v36, 7 }
 0x3f4   : > { %11556 = vst [vmem:[#allocation75_spill] sm:$0xff] %v9042_v32  ;;  %v11027_v60 = vrot.slane %v9049_v47, 1 }
 0x3f5   : > { %v9082_v61 = vmul.f32 %v6291_v58, %v2131_v6 }
 0x3f6   : > { %v2069_v51 = vpop.f32.mrf.mxu2  ;;  %v4175_v56 = vmul.f32 %v8374_v53, %v11027_v60 }
 0x3f7   : > { %v9079_v41 = vpop.permute.xlu2 %5047  ;;  %v11028_v38 = vrot.slane %v9082_v61, 5  ;;  %v2853_v60 = vrot.slane %v9082_v61, 4  ;;  %v11030_v43 = vrot.slane %v9082_v61, 6  ;;  %v11032_v58 = vrot.slane %v9082_v61, 7 }
 0x3f8   : > { %11565 = vst [vmem:[#allocation87_spill] sm:$0xff] %v9079_v41 }
 0x3f9   : > { %v4177_v6 = vmul.f32 %v11558_v5, %v11028_v38  ;;  %v4179_v38 = vmul.f32 %v8376_v17, %v11032_v58 }
 0x3fa   : > { %v9056_v12 = vld [vmem:[#allocation1] sm:$0xff] }
 0x3fb   : > { %11559 = vst [vmem:[#allocation80_spill] sm:$0xff] %v9056_v12  ;;  %v4172_v12 = vmul.f32 %v11562_v7, %v11026_v31  ;;  %v6292_v31 = vunpack.i.h.bf16 %v11561_v25  ;;  %v4176_v25 = vmul.f32 %v11557_v27, %v2853_v60 }
 0x3fc   : > { %4296 = vst [vmem:[#allocation1] ss:$9 sm:$0xff] %v4168_v16  ;;  %v11564_v16 = vld [vmem:[#allocation72_spill] sm:$0xff] }
 0x3fd   : > { %4298 = vst [vmem:[#allocation1 + $0x1] ss:$9 sm:$0xff] %v4169_v13  ;;  %v4173_v26 = vmul.f32 %v11564_v16, %v11563_v52  ;;  %v4174_v13 = vmul.f32 %v8400_v0, %v9049_v47  ;;  %v9084_v52 = vpop.permute.xlu0 %4768 }
 0x3fe   : > { %4300 = vst [vmem:[#allocation1 + $0x2] ss:$9 sm:$0xff] %v4170_v50  ;;  %v2132_v50 = vmax.f32 %v2065_v9, 0.0  ;;  %v6296_v9 = vunpack.i.l.bf16 %v11568_v3 }
 0x3ff   : > { %4302 = vst [vmem:[#allocation1 + $0x3] ss:$9 sm:$0xff] %v4171_v4  ;;  %v9086_v4 = vpop.permute.xlu1 %5033 }
 0x400   : > { %4304 = vst [vmem:[#allocation1 + $0x4] ss:$9 sm:$0xff] %v4172_v12  ;;  %v9088_v12 = vmul.f32 %v6292_v31, %v2132_v50  ;;  %v9108_v50 = vpop.permute.xlu2 %5308 }
 0x401   : > { %4306 = vst [vmem:[#allocation1 + $0x5] ss:$9 sm:$0xff] %v4173_v26  ;;  %v2068_v26 = vadd.f32 %v8499_v22, %v2067_v21  ;;  %v4178_v21 = vmul.f32 %v11560_v62, %v11030_v43 }
 0x402   : > { %4308 = vst [vmem:[#allocation1 + $0x6] ss:$9 sm:$0xff] %v4174_v13  ;;  %v2070_v13 = vadd.f32 %v8499_v22, %v2069_v51  ;;  %v4180_v51 = vmul.f32 %v11562_v7, %v9088_v12 }
 0x403   : > { %4310 = vst [vmem:[#allocation1 + $0x7] ss:$9 sm:$0xff] %v4175_v56  ;;  %v9103_v56 = vpop.f32.mrf.mxu2  ;;  %v2133_v60 = vmax.f32 %v2068_v26, 0.0  ;;  %v11570_v26 = vrot.slane %v9088_v12, 1 }
 0x404   : > { %11567 = vst [vmem:[#allocation83_spill] sm:$0xff] %v9108_v50  ;;  %v2134_v58 = vmax.f32 %v2070_v13, 0.0 }
 0x405   : > { %v9117_v29 = vpop.permute.xlu0 %4774  ;;  %v4181_v50 = vmul.f32 %v11564_v16, %v11570_v26  ;;  %v9132_v8 = vmul.f32 %v6296_v9, %v2133_v60 }
 0x406   : > { %v9134_v57 = vmul.f32 %v6297_v28, %v2134_v58 }
 0x407   : > { %v9119_v43 = vpop.permute.xlu1 %5039  ;;  %v11036_v26 = vrot.slane %v9132_v8, 7 }
 0x408   : > { %11569 = vst [vmem:[#allocation85_spill] sm:$0xff] %v9119_v43  ;;  %v11038_v3 = vrot.slane %v9134_v57, 1  ;;  %v11575_v60 = vrot.slane %v9134_v57, 2  ;;  %v11576_v35 = vrot.slane %v9134_v57, 3 }
 0x409   : > { %v4185_v58 = vmul.f32 %v11558_v5, %v11036_v26  ;;  %v6301_v26 = vunpack.i.l.bf16 %v11574_v24 }
 0x40a   : > { %v9100_v31 = vld [vmem:[#allocation1] sm:$0xff] }
 0x40b   : > { %11566 = vst [vmem:[#allocation71_spill] sm:$0xff] %v9100_v31  ;;  %v11033_v31 = vrot.slane %v9088_v12, 2  ;;  %v2074_v13 = vpop.f32.mrf.mxu2 }
 0x40c   : > { %4312 = vst [vmem:[#allocation1] ss:$9 sm:$0xff] %v4176_v25  ;;  %v11035_v25 = vrot.slane %v9088_v12, 3  ;;  %v2075_v9 = vadd.f32 %v8499_v22, %v2074_v13 }
 0x40d   : > { %4313 = vst [vmem:[#allocation1 + $0x1] ss:$9 sm:$0xff] %v4177_v6  ;;  %v4182_v6 = vmul.f32 %v8400_v0, %v11033_v31  ;;  %v9138_v31 = vpop.permute.xlu2 %5314 }
 0x40e   : > { %4314 = vst [vmem:[#allocation1 + $0x2] ss:$9 sm:$0xff] %v4178_v21  ;;  %v4183_v21 = vmul.f32 %v8374_v53, %v11035_v25  ;;  %v2136_v28 = vmax.f32 %v2075_v9, 0.0  ;;  %v4189_v25 = vmul.f32 %v11564_v16, %v11576_v35  ;;  %v2053_v35 = vadd.f32 %v8499_v22, %v8952_v15 }
 0x40f   : > { %4315 = vst [vmem:[#allocation1 + $0x3] ss:$9 sm:$0xff] %v4179_v38  ;;  %v2868_v38 = vrot.slane %v9132_v8, 6  ;;  %v9143_v41 = vpop.permute.xlu1 %5045 }
 0x410   : > { %4316 = vst [vmem:[#allocation1 + $0x4] ss:$9 sm:$0xff] %v4180_v51  ;;  %v9141_v51 = vpop.permute.xlu0 %5037 }
 0x411   : > { %4317 = vst [vmem:[#allocation1 + $0x5] ss:$9 sm:$0xff] %v4181_v50  ;;  %v4184_v50 = vmul.f32 %v11557_v27, %v2868_v38  ;;  %v4187_v38 = vmul.f32 %v8376_v17, %v11038_v3 }
 0x412   : > { %4318 = vst [vmem:[#allocation1 + $0x6] ss:$9 sm:$0xff] %v4182_v6 }
 0x413   : > { %4319 = vst [vmem:[#allocation1 + $0x7] ss:$9 sm:$0xff] %v4183_v21  ;;  %v4186_v21 = vmul.f32 %v11560_v62, %v9134_v57 }
 0x414   : > { %11571 = vst [vmem:[#allocation72_spill] sm:$0xff] %v9141_v51 }
 0x415   : > { %11572 = vst [vmem:[#allocation95_spill] sm:$0xff] %v9143_v41  ;;  %v9174_v24 = vpop.permute.xlu2 %5320 }
 0x416   : > { %11579 = vst [vmem:[#allocation93_spill] sm:$0xff] %v9174_v24 }
 0x418   : > { %v9176_v3 = vpop.permute.xlu0 %5043 }
 0x419   : > { %11580 = vst [vmem:[#allocation152_spill] sm:$0xff] %v9176_v3 }
 0x41a   : > { %v9152_v6 = vld [vmem:[#allocation1] sm:$0xff] }
 0x41b   : > { %11573 = vst [vmem:[#allocation151_spill] sm:$0xff] %v9152_v6  ;;  %v4188_v6 = vmul.f32 %v11562_v7, %v11575_v60  ;;  %v9178_v60 = vmul.f32 %v6301_v26, %v2136_v28 }
 0x41c   : > { %4321 = vst [vmem:[#allocation1] ss:$9 sm:$0xff] %v4184_v50  ;;  %v11577_v50 = vrot.slane %v9134_v57, 4 }
 0x41d   : > { %4322 = vst [vmem:[#allocation1 + $0x1] ss:$9 sm:$0xff] %v4185_v58  ;;  %v11578_v58 = vrot.slane %v9134_v57, 5  ;;  %v9190_v28 = vpop.permute.xlu2 %5637  ;;  %v11042_v33 = vrot.slane %v9178_v60, 7  ;;  %v11585_v32 = vrot.slane %v9178_v60, 3  ;;  %v11586_v22 = vrot.slane %v9178_v60, 4 }
 0x41e   : > { %4323 = vst [vmem:[#allocation1 + $0x2] ss:$9 sm:$0xff] %v4186_v21  ;;  %v4190_v13 = vmul.f32 %v8400_v0, %v11577_v50  ;;  %v9180_v21 = vpop.permute.xlu1 %5306  ;;  %v11583_v50 = vrot.slane %v9178_v60, 2  ;;  %v11587_v23 = vrot.slane %v9178_v60, 5 }
 0x41f   : > { %4324 = vst [vmem:[#allocation1 + $0x3] ss:$9 sm:$0xff] %v4187_v38  ;;  %v4191_v9 = vmul.f32 %v8374_v53, %v11578_v58  ;;  %v4192_v58 = vmul.f32 %v11557_v27, %v9178_v60 }
 0x420   : > { %4325 = vst [vmem:[#allocation1 + $0x4] ss:$9 sm:$0xff] %v4188_v6  ;;  %v11041_v6 = vrot.slane %v9178_v60, 1  ;;  %v4194_v24 = vmul.f32 %v11560_v62, %v11583_v50  ;;  %v4197_v50 = vmul.f32 %v11564_v16, %v11587_v23  ;;  %v4199_v23 = vmul.f32 %v8374_v53, %v11042_v33 }
 0x421   : > { %4326 = vst [vmem:[#allocation1 + $0x5] ss:$9 sm:$0xff] %v4189_v25  ;;  %v2127_v25 = vmax.f32 %v2053_v35, 0.0 }
 0x422   : > { %4327 = vst [vmem:[#allocation1 + $0x6] ss:$9 sm:$0xff] %v4190_v13  ;;  %v2527_v13 = vpop.permute.xlu0 %2526 }
 0x423   : > { %4328 = vst [vmem:[#allocation1 + $0x7] ss:$9 sm:$0xff] %v4191_v9  ;;  %v4193_v9 = vmul.f32 %v11558_v5, %v11041_v6  ;;  %v9204_v26 = vmul.f32 %v2527_v13, %v2127_v25  ;;  %v4195_v6 = vmul.f32 %v8376_v17, %v11585_v32 }
 0x424   : > { %11581 = vst [vmem:[#allocation153_spill] sm:$0xff] %v9190_v28 }
 0x425   : > { %11584 = vst [vmem:[#allocation155_spill] sm:$0xff] %v9204_v26  ;;  %v2825_v35 = vrot.slane %v9204_v26, 2  ;;  %v2828_v25 = vrot.slane %v9204_v26, 5 }
 0x426   : > { %v9198_v38 = vpop.permute.xlu1 %5312 }
 0x427   : > { %v9222_v32 = vmul.f32 %v9141_v51, %v2825_v35 }
 0x429   : > { %11589 = vst [vmem:[#allocation156_spill] sm:$0xff] %v9222_v32 }
 0x42a   : > { %v9196_v15 = vld [vmem:[#allocation1] sm:$0xff] }
 0x42b   : > { %11582 = vst [vmem:[#allocation154_spill] sm:$0xff] %v9196_v15  ;;  %v4196_v15 = vmul.f32 %v11562_v7, %v11586_v22  ;;  %v9237_v22 = vld [vmem:[%s10628_s5] ss:$0 sm:$0xff] }
 0x42c   : > { %4330 = vst [vmem:[#allocation1] ss:$9 sm:$0xff] %v4192_v58  ;;  %v11588_v58 = vrot.slane %v9178_v60, 6 }
 0x42d   : > { %4331 = vst [vmem:[#allocation1 + $0x1] ss:$9 sm:$0xff] %v4193_v9  ;;  %v9225_v9 = vmul.f32 %v9190_v28, %v2825_v35  ;;  %v9241_v35 = vpop.permute.xlu2 %5643 }
 0x42e   : > { %4332 = vst [vmem:[#allocation1 + $0x2] ss:$9 sm:$0xff] %v4194_v24  ;;  %v4198_v13 = vmul.f32 %v8400_v0, %v11588_v58  ;;  %v9243_v24 = vpop.permute.xlu0 %5310  ;;  %v9250_v33 = vpop.permute.xlu1 %5318  ;;  %v9253_v28 = vmul.f32 %v9241_v35, %v2828_v25 }
 0x42f   : > { %4333 = vst [vmem:[#allocation1 + $0x3] ss:$9 sm:$0xff] %v4195_v6  ;;  %v9232_v6 = vmul.f32 %v9176_v3, %v2828_v25  ;;  %v2897_v3 = vrot.slane %v8503_v59, 2 }
 0x430   : > { %4334 = vst [vmem:[#allocation1 + $0x4] ss:$9 sm:$0xff] %v4196_v15  ;;  %v11592_v15 = vld [vmem:[#allocation68_spill] sm:$0xff] }
 0x431   : > { %11590 = vst [vmem:[#allocation157_spill] sm:$0xff] %v9225_v9  ;;  %v2083_v58 = vadd.f32 %v9237_v22, %v11592_v15  ;;  %v11594_v9 = vrot.slane %v9204_v26, 3  ;;  %v11597_v15 = vld [vmem:[#allocation81_spill] sm:$0xff]  ;;  %v4200_v25 = vmul.f32 %v11557_v27, %v2897_v3  ;;  %v2055_v3 = vadd.f32 %v9237_v22, %v8970_v2 }
 0x432   : > { %4335 = vst [vmem:[#allocation1 + $0x5] ss:$9 sm:$0xff] %v4197_v50 }
 0x433   : > { %11591 = vst [vmem:[#allocation158_spill] sm:$0xff] %v9232_v6  ;;  %v9248_v50 = vmul.f32 %v9119_v43, %v11594_v9  ;;  %v11051_v6 = vrot.slane %v9204_v26, 6  ;;  %v2139_v32 = vmax.f32 %v2083_v58, 0.0  ;;  %v11599_v9 = vrot.slane %v8503_v59, 3 }
 0x434   : > { %4336 = vst [vmem:[#allocation1 + $0x6] ss:$9 sm:$0xff] %v4198_v13  ;;  %v6306_v13 = vunpack.i.l.bf16 %v11597_v15 }
 0x435   : > { %11593 = vst [vmem:[#allocation68_spill] sm:$0xff] %v9241_v35  ;;  %v9261_v1 = vmul.f32 %v9143_v41, %v11051_v6  ;;  %v11601_v35 = vrot.slane %v8503_v59, 4  ;;  %v11602_v6 = vrot.slane %v8503_v59, 5 }
 0x436   : > { %11595 = vst [vmem:[#allocation159_spill] sm:$0xff] %v9248_v50  ;;  %v9266_v50 = vmul.f32 %v6306_v13, %v2139_v32  ;;  %v9272_v15 = vpop.permute.xlu0 %5316  ;;  %v9280_v32 = vpop.permute.xlu1 %5635  ;;  %v11604_v13 = vrot.slane %v8503_v59, 6 }
 0x437   : > { %4337 = vst [vmem:[#allocation1 + $0x7] ss:$9 sm:$0xff] %v4199_v23  ;;  %v4201_v23 = vmul.f32 %v11558_v5, %v11599_v9  ;;  %v4202_v43 = vmul.f32 %v11560_v62, %v11601_v35  ;;  %v11605_v35 = vrot.slane %v8503_v59, 7 }
 0x438   : > { %11596 = vst [vmem:[#allocation160_spill] sm:$0xff] %v9253_v28  ;;  %v4204_v9 = vmul.f32 %v11562_v7, %v11604_v13  ;;  %v11054_v28 = vrot.slane %v9266_v50, 1  ;;  %v2128_v13 = vmax.f32 %v2055_v3, 0.0 }
 0x439   : > { %11598 = vst [vmem:[#allocation81_spill] sm:$0xff] %v9261_v1  ;;  %v4203_v1 = vmul.f32 %v8376_v17, %v11602_v6  ;;  %v11057_v6 = vrot.slane %v9204_v26, 1 }
 0x43a   : > { %11603 = vst [vmem:[#allocation162_spill] sm:$0xff] %v9280_v32  ;;  %v4207_v2 = vmul.f32 %v8374_v53, %v11054_v28 }
 0x43e   : > { %v9270_v58 = vld [vmem:[#allocation1] sm:$0xff]  ;;  %v9311_v3 = vpop.permute.xlu1 %5641 }
 0x43f   : > { %11600 = vst [vmem:[#allocation161_spill] sm:$0xff] %v9270_v58  ;;  %v2912_v58 = vrot.slane %v8494_v45, 4 }
 0x440   : > { %4340 = vst [vmem:[#allocation1 + $0x1] ss:$9 sm:$0xff] %v4201_v23  ;;  %v4205_v23 = vmul.f32 %v11564_v16, %v11605_v35 }
 0x441   : > { %4339 = vst [vmem:[#allocation1] ss:$9 sm:$0xff] %v4200_v25  ;;  %v4206_v25 = vmul.f32 %v8400_v0, %v9266_v50 }
 0x442   : > { %4341 = vst [vmem:[#allocation1 + $0x2] ss:$9 sm:$0xff] %v4202_v43  ;;  %v9300_v43 = vmul.f32 %v9280_v32, %v11057_v6 }
 0x443   : > { %4342 = vst [vmem:[#allocation1 + $0x3] ss:$9 sm:$0xff] %v4203_v1  ;;  %v2532_v1 = vpop.permute.xlu0 %2531 }
 0x444   : > { %4343 = vst [vmem:[#allocation1 + $0x4] ss:$9 sm:$0xff] %v4204_v9  ;;  %v9302_v35 = vmul.f32 %v2532_v1, %v2128_v13 }
 0x445   : > { %4344 = vst [vmem:[#allocation1 + $0x5] ss:$9 sm:$0xff] %v4205_v23 }
 0x446   : > { %11606 = vst [vmem:[#allocation163_spill] sm:$0xff] %v9300_v43  ;;  %v2831_v9 = vrot.slane %v9302_v35, 1  ;;  %v2833_v41 = vrot.slane %v9302_v35, 3  ;;  %v2834_v28 = vrot.slane %v9302_v35, 4  ;;  %v2835_v23 = vrot.slane %v9302_v35, 5 }
 0x447   : > { %4345 = vst [vmem:[#allocation1 + $0x6] ss:$9 sm:$0xff] %v4206_v25  ;;  %v2836_v51 = vrot.slane %v9302_v35, 6  ;;  %v2837_v6 = vrot.slane %v9302_v35, 7  ;;  %v4208_v43 = vmul.f32 %v11557_v27, %v2912_v58  ;;  %v11611_v27 = vrot.slane %v9204_v26, 4 }
 0x448   : > { %4346 = vst [vmem:[#allocation1 + $0x7] ss:$9 sm:$0xff] %v4207_v2  ;;  %v9314_v25 = vmul.f32 %v9180_v21, %v2831_v9  ;;  %v9317_v2 = vmul.f32 %v9243_v24, %v2833_v41  ;;  %v9320_v13 = vmul.f32 %v9198_v38, %v2834_v28  ;;  %v9325_v32 = vmul.f32 %v9138_v31, %v2835_v23 }
 0x449   : > { %11607 = vst [vmem:[#allocation164_spill] sm:$0xff] %v9302_v35  ;;  %v9328_v35 = vmul.f32 %v9272_v15, %v2836_v51  ;;  %v9331_v11 = vmul.f32 %v9250_v33, %v2837_v6  ;;  %v11064_v9 = vrot.slane %v8494_v45, 7  ;;  %v11609_v41 = vrot.slane %v8494_v45, 5 }
 0x44a   : > { %11608 = vst [vmem:[#allocation165_spill] sm:$0xff] %v9320_v13  ;;  %v9343_v58 = vmul.f32 %v9311_v3, %v11611_v27  ;;  %v11613_v51 = vrot.slane %v8494_v45, 6  ;;  %v11614_v13 = vrot.slane %v9204_v26, 3 }
 0x44b   : > { %v4209_v28 = vmul.f32 %v11558_v5, %v11609_v41  ;;  %v9348_v23 = vpop.permute.xlu0 %5639  ;;  %v4211_v5 = vmul.f32 %v8376_v17, %v11064_v9  ;;  %v4212_v41 = vmul.f32 %v11562_v7, %v8585_v34 }
 0x44c   : > { %11612 = vst [vmem:[#allocation167_spill] sm:$0xff] %v9343_v58  ;;  %v4210_v6 = vmul.f32 %v11560_v62, %v11613_v51  ;;  %v9358_v27 = vmul.f32 %v9348_v23, %v11614_v13  ;;  %v11616_v58 = vrot.slane %v8585_v34, 1  ;;  %v11617_v51 = vrot.slane %v8585_v34, 2 }
 0x44d   : > { %v11066_v13 = vrot.slane %v8550_v54, 3 }
 0x44e   : > { %11615 = vst [vmem:[#allocation168_spill] sm:$0xff] %v9358_v27  ;;  %v11621_v27 = vrot.slane %v8550_v54, 1 }
 0x44f   : > { %v9338_v1 = vld [vmem:[#allocation1] sm:$0xff] }
 0x450   : > { %11610 = vst [vmem:[#allocation166_spill] sm:$0xff] %v9338_v1  ;;  %v4214_v1 = vmul.f32 %v8400_v0, %v11617_v51  ;;  %v11622_v51 = vld [vmem:[#allocation97_spill] sm:$0xff] }
 0x451   : > { %4348 = vst [vmem:[#allocation1] ss:$9 sm:$0xff] %v4208_v43  ;;  %v4213_v43 = vmul.f32 %v11564_v16, %v11616_v58  ;;  %v4218_v58 = vmul.f32 %v11560_v62, %v8550_v54 }
 0x452   : > { %4349 = vst [vmem:[#allocation1 + $0x1] ss:$9 sm:$0xff] %v4209_v28  ;;  %v11618_v28 = vrot.slane %v8585_v34, 3 }
 0x453   : > { %4350 = vst [vmem:[#allocation1 + $0x2] ss:$9 sm:$0xff] %v4210_v6 }
 0x454   : > { %4351 = vst [vmem:[#allocation1 + $0x3] ss:$9 sm:$0xff] %v4211_v5  ;;  %v4215_v9 = vmul.f32 %v8374_v53, %v11618_v28  ;;  %v11620_v5 = vld [vmem:[#allocation102_spill] sm:$0xff]  ;;  %v11623_v28 = vrot.slane %v8550_v54, 2 }
 0x455   : > { %4352 = vst [vmem:[#allocation1 + $0x4] ss:$9 sm:$0xff] %v4212_v41  ;;  %v4219_v41 = vmul.f32 %v8376_v17, %v11621_v27 }
 0x456   : > { %4353 = vst [vmem:[#allocation1 + $0x5] ss:$9 sm:$0xff] %v4213_v43  ;;  %v11624_v43 = vrot.slane %v8550_v54, 4 }
 0x457   : > { %4354 = vst [vmem:[#allocation1 + $0x6] ss:$9 sm:$0xff] %v4214_v1  ;;  %v4220_v1 = vmul.f32 %v11562_v7, %v11623_v28  ;;  %v11065_v7 = vrot.slane %v8453_v44, 5  ;;  %v11629_v28 = vld [vmem:[#allocation100_spill] sm:$0xff] }
 0x458   : > { %4355 = vst [vmem:[#allocation1 + $0x7] ss:$9 sm:$0xff] %v4215_v9  ;;  %v4221_v9 = vmul.f32 %v11564_v16, %v11066_v13 }
 0x45f   : > { %v9370_v6 = vld [vmem:[#allocation1] sm:$0xff] }
 0x460   : > { %11619 = vst [vmem:[#allocation169_spill] sm:$0xff] %v9370_v6  ;;  %v11625_v6 = vrot.slane %v8550_v54, 5 }
 0x461   : > { %4357 = vst [vmem:[#allocation1] ss:$9 sm:$0xff] %v11620_v5  ;;  %v4222_v5 = vmul.f32 %v8400_v0, %v11624_v43  ;;  %v11630_v0 = vld [vmem:[#allocation104_spill] sm:$0xff]  ;;  %v2848_v43 = vrot.slane %v9049_v47, 5 }
 0x462   : > { %4358 = vst [vmem:[#allocation1 + $0x1] ss:$9 sm:$0xff] %v11622_v51  ;;  %v4223_v17 = vmul.f32 %v8374_v53, %v11625_v6  ;;  %v11628_v51 = vld [vmem:[#allocation88_spill] sm:$0xff]  ;;  %v4229_v53 = vmul.f32 %v11564_v16, %v11065_v7  ;;  %v2847_v6 = vrot.slane %v9049_v47, 4 }
 0x463   : > { %4359 = vst [vmem:[#allocation1 + $0x2] ss:$9 sm:$0xff] %v4218_v58  ;;  %v11627_v58 = vrot.slane %v8453_v44, 2 }
 0x464   : > { %4360 = vst [vmem:[#allocation1 + $0x3] ss:$9 sm:$0xff] %v4219_v41  ;;  %v4449_v16 = vmul.f32 %v8520_v37, %v2847_v6  ;;  %v2861_v6 = vrot.slane %v9088_v12, 5 }
 0x465   : > { %4361 = vst [vmem:[#allocation1 + $0x4] ss:$9 sm:$0xff] %v4220_v1  ;;  %v4226_v41 = vmul.f32 %v11560_v62, %v11627_v58  ;;  %v2846_v62 = vrot.slane %v9049_v47, 3  ;;  %v11631_v1 = vld [vmem:[#allocation84_spill] sm:$0xff]  ;;  %v2851_v58 = vrot.slane %v9082_v61, 1 }
 0x466   : > { %4362 = vst [vmem:[#allocation1 + $0x5] ss:$9 sm:$0xff] %v4221_v9 }
 0x467   : > { %4363 = vst [vmem:[#allocation1 + $0x6] ss:$9 sm:$0xff] %v4222_v5  ;;  %v4448_v9 = vmul.f32 %v11631_v1, %v2846_v62  ;;  %v2849_v5 = vrot.slane %v9049_v47, 6  ;;  %v2864_v62 = vrot.slane %v9132_v8, 1 }
 0x468   : > { %4364 = vst [vmem:[#allocation1 + $0x7] ss:$9 sm:$0xff] %v4223_v17  ;;  %v4450_v17 = vmul.f32 %v8477_v48, %v2848_v43 }
 0x469   : > { %v4460_v43 = vmul.f32 %v8560_v49, %v2864_v62 }
 0x46f   : > { %v9392_v27 = vld [vmem:[#allocation1] sm:$0xff] }
 0x470   : > { %11626 = vst [vmem:[#allocation102_spill] sm:$0xff] %v9392_v27 }
 0x471   : > { %4366 = vst [vmem:[#allocation1] ss:$9 sm:$0xff] %v11628_v51  ;;  %v4453_v51 = vmul.f32 %v8522_v55, %v9082_v61 }
 0x472   : > { %4367 = vst [vmem:[#allocation1 + $0x1] ss:$9 sm:$0xff] %v11629_v28  ;;  %v2852_v28 = vrot.slane %v9082_v61, 2 }
 0x473   : > { %4368 = vst [vmem:[#allocation1 + $0x2] ss:$9 sm:$0xff] %v4226_v41 }
 0x474   : > { %4369 = vst [vmem:[#allocation1 + $0x3] ss:$9 sm:$0xff] %v8624_v19 }
 0x475   : > { %4370 = vst [vmem:[#allocation1 + $0x4] ss:$9 sm:$0xff] %v11630_v0  ;;  %v4455_v0 = vmul.f32 %v8589_v39, %v2852_v28  ;;  %v4459_v28 = vmul.f32 %v8406_v14, %v9132_v8 }
 0x476   : > { %4371 = vst [vmem:[#allocation1 + $0x5] ss:$9 sm:$0xff] %v4229_v53  ;;  %v4454_v53 = vmul.f32 %v8446_v10, %v2851_v58 }
 0x477   : > { %4372 = vst [vmem:[#allocation1 + $0x6] ss:$9 sm:$0xff] %v8691_v42  ;;  %v2850_v42 = vrot.slane %v9049_v47, 7 }
 0x478   : > { %4373 = vst [vmem:[#allocation1 + $0x7] ss:$9 sm:$0xff] %v8596_v20  ;;  %v4451_v20 = vmul.f32 %v8406_v14, %v2849_v5  ;;  %v2073_v5 = vadd.f32 %v9237_v22, %v9103_v56 }
 0x479   : > { %v4452_v41 = vmul.f32 %v8560_v49, %v2850_v42 }
 0x47a   : > { %v2135_v56 = vmax.f32 %v2073_v5, 0.0 }
 0x47f   : > { %v9412_v19 = vld [vmem:[#allocation1] sm:$0xff] }
 0x480   : > { %11632 = vst [vmem:[#allocation97_spill] sm:$0xff] %v9412_v19  ;;  %v11635_v19 = vld [vmem:[#allocation91_spill] sm:$0xff] }
 0x481   : > { %4576 = vst [vmem:[#allocation1] ss:$9 sm:$0xff] %v4448_v9  ;;  %v2862_v9 = vrot.slane %v9088_v12, 6 }
 0x482   : > { %4578 = vst [vmem:[#allocation1 + $0x1] ss:$9 sm:$0xff] %v4449_v16  ;;  %v4456_v16 = vmul.f32 %v11631_v1, %v2861_v6 }
 0x483   : > { %4580 = vst [vmem:[#allocation1 + $0x2] ss:$9 sm:$0xff] %v4450_v17  ;;  %v2863_v17 = vrot.slane %v9088_v12, 7  ;;  %v4457_v58 = vmul.f32 %v8520_v37, %v2862_v9  ;;  %v11633_v9 = vld [vmem:[#allocation105_spill] sm:$0xff] }
 0x484   : > { %4582 = vst [vmem:[#allocation1 + $0x3] ss:$9 sm:$0xff] %v4451_v20  ;;  %v2866_v20 = vrot.slane %v9132_v8, 3 }
 0x485   : > { %4584 = vst [vmem:[#allocation1 + $0x4] ss:$9 sm:$0xff] %v4452_v41  ;;  %v4458_v41 = vmul.f32 %v8477_v48, %v2863_v17 }
 0x486   : > { %4586 = vst [vmem:[#allocation1 + $0x5] ss:$9 sm:$0xff] %v4453_v51  ;;  %v2865_v51 = vrot.slane %v9132_v8, 2  ;;  %v4462_v62 = vmul.f32 %v8446_v10, %v2866_v20 }
 0x487   : > { %4588 = vst [vmem:[#allocation1 + $0x6] ss:$9 sm:$0xff] %v4454_v53 }
 0x488   : > { %4590 = vst [vmem:[#allocation1 + $0x7] ss:$9 sm:$0xff] %v4455_v0  ;;  %v4461_v53 = vmul.f32 %v8522_v55, %v2865_v51  ;;  %v2867_v0 = vrot.slane %v9132_v8, 4 }
 0x48a   : > { %v4463_v6 = vmul.f32 %v8589_v39, %v2867_v0 }
 0x48f   : > { %v9432_v42 = vld [vmem:[#allocation1] sm:$0xff] }
 0x490   : > { %4596 = vst [vmem:[#allocation1 + $0x4] ss:$9 sm:$0xff] %v4460_v43  ;;  %v2655_v43 = vmul.f32 %v11633_v9, %v2135_v56 }
 0x491   : > { %4592 = vst [vmem:[#allocation1] ss:$9 sm:$0xff] %v4456_v16  ;;  %v2876_v16 = vrot.slane %v9134_v57, 7 }
 0x492   : > { %4593 = vst [vmem:[#allocation1 + $0x1] ss:$9 sm:$0xff] %v4457_v58  ;;  %v2877_v17 = vrot.slane %v2655_v43, 1  ;;  %v11634_v58 = vld [vmem:[#allocation61_spill] sm:$0xff]  ;;  %v2878_v51 = vrot.slane %v2655_v43, 2  ;;  %v2880_v13 = vrot.slane %v2655_v43, 4  ;;  %v4465_v20 = vmul.f32 %v8520_v37, %v2655_v43 }
 0x493   : > { %4594 = vst [vmem:[#allocation1 + $0x2] ss:$9 sm:$0xff] %v4458_v41  ;;  %v2078_v5 = vadd.f32 %v9237_v22, %v11634_v58  ;;  %v4464_v7 = vmul.f32 %v11631_v1, %v2876_v16  ;;  %v2879_v41 = vrot.slane %v2655_v43, 3  ;;  %v2882_v16 = vrot.slane %v2655_v43, 6 }
 0x494   : > { %4595 = vst [vmem:[#allocation1 + $0x3] ss:$9 sm:$0xff] %v4459_v28  ;;  %v4466_v0 = vmul.f32 %v8477_v48, %v2877_v17  ;;  %v4469_v9 = vmul.f32 %v8522_v55, %v2880_v13 }
 0x495   : > { %4597 = vst [vmem:[#allocation1 + $0x5] ss:$9 sm:$0xff] %v4461_v53  ;;  %v2881_v53 = vrot.slane %v2655_v43, 5  ;;  %v2137_v56 = vmax.f32 %v2078_v5, 0.0  ;;  %v4471_v17 = vmul.f32 %v8589_v39, %v2882_v16 }
 0x496   : > { %4598 = vst [vmem:[#allocation1 + $0x6] ss:$9 sm:$0xff] %v4462_v62  ;;  %v4467_v62 = vmul.f32 %v8406_v14, %v2878_v51 }
 0x497   : > { %4599 = vst [vmem:[#allocation1 + $0x7] ss:$9 sm:$0xff] %v4463_v6  ;;  %v4468_v6 = vmul.f32 %v8560_v49, %v2879_v41  ;;  %v4470_v58 = vmul.f32 %v8446_v10, %v2881_v53  ;;  %v9458_v27 = vmul.f32 %v11635_v19, %v2137_v56 }
 0x499   : > { %v2892_v5 = vrot.slane %v9458_v27, 3  ;;  %v2893_v51 = vrot.slane %v9458_v27, 4  ;;  %v2891_v13 = vrot.slane %v9458_v27, 2  ;;  %v2896_v19 = vrot.slane %v9458_v27, 7 }
 0x49b   : > { %v4473_v41 = vmul.f32 %v8520_v37, %v2891_v13  ;;  %v4474_v53 = vmul.f32 %v8477_v48, %v2892_v5  ;;  %v4475_v56 = vmul.f32 %v8406_v14, %v2893_v51  ;;  %v4478_v16 = vmul.f32 %v8446_v10, %v2896_v19 }
 0x49c   : > { %v2907_v51 = vrot.slane %v9266_v50, 5  ;;  %v2908_v13 = vrot.slane %v9266_v50, 6 }
 0x49e   : > { %v9450_v28 = vld [vmem:[#allocation1] sm:$0xff]  ;;  %v4482_v19 = vmul.f32 %v8477_v48, %v2907_v51 }
 0x49f   : > { %4601 = vst [vmem:[#allocation1] ss:$9 sm:$0xff] %v4464_v7  ;;  %v2890_v7 = vrot.slane %v9458_v27, 1 }
 0x4a0   : > { %4602 = vst [vmem:[#allocation1 + $0x1] ss:$9 sm:$0xff] %v4465_v20 }
 0x4a1   : > { %4603 = vst [vmem:[#allocation1 + $0x2] ss:$9 sm:$0xff] %v4466_v0  ;;  %v4472_v43 = vmul.f32 %v11631_v1, %v2890_v7  ;;  %v2894_v0 = vrot.slane %v9458_v27, 5  ;;  %v2906_v7 = vrot.slane %v9266_v50, 4 }
 0x4a2   : > { %4604 = vst [vmem:[#allocation1 + $0x3] ss:$9 sm:$0xff] %v4467_v62  ;;  %v2895_v62 = vrot.slane %v9458_v27, 6 }
 0x4a3   : > { %4605 = vst [vmem:[#allocation1 + $0x4] ss:$9 sm:$0xff] %v4468_v6  ;;  %v4476_v6 = vmul.f32 %v8560_v49, %v2894_v0  ;;  %v4483_v0 = vmul.f32 %v8406_v14, %v2908_v13 }
 0x4a4   : > { %4606 = vst [vmem:[#allocation1 + $0x5] ss:$9 sm:$0xff] %v4469_v9  ;;  %v4477_v9 = vmul.f32 %v8522_v55, %v2895_v62 }
 0x4a5   : > { %4607 = vst [vmem:[#allocation1 + $0x6] ss:$9 sm:$0xff] %v4470_v58  ;;  %v4479_v58 = vmul.f32 %v8589_v39, %v8503_v59 }
 0x4a6   : > { %4608 = vst [vmem:[#allocation1 + $0x7] ss:$9 sm:$0xff] %v4471_v17  ;;  %v2905_v17 = vrot.slane %v9266_v50, 3 }
 0x4a8   : > { %v4480_v5 = vmul.f32 %v11631_v1, %v2905_v17  ;;  %v2920_v17 = vrot.slane %v8585_v34, 5 }
 0x4aa   : > { %v4488_v51 = vmul.f32 %v11631_v1, %v2920_v17 }
 0x4ad   : > { %v9467_v20 = vld [vmem:[#allocation1] sm:$0xff] }
 0x4ae   : > { %11636 = vst [vmem:[#allocation88_spill] sm:$0xff] %v9467_v20  ;;  %v11752_v20 = vld [vmem:[#allocation45_spill] sm:$0xff] }
 0x4af   : > { %4610 = vst [vmem:[#allocation1] ss:$9 sm:$0xff] %v4472_v43  ;;  %v4481_v43 = vmul.f32 %v8520_v37, %v2906_v7  ;;  %v2922_v7 = vrot.slane %v8585_v34, 7 }
 0x4b0   : > { %4611 = vst [vmem:[#allocation1 + $0x1] ss:$9 sm:$0xff] %v4473_v41 }
 0x4b1   : > { %4612 = vst [vmem:[#allocation1 + $0x2] ss:$9 sm:$0xff] %v4474_v53  ;;  %v2909_v53 = vrot.slane %v9266_v50, 7 }
 0x4b2   : > { %4613 = vst [vmem:[#allocation1 + $0x3] ss:$9 sm:$0xff] %v4475_v56  ;;  %v2910_v56 = vrot.slane %v8494_v45, 1 }
 0x4b3   : > { %4614 = vst [vmem:[#allocation1 + $0x4] ss:$9 sm:$0xff] %v4476_v6  ;;  %v4484_v62 = vmul.f32 %v8560_v49, %v2909_v53  ;;  %v4485_v6 = vmul.f32 %v8522_v55, %v8494_v45  ;;  %v11640_v53 = vld [vmem:[#allocation117_spill] sm:$0xff] }
 0x4b4   : > { %4615 = vst [vmem:[#allocation1 + $0x5] ss:$9 sm:$0xff] %v4477_v9  ;;  %v2911_v9 = vrot.slane %v8494_v45, 2 }
 0x4b5   : > { %4616 = vst [vmem:[#allocation1 + $0x6] ss:$9 sm:$0xff] %v4478_v16  ;;  %v4486_v16 = vmul.f32 %v8446_v10, %v2910_v56  ;;  %v11642_v56 = vld [vmem:[#allocation103_spill] sm:$0xff] }
 0x4b6   : > { %4617 = vst [vmem:[#allocation1 + $0x7] ss:$9 sm:$0xff] %v4479_v58  ;;  %v4487_v58 = vmul.f32 %v8589_v39, %v2911_v9  ;;  %v11639_v39 = vld [vmem:[#allocation101_spill] sm:$0xff] }
 0x4b7   : > { %v11644_v9 = vld [vmem:[#allocation89_spill] sm:$0xff] }
 0x4bd   : > { %v9485_v41 = vld [vmem:[#allocation1] sm:$0xff] }
 0x4be   : > { %11637 = vst [vmem:[#allocation100_spill] sm:$0xff] %v9485_v41  ;;  %v11751_v41 = vld [vmem:[#allocation44_spill] sm:$0xff] }
 0x4bf   : > { %4619 = vst [vmem:[#allocation1] ss:$9 sm:$0xff] %v4480_v5  ;;  %v2921_v5 = vrot.slane %v8585_v34, 6 }
 0x4c0   : > { %4620 = vst [vmem:[#allocation1 + $0x1] ss:$9 sm:$0xff] %v4481_v43 }
 0x4c1   : > { %4621 = vst [vmem:[#allocation1 + $0x2] ss:$9 sm:$0xff] %v4482_v19  ;;  %v4489_v13 = vmul.f32 %v8520_v37, %v2921_v5  ;;  %v4490_v19 = vmul.f32 %v8477_v48, %v2922_v7  ;;  %v11646_v5 = vld [vmem:[#allocation120_spill] sm:$0xff] }
 0x4c2   : > { %4622 = vst [vmem:[#allocation1 + $0x3] ss:$9 sm:$0xff] %v4483_v0  ;;  %v11641_v0 = vld [vmem:[#allocation110_spill] sm:$0xff] }
 0x4c3   : > { %4623 = vst [vmem:[#allocation1 + $0x4] ss:$9 sm:$0xff] %v4484_v62  ;;  %v11643_v62 = vld [vmem:[#allocation113_spill] sm:$0xff] }
 0x4c4   : > { %4624 = vst [vmem:[#allocation1 + $0x5] ss:$9 sm:$0xff] %v4485_v6  ;;  %v2935_v6 = vrot.slane %v8550_v54, 7 }
 0x4c5   : > { %4625 = vst [vmem:[#allocation1 + $0x6] ss:$9 sm:$0xff] %v4486_v16  ;;  %v2100_v16 = vadd.f32 %v9237_v22, %v11644_v9  ;;  %v11649_v22 = vld [vmem:[#allocation125_spill] sm:$0xff] }
 0x4c6   : > { %4626 = vst [vmem:[#allocation1 + $0x7] ss:$9 sm:$0xff] %v4487_v58  ;;  %v4496_v58 = vmul.f32 %v11631_v1, %v2935_v6 }
 0x4c7   : > { %v2146_v7 = vmax.f32 %v2100_v16, 0.0 }
 0x4cd   : > { %v9502_v43 = vld [vmem:[#allocation1] sm:$0xff] }
 0x4ce   : > { %11638 = vst [vmem:[#allocation104_spill] sm:$0xff] %v9502_v43 }
 0x4cf   : > { %4628 = vst [vmem:[#allocation1] ss:$9 sm:$0xff] %v4488_v51  ;;  %v6322_v51 = vunpack.i.h.bf16 %v11646_v5 }
 0x4d0   : > { %4629 = vst [vmem:[#allocation1 + $0x1] ss:$9 sm:$0xff] %v4489_v13  ;;  %v11647_v13 = vld [vmem:[#allocation123_spill] sm:$0xff] }
 0x4d1   : > { %4630 = vst [vmem:[#allocation1 + $0x2] ss:$9 sm:$0xff] %v4490_v19  ;;  %v9521_v19 = vmul.f32 %v6322_v51, %v2146_v7 }
 0x4d2   : > { %4631 = vst [vmem:[#allocation1 + $0x3] ss:$9 sm:$0xff] %v11639_v39  ;;  %v11648_v39 = vld [vmem:[#allocation124_spill] sm:$0xff] }
 0x4d3   : > { %4632 = vst [vmem:[#allocation1 + $0x4] ss:$9 sm:$0xff] %v11640_v53  ;;  %v11650_v53 = vld [vmem:[#allocation126_spill] sm:$0xff]  ;;  %v2954_v6 = vrot.slane %v9521_v19, 6 }
 0x4d4   : > { %4633 = vst [vmem:[#allocation1 + $0x5] ss:$9 sm:$0xff] %v11641_v0  ;;  %v2949_v0 = vrot.slane %v9521_v19, 1 }
 0x4d5   : > { %4634 = vst [vmem:[#allocation1 + $0x6] ss:$9 sm:$0xff] %v11642_v56  ;;  %v2950_v56 = vrot.slane %v9521_v19, 2 }
 0x4d6   : > { %4635 = vst [vmem:[#allocation1 + $0x7] ss:$9 sm:$0xff] %v11643_v62  ;;  %v4504_v62 = vmul.f32 %v11631_v1, %v2949_v0 }
 0x4d7   : > { %v4505_v9 = vmul.f32 %v8520_v37, %v2950_v56  ;;  %v11652_v37 = vld [vmem:[#allocation119_spill] sm:$0xff]  ;;  %v11659_v56 = vld [vmem:[#allocation121_spill] sm:$0xff] }
 0x4dd   : > { %v9514_v17 = vld [vmem:[#allocation1] sm:$0xff] }
 0x4de   : > { %11645 = vst [vmem:[#allocation84_spill] sm:$0xff] %v9514_v17  ;;  %v11747_v17 = vld [vmem:[#allocation33_spill] sm:$0xff] }
 0x4df   : > { %4637 = vst [vmem:[#allocation1] ss:$9 sm:$0xff] %v4496_v58  ;;  %v2955_v58 = vrot.slane %v9521_v19, 7 }
 0x4e0   : > { %4638 = vst [vmem:[#allocation1 + $0x1] ss:$9 sm:$0xff] %v8636_v30  ;;  %v2951_v30 = vrot.slane %v9521_v19, 3 }
 0x4e1   : > { %4639 = vst [vmem:[#allocation1 + $0x2] ss:$9 sm:$0xff] %v8639_v18  ;;  %v2952_v18 = vrot.slane %v9521_v19, 4  ;;  %v4510_v1 = vmul.f32 %v8446_v10, %v2955_v58  ;;  %v11660_v10 = vrot.slane %v9039_v36, 6 }
 0x4e2   : > { %4640 = vst [vmem:[#allocation1 + $0x3] ss:$9 sm:$0xff] %v8642_v40  ;;  %v2953_v40 = vrot.slane %v9521_v19, 5  ;;  %v4506_v7 = vmul.f32 %v8477_v48, %v2951_v30  ;;  %v11654_v48 = vld [vmem:[#allocation96_spill] sm:$0xff] }
 0x4e3   : > { %4641 = vst [vmem:[#allocation1 + $0x4] ss:$9 sm:$0xff] %v11647_v13  ;;  %v4507_v5 = vmul.f32 %v8406_v14, %v2952_v18  ;;  %v4509_v13 = vmul.f32 %v8522_v55, %v2954_v6  ;;  %v11655_v14 = vrot.slane %v9039_v36, 4  ;;  %v11658_v55 = vrot.slane %v9039_v36, 5  ;;  %v11661_v18 = vld [vmem:[#allocation106_spill] sm:$0xff] }
 0x4e4   : > { %4642 = vst [vmem:[#allocation1 + $0x5] ss:$9 sm:$0xff] %v11648_v39  ;;  %v4508_v51 = vmul.f32 %v8560_v49, %v2953_v40  ;;  %v11653_v39 = vrot.slane %v9039_v36, 3  ;;  %v4787_v40 = vmul.f32 %v11661_v18, %v11660_v10  ;;  %v11669_v10 = vrot.slane %v9088_v12, 1 }
 0x4e5   : > { %4643 = vst [vmem:[#allocation1 + $0x6] ss:$9 sm:$0xff] %v11649_v22  ;;  %v4786_v30 = vmul.f32 %v11659_v56, %v11658_v55 }
 0x4e6   : > { %4644 = vst [vmem:[#allocation1 + $0x7] ss:$9 sm:$0xff] %v11650_v53  ;;  %v4784_v22 = vmul.f32 %v11654_v48, %v11653_v39  ;;  %v11656_v53 = vld [vmem:[#allocation129_spill] sm:$0xff] }
 0x4e7   : > { %v4785_v0 = vmul.f32 %v11656_v53, %v11655_v14 }
 0x4ed   : > { %v9534_v16 = vld [vmem:[#allocation1] sm:$0xff] }
 0x4ee   : > { %11651 = vst [vmem:[#allocation105_spill] sm:$0xff] %v9534_v16 }
 0x4ef   : > { %4646 = vst [vmem:[#allocation1] ss:$9 sm:$0xff] %v4504_v62  ;;  %v11662_v62 = vrot.slane %v9039_v36, 7 }
 0x4f0   : > { %4647 = vst [vmem:[#allocation1 + $0x1] ss:$9 sm:$0xff] %v4505_v9  ;;  %v11663_v9 = vld [vmem:[#allocation133_spill] sm:$0xff] }
 0x4f1   : > { %4648 = vst [vmem:[#allocation1 + $0x2] ss:$9 sm:$0xff] %v4506_v7  ;;  %v4788_v6 = vmul.f32 %v9084_v52, %v11662_v62  ;;  %v4789_v58 = vmul.f32 %v11663_v9, %v9049_v47  ;;  %v2845_v7 = vrot.slane %v9049_v47, 2  ;;  %v11670_v62 = vrot.slane %v9088_v12, 2 }
 0x4f2   : > { %4649 = vst [vmem:[#allocation1 + $0x3] ss:$9 sm:$0xff] %v4507_v5  ;;  %v11664_v5 = vrot.slane %v9049_v47, 1  ;;  %v11668_v47 = vrot.slane %v9082_v61, 7 }
 0x4f3   : > { %4650 = vst [vmem:[#allocation1 + $0x4] ss:$9 sm:$0xff] %v4508_v51  ;;  %v11665_v51 = vld [vmem:[#allocation118_spill] sm:$0xff] }
 0x4f4   : > { %4651 = vst [vmem:[#allocation1 + $0x5] ss:$9 sm:$0xff] %v4509_v13  ;;  %v4790_v13 = vmul.f32 %v11665_v51, %v11664_v5  ;;  %v4794_v55 = vmul.f32 %v11659_v56, %v11668_v47 }
 0x4f5   : > { %4652 = vst [vmem:[#allocation1 + $0x6] ss:$9 sm:$0xff] %v4510_v1  ;;  %v4791_v1 = vmul.f32 %v9117_v29, %v2845_v7 }
 0x4f6   : > { %4653 = vst [vmem:[#allocation1 + $0x7] ss:$9 sm:$0xff] %v11652_v37  ;;  %v11666_v37 = vrot.slane %v9082_v61, 5 }
 0x4f8   : > { %v4792_v39 = vmul.f32 %v11654_v48, %v11666_v37  ;;  %v4801_v37 = vmul.f32 %v11656_v53, %v9134_v57 }
 0x4fd   : > { %v9549_v49 = vld [vmem:[#allocation1] sm:$0xff] }
 0x4fe   : > { %11657 = vst [vmem:[#allocation61_spill] sm:$0xff] %v9549_v49 }
 0x4ff   : > { %4912 = vst [vmem:[#allocation1] ss:$9 sm:$0xff] %v4784_v22  ;;  %v11667_v22 = vrot.slane %v9082_v61, 6  ;;  %v11671_v61 = vrot.slane %v9088_v12, 3 }
 0x500   : > { %4914 = vst [vmem:[#allocation1 + $0x1] ss:$9 sm:$0xff] %v4785_v0 }
 0x501   : > { %4916 = vst [vmem:[#allocation1 + $0x2] ss:$9 sm:$0xff] %v4786_v30  ;;  %v4793_v14 = vmul.f32 %v11656_v53, %v11667_v22  ;;  %v4795_v30 = vmul.f32 %v11661_v18, %v9088_v12  ;;  %v4798_v7 = vmul.f32 %v11665_v51, %v11671_v61  ;;  %v11673_v22 = vrot.slane %v9134_v57, 1 }
 0x502   : > { %4918 = vst [vmem:[#allocation1 + $0x3] ss:$9 sm:$0xff] %v4787_v40  ;;  %v4796_v40 = vmul.f32 %v9084_v52, %v11669_v10  ;;  %v11678_v61 = vrot.slane %v9178_v60, 1 }
 0x503   : > { %4920 = vst [vmem:[#allocation1 + $0x4] ss:$9 sm:$0xff] %v4788_v6  ;;  %v4797_v6 = vmul.f32 %v11663_v9, %v11670_v62  ;;  %v11677_v62 = vrot.slane %v9134_v57, 5 }
 0x504   : > { %4922 = vst [vmem:[#allocation1 + $0x5] ss:$9 sm:$0xff] %v4789_v58  ;;  %v2860_v58 = vrot.slane %v9088_v12, 4  ;;  %v4802_v12 = vmul.f32 %v11659_v56, %v11673_v22  ;;  %v11682_v22 = vrot.slane %v9178_v60, 4 }
 0x505   : > { %4924 = vst [vmem:[#allocation1 + $0x6] ss:$9 sm:$0xff] %v4790_v13  ;;  %v11672_v13 = vrot.slane %v9132_v8, 7 }
 0x506   : > { %4926 = vst [vmem:[#allocation1 + $0x7] ss:$9 sm:$0xff] %v4791_v1  ;;  %v4799_v5 = vmul.f32 %v9117_v29, %v2860_v58 }
 0x507   : > { %v4800_v1 = vmul.f32 %v11654_v48, %v11672_v13 }
 0x50d   : > { %v9573_v0 = vld [vmem:[#allocation1] sm:$0xff] }
 0x50e   : > { %4928 = vst [vmem:[#allocation1] ss:$9 sm:$0xff] %v4792_v39 }
 0x50f   : > { %4929 = vst [vmem:[#allocation1 + $0x1] ss:$9 sm:$0xff] %v4793_v14  ;;  %v11674_v14 = vrot.slane %v9134_v57, 2 }
 0x510   : > { %4930 = vst [vmem:[#allocation1 + $0x2] ss:$9 sm:$0xff] %v4794_v55  ;;  %v11675_v55 = vrot.slane %v9134_v57, 3 }
 0x511   : > { %4931 = vst [vmem:[#allocation1 + $0x3] ss:$9 sm:$0xff] %v4795_v30  ;;  %v4803_v47 = vmul.f32 %v11661_v18, %v11674_v14  ;;  %v11676_v30 = vrot.slane %v9134_v57, 4  ;;  %v11683_v14 = vrot.slane %v9178_v60, 5 }
 0x512   : > { %4932 = vst [vmem:[#allocation1 + $0x4] ss:$9 sm:$0xff] %v4796_v40  ;;  %v4804_v8 = vmul.f32 %v9084_v52, %v11675_v55  ;;  %v2875_v40 = vrot.slane %v9134_v57, 6  ;;  %v11681_v57 = vrot.slane %v9178_v60, 3 }
 0x513   : > { %4933 = vst [vmem:[#allocation1 + $0x5] ss:$9 sm:$0xff] %v4797_v6  ;;  %v4805_v10 = vmul.f32 %v11663_v9, %v11676_v30  ;;  %v4806_v6 = vmul.f32 %v11665_v51, %v11677_v62  ;;  %v11687_v62 = vld [vmem:[#allocation98_spill] sm:$0xff] }
 0x514   : > { %4934 = vst [vmem:[#allocation1 + $0x6] ss:$9 sm:$0xff] %v4798_v7  ;;  %v4807_v58 = vmul.f32 %v9117_v29, %v2875_v40  ;;  %v4808_v7 = vmul.f32 %v11654_v48, %v11678_v61  ;;  %v4812_v48 = vmul.f32 %v9084_v52, %v11683_v14  ;;  %v4827_v14 = vmul.f32 %v11661_v18, %v8585_v34 }
 0x515   : > { %4935 = vst [vmem:[#allocation1 + $0x7] ss:$9 sm:$0xff] %v4799_v5  ;;  %v11679_v5 = vrot.slane %v9178_v60, 2 }
 0x517   : > { %v4809_v13 = vmul.f32 %v11656_v53, %v11679_v5  ;;  %v11691_v5 = vld [vmem:[#allocation107_spill] sm:$0xff] }
 0x51c   : > { %v9596_v39 = vld [vmem:[#allocation1] sm:$0xff] }
 0x51d   : > { %4937 = vst [vmem:[#allocation1] ss:$9 sm:$0xff] %v4800_v1 }
 0x51e   : > { %4938 = vst [vmem:[#allocation1 + $0x1] ss:$9 sm:$0xff] %v4801_v37  ;;  %v4810_v37 = vmul.f32 %v11659_v56, %v11681_v57 }
 0x51f   : > { %4939 = vst [vmem:[#allocation1 + $0x2] ss:$9 sm:$0xff] %v4802_v12  ;;  %v4811_v12 = vmul.f32 %v11661_v18, %v11682_v22  ;;  %v11694_v22 = vrot.slane %v8494_v45, 7  ;;  %v4833_v18 = vmul.f32 %v11656_v53, %v8550_v54  ;;  %v11706_v53 = vld [vmem:[#allocation111_spill] sm:$0xff] }
 0x520   : > { %4940 = vst [vmem:[#allocation1 + $0x3] ss:$9 sm:$0xff] %v4803_v47  ;;  %v11684_v47 = vrot.slane %v9178_v60, 6 }
 0x521   : > { %4941 = vst [vmem:[#allocation1 + $0x4] ss:$9 sm:$0xff] %v4804_v8  ;;  %v11685_v8 = vrot.slane %v9178_v60, 7  ;;  %v11690_v60 = vld [vmem:[#allocation122_spill] sm:$0xff] }
 0x522   : > { %4942 = vst [vmem:[#allocation1 + $0x5] ss:$9 sm:$0xff] %v4805_v10  ;;  %v4813_v55 = vmul.f32 %v11663_v9, %v11684_v47  ;;  %v4815_v10 = vmul.f32 %v9117_v29, %v9458_v27  ;;  %v2904_v27 = vrot.slane %v9266_v50, 2  ;;  %v2919_v47 = vrot.slane %v8585_v34, 4 }
 0x523   : > { %4943 = vst [vmem:[#allocation1 + $0x6] ss:$9 sm:$0xff] %v4806_v6  ;;  %v4814_v30 = vmul.f32 %v11665_v51, %v11685_v8  ;;  %v11688_v6 = vld [vmem:[#allocation130_spill] sm:$0xff] }
 0x524   : > { %4944 = vst [vmem:[#allocation1 + $0x7] ss:$9 sm:$0xff] %v4807_v58  ;;  %v11689_v58 = vrot.slane %v8503_v59, 7  ;;  %v4831_v45 = vmul.f32 %v9117_v29, %v2919_v47  ;;  %v11719_v47 = vld [vmem:[#allocation72_spill] sm:$0xff] }
 0x526   : > { %v4820_v61 = vmul.f32 %v9084_v52, %v11689_v58  ;;  %v11704_v58 = vld [vmem:[#allocation115_spill] sm:$0xff] }
 0x52b   : > { %v9621_v1 = vld [vmem:[#allocation1] sm:$0xff] }
 0x52c   : > { %11680 = vst [vmem:[#allocation91_spill] sm:$0xff] %v9621_v1 }
 0x52d   : > { %4946 = vst [vmem:[#allocation1] ss:$9 sm:$0xff] %v4808_v7  ;;  %v4821_v7 = vmul.f32 %v11663_v9, %v9266_v50  ;;  %v4826_v9 = vmul.f32 %v11659_v56, %v11694_v22  ;;  %v11699_v56 = vld [vmem:[#allocation114_spill] sm:$0xff]  ;;  %v4847_v22 = vmul.f32 %v9117_v29, %v9521_v19 }
 0x52e   : > { %4947 = vst [vmem:[#allocation1 + $0x1] ss:$9 sm:$0xff] %v4809_v13  ;;  %v11692_v13 = vrot.slane %v9266_v50, 1  ;;  %v11696_v50 = vld [vmem:[#allocation131_spill] sm:$0xff] }
 0x52f   : > { %4948 = vst [vmem:[#allocation1 + $0x2] ss:$9 sm:$0xff] %v4810_v37  ;;  %v4823_v37 = vmul.f32 %v9117_v29, %v2904_v27  ;;  %v11708_v27 = vld [vmem:[#allocation109_spill] sm:$0xff] }
 0x530   : > { %4949 = vst [vmem:[#allocation1 + $0x3] ss:$9 sm:$0xff] %v4811_v12  ;;  %v4822_v57 = vmul.f32 %v11665_v51, %v11692_v13  ;;  %v11695_v12 = vld [vmem:[#allocation99_spill] sm:$0xff]  ;;  %v11697_v51 = vrot.slane %v8585_v34, 1  ;;  %v11710_v13 = vrot.slane %v8453_v44, 5  ;;  %v5058_v44 = vmul.f32 %v9023_v46, %v7883_v63 }
 0x531   : > { %4950 = vst [vmem:[#allocation1 + $0x4] ss:$9 sm:$0xff] %v4812_v48 }
 0x532   : > { %4951 = vst [vmem:[#allocation1 + $0x5] ss:$9 sm:$0xff] %v4813_v55  ;;  %v4828_v48 = vmul.f32 %v9084_v52, %v11697_v51  ;;  %v11698_v55 = vld [vmem:[#allocation134_spill] sm:$0xff] }
 0x533   : > { %4952 = vst [vmem:[#allocation1 + $0x6] ss:$9 sm:$0xff] %v4814_v30  ;;  %v11701_v30 = vld [vmem:[#allocation108_spill] sm:$0xff] }
 0x534   : > { %4953 = vst [vmem:[#allocation1 + $0x7] ss:$9 sm:$0xff] %v4815_v10  ;;  %v11702_v10 = vrot.slane %v8550_v54, 3 }
 0x536   : > { %v4836_v34 = vmul.f32 %v9084_v52, %v11702_v10  ;;  %v11724_v10 = vld [vmem:[#allocation22_spill] sm:$0xff] }
 0x53b   : > { %v9640_v40 = vld [vmem:[#allocation1] sm:$0xff] }
 0x53c   : > { %11686 = vst [vmem:[#allocation101_spill] sm:$0xff] %v9640_v40  ;;  %v11749_v40 = vld [vmem:[#allocation35_spill] sm:$0xff] }
 0x53d   : > { %4955 = vst [vmem:[#allocation1] ss:$9 sm:$0xff] %v11687_v62  ;;  %v11703_v62 = vld [vmem:[#allocation127_spill] sm:$0xff] }
 0x53e   : > { %4956 = vst [vmem:[#allocation1 + $0x1] ss:$9 sm:$0xff] %v11688_v6  ;;  %v2934_v6 = vrot.slane %v8550_v54, 6  ;;  %v4844_v54 = vmul.f32 %v9084_v52, %v11710_v13 }
 0x53f   : > { %4957 = vst [vmem:[#allocation1 + $0x2] ss:$9 sm:$0xff] %v11690_v60  ;;  %v11705_v60 = vld [vmem:[#allocation135_spill] sm:$0xff] }
 0x540   : > { %4958 = vst [vmem:[#allocation1 + $0x3] ss:$9 sm:$0xff] %v11691_v5  ;;  %v11709_v5 = vld [vmem:[#allocation132_spill] sm:$0xff] }
 0x541   : > { %4959 = vst [vmem:[#allocation1 + $0x4] ss:$9 sm:$0xff] %v4820_v61  ;;  %v4839_v61 = vmul.f32 %v9117_v29, %v2934_v6  ;;  %v11721_v29 = vld [vmem:[#allocation85_spill] sm:$0xff]  ;;  %v11726_v6 = vld [vmem:[#allocation12_spill] sm:$0xff] }
 0x542   : > { %4960 = vst [vmem:[#allocation1 + $0x5] ss:$9 sm:$0xff] %v4821_v7 }
 0x543   : > { %4961 = vst [vmem:[#allocation1 + $0x6] ss:$9 sm:$0xff] %v4822_v57  ;;  %v11711_v57 = vld [vmem:[#allocation128_spill] sm:$0xff] }
 0x544   : > { %4962 = vst [vmem:[#allocation1 + $0x7] ss:$9 sm:$0xff] %v4823_v37  ;;  %v11712_v37 = vld [vmem:[#allocation116_spill] sm:$0xff] }
 0x54b   : > { %v9656_v59 = vld [vmem:[#allocation1] sm:$0xff] }
 0x54c   : > { %11693 = vst [vmem:[#allocation117_spill] sm:$0xff] %v9656_v59 }
 0x54d   : > { %4964 = vst [vmem:[#allocation1] ss:$9 sm:$0xff] %v11695_v12  ;;  %v11714_v12 = vld [vmem:[#allocation112_spill] sm:$0xff] }
 0x54e   : > { %4965 = vst [vmem:[#allocation1 + $0x1] ss:$9 sm:$0xff] %v11696_v50 }
 0x54f   : > { %4966 = vst [vmem:[#allocation1 + $0x2] ss:$9 sm:$0xff] %v4826_v9  ;;  %v11713_v9 = vld [vmem:[#allocation136_spill] sm:$0xff] }
 0x550   : > { %4967 = vst [vmem:[#allocation1 + $0x3] ss:$9 sm:$0xff] %v4827_v14  ;;  %v11715_v14 = vld [vmem:[#allocation9_spill] sm:$0xff] }
 0x551   : > { %4968 = vst [vmem:[#allocation1 + $0x4] ss:$9 sm:$0xff] %v4828_v48  ;;  %v11716_v50 = vrot.slane %v11715_v14, 2  ;;  %v11718_v48 = vld [vmem:[#allocation11_spill] sm:$0xff]  ;;  %v11734_v14 = vld [vmem:[#allocation28_spill] sm:$0xff] }
 0x552   : > { %4969 = vst [vmem:[#allocation1 + $0x5] ss:$9 sm:$0xff] %v11698_v55  ;;  %v11720_v55 = vld [vmem:[#allocation13_spill] sm:$0xff] }
 0x553   : > { %4970 = vst [vmem:[#allocation1 + $0x6] ss:$9 sm:$0xff] %v11699_v56  ;;  %v5057_v51 = vmul.f32 %v9086_v4, %v11716_v50  ;;  %v5060_v19 = vmul.f32 %v11721_v29, %v11720_v55  ;;  %v11722_v56 = vld [vmem:[#allocation14_spill] sm:$0xff]  ;;  %v5068_v50 = vmul.f32 %v11721_v29, %v11734_v14 }
 0x554   : > { %4971 = vst [vmem:[#allocation1 + $0x7] ss:$9 sm:$0xff] %v4831_v45  ;;  %v5059_v45 = vmul.f32 %v11719_v47, %v11718_v48 }
 0x55b   : > { %v9674_v8 = vld [vmem:[#allocation1] sm:$0xff] }
 0x55c   : > { %11700 = vst [vmem:[#allocation110_spill] sm:$0xff] %v9674_v8  ;;  %v11746_v8 = vld [vmem:[#allocation32_spill] sm:$0xff] }
 0x55d   : > { %4973 = vst [vmem:[#allocation1] ss:$9 sm:$0xff] %v11701_v30 }
 0x55e   : > { %4974 = vst [vmem:[#allocation1 + $0x1] ss:$9 sm:$0xff] %v4833_v18  ;;  %v11723_v18 = vld [vmem:[#allocation75_spill] sm:$0xff] }
 0x55f   : > { %4975 = vst [vmem:[#allocation1 + $0x2] ss:$9 sm:$0xff] %v11703_v62  ;;  %v5061_v30 = vmul.f32 %v11723_v18, %v11722_v56 }
 0x560   : > { %4976 = vst [vmem:[#allocation1 + $0x3] ss:$9 sm:$0xff] %v11704_v58  ;;  %v11727_v58 = vld [vmem:[#allocation95_spill] sm:$0xff] }
 0x561   : > { %4977 = vst [vmem:[#allocation1 + $0x4] ss:$9 sm:$0xff] %v4836_v34  ;;  %v11725_v34 = vld [vmem:[#allocation152_spill] sm:$0xff]  ;;  %v5079_v59 = vmul.f32 %v11727_v58, %v11746_v8 }
 0x562   : > { %4978 = vst [vmem:[#allocation1 + $0x5] ss:$9 sm:$0xff] %v11705_v60  ;;  %v5062_v62 = vmul.f32 %v11725_v34, %v11724_v10  ;;  %v11728_v60 = vld [vmem:[#allocation23_spill] sm:$0xff] }
 0x563   : > { %4979 = vst [vmem:[#allocation1 + $0x6] ss:$9 sm:$0xff] %v11706_v53  ;;  %v11729_v53 = vld [vmem:[#allocation87_spill] sm:$0xff] }
 0x564   : > { %4980 = vst [vmem:[#allocation1 + $0x7] ss:$9 sm:$0xff] %v4839_v61  ;;  %v5063_v61 = vmul.f32 %v11727_v58, %v11726_v6  ;;  %v5080_v43 = vmul.f32 %v11729_v53, %v11747_v17  ;;  %v11753_v17 = vld [vmem:[#allocation46_spill] sm:$0xff] }
 0x56b   : > { %v9686_v7 = vld [vmem:[#allocation1] sm:$0xff] }
 0x56c   : > { %11707 = vst [vmem:[#allocation103_spill] sm:$0xff] %v9686_v7 }
 0x56d   : > { %4982 = vst [vmem:[#allocation1] ss:$9 sm:$0xff] %v11708_v27  ;;  %v5064_v27 = vmul.f32 %v11729_v53, %v11728_v60 }
 0x56e   : > { %4983 = vst [vmem:[#allocation1 + $0x1] ss:$9 sm:$0xff] %v11709_v5  ;;  %v11730_v5 = vld [vmem:[#allocation16_spill] sm:$0xff] }
 0x56f   : > { %4984 = vst [vmem:[#allocation1 + $0x2] ss:$9 sm:$0xff] %v11711_v57  ;;  %v11731_v13 = vrot.slane %v11730_v5, 4  ;;  %v11732_v57 = vld [vmem:[#allocation18_spill] sm:$0xff] }
 0x570   : > { %4985 = vst [vmem:[#allocation1 + $0x3] ss:$9 sm:$0xff] %v11712_v37  ;;  %v5066_v37 = vmul.f32 %v9023_v46, %v11732_v57 }
 0x571   : > { %4986 = vst [vmem:[#allocation1 + $0x4] ss:$9 sm:$0xff] %v4844_v54  ;;  %v5065_v54 = vmul.f32 %v9086_v4, %v11731_v13  ;;  %v11739_v13 = vld [vmem:[#allocation25_spill] sm:$0xff] }
 0x572   : > { %4987 = vst [vmem:[#allocation1 + $0x5] ss:$9 sm:$0xff] %v11713_v9  ;;  %v11733_v9 = vld [vmem:[#allocation19_spill] sm:$0xff] }
 0x573   : > { %4988 = vst [vmem:[#allocation1 + $0x6] ss:$9 sm:$0xff] %v11714_v12  ;;  %v5067_v12 = vmul.f32 %v11719_v47, %v11733_v9 }
 0x574   : > { %4989 = vst [vmem:[#allocation1 + $0x7] ss:$9 sm:$0xff] %v4847_v22 }
 0x57b   : > { %v9704_v52 = vld [vmem:[#allocation1] sm:$0xff] }
 0x57c   : > { %11717 = vst [vmem:[#allocation113_spill] sm:$0xff] %v9704_v52  ;;  %v11741_v52 = vld [vmem:[#allocation27_spill] sm:$0xff] }
 0x57d   : > { %5185 = vst [vmem:[#allocation1] ss:$9 sm:$0xff] %v5057_v51  ;;  %v11735_v51 = vld [vmem:[#allocation17_spill] sm:$0xff] }
 0x57e   : > { %5187 = vst [vmem:[#allocation1 + $0x1] ss:$9 sm:$0xff] %v5058_v44  ;;  %v5069_v44 = vmul.f32 %v11723_v18, %v11735_v51 }
 0x57f   : > { %5189 = vst [vmem:[#allocation1 + $0x2] ss:$9 sm:$0xff] %v5059_v45  ;;  %v11736_v45 = vld [vmem:[#allocation29_spill] sm:$0xff] }
 0x580   : > { %5191 = vst [vmem:[#allocation1 + $0x3] ss:$9 sm:$0xff] %v5060_v19  ;;  %v5070_v19 = vmul.f32 %v11725_v34, %v11736_v45 }
 0x581   : > { %5193 = vst [vmem:[#allocation1 + $0x4] ss:$9 sm:$0xff] %v5061_v30  ;;  %v11737_v30 = vld [vmem:[#allocation31_spill] sm:$0xff] }
 0x582   : > { %5195 = vst [vmem:[#allocation1 + $0x5] ss:$9 sm:$0xff] %v5062_v62  ;;  %v5071_v62 = vmul.f32 %v11727_v58, %v11737_v30 }
 0x583   : > { %5197 = vst [vmem:[#allocation1 + $0x6] ss:$9 sm:$0xff] %v5063_v61  ;;  %v11738_v61 = vld [vmem:[#allocation24_spill] sm:$0xff] }
 0x584   : > { %5199 = vst [vmem:[#allocation1 + $0x7] ss:$9 sm:$0xff] %v5064_v27  ;;  %v5072_v27 = vmul.f32 %v11729_v53, %v11738_v61 }
 0x58b   : > { %v9723_v22 = vld [vmem:[#allocation1] sm:$0xff] }
 0x58c   : > { %5201 = vst [vmem:[#allocation1] ss:$9 sm:$0xff] %v5065_v54  ;;  %v11740_v54 = vrot.slane %v11739_v13, 6 }
 0x58d   : > { %5202 = vst [vmem:[#allocation1 + $0x1] ss:$9 sm:$0xff] %v5066_v37 }
 0x58e   : > { %5203 = vst [vmem:[#allocation1 + $0x2] ss:$9 sm:$0xff] %v5067_v12  ;;  %v5073_v37 = vmul.f32 %v9086_v4, %v11740_v54  ;;  %v5074_v12 = vmul.f32 %v9023_v46, %v11741_v52 }
 0x58f   : > { %5204 = vst [vmem:[#allocation1 + $0x3] ss:$9 sm:$0xff] %v5068_v50  ;;  %v11742_v50 = vld [vmem:[#allocation26_spill] sm:$0xff] }
 0x590   : > { %5205 = vst [vmem:[#allocation1 + $0x4] ss:$9 sm:$0xff] %v5069_v44  ;;  %v5075_v49 = vmul.f32 %v11719_v47, %v11742_v50  ;;  %v11743_v44 = vld [vmem:[#allocation36_spill] sm:$0xff] }
 0x591   : > { %5206 = vst [vmem:[#allocation1 + $0x5] ss:$9 sm:$0xff] %v5070_v19  ;;  %v5076_v16 = vmul.f32 %v11721_v29, %v11743_v44  ;;  %v11744_v19 = vld [vmem:[#allocation37_spill] sm:$0xff]  ;;  %v11779_v44 = vld [vmem:[#allocation66_spill] sm:$0xff] }
 0x592   : > { %5207 = vst [vmem:[#allocation1 + $0x6] ss:$9 sm:$0xff] %v5071_v62  ;;  %v5077_v62 = vmul.f32 %v11723_v18, %v11744_v19 }
 0x593   : > { %5208 = vst [vmem:[#allocation1 + $0x7] ss:$9 sm:$0xff] %v5072_v27  ;;  %v11745_v27 = vld [vmem:[#allocation38_spill] sm:$0xff] }
 0x594   : > { %v5078_v54 = vmul.f32 %v11725_v34, %v11745_v27 }
 0x59a   : > { %v9742_v7 = vld [vmem:[#allocation1] sm:$0xff] }
 0x59b   : > { %5210 = vst [vmem:[#allocation1] ss:$9 sm:$0xff] %v5073_v37  ;;  %v11748_v37 = vld [vmem:[#allocation34_spill] sm:$0xff] }
 0x59c   : > { %5211 = vst [vmem:[#allocation1 + $0x1] ss:$9 sm:$0xff] %v5074_v12  ;;  %v5081_v12 = vmul.f32 %v9086_v4, %v11748_v37  ;;  %v11755_v37 = vld [vmem:[#allocation40_spill] sm:$0xff] }
 0x59d   : > { %5212 = vst [vmem:[#allocation1 + $0x2] ss:$9 sm:$0xff] %v5075_v49  ;;  %v5082_v49 = vmul.f32 %v9023_v46, %v11749_v40  ;;  %v5087_v40 = vmul.f32 %v11727_v58, %v11755_v37 }
 0x59e   : > { %5213 = vst [vmem:[#allocation1 + $0x3] ss:$9 sm:$0xff] %v5076_v16  ;;  %v5083_v16 = vmul.f32 %v11719_v47, %v11751_v41 }
 0x59f   : > { %5214 = vst [vmem:[#allocation1 + $0x4] ss:$9 sm:$0xff] %v5077_v62  ;;  %v5084_v62 = vmul.f32 %v11721_v29, %v11752_v20 }
 0x5a0   : > { %5215 = vst [vmem:[#allocation1 + $0x5] ss:$9 sm:$0xff] %v5078_v54 }
 0x5a1   : > { %5216 = vst [vmem:[#allocation1 + $0x6] ss:$9 sm:$0xff] %v5079_v59  ;;  %v5085_v59 = vmul.f32 %v11723_v18, %v11753_v17  ;;  %v11759_v17 = vld [vmem:[#allocation51_spill] sm:$0xff] }
 0x5a2   : > { %5217 = vst [vmem:[#allocation1 + $0x7] ss:$9 sm:$0xff] %v5080_v43  ;;  %v11754_v43 = vld [vmem:[#allocation47_spill] sm:$0xff] }
 0x5a3   : > { %v5086_v54 = vmul.f32 %v11725_v34, %v11754_v43 }
 0x5a9   : > { %v9760_v1 = vld [vmem:[#allocation1] sm:$0xff] }
 0x5aa   : > { %11750 = vst [vmem:[#allocation89_spill] sm:$0xff] %v9760_v1  ;;  %v11756_v1 = vld [vmem:[#allocation41_spill] sm:$0xff] }
 0x5ab   : > { %5219 = vst [vmem:[#allocation1] ss:$9 sm:$0xff] %v5081_v12  ;;  %v5088_v41 = vmul.f32 %v11729_v53, %v11756_v1  ;;  %v11757_v12 = vld [vmem:[#allocation42_spill] sm:$0xff] }
 0x5ac   : > { %5220 = vst [vmem:[#allocation1 + $0x1] ss:$9 sm:$0xff] %v5082_v49  ;;  %v11758_v49 = vrot.slane %v11757_v12, 2  ;;  %v11765_v1 = vld [vmem:[#allocation54_spill] sm:$0xff] }
 0x5ad   : > { %5221 = vst [vmem:[#allocation1 + $0x2] ss:$9 sm:$0xff] %v5083_v16  ;;  %v5090_v16 = vmul.f32 %v9023_v46, %v11759_v17  ;;  %v5095_v17 = vmul.f32 %v11727_v58, %v11765_v1 }
 0x5ae   : > { %5222 = vst [vmem:[#allocation1 + $0x3] ss:$9 sm:$0xff] %v5084_v62  ;;  %v5089_v20 = vmul.f32 %v9086_v4, %v11758_v49  ;;  %v11761_v62 = vld [vmem:[#allocation53_spill] sm:$0xff] }
 0x5af   : > { %5223 = vst [vmem:[#allocation1 + $0x4] ss:$9 sm:$0xff] %v5085_v59  ;;  %v5091_v43 = vmul.f32 %v11719_v47, %v11761_v62  ;;  %v11762_v59 = vld [vmem:[#allocation55_spill] sm:$0xff] }
 0x5b0   : > { %5224 = vst [vmem:[#allocation1 + $0x5] ss:$9 sm:$0xff] %v5086_v54  ;;  %v5092_v37 = vmul.f32 %v11721_v29, %v11762_v59  ;;  %v11763_v54 = vld [vmem:[#allocation50_spill] sm:$0xff] }
 0x5b1   : > { %5225 = vst [vmem:[#allocation1 + $0x6] ss:$9 sm:$0xff] %v5087_v40  ;;  %v11764_v40 = vld [vmem:[#allocation52_spill] sm:$0xff] }
 0x5b2   : > { %5226 = vst [vmem:[#allocation1 + $0x7] ss:$9 sm:$0xff] %v5088_v41  ;;  %v5093_v41 = vmul.f32 %v11723_v18, %v11763_v54  ;;  %v5094_v49 = vmul.f32 %v11725_v34, %v11764_v40  ;;  %v11769_v54 = vld [vmem:[#allocation63_spill] sm:$0xff] }
 0x5b9   : > { %v9779_v8 = vld [vmem:[#allocation1] sm:$0xff] }
 0x5ba   : > { %11760 = vst [vmem:[#allocation120_spill] sm:$0xff] %v9779_v8  ;;  %v11766_v8 = vld [vmem:[#allocation49_spill] sm:$0xff] }
 0x5bb   : > { %5228 = vst [vmem:[#allocation1] ss:$9 sm:$0xff] %v5089_v20  ;;  %v5096_v62 = vmul.f32 %v11729_v53, %v11766_v8  ;;  %v11767_v20 = vld [vmem:[#allocation58_spill] sm:$0xff]  ;;  %v11775_v8 = vld [vmem:[#allocation65_spill] sm:$0xff] }
 0x5bc   : > { %5229 = vst [vmem:[#allocation1 + $0x1] ss:$9 sm:$0xff] %v5090_v16  ;;  %v11768_v16 = vrot.slane %v11767_v20, 4 }
 0x5bd   : > { %5230 = vst [vmem:[#allocation1 + $0x2] ss:$9 sm:$0xff] %v5091_v43  ;;  %v5098_v43 = vmul.f32 %v9023_v46, %v11769_v54  ;;  %v5103_v54 = vmul.f32 %v11727_v58, %v11775_v8 }
 0x5be   : > { %5231 = vst [vmem:[#allocation1 + $0x3] ss:$9 sm:$0xff] %v5092_v37  ;;  %v5097_v59 = vmul.f32 %v9086_v4, %v11768_v16  ;;  %v11771_v37 = vld [vmem:[#allocation57_spill] sm:$0xff] }
 0x5bf   : > { %5232 = vst [vmem:[#allocation1 + $0x4] ss:$9 sm:$0xff] %v5093_v41  ;;  %v5099_v40 = vmul.f32 %v11719_v47, %v11771_v37  ;;  %v11772_v41 = vld [vmem:[#allocation59_spill] sm:$0xff] }
 0x5c0   : > { %5233 = vst [vmem:[#allocation1 + $0x5] ss:$9 sm:$0xff] %v5094_v49  ;;  %v5100_v19 = vmul.f32 %v11721_v29, %v11772_v41  ;;  %v11773_v49 = vld [vmem:[#allocation62_spill] sm:$0xff] }
 0x5c1   : > { %5234 = vst [vmem:[#allocation1 + $0x6] ss:$9 sm:$0xff] %v5095_v17  ;;  %v5101_v17 = vmul.f32 %v11723_v18, %v11773_v49 }
 0x5c2   : > { %5235 = vst [vmem:[#allocation1 + $0x7] ss:$9 sm:$0xff] %v5096_v62  ;;  %v11774_v62 = vld [vmem:[#allocation60_spill] sm:$0xff] }
 0x5c3   : > { %v5102_v16 = vmul.f32 %v11725_v34, %v11774_v62 }
 0x5c9   : > { %v9798_v27 = vld [vmem:[#allocation1] sm:$0xff] }
 0x5ca   : > { %11770 = vst [vmem:[#allocation123_spill] sm:$0xff] %v9798_v27  ;;  %v11776_v27 = vld [vmem:[#allocation67_spill] sm:$0xff] }
 0x5cb   : > { %5237 = vst [vmem:[#allocation1] ss:$9 sm:$0xff] %v5097_v59  ;;  %v5104_v37 = vmul.f32 %v11729_v53, %v11776_v27  ;;  %v11777_v59 = vld [vmem:[#allocation69_spill] sm:$0xff]  ;;  %v11785_v27 = vld [vmem:[#allocation78_spill] sm:$0xff] }
 0x5cc   : > { %5238 = vst [vmem:[#allocation1 + $0x1] ss:$9 sm:$0xff] %v5098_v43  ;;  %v11778_v43 = vrot.slane %v11777_v59, 6 }
 0x5cd   : > { %5239 = vst [vmem:[#allocation1 + $0x2] ss:$9 sm:$0xff] %v5099_v40  ;;  %v5106_v40 = vmul.f32 %v9023_v46, %v11779_v44  ;;  %v5111_v44 = vmul.f32 %v11727_v58, %v11785_v27 }
 0x5ce   : > { %5240 = vst [vmem:[#allocation1 + $0x3] ss:$9 sm:$0xff] %v5100_v19  ;;  %v5105_v41 = vmul.f32 %v9086_v4, %v11778_v43  ;;  %v11781_v19 = vld [vmem:[#allocation64_spill] sm:$0xff] }
 0x5cf   : > { %5241 = vst [vmem:[#allocation1 + $0x4] ss:$9 sm:$0xff] %v5101_v17  ;;  %v5107_v62 = vmul.f32 %v11719_v47, %v11781_v19  ;;  %v11782_v17 = vld [vmem:[#allocation70_spill] sm:$0xff] }
 0x5d0   : > { %5242 = vst [vmem:[#allocation1 + $0x5] ss:$9 sm:$0xff] %v5102_v16  ;;  %v5108_v8 = vmul.f32 %v11721_v29, %v11782_v17  ;;  %v11783_v16 = vld [vmem:[#allocation79_spill] sm:$0xff]  ;;  %v5113_v29 = vmul.f32 %v9086_v4, %v9204_v26 }
 0x5d1   : > { %5243 = vst [vmem:[#allocation1 + $0x6] ss:$9 sm:$0xff] %v5103_v54  ;;  %v5109_v54 = vmul.f32 %v11723_v18, %v11783_v16 }
 0x5d2   : > { %5244 = vst [vmem:[#allocation1 + $0x7] ss:$9 sm:$0xff] %v5104_v37  ;;  %v11784_v37 = vld [vmem:[#allocation74_spill] sm:$0xff] }
 0x5d3   : > { %v5110_v43 = vmul.f32 %v11725_v34, %v11784_v37  ;;  %v11789_v34 = vrot.slane %v9204_v26, 4 }
 0x5d5   : > { %v5117_v58 = vmul.f32 %v11723_v18, %v11789_v34  ;;  %v11795_v18 = vrot.slane %v11726_v6, 4 }
 0x5d9   : > { %v9817_v52 = vld [vmem:[#allocation1] sm:$0xff] }
 0x5da   : > { %11780 = vst [vmem:[#allocation124_spill] sm:$0xff] %v9817_v52  ;;  %v11786_v52 = vld [vmem:[#allocation73_spill] sm:$0xff] }
 0x5db   : > { %5246 = vst [vmem:[#allocation1] ss:$9 sm:$0xff] %v5105_v41  ;;  %v5112_v47 = vmul.f32 %v11729_v53, %v11786_v52  ;;  %v11787_v41 = vrot.slane %v9204_v26, 1 }
 0x5dc   : > { %5247 = vst [vmem:[#allocation1 + $0x1] ss:$9 sm:$0xff] %v5106_v40 }
 0x5dd   : > { %5248 = vst [vmem:[#allocation1 + $0x2] ss:$9 sm:$0xff] %v5107_v62  ;;  %v5114_v62 = vmul.f32 %v9023_v46, %v11787_v41  ;;  %v11792_v46 = vld [vmem:[#allocation158_spill] sm:$0xff]  ;;  %v11796_v41 = vld [vmem:[#allocation83_spill] sm:$0xff] }
 0x5de   : > { %5249 = vst [vmem:[#allocation1 + $0x3] ss:$9 sm:$0xff] %v5108_v8  ;;  %v11067_v8 = vrot.slane %v9204_v26, 7 }
 0x5df   : > { %5250 = vst [vmem:[#allocation1 + $0x4] ss:$9 sm:$0xff] %v5109_v54  ;;  %v11790_v54 = vld [vmem:[#allocation156_spill] sm:$0xff] }
 0x5e0   : > { %5251 = vst [vmem:[#allocation1 + $0x5] ss:$9 sm:$0xff] %v5110_v43  ;;  %v5120_v4 = vmul.f32 %v11729_v53, %v11067_v8  ;;  %v11793_v43 = vld [vmem:[#allocation81_spill] sm:$0xff]  ;;  %v11799_v53 = vrot.slane %v11726_v6, 6 }
 0x5e1   : > { %5252 = vst [vmem:[#allocation1 + $0x6] ss:$9 sm:$0xff] %v5111_v44  ;;  %v11791_v44 = vld [vmem:[#allocation159_spill] sm:$0xff] }
 0x5e2   : > { %5253 = vst [vmem:[#allocation1 + $0x7] ss:$9 sm:$0xff] %v5112_v47  ;;  %v11794_v47 = vrot.slane %v11726_v6, 3 }
 0x5e9   : > { %v9836_v40 = vld [vmem:[#allocation1] sm:$0xff] }
 0x5ea   : > { %11788 = vst [vmem:[#allocation125_spill] sm:$0xff] %v9836_v40 }
 0x5eb   : > { %5255 = vst [vmem:[#allocation1] ss:$9 sm:$0xff] %v5113_v29  ;;  %v5330_v29 = vmul.f32 %v9180_v21, %v11794_v47  ;;  %v11801_v47 = vrot.slane %v11730_v5, 1 }
 0x5ec   : > { %5256 = vst [vmem:[#allocation1 + $0x1] ss:$9 sm:$0xff] %v5114_v62  ;;  %v5331_v62 = vmul.f32 %v11796_v41, %v11795_v18 }
 0x5ed   : > { %5257 = vst [vmem:[#allocation1 + $0x2] ss:$9 sm:$0xff] %v11790_v54  ;;  %v5336_v18 = vmul.f32 %v9250_v33, %v11801_v47  ;;  %v11806_v47 = vrot.slane %v11735_v51, 7 }
 0x5ee   : > { %5258 = vst [vmem:[#allocation1 + $0x3] ss:$9 sm:$0xff] %v11791_v44  ;;  %v5333_v44 = vmul.f32 %v9198_v38, %v11799_v53  ;;  %v11805_v53 = vrot.slane %v11735_v51, 6 }
 0x5ef   : > { %5259 = vst [vmem:[#allocation1 + $0x4] ss:$9 sm:$0xff] %v5117_v58  ;;  %v11798_v58 = vrot.slane %v11726_v6, 5 }
 0x5f0   : > { %5260 = vst [vmem:[#allocation1 + $0x5] ss:$9 sm:$0xff] %v11792_v46 }
 0x5f1   : > { %5261 = vst [vmem:[#allocation1 + $0x6] ss:$9 sm:$0xff] %v11793_v43  ;;  %v5332_v54 = vmul.f32 %v9243_v24, %v11798_v58  ;;  %v5335_v43 = vmul.f32 %v9272_v15, %v11730_v5  ;;  %v11803_v58 = vld [vmem:[#allocation93_spill] sm:$0xff] }
 0x5f2   : > { %5262 = vst [vmem:[#allocation1 + $0x7] ss:$9 sm:$0xff] %v5120_v4  ;;  %v11800_v4 = vrot.slane %v11726_v6, 7 }
 0x5f4   : > { %v5334_v46 = vmul.f32 %v9138_v31, %v11800_v4 }
 0x5f9   : > { %v9855_v34 = vld [vmem:[#allocation1] sm:$0xff] }
 0x5fa   : > { %11797 = vst [vmem:[#allocation126_spill] sm:$0xff] %v9855_v34 }
 0x5fb   : > { %5458 = vst [vmem:[#allocation1] ss:$9 sm:$0xff] %v5330_v29  ;;  %v11802_v29 = vrot.slane %v11730_v5, 2  ;;  %v5341_v5 = vmul.f32 %v9198_v38, %v11739_v13 }
 0x5fc   : > { %5460 = vst [vmem:[#allocation1 + $0x1] ss:$9 sm:$0xff] %v5331_v62  ;;  %v11804_v62 = vrot.slane %v11735_v51, 5 }
 0x5fd   : > { %5462 = vst [vmem:[#allocation1 + $0x2] ss:$9 sm:$0xff] %v5332_v54  ;;  %v5337_v8 = vmul.f32 %v11803_v58, %v11802_v29 }
 0x5fe   : > { %5464 = vst [vmem:[#allocation1 + $0x3] ss:$9 sm:$0xff] %v5333_v44  ;;  %v5338_v54 = vmul.f32 %v9180_v21, %v11804_v62  ;;  %v5339_v44 = vmul.f32 %v11796_v41, %v11805_v53  ;;  %v11809_v62 = vrot.slane %v11739_v13, 3 }
 0x5ff   : > { %5466 = vst [vmem:[#allocation1 + $0x4] ss:$9 sm:$0xff] %v5334_v46  ;;  %v5340_v46 = vmul.f32 %v9243_v24, %v11806_v47 }
 0x600   : > { %5468 = vst [vmem:[#allocation1 + $0x5] ss:$9 sm:$0xff] %v5335_v43  ;;  %v5344_v53 = vmul.f32 %v9250_v33, %v11809_v62 }
 0x601   : > { %5470 = vst [vmem:[#allocation1 + $0x6] ss:$9 sm:$0xff] %v5336_v18  ;;  %v11808_v18 = vrot.slane %v11739_v13, 2 }
 0x602   : > { %5472 = vst [vmem:[#allocation1 + $0x7] ss:$9 sm:$0xff] %v5337_v8  ;;  %v11807_v8 = vrot.slane %v11739_v13, 1 }
 0x603   : > { %v5343_v29 = vmul.f32 %v9272_v15, %v11808_v18 }
 0x604   : > { %v5342_v43 = vmul.f32 %v9138_v31, %v11807_v8  ;;  %v11812_v8 = vld [vmem:[#allocation92_spill] sm:$0xff] }
 0x605   : > { %v5347_v18 = vmul.f32 %v11796_v41, %v11812_v8  ;;  %v11813_v34 = vrot.slane %v11812_v8, 1  ;;  %v11815_v62 = vrot.slane %v11812_v8, 3 }
 0x609   : > { %v9880_v4 = vld [vmem:[#allocation1] sm:$0xff] }
 0x60a   : > { %5474 = vst [vmem:[#allocation1] ss:$9 sm:$0xff] %v5338_v54  ;;  %v11810_v54 = vrot.slane %v11739_v13, 4  ;;  %v11814_v13 = vrot.slane %v11812_v8, 2 }
 0x60b   : > { %5475 = vst [vmem:[#allocation1 + $0x1] ss:$9 sm:$0xff] %v5339_v44  ;;  %v11811_v44 = vrot.slane %v11742_v50, 7 }
 0x60c   : > { %5476 = vst [vmem:[#allocation1 + $0x2] ss:$9 sm:$0xff] %v5340_v46  ;;  %v5345_v47 = vmul.f32 %v11803_v58, %v11810_v54  ;;  %v11816_v54 = vrot.slane %v11812_v8, 4 }
 0x60d   : > { %5477 = vst [vmem:[#allocation1 + $0x3] ss:$9 sm:$0xff] %v5341_v5  ;;  %v5346_v46 = vmul.f32 %v9180_v21, %v11811_v44  ;;  %v11817_v44 = vrot.slane %v11812_v8, 5 }
 0x60e   : > { %5478 = vst [vmem:[#allocation1 + $0x4] ss:$9 sm:$0xff] %v5342_v43  ;;  %v5348_v43 = vmul.f32 %v9243_v24, %v11813_v34 }
 0x60f   : > { %5479 = vst [vmem:[#allocation1 + $0x5] ss:$9 sm:$0xff] %v5343_v29  ;;  %v5349_v29 = vmul.f32 %v9198_v38, %v11814_v13  ;;  %v5352_v34 = vmul.f32 %v9250_v33, %v11817_v44 }
 0x610   : > { %5480 = vst [vmem:[#allocation1 + $0x6] ss:$9 sm:$0xff] %v5344_v53  ;;  %v5350_v53 = vmul.f32 %v9138_v31, %v11815_v62 }
 0x611   : > { %5481 = vst [vmem:[#allocation1 + $0x7] ss:$9 sm:$0xff] %v5345_v47  ;;  %v5351_v47 = vmul.f32 %v9272_v15, %v11816_v54 }
 0x618   : > { %v9904_v5 = vld [vmem:[#allocation1] sm:$0xff] }
 0x619   : > { %5483 = vst [vmem:[#allocation1] ss:$9 sm:$0xff] %v5346_v46  ;;  %v11818_v46 = vrot.slane %v11812_v8, 6 }
 0x61a   : > { %5484 = vst [vmem:[#allocation1 + $0x1] ss:$9 sm:$0xff] %v5347_v18  ;;  %v11819_v18 = vld [vmem:[#allocation137_spill] sm:$0xff] }
 0x61b   : > { %5485 = vst [vmem:[#allocation1 + $0x2] ss:$9 sm:$0xff] %v5348_v43  ;;  %v5353_v13 = vmul.f32 %v11803_v58, %v11818_v46  ;;  %v11820_v62 = vrot.slane %v11819_v18, 1  ;;  %v11821_v40 = vrot.slane %v11819_v18, 2  ;;  %v11822_v44 = vrot.slane %v11819_v18, 3 }
 0x61c   : > { %5486 = vst [vmem:[#allocation1 + $0x3] ss:$9 sm:$0xff] %v5349_v29  ;;  %v11823_v8 = vrot.slane %v11819_v18, 4 }
 0x61d   : > { %5487 = vst [vmem:[#allocation1 + $0x4] ss:$9 sm:$0xff] %v5350_v53  ;;  %v5354_v43 = vmul.f32 %v9180_v21, %v11820_v62  ;;  %v5355_v29 = vmul.f32 %v11796_v41, %v11821_v40  ;;  %v5356_v53 = vmul.f32 %v9243_v24, %v11822_v44  ;;  %v11826_v62 = vrot.slane %v11819_v18, 7 }
 0x61e   : > { %5488 = vst [vmem:[#allocation1 + $0x5] ss:$9 sm:$0xff] %v5351_v47  ;;  %v5357_v47 = vmul.f32 %v9198_v38, %v11823_v8  ;;  %v11828_v8 = vrot.slane %v11765_v1, 4 }
 0x61f   : > { %5489 = vst [vmem:[#allocation1 + $0x6] ss:$9 sm:$0xff] %v5352_v34  ;;  %v11824_v34 = vrot.slane %v11819_v18, 5  ;;  %v5360_v44 = vmul.f32 %v9250_v33, %v11826_v62  ;;  %v11831_v62 = vrot.slane %v11765_v1, 7 }
 0x620   : > { %5490 = vst [vmem:[#allocation1 + $0x7] ss:$9 sm:$0xff] %v5353_v13  ;;  %v11825_v13 = vrot.slane %v11819_v18, 6 }
 0x621   : > { %v5358_v46 = vmul.f32 %v9138_v31, %v11824_v34  ;;  %v5363_v34 = vmul.f32 %v11796_v41, %v11828_v8 }
 0x622   : > { %v5359_v40 = vmul.f32 %v9272_v15, %v11825_v13  ;;  %v11829_v13 = vrot.slane %v11765_v1, 5 }
 0x627   : > { %v9930_v54 = vld [vmem:[#allocation1] sm:$0xff] }
 0x628   : > { %5492 = vst [vmem:[#allocation1] ss:$9 sm:$0xff] %v5354_v43  ;;  %v5361_v43 = vmul.f32 %v11803_v58, %v11757_v12  ;;  %v11830_v12 = vrot.slane %v11765_v1, 6 }
 0x629   : > { %5493 = vst [vmem:[#allocation1 + $0x1] ss:$9 sm:$0xff] %v5355_v29  ;;  %v11827_v29 = vrot.slane %v11765_v1, 3 }
 0x62a   : > { %5494 = vst [vmem:[#allocation1 + $0x2] ss:$9 sm:$0xff] %v5356_v53 }
 0x62b   : > { %5495 = vst [vmem:[#allocation1 + $0x3] ss:$9 sm:$0xff] %v5357_v47  ;;  %v5362_v53 = vmul.f32 %v9180_v21, %v11827_v29  ;;  %v11832_v29 = vrot.slane %v11767_v20, 1 }
 0x62c   : > { %5496 = vst [vmem:[#allocation1 + $0x4] ss:$9 sm:$0xff] %v5358_v46  ;;  %v5364_v46 = vmul.f32 %v9243_v24, %v11829_v13 }
 0x62d   : > { %5497 = vst [vmem:[#allocation1 + $0x5] ss:$9 sm:$0xff] %v5359_v40  ;;  %v5365_v40 = vmul.f32 %v9198_v38, %v11830_v12  ;;  %v5368_v8 = vmul.f32 %v9250_v33, %v11832_v29  ;;  %v11835_v12 = vrot.slane %v11773_v49, 6  ;;  %v11836_v29 = vrot.slane %v11773_v49, 7 }
 0x62e   : > { %5498 = vst [vmem:[#allocation1 + $0x6] ss:$9 sm:$0xff] %v5360_v44  ;;  %v5366_v44 = vmul.f32 %v9138_v31, %v11831_v62 }
 0x62f   : > { %5499 = vst [vmem:[#allocation1 + $0x7] ss:$9 sm:$0xff] %v5361_v43  ;;  %v5367_v43 = vmul.f32 %v9272_v15, %v11767_v20 }
 0x636   : > { %v9955_v47 = vld [vmem:[#allocation1] sm:$0xff] }
 0x637   : > { %5501 = vst [vmem:[#allocation1] ss:$9 sm:$0xff] %v5362_v53  ;;  %v11833_v53 = vrot.slane %v11767_v20, 2  ;;  %v5373_v20 = vmul.f32 %v9198_v38, %v11777_v59 }
 0x638   : > { %5502 = vst [vmem:[#allocation1 + $0x1] ss:$9 sm:$0xff] %v5363_v34  ;;  %v11834_v34 = vrot.slane %v11773_v49, 5 }
 0x639   : > { %5503 = vst [vmem:[#allocation1 + $0x2] ss:$9 sm:$0xff] %v5364_v46  ;;  %v5369_v13 = vmul.f32 %v11803_v58, %v11833_v53  ;;  %v11838_v53 = vrot.slane %v11777_v59, 2 }
 0x63a   : > { %5504 = vst [vmem:[#allocation1 + $0x3] ss:$9 sm:$0xff] %v5365_v40  ;;  %v5370_v46 = vmul.f32 %v9180_v21, %v11834_v34  ;;  %v5371_v40 = vmul.f32 %v11796_v41, %v11835_v12  ;;  %v11839_v34 = vrot.slane %v11777_v59, 3 }
 0x63b   : > { %5505 = vst [vmem:[#allocation1 + $0x4] ss:$9 sm:$0xff] %v5366_v44  ;;  %v5372_v44 = vmul.f32 %v9243_v24, %v11836_v29 }
 0x63c   : > { %5506 = vst [vmem:[#allocation1 + $0x5] ss:$9 sm:$0xff] %v5367_v43  ;;  %v11837_v43 = vrot.slane %v11777_v59, 1  ;;  %v5376_v12 = vmul.f32 %v9250_v33, %v11839_v34 }
 0x63d   : > { %5507 = vst [vmem:[#allocation1 + $0x6] ss:$9 sm:$0xff] %v5368_v8 }
 0x63e   : > { %5508 = vst [vmem:[#allocation1 + $0x7] ss:$9 sm:$0xff] %v5369_v13  ;;  %v5374_v8 = vmul.f32 %v9138_v31, %v11837_v43  ;;  %v5375_v13 = vmul.f32 %v9272_v15, %v11838_v53  ;;  %v11842_v43 = vld [vmem:[#allocation141_spill] sm:$0xff] }
 0x63f   : > { %v5379_v53 = vmul.f32 %v11796_v41, %v11842_v43  ;;  %v11843_v26 = vrot.slane %v11842_v43, 1  ;;  %v11845_v34 = vrot.slane %v11842_v43, 3 }
 0x645   : > { %v9980_v62 = vld [vmem:[#allocation1] sm:$0xff] }
 0x646   : > { %5510 = vst [vmem:[#allocation1] ss:$9 sm:$0xff] %v5370_v46  ;;  %v11840_v46 = vrot.slane %v11777_v59, 4  ;;  %v11844_v59 = vrot.slane %v11842_v43, 2 }
 0x647   : > { %5511 = vst [vmem:[#allocation1 + $0x1] ss:$9 sm:$0xff] %v5371_v40  ;;  %v11841_v40 = vrot.slane %v11781_v19, 7 }
 0x648   : > { %5512 = vst [vmem:[#allocation1 + $0x2] ss:$9 sm:$0xff] %v5372_v44  ;;  %v5377_v29 = vmul.f32 %v11803_v58, %v11840_v46 }
 0x649   : > { %5513 = vst [vmem:[#allocation1 + $0x3] ss:$9 sm:$0xff] %v5373_v20  ;;  %v5378_v44 = vmul.f32 %v9180_v21, %v11841_v40  ;;  %v11846_v21 = vrot.slane %v11842_v43, 4  ;;  %v11849_v40 = vld [vmem:[#allocation164_spill] sm:$0xff] }
 0x64a   : > { %5514 = vst [vmem:[#allocation1 + $0x4] ss:$9 sm:$0xff] %v5374_v8  ;;  %v5380_v8 = vmul.f32 %v9243_v24, %v11843_v26  ;;  %v11848_v24 = vrot.slane %v11842_v43, 6 }
 0x64b   : > { %5515 = vst [vmem:[#allocation1 + $0x5] ss:$9 sm:$0xff] %v5375_v13  ;;  %v5381_v13 = vmul.f32 %v9198_v38, %v11844_v59  ;;  %v5383_v46 = vmul.f32 %v9272_v15, %v11846_v21  ;;  %v5393_v15 = vmul.f32 %v11803_v58, %v9039_v36  ;;  %v5662_v36 = vmul.f32 %v9311_v3, %v11722_v56 }
 0x64c   : > { %5516 = vst [vmem:[#allocation1 + $0x6] ss:$9 sm:$0xff] %v5376_v12  ;;  %v5382_v12 = vmul.f32 %v9138_v31, %v11845_v34  ;;  %v5385_v38 = vmul.f32 %v11803_v58, %v11848_v24  ;;  %v2832_v31 = vrot.slane %v11849_v40, 2  ;;  %v10052_v58 = vpop.permute.xlu2 %5649  ;;  %v5670_v24 = vmul.f32 %v9311_v3, %v11735_v51 }
 0x64d   : > { %5517 = vst [vmem:[#allocation1 + $0x7] ss:$9 sm:$0xff] %v5377_v29  ;;  %v11847_v29 = vrot.slane %v11842_v43, 5 }
 0x64f   : > { %v5384_v26 = vmul.f32 %v9250_v33, %v11847_v29  ;;  %v11850_v33 = vld [vmem:[#allocation165_spill] sm:$0xff] }
 0x654   : > { %v10004_v20 = vld [vmem:[#allocation1] sm:$0xff] }
 0x655   : > { %5519 = vst [vmem:[#allocation1] ss:$9 sm:$0xff] %v5378_v44  ;;  %v5387_v44 = vmul.f32 %v11796_v41, %v2832_v31  ;;  %v11851_v41 = vld [vmem:[#allocation162_spill] sm:$0xff] }
 0x656   : > { %5520 = vst [vmem:[#allocation1 + $0x1] ss:$9 sm:$0xff] %v5379_v53  ;;  %v5659_v43 = vmul.f32 %v11851_v41, %v7883_v63  ;;  %v5667_v34 = vmul.f32 %v11851_v41, %v11732_v57  ;;  %v11858_v57 = vld [vmem:[#allocation94_spill] sm:$0xff] }
 0x657   : > { %5521 = vst [vmem:[#allocation1 + $0x2] ss:$9 sm:$0xff] %v5380_v8 }
 0x658   : > { %5522 = vst [vmem:[#allocation1 + $0x3] ss:$9 sm:$0xff] %v5381_v13  ;;  %v11854_v13 = vrot.slane %v11726_v6, 2 }
 0x659   : > { %5523 = vst [vmem:[#allocation1 + $0x4] ss:$9 sm:$0xff] %v5382_v12 }
 0x65a   : > { %5524 = vst [vmem:[#allocation1 + $0x5] ss:$9 sm:$0xff] %v5383_v46  ;;  %v5666_v56 = vmul.f32 %v10052_v58, %v11854_v13 }
 0x65b   : > { %5525 = vst [vmem:[#allocation1 + $0x6] ss:$9 sm:$0xff] %v5384_v26  ;;  %v5669_v26 = vmul.f32 %v9348_v23, %v11734_v14 }
 0x65c   : > { %5526 = vst [vmem:[#allocation1 + $0x7] ss:$9 sm:$0xff] %v5385_v38  ;;  %v11857_v38 = vld [vmem:[#allocation82_spill] sm:$0xff] }
 0x663   : > { %v10026_v53 = vld [vmem:[#allocation1] sm:$0xff] }
 0x664   : > { %5528 = vst [vmem:[#allocation1] ss:$9 sm:$0xff] %v9314_v25  ;;  %v11852_v25 = vld [vmem:[#allocation153_spill] sm:$0xff] }
 0x665   : > { %5529 = vst [vmem:[#allocation1 + $0x1] ss:$9 sm:$0xff] %v5387_v44  ;;  %v5660_v8 = vmul.f32 %v11852_v25, %v11718_v48  ;;  %v5668_v12 = vmul.f32 %v11852_v25, %v11733_v9 }
 0x666   : > { %5530 = vst [vmem:[#allocation1 + $0x2] ss:$9 sm:$0xff] %v9317_v2  ;;  %v5661_v2 = vmul.f32 %v9348_v23, %v11720_v55 }
 0x667   : > { %5531 = vst [vmem:[#allocation1 + $0x3] ss:$9 sm:$0xff] %v11850_v33 }
 0x668   : > { %5532 = vst [vmem:[#allocation1 + $0x4] ss:$9 sm:$0xff] %v9325_v32  ;;  %v10044_v32 = vpop.permute.xlu0 %5645 }
 0x669   : > { %5533 = vst [vmem:[#allocation1 + $0x5] ss:$9 sm:$0xff] %v9328_v35  ;;  %v10048_v35 = vpop.permute.xlu1 %5647  ;;  %v5664_v48 = vmul.f32 %v10044_v32, %v11726_v6  ;;  %v11856_v6 = vld [vmem:[#allocation30_spill] sm:$0xff]  ;;  %v5672_v33 = vmul.f32 %v10044_v32, %v11737_v30 }
 0x66a   : > { %5534 = vst [vmem:[#allocation1 + $0x6] ss:$9 sm:$0xff] %v9331_v11  ;;  %v11853_v11 = vld [vmem:[#allocation68_spill] sm:$0xff]  ;;  %v5665_v55 = vmul.f32 %v10048_v35, %v11728_v60  ;;  %v11855_v60 = vld [vmem:[#allocation21_spill] sm:$0xff] }
 0x66b   : > { %5535 = vst [vmem:[#allocation1 + $0x7] ss:$9 sm:$0xff] %v5393_v15  ;;  %v5663_v63 = vmul.f32 %v11853_v11, %v11724_v10  ;;  %v10064_v10 = vld [vmem:[%s10628_s5 + $0x1] ss:$0 sm:$0xff]  ;;  %v5671_v9 = vmul.f32 %v11853_v11, %v11736_v45  ;;  %v11863_v45 = vld [vmem:[#allocation151_spill] sm:$0xff] }
 0x66c   : > { %v3486_v21 = vadd.f32 %v10064_v10, %v11855_v60  ;;  %v3487_v46 = vadd.f32 %v10064_v10, %v11856_v6  ;;  %v11859_v15 = vld [vmem:[#allocation144_spill] sm:$0xff]  ;;  %v11864_v60 = vld [vmem:[#allocation27_spill] sm:$0xff] }
 0x66e   : > { %v3766_v31 = vadd.f32 %v11857_v38, %v3486_v21  ;;  %v3767_v44 = vadd.f32 %v11858_v57, %v3487_v46  ;;  %v5675_v21 = vmul.f32 %v11851_v41, %v11864_v60  ;;  %v11867_v38 = vld [vmem:[#allocation38_spill] sm:$0xff] }
 0x672   : > { %v10040_v59 = vld [vmem:[#allocation1] sm:$0xff] }
 0x673   : > { %5787 = vst [vmem:[#allocation1] ss:$9 sm:$0xff] %v5659_v43  ;;  %v4103_v43 = vadd.f32 %v11859_v15, %v3766_v31  ;;  %v5679_v31 = vmul.f32 %v11853_v11, %v11867_v38  ;;  %v11871_v15 = vld [vmem:[#allocation35_spill] sm:$0xff]  ;;  %v11885_v38 = vld [vmem:[#allocation161_spill] sm:$0xff] }
 0x674   : > { %5789 = vst [vmem:[#allocation1 + $0x1] ss:$9 sm:$0xff] %v5660_v8  ;;  %v11860_v8 = vld [vmem:[#allocation145_spill] sm:$0xff] }
 0x675   : > { %5791 = vst [vmem:[#allocation1 + $0x2] ss:$9 sm:$0xff] %v5661_v2  ;;  %v4104_v14 = vadd.f32 %v11860_v8, %v3767_v44  ;;  %v5673_v2 = vmul.f32 %v10048_v35, %v11738_v61  ;;  %v11869_v44 = vld [vmem:[#allocation33_spill] sm:$0xff]  ;;  %v11872_v8 = vld [vmem:[#allocation44_spill] sm:$0xff] }
 0x676   : > { %5793 = vst [vmem:[#allocation1 + $0x3] ss:$9 sm:$0xff] %v5662_v36  ;;  %v11861_v36 = vrot.slane %v11735_v51, 4 }
 0x677   : > { %5795 = vst [vmem:[#allocation1 + $0x4] ss:$9 sm:$0xff] %v5663_v63  ;;  %v4384_v13 = vadd.f32 %v11863_v45, %v4104_v14  ;;  %v5684_v14 = vmul.f32 %v11852_v25, %v11872_v8  ;;  %v11875_v45 = vld [vmem:[#allocation45_spill] sm:$0xff] }
 0x678   : > { %5797 = vst [vmem:[#allocation1 + $0x5] ss:$9 sm:$0xff] %v5664_v48  ;;  %v5674_v63 = vmul.f32 %v10052_v58, %v11861_v36  ;;  %v11862_v48 = vld [vmem:[#allocation71_spill] sm:$0xff] }
 0x679   : > { %5799 = vst [vmem:[#allocation1 + $0x6] ss:$9 sm:$0xff] %v5665_v55  ;;  %v4383_v55 = vadd.f32 %v11862_v48, %v4103_v43  ;;  %v5683_v43 = vmul.f32 %v11851_v41, %v11871_v15 }
 0x67a   : > { %5801 = vst [vmem:[#allocation1 + $0x7] ss:$9 sm:$0xff] %v5666_v56  ;;  %v4664_v56 = vadd.f32 %v9450_v28, %v4384_v13  ;;  %v11876_v13 = vld [vmem:[#allocation46_spill] sm:$0xff] }
 0x67b   : > { %v4663_v30 = vadd.f32 %v9432_v42, %v4383_v55  ;;  %v5676_v42 = vmul.f32 %v11852_v25, %v11742_v50 }
 0x67c   : > { %v5000_v61 = vadd.f32 %v9596_v39, %v4664_v56  ;;  %v11877_v56 = vld [vmem:[#allocation90_spill] sm:$0xff] }
 0x67e   : > { %v5273_v51 = vadd.f32 %v9742_v7, %v5000_v61  ;;  %v11878_v61 = vld [vmem:[#allocation138_spill] sm:$0xff] }
 0x680   : > { %v5546_v46 = vadd.f32 %v9904_v5, %v5273_v51  ;;  %v11868_v5 = vld [vmem:[#allocation32_spill] sm:$0xff]  ;;  %v11879_v51 = vld [vmem:[#allocation47_spill] sm:$0xff] }
 0x681   : > { %v5802_v29 = vld [vmem:[#allocation1] sm:$0xff]  ;;  %v5680_v57 = vmul.f32 %v10044_v32, %v11868_v5  ;;  %v5687_v60 = vmul.f32 %v11853_v11, %v11879_v51 }
 0x682   : > { %5803 = vst [vmem:[#allocation1] ss:$9 sm:$0xff] %v5667_v34  ;;  %v4999_v34 = vadd.f32 %v9573_v0, %v4663_v30  ;;  %v5686_v30 = vmul.f32 %v9311_v3, %v11876_v13 }
 0x683   : > { %5804 = vst [vmem:[#allocation1 + $0x1] ss:$9 sm:$0xff] %v5668_v12 }
 0x684   : > { %5805 = vst [vmem:[#allocation1 + $0x2] ss:$9 sm:$0xff] %v5669_v26  ;;  %v5272_v12 = vadd.f32 %v9723_v22, %v4999_v34  ;;  %v11865_v26 = vld [vmem:[#allocation36_spill] sm:$0xff]  ;;  %v11866_v22 = vld [vmem:[#allocation37_spill] sm:$0xff] }
 0x685   : > { %5806 = vst [vmem:[#allocation1 + $0x3] ss:$9 sm:$0xff] %v5670_v24  ;;  %v5677_v0 = vmul.f32 %v9348_v23, %v11865_v26  ;;  %v5678_v7 = vmul.f32 %v9311_v3, %v11866_v22  ;;  %v11884_v22 = vld [vmem:[#allocation154_spill] sm:$0xff] }
 0x686   : > { %5807 = vst [vmem:[#allocation1 + $0x4] ss:$9 sm:$0xff] %v5671_v9  ;;  %v5545_v6 = vadd.f32 %v9880_v4, %v5272_v12  ;;  %v5681_v9 = vmul.f32 %v10048_v35, %v11869_v44 }
 0x687   : > { %5808 = vst [vmem:[#allocation1 + $0x5] ss:$9 sm:$0xff] %v5672_v33 }
 0x688   : > { %5809 = vst [vmem:[#allocation1 + $0x6] ss:$9 sm:$0xff] %v5673_v2  ;;  %v5874_v24 = vadd.f32 %v5802_v29, %v5545_v6  ;;  %v11870_v29 = vrot.slane %v11742_v50, 6  ;;  %v11873_v2 = vld [vmem:[#allocation39_spill] sm:$0xff]  ;;  %v5685_v50 = vmul.f32 %v9348_v23, %v11875_v45  ;;  %v11893_v45 = vld [vmem:[#allocation53_spill] sm:$0xff] }
 0x689   : > { %5810 = vst [vmem:[#allocation1 + $0x7] ss:$9 sm:$0xff] %v5674_v63  ;;  %v3488_v36 = vadd.f32 %v10064_v10, %v11873_v2  ;;  %v11874_v63 = vld [vmem:[#allocation43_spill] sm:$0xff] }
 0x68a   : > { %v5682_v33 = vmul.f32 %v10052_v58, %v11870_v29  ;;  %v3489_v48 = vadd.f32 %v10064_v10, %v11874_v63 }
 0x68b   : > { %v3768_v34 = vadd.f32 %v11877_v56, %v3488_v36 }
 0x68c   : > { %v3769_v12 = vadd.f32 %v11878_v61, %v3489_v48 }
 0x690   : > { %v5811_v28 = vld [vmem:[#allocation1] sm:$0xff] }
 0x691   : > { %v5875_v39 = vadd.f32 %v5811_v28, %v5546_v46  ;;  %5812 = vst [vmem:[#allocation1] ss:$9 sm:$0xff] %v5675_v21  ;;  %v11880_v21 = vld [vmem:[#allocation40_spill] sm:$0xff]  ;;  %v11881_v46 = vld [vmem:[#allocation146_spill] sm:$0xff]  ;;  %v11882_v28 = vld [vmem:[#allocation147_spill] sm:$0xff] }
 0x692   : > { %5813 = vst [vmem:[#allocation1 + $0x1] ss:$9 sm:$0xff] %v5676_v42  ;;  %v5688_v6 = vmul.f32 %v10044_v32, %v11880_v21  ;;  %v4105_v42 = vadd.f32 %v11881_v46, %v3768_v34  ;;  %v4106_v26 = vadd.f32 %v11882_v28, %v3769_v12  ;;  %v11895_v12 = vld [vmem:[#allocation50_spill] sm:$0xff]  ;;  %v11899_v28 = vld [vmem:[#allocation63_spill] sm:$0xff] }
 0x693   : > { %v6323_v4 = vpack.i.bf16 %v5875_v39, %v5874_v24  ;;  %5814 = vst [vmem:[#allocation1 + $0x2] ss:$9 sm:$0xff] %v5677_v0  ;;  %v11883_v0 = vld [vmem:[#allocation41_spill] sm:$0xff]  ;;  %v5690_v39 = vmul.f32 %v10052_v58, %v11819_v18  ;;  %v11892_v18 = vld [vmem:[#allocation51_spill] sm:$0xff]  ;;  %v5694_v51 = vmul.f32 %v9311_v3, %v11895_v12 }
 0x694   : > { %5815 = vst [vmem:[#allocation1 + $0x3] ss:$9 sm:$0xff] %v5678_v7  ;;  %v5689_v24 = vmul.f32 %v10048_v35, %v11883_v0  ;;  %v4385_v7 = vadd.f32 %v11884_v22, %v4105_v42  ;;  %v5691_v36 = vmul.f32 %v11851_v41, %v11892_v18  ;;  %v11900_v0 = vld [vmem:[#allocation57_spill] sm:$0xff] }
 0x695   : > { %6324 = vrot.lane.b32.xlu0 %v6323_v4, %s6470_s29  ;;  %5816 = vst [vmem:[#allocation1 + $0x4] ss:$9 sm:$0xff] %v5679_v31  ;;  %v4386_v31 = vadd.f32 %v11885_v38, %v4106_v26  ;;  %v11886_v4 = vld [vmem:[#allocation88_spill] sm:$0xff]  ;;  %v5699_v26 = vmul.f32 %v11851_v41, %v11899_v28  ;;  %v11909_v18 = vld [vmem:[#allocation149_spill] sm:$0xff]  ;;  %v11920_v28 = vld [vmem:[#allocation66_spill] sm:$0xff] }
 0x696   : > { %5817 = vst [vmem:[#allocation1 + $0x5] ss:$9 sm:$0xff] %v5680_v57  ;;  %v4665_v5 = vadd.f32 %v11886_v4, %v4385_v7  ;;  %v11887_v57 = vld [vmem:[#allocation100_spill] sm:$0xff]  ;;  %v11903_v4 = vld [vmem:[#allocation59_spill] sm:$0xff] }
 0x697   : > { %5818 = vst [vmem:[#allocation1 + $0x6] ss:$9 sm:$0xff] %v5681_v9  ;;  %v4666_v44 = vadd.f32 %v11887_v57, %v4386_v31  ;;  %v11888_v9 = vld [vmem:[#allocation91_spill] sm:$0xff]  ;;  %v11902_v7 = vld [vmem:[#allocation56_spill] sm:$0xff] }
 0x698   : > { %5819 = vst [vmem:[#allocation1 + $0x7] ss:$9 sm:$0xff] %v5682_v33  ;;  %v5001_v29 = vadd.f32 %v11888_v9, %v4665_v5  ;;  %v11889_v33 = vld [vmem:[#allocation101_spill] sm:$0xff]  ;;  %v3491_v38 = vadd.f32 %v10064_v10, %v11902_v7  ;;  %v5702_v5 = vmul.f32 %v9311_v3, %v11773_v49  ;;  %v11904_v57 = vld [vmem:[#allocation139_spill] sm:$0xff]  ;;  %v11905_v9 = vld [vmem:[#allocation140_spill] sm:$0xff]  ;;  %v5709_v7 = vmul.f32 %v9348_v23, %v11782_v17 }
 0x699   : > { %v5002_v15 = vadd.f32 %v11889_v33, %v4666_v44  ;;  %v11906_v33 = vld [vmem:[#allocation60_spill] sm:$0xff] }
 0x69a   : > { %v11922_v17 = vld [vmem:[#allocation76_spill] sm:$0xff] }
 0x69f   : > { %v5820_v55 = vld [vmem:[#allocation1] sm:$0xff] }
 0x6a0   : > { %5821 = vst [vmem:[#allocation1] ss:$9 sm:$0xff] %v5683_v43  ;;  %v11890_v43 = vld [vmem:[#allocation89_spill] sm:$0xff] }
 0x6a1   : > { %5822 = vst [vmem:[#allocation1 + $0x1] ss:$9 sm:$0xff] %v5684_v14  ;;  %v5274_v8 = vadd.f32 %v11890_v43, %v5001_v29  ;;  %v11891_v14 = vld [vmem:[#allocation120_spill] sm:$0xff]  ;;  %v3771_v29 = vadd.f32 %v11905_v9, %v3491_v38  ;;  %v11907_v43 = vld [vmem:[#allocation65_spill] sm:$0xff] }
 0x6a2   : > { %5823 = vst [vmem:[#allocation1 + $0x2] ss:$9 sm:$0xff] %v5685_v50  ;;  %v5275_v2 = vadd.f32 %v11891_v14, %v5002_v15  ;;  %v5692_v50 = vmul.f32 %v11852_v25, %v11893_v45  ;;  %v5703_v15 = vmul.f32 %v11853_v11, %v11906_v33  ;;  %v11908_v14 = vld [vmem:[#allocation148_spill] sm:$0xff]  ;;  %v11911_v45 = vrot.slane %v11773_v49, 4  ;;  %v11927_v9 = vld [vmem:[#allocation157_spill] sm:$0xff] }
 0x6a3   : > { %5824 = vst [vmem:[#allocation1 + $0x3] ss:$9 sm:$0xff] %v5686_v30  ;;  %v5547_v63 = vadd.f32 %v9930_v54, %v5274_v8  ;;  %v11894_v30 = vld [vmem:[#allocation55_spill] sm:$0xff]  ;;  %v5704_v8 = vmul.f32 %v10044_v32, %v11907_v43  ;;  %v11919_v49 = vld [vmem:[#allocation124_spill] sm:$0xff] }
 0x6a4   : > { %5825 = vst [vmem:[#allocation1 + $0x4] ss:$9 sm:$0xff] %v5687_v60  ;;  %v5548_v48 = vadd.f32 %v9955_v47, %v5275_v2  ;;  %v5693_v56 = vmul.f32 %v9348_v23, %v11894_v30  ;;  %v11896_v60 = vld [vmem:[#allocation52_spill] sm:$0xff]  ;;  %v5696_v47 = vmul.f32 %v10044_v32, %v11765_v1 }
 0x6a5   : > { %5826 = vst [vmem:[#allocation1 + $0x5] ss:$9 sm:$0xff] %v5688_v6  ;;  %v5876_v34 = vadd.f32 %v5820_v55, %v5547_v63  ;;  %v5695_v21 = vmul.f32 %v11853_v11, %v11896_v60  ;;  %v11897_v6 = vld [vmem:[#allocation49_spill] sm:$0xff]  ;;  %v11898_v55 = vrot.slane %v11765_v1, 2  ;;  %v5701_v1 = vmul.f32 %v9348_v23, %v11903_v4  ;;  %v11910_v63 = vld [vmem:[#allocation67_spill] sm:$0xff]  ;;  %v11929_v33 = vld [vmem:[#allocation168_spill] sm:$0xff] }
 0x6a6   : > { %5827 = vst [vmem:[#allocation1 + $0x6] ss:$9 sm:$0xff] %v5689_v24  ;;  %v5697_v46 = vmul.f32 %v10048_v35, %v11897_v6  ;;  %v5700_v24 = vmul.f32 %v11852_v25, %v11900_v0  ;;  %v11921_v23 = vrot.slane %v11781_v19, 6 }
 0x6a7   : > { %5828 = vst [vmem:[#allocation1 + $0x7] ss:$9 sm:$0xff] %v5690_v39  ;;  %v5698_v42 = vmul.f32 %v10052_v58, %v11898_v55  ;;  %v11901_v39 = vld [vmem:[#allocation48_spill] sm:$0xff] }
 0x6a8   : > { %v3490_v22 = vadd.f32 %v10064_v10, %v11901_v39  ;;  %v5708_v39 = vmul.f32 %v11852_v25, %v11781_v19  ;;  %v5713_v25 = vmul.f32 %v10048_v35, %v11786_v52  ;;  %v11925_v52 = vld [vmem:[#allocation163_spill] sm:$0xff]  ;;  %v11928_v19 = vld [vmem:[#allocation150_spill] sm:$0xff] }
 0x6aa   : > { %v3770_v44 = vadd.f32 %v11904_v57, %v3490_v22  ;;  %v11926_v57 = vld [vmem:[#allocation143_spill] sm:$0xff] }
 0x6ac   : > { %v4107_v2 = vadd.f32 %v11908_v14, %v3770_v44  ;;  %v11932_v14 = vld [vmem:[#allocation80_spill] sm:$0xff] }
 0x6ae   : > { %v5829_v13 = vld [vmem:[#allocation1] sm:$0xff] }
 0x6af   : > { %v5877_v61 = vadd.f32 %v5829_v13, %v5548_v48  ;;  %5830 = vst [vmem:[#allocation1] ss:$9 sm:$0xff] %v5691_v36  ;;  %v4108_v36 = vadd.f32 %v11909_v18, %v3771_v29  ;;  %v5705_v48 = vmul.f32 %v10048_v35, %v11910_v63  ;;  %v11912_v13 = vld [vmem:[#allocation166_spill] sm:$0xff] }
 0x6b0   : > { %5831 = vst [vmem:[#allocation1 + $0x1] ss:$9 sm:$0xff] %v5692_v50  ;;  %v5706_v50 = vmul.f32 %v10052_v58, %v11911_v45  ;;  %v4387_v30 = vadd.f32 %v11912_v13, %v4107_v2  ;;  %v11935_v63 = vld [vmem:[#allocation102_spill] sm:$0xff]  ;;  %v11936_v45 = vld [vmem:[#allocation160_spill] sm:$0xff]  ;;  %v11937_v13 = vld [vmem:[#allocation97_spill] sm:$0xff] }
 0x6b1   : > { %v6328_v54 = vpack.i.bf16 %v5877_v61, %v5876_v34  ;;  %5832 = vst [vmem:[#allocation1 + $0x2] ss:$9 sm:$0xff] %v5693_v56  ;;  %v11913_v56 = vld [vmem:[#allocation169_spill] sm:$0xff]  ;;  %v11914_v61 = vld [vmem:[#allocation104_spill] sm:$0xff] }
 0x6b2   : > { %5833 = vst [vmem:[#allocation1 + $0x3] ss:$9 sm:$0xff] %v5694_v51  ;;  %v4388_v34 = vadd.f32 %v11913_v56, %v4108_v36  ;;  %v4667_v12 = vadd.f32 %v11914_v61, %v4387_v30  ;;  %v11915_v51 = vld [vmem:[#allocation84_spill] sm:$0xff] }
 0x6b3   : > { %6329 = vrot.lane.b32.xlu1 %v6328_v54, %s6470_s29  ;;  %5834 = vst [vmem:[#allocation1 + $0x4] ss:$9 sm:$0xff] %v5695_v21  ;;  %v11916_v21 = vld [vmem:[#allocation117_spill] sm:$0xff] }
 0x6b4   : > { %5835 = vst [vmem:[#allocation1 + $0x5] ss:$9 sm:$0xff] %v5696_v47  ;;  %v4668_v60 = vadd.f32 %v11915_v51, %v4388_v34  ;;  %v5003_v54 = vadd.f32 %v11916_v21, %v4667_v12  ;;  %v11917_v47 = vld [vmem:[#allocation110_spill] sm:$0xff]  ;;  %v11939_v34 = vld [vmem:[#allocation61_spill] sm:$0xff] }
 0x6b5   : > { %5836 = vst [vmem:[#allocation1 + $0x6] ss:$9 sm:$0xff] %v5697_v46  ;;  %v11918_v46 = vld [vmem:[#allocation123_spill] sm:$0xff]  ;;  %v11941_v51 = vld [vmem:[#allocation113_spill] sm:$0xff] }
 0x6b6   : > { %5837 = vst [vmem:[#allocation1 + $0x7] ss:$9 sm:$0xff] %v5698_v42  ;;  %v5004_v6 = vadd.f32 %v11917_v47, %v4668_v60  ;;  %v5276_v55 = vadd.f32 %v11918_v46, %v5003_v54  ;;  %v11942_v21 = vld [vmem:[#allocation125_spill] sm:$0xff]  ;;  %v11943_v47 = vld [vmem:[#allocation126_spill] sm:$0xff]  ;;  %v6352_v46 = vld [vmem:[%s6569_s19] sm:$0xf] }
 0x6b8   : > { %v5277_v42 = vadd.f32 %v11919_v49, %v5004_v6  ;;  %v5549_v0 = vadd.f32 %v9980_v62, %v5276_v55  ;;  %v5926_v6 = vld [vmem:[%s10626_s3] sm:$0xf]  ;;  %v3210_v55 = vunpack.c.l.bf16 %v6352_v46  ;;  %v6353_v49 = vld [vmem:[%s6569_s19 + $0x10] sm:$0xf] }
 0x6bd   : > { %v5838_v31 = vld [vmem:[#allocation1] sm:$0xff] }
 0x6be   : > { %5839 = vst [vmem:[#allocation1] ss:$9 sm:$0xff] %v5699_v26  ;;  %v5707_v26 = vmul.f32 %v11851_v41, %v11920_v28  ;;  %v5878_v38 = vadd.f32 %v5838_v31, %v5549_v0  ;;  %v5711_v41 = vmul.f32 %v11853_v11, %v11784_v37  ;;  %v11923_v37 = vld [vmem:[#allocation77_spill] sm:$0xff]  ;;  %v11924_v31 = vld [vmem:[#allocation142_spill] sm:$0xff]  ;;  %v10264_v28 = vld [vmem:[%s10627_s4] ss:$0 sm:$0xff] }
 0x6bf   : > { %5840 = vst [vmem:[#allocation1 + $0x1] ss:$9 sm:$0xff] %v5700_v24  ;;  %v5550_v24 = vadd.f32 %v10004_v20, %v5277_v42  ;;  %v5712_v20 = vmul.f32 %v10044_v32, %v11785_v27  ;;  %v3493_v27 = vadd.f32 %v10064_v10, %v11923_v37  ;;  %v10259_v42 = vunpack.c.l.bf16 %v6353_v49  ;;  %v6357_v37 = vld [vmem:[%s6569_s19 + $0x14] sm:$0x1] }
 0x6c0   : > { %5841 = vst [vmem:[#allocation1 + $0x2] ss:$9 sm:$0xff] %v5701_v1  ;;  %v5710_v1 = vmul.f32 %v9311_v3, %v11783_v16  ;;  %v5714_v3 = vmul.f32 %v10052_v58, %v11921_v23  ;;  %v3492_v16 = vadd.f32 %v10064_v10, %v11922_v17  ;;  %v11933_v10 = vld [vmem:[#allocation167_spill] sm:$0xff]  ;;  %v5946_v0 = vsel %vm5944_vm6, %v5926_v6, 0  ;;  %v6364_v6 = vld [vmem:[%s6569_s19 + $0x20] sm:$0xf] }
 0x6c1   : > { %5842 = vst [vmem:[#allocation1 + $0x3] ss:$9 sm:$0xff] %v5702_v5  ;;  %v3773_v44 = vadd.f32 %v11926_v57, %v3493_v27  ;;  %5955 = vmatpush.bf16.msra.mxu1 %v5946_v0  ;;  %v3775_v27 = vunpack.c.l.bf16 %v6357_v37  ;;  %v10304_v46 = vunpack.c.l.bf16 %v6364_v6 }
 0x6c2   : > { %5843 = vst [vmem:[#allocation1 + $0x4] ss:$9 sm:$0xff] %v5703_v15  ;;  %v3772_v5 = vadd.f32 %v11924_v31, %v3492_v16  ;;  %v11930_v15 = vld [vmem:[#allocation155_spill] sm:$0xff] }
 0x6c3   : > { %5844 = vst [vmem:[#allocation1 + $0x5] ss:$9 sm:$0xff] %v5704_v8  ;;  %v11931_v43 = vrot.slane %v11930_v15, 6  ;;  %v4110_v2 = vadd.f32 %v11932_v14, %v3773_v44  ;;  %v11934_v18 = vrot.slane %v11930_v15, 7  ;;  %v6359_v14 = vld [vmem:[%s6569_s19 + $0xa0] sm:$0xf] }
 0x6c4   : > { %5845 = vst [vmem:[#allocation1 + $0x6] ss:$9 sm:$0xff] %v5705_v48  ;;  %v4109_v29 = vadd.f32 %v11928_v19, %v3772_v5  ;;  %v11946_v5 = vld [vmem:[#allocation7_spill] sm:$0xff] }
 0x6c5   : > { %5846 = vst [vmem:[#allocation1 + $0x7] ss:$9 sm:$0xff] %v5706_v50  ;;  %v5720_v8 = vmul.f32 %v10044_v32, %v11931_v43  ;;  %v5721_v36 = vmul.f32 %v10048_v35, %v11934_v18  ;;  %v5722_v50 = vmul.f32 %v10052_v58, %v11849_v40  ;;  %v4390_v30 = vadd.f32 %v11937_v13, %v4110_v2  ;;  %v11938_v32 = vld [vmem:[#allocation105_spill] sm:$0xff]  ;;  %v11940_v35 = vld [vmem:[#allocation103_spill] sm:$0xff]  ;;  %v6358_v43 = vld [vmem:[%s6569_s19 + $0x90] sm:$0xf] }
 0x6c6   : > { %v4389_v48 = vadd.f32 %v11935_v63, %v4109_v29  ;;  %v3785_v44 = vmul.f32 %v11946_v5, %v10259_v42  ;;  %v3786_v19 = vmul.f32 %v11946_v5, %v3775_v27  ;;  %v4112_v2 = vunpack.c.l.bf16 %v6359_v14  ;;  %v6360_v18 = vld [vmem:[%s6569_s19 + $0x98] sm:$0xf]  ;;  %v6361_v63 = vld [vmem:[%s6569_s19 + $0xa8] sm:$0xf] }
 0x6c7   : > { %v4670_v61 = vadd.f32 %v11939_v34, %v4390_v30 }
 0x6c8   : > { %v4669_v56 = vadd.f32 %v11938_v32, %v4389_v48  ;;  %v3819_v15 = vrot.slane %v3785_v44, 1  ;;  %v4392_v48 = vunpack.c.l.bf16 %v6361_v63  ;;  %v6362_v32 = vld [vmem:[%s6569_s19 + $0x94] sm:$0x1] }
 0x6c9   : > { %v5006_v60 = vadd.f32 %v11941_v51, %v4670_v61 }
 0x6ca   : > { %v5005_v12 = vadd.f32 %v11940_v35, %v4669_v56  ;;  %v4671_v56 = vunpack.c.l.bf16 %v6362_v32  ;;  %v11948_v35 = vld [vmem:[#allocation10_spill] sm:$0xff] }
 0x6cb   : > { %v5279_v40 = vadd.f32 %v11943_v47, %v5006_v60  ;;  %v4401_v51 = vmul.f32 %v11948_v35, %v4392_v48  ;;  %v11949_v47 = vld [vmem:[#allocation8_spill] sm:$0xff] }
 0x6cc   : > { %v5847_v22 = vld [vmem:[#allocation1] sm:$0xff]  ;;  %v5278_v54 = vadd.f32 %v11942_v21, %v5005_v12  ;;  %v4682_v49 = vmul.f32 %v11949_v47, %v4112_v2 }
 0x6cd   : > { %v5879_v4 = vadd.f32 %v5847_v22, %v5550_v24  ;;  %5848 = vst [vmem:[#allocation1] ss:$9 sm:$0xff] %v5707_v26  ;;  %v5552_v26 = vadd.f32 %v10040_v59, %v5279_v40  ;;  %v11945_v59 = vld [vmem:[#allocation6_spill] sm:$0xff]  ;;  %v6363_v21 = vld [vmem:[%s6569_s19 + $0xa4] sm:$0x1] }
 0x6ce   : > { %5849 = vst [vmem:[#allocation1 + $0x1] ss:$9 sm:$0xff] %v5708_v39  ;;  %v5551_v58 = vadd.f32 %v10026_v53, %v5278_v54  ;;  %v6354_v53 = vld [vmem:[%s6569_s19 + $0x8] sm:$0xf]  ;;  %v10269_v39 = vld [vmem:[%s6569_s19 + $0x18] sm:$0xf]  ;;  %v4672_v54 = vunpack.c.l.bf16 %v6363_v21 }
 0x6cf   : > { %v6333_v62 = vpack.i.bf16 %v5879_v4, %v5878_v38  ;;  %5850 = vst [vmem:[#allocation1 + $0x2] ss:$9 sm:$0xff] %v5709_v7  ;;  %v3494_v24 = vunpack.c.l.bf16 %v6354_v53  ;;  %v3495_v22 = vunpack.c.l.bf16 %v10269_v39  ;;  %v11944_v38 = vld [vmem:[#allocation5_spill] sm:$0xff] }
 0x6d0   : > { %5851 = vst [vmem:[#allocation1 + $0x3] ss:$9 sm:$0xff] %v5710_v1  ;;  %v3219_v4 = vmul.f32 %v11944_v38, %v3210_v55  ;;  %v3220_v1 = vmul.f32 %v11944_v38, %v10259_v42  ;;  %v4683_v0 = vmul.f32 %v11949_v47, %v4672_v54 }
 0x6d1   : > { %6334 = vrot.lane.b32.xlu2 %v6333_v62, %s6470_s29  ;;  %5852 = vst [vmem:[#allocation1 + $0x4] ss:$9 sm:$0xff] %v5711_v41  ;;  %v6356_v41 = vld [vmem:[%s6569_s19 + $0x4] sm:$0x1]  ;;  %v3503_v23 = vmul.f32 %v11945_v59, %v3494_v24 }
 0x6d2   : > { %5853 = vst [vmem:[#allocation1 + $0x5] ss:$9 sm:$0xff] %v5712_v20  ;;  %v3774_v62 = vunpack.c.l.bf16 %v6356_v41  ;;  %v3230_v17 = vadd.f32 %v10264_v28, %v3219_v4  ;;  %v3231_v16 = vadd.f32 %v10264_v28, %v3220_v1  ;;  %v4715_v41 = vrot.slane %v4682_v49, 1 }
 0x6d3   : > { %5854 = vst [vmem:[#allocation1 + $0x6] ss:$9 sm:$0xff] %v5713_v25 }
 0x6d4   : > { %5855 = vst [vmem:[#allocation1 + $0x7] ss:$9 sm:$0xff] %v5714_v3  ;;  %v3504_v3 = vmul.f32 %v11945_v59, %v3495_v22  ;;  %v3511_v57 = vadd.f32 %v3503_v23, %v3230_v17  ;;  %v6366_v23 = vld [vmem:[%s6569_s19 + $0x28] sm:$0xf]  ;;  %v11950_v17 = vld [vmem:[#allocation20_spill] sm:$0xff] }
 0x6db   : > { %v5856_v11 = vld [vmem:[#allocation1] sm:$0xff] }
 0x6dc   : > { %5857 = vst [vmem:[#allocation1] ss:$9 sm:$0xff] %v11925_v52  ;;  %v5880_v20 = vadd.f32 %v5856_v11, %v5551_v58  ;;  %v3783_v52 = vmul.f32 %v11946_v5, %v3210_v55  ;;  %v3784_v11 = vmul.f32 %v11946_v5, %v3774_v62  ;;  %v4681_v58 = vmul.f32 %v11949_v47, %v4671_v56  ;;  %v6368_v56 = vld [vmem:[%s6569_s19 + $0x40] sm:$0xf] }
 0x6dd   : > { %5858 = vst [vmem:[#allocation1 + $0x1] ss:$9 sm:$0xff] %v11927_v9  ;;  %v3512_v9 = vadd.f32 %v3504_v3, %v3231_v16  ;;  %v3496_v3 = vunpack.c.l.bf16 %v6366_v23  ;;  %v5009_v16 = vmul.f32 %v11950_v17, %v10259_v42 }
 0x6de   : > { %5859 = vst [vmem:[#allocation1 + $0x2] ss:$9 sm:$0xff] %v11929_v33  ;;  %v3816_v29 = vrot.slane %v3783_v52, 1  ;;  %v3817_v33 = vrot.slane %v3784_v11, 1  ;;  %v4713_v24 = vrot.slane %v4681_v58, 1  ;;  %v5010_v52 = vmul.f32 %v11950_v17, %v10304_v46 }
 0x6df   : > { %5860 = vst [vmem:[#allocation1 + $0x3] ss:$9 sm:$0xff] %v11933_v10  ;;  %v3820_v10 = vrot.slane %v3786_v19, 1  ;;  %v10319_v11 = vld [vmem:[%s10624_s1 + $0x8] ss:$0 sm:$0xff] }
 0x6e0   : > { %5861 = vst [vmem:[#allocation1 + $0x4] ss:$9 sm:$0xff] %v11936_v45  ;;  %v3818_v45 = vsel %vm3815_vm7, %v3816_v29, %v3817_v33  ;;  %v5557_v19 = vmul.f32 %v10319_v11, %v10304_v46 }
 0x6e1   : > { %5862 = vst [vmem:[#allocation1 + $0x5] ss:$9 sm:$0xff] %v5720_v8  ;;  %v4111_v8 = vunpack.c.l.bf16 %v6358_v43  ;;  %v3821_v34 = vsel %vm3815_vm7, %v3819_v15, %v3820_v10  ;;  %v3848_v61 = vadd.f32 %v3818_v45, %v3511_v57  ;;  %v5555_v57 = vmul.f32 %v10319_v11, %v10259_v42  ;;  %v11951_v43 = vld [vmem:[#allocation86_spill] sm:$0xff] }
 0x6e2   : > { %5863 = vst [vmem:[#allocation1 + $0x6] ss:$9 sm:$0xff] %v5721_v36  ;;  %v4391_v36 = vunpack.c.l.bf16 %v6360_v18  ;;  %v3849_v60 = vadd.f32 %v3821_v34, %v3512_v9  ;;  %v5556_v9 = vmul.f32 %v10319_v11, %v3775_v27  ;;  %v5283_v14 = vmul.f32 %v11951_v43, %v3496_v3 }
 0x6e3   : > { %5864 = vst [vmem:[#allocation1 + $0x7] ss:$9 sm:$0xff] %v5722_v50  ;;  %v11947_v50 = vld [vmem:[#allocation15_spill] sm:$0xff]  ;;  %v4680_v40 = vmul.f32 %v11949_v47, %v4111_v8  ;;  %v5590_v42 = vrot.slane %v5557_v19, 1  ;;  %v3221_v27 = vmul.f32 %v11944_v38, %v10304_v46  ;;  %v3505_v45 = vmul.f32 %v11945_v59, %v3496_v3  ;;  %v6375_v3 = vld [vmem:[%s6569_s19 + $0x34] sm:$0x1] }
 0x6e4   : > { %v4120_v13 = vmul.f32 %v11947_v50, %v4111_v8  ;;  %v4121_v30 = vmul.f32 %v11947_v50, %v4112_v2  ;;  %v4400_v12 = vmul.f32 %v11948_v35, %v4391_v36  ;;  %v5282_v8 = vmul.f32 %v11951_v43, %v3495_v22 }
 0x6e5   : > { %v4712_v53 = vrot.slane %v4680_v40, 1  ;;  %v5587_v2 = vrot.slane %v5555_v57, 1  ;;  %v5588_v10 = vrot.slane %v5556_v9, 1  ;;  %v3232_v22 = vadd.f32 %v10264_v28, %v3221_v27  ;;  %v6377_v57 = vld [vmem:[%s6569_s19 + $0xb0] sm:$0xf] }
 0x6e6   : > { %v4128_v55 = vadd.f32 %v4120_v13, %v3848_v61  ;;  %v10339_v34 = vunpack.c.l.bf16 %v6368_v56  ;;  %v6378_v9 = vld [vmem:[%s6569_s19 + $0xc0] sm:$0xf] }
 0x6e7   : > { %v5589_v48 = vsel %vm3815_vm7, %v5587_v2, %v5588_v10  ;;  %v3513_v58 = vadd.f32 %v3505_v45, %v3232_v22  ;;  %v4114_v19 = vunpack.c.l.bf16 %v6378_v9 }
 0x6e8   : > { %v4408_v1 = vadd.f32 %v4400_v12, %v4128_v55  ;;  %v10342_v12 = vld [vmem:[%s6569_s19 + $0x44] sm:$0x1] }
 0x6ea   : > { %v5865_v7 = vld [vmem:[#allocation1] sm:$0xff] }
 0x6eb   : > { %v5881_v25 = vadd.f32 %v5865_v7, %v5552_v26  ;;  %v4129_v26 = vadd.f32 %v4121_v30, %v3849_v60  ;;  %v6365_v7 = vld [vmem:[%s6569_s19 + $0x24] sm:$0x1]  ;;  %v6370_v60 = vld [vmem:[%s6569_s19 + $0x50] sm:$0xf] }
 0x6ec   : > { %v3776_v4 = vunpack.c.l.bf16 %v6365_v7  ;;  %v10346_v21 = vunpack.c.l.bf16 %v6370_v60  ;;  %v10357_v7 = vld [vmem:[%s6569_s19 + $0x48] sm:$0xf] }
 0x6ed   : > { %v6338_v31 = vpack.i.bf16 %v5881_v25, %v5880_v20  ;;  %v4409_v62 = vadd.f32 %v4401_v51, %v4129_v26  ;;  %v4714_v20 = vsel %vm3815_vm7, %v4712_v53, %v4713_v24  ;;  %v4716_v25 = vrot.slane %v4683_v0, 1  ;;  %v10353_v0 = vld [vmem:[%s6569_s19 + $0x54] sm:$0x1] }
 0x6ee   : > { %v5558_v29 = vmul.f32 %v10319_v11, %v3776_v4  ;;  %v3788_v13 = vmul.f32 %v11946_v5, %v3776_v4  ;;  %v3778_v51 = vunpack.c.l.bf16 %v10342_v12  ;;  %v3223_v26 = vmul.f32 %v11944_v38, %v10339_v34 }
 0x6ef   : > { %6339 = vrot.lane.b32.xlu0 %v6338_v31, %s6470_s29  ;;  %v4717_v37 = vsel %vm3815_vm7, %v4715_v41, %v4716_v25  ;;  %v4744_v31 = vadd.f32 %v4714_v20, %v4408_v1  ;;  %v3779_v53 = vunpack.c.l.bf16 %v10353_v0  ;;  %v3498_v4 = vunpack.c.l.bf16 %v10357_v7  ;;  %v6374_v25 = vld [vmem:[%s6569_s19 + $0x38] sm:$0xf] }
 0x6f0   : > { %v4745_v44 = vadd.f32 %v4717_v37, %v4409_v62  ;;  %v5591_v18 = vrot.slane %v5558_v29, 1  ;;  %v3823_v6 = vrot.slane %v3788_v13, 1  ;;  %v10363_v1 = vmul.f32 %v11946_v5, %v3778_v51  ;;  %v6373_v62 = vld [vmem:[%s6569_s19 + $0x30] sm:$0xf]  ;;  %v10373_v37 = vld [vmem:[%s6569_s19 + $0x58] sm:$0xf] }
 0x6f1   : > { %v5017_v33 = vadd.f32 %v5009_v16, %v4744_v31  ;;  %v10367_v41 = vmul.f32 %v11944_v38, %v10346_v21  ;;  %v3213_v20 = vunpack.c.l.bf16 %v6373_v62  ;;  %v3497_v23 = vunpack.c.l.bf16 %v6374_v25  ;;  %v6379_v29 = vld [vmem:[%s6569_s19 + $0xb8] sm:$0xf]  ;;  %v6381_v13 = vld [vmem:[%s6569_s19 + $0xb4] sm:$0x1] }
 0x6f2   : > { %v5018_v15 = vadd.f32 %v5010_v52, %v4745_v44  ;;  %v5592_v39 = vsel %vm3815_vm7, %v5590_v42, %v5591_v18  ;;  %v3777_v16 = vunpack.c.l.bf16 %v6375_v3  ;;  %v3499_v31 = vunpack.c.l.bf16 %v10373_v37 }
 0x6f3   : > { %v5290_v36 = vadd.f32 %v5282_v8, %v5017_v33  ;;  %v3787_v52 = vmul.f32 %v11946_v5, %v10304_v46  ;;  %v4113_v44 = vunpack.c.l.bf16 %v6377_v57  ;;  %v4393_v33 = vunpack.c.l.bf16 %v6379_v29 }
 0x6f4   : > { %v5291_v63 = vadd.f32 %v5283_v14, %v5018_v15  ;;  %v3222_v15 = vmul.f32 %v11944_v38, %v3213_v20  ;;  %v3506_v8 = vmul.f32 %v11945_v59, %v3497_v23  ;;  %v3789_v14 = vmul.f32 %v11946_v5, %v3213_v20 }
 0x6f5   : > { %v5619_v30 = vadd.f32 %v5589_v48, %v5290_v36  ;;  %v3790_v2 = vmul.f32 %v11946_v5, %v3777_v16  ;;  %v3234_v10 = vadd.f32 %v10264_v28, %v3223_v26  ;;  %v3822_v46 = vrot.slane %v3787_v52, 1  ;;  %v6380_v48 = vld [vmem:[%s6569_s19 + $0xc8] sm:$0xf] }
 0x6f6   : > { %v5620_v32 = vadd.f32 %v5592_v39, %v5291_v63  ;;  %v4122_v42 = vmul.f32 %v11947_v50, %v4113_v44  ;;  %v4123_v18 = vmul.f32 %v11947_v50, %v4114_v19  ;;  %v3233_v27 = vadd.f32 %v10264_v28, %v3222_v15 }
 0x6f7   : > { %v3825_v36 = vrot.slane %v3789_v14, 1  ;;  %v3826_v63 = vrot.slane %v3790_v2, 1  ;;  %v4394_v39 = vunpack.c.l.bf16 %v6380_v48  ;;  %v3824_v22 = vsel %vm3815_vm7, %v3822_v46, %v3823_v6 }
 0x6f8   : > { %v4402_v45 = vmul.f32 %v11948_v35, %v4393_v33  ;;  %v4686_v6 = vmul.f32 %v11949_v47, %v4114_v19  ;;  %v5012_v33 = vmul.f32 %v11950_v17, %v10339_v34  ;;  %v5559_v15 = vmul.f32 %v10319_v11, %v3213_v20 }
 0x6f9   : > { %v3827_v60 = vsel %vm3815_vm7, %v3825_v36, %v3826_v63  ;;  %v4403_v25 = vmul.f32 %v11948_v35, %v4394_v39  ;;  %v5560_v14 = vmul.f32 %v10319_v11, %v3777_v16  ;;  %v5561_v2 = vmul.f32 %v10319_v11, %v10339_v34 }
 0x6fa   : > { %v4721_v57 = vrot.slane %v4686_v6, 1  ;;  %v5593_v36 = vrot.slane %v5559_v15, 1  ;;  %v3791_v16 = vmul.f32 %v11946_v5, %v10339_v34  ;;  %v3508_v12 = vmul.f32 %v11945_v59, %v3499_v31  ;;  %v6389_v15 = vld [vmem:[%s6569_s19 + $0xe8] sm:$0xf] }
 0x6fb   : > { %v5594_v63 = vrot.slane %v5560_v14, 1 }
 0x707   : > { %v6325_v61 = vpop.permute.xlu0 %6324 }
 0x708   : > { %v6327_v54 = vunpack.i.h.bf16 %v6325_v61  ;;  %v6326_v40 = vunpack.i.l.bf16 %v6325_v61  ;;  %v3514_v61 = vadd.f32 %v3506_v8, %v3233_v27  ;;  %v5284_v27 = vmul.f32 %v11951_v43, %v3497_v23 }
 0x70a   : > { %v5914_v55 = vsel %vm1951_vm5, %v5619_v30, %v6326_v40  ;;  %v5915_v49 = vsel %vm1951_vm5, %v5620_v32, %v6327_v54  ;;  %v4673_v30 = vunpack.c.l.bf16 %v6381_v13  ;;  %v6382_v32 = vld [vmem:[%s6569_s19 + $0xc4] sm:$0x1]  ;;  %v3850_v54 = vadd.f32 %v3824_v22, %v3513_v58 }
 0x70b   : > { %v5922_v24 = vpack.c.bf16 %v5915_v49, %v5914_v55  ;;  %v4674_v56 = vunpack.c.l.bf16 %v6382_v32  ;;  %v4684_v40 = vmul.f32 %v11949_v47, %v4113_v44  ;;  %v3507_v55 = vmul.f32 %v11945_v59, %v3498_v4 }
 0x70c   : > { %v4685_v49 = vmul.f32 %v11949_v47, %v4673_v30  ;;  %v4130_v62 = vadd.f32 %v4122_v42, %v3850_v54  ;;  %v5011_v44 = vmul.f32 %v11950_v17, %v3213_v20  ;;  %v3829_v20 = vrot.slane %v10363_v1, 1  ;;  %v6383_v30 = vld [vmem:[%s6569_s19 + $0x60] sm:$0xf]  ;;  %v10442_v54 = vld [vmem:[%s6569_s19 + $0x64] sm:$0x1] }
 0x70d   : > { %6188 = vmatmul.msk.bf16.vlgmr.msra.gmra.mxu1 %vm5931_vm8, %v5922_v24  ;;  %v4687_v26 = vmul.f32 %v11949_v47, %v4674_v56  ;;  %v3851_v24 = vadd.f32 %v3827_v60, %v3514_v61  ;;  %v4718_v3 = vrot.slane %v4684_v40, 1  ;;  %v3235_v22 = vadd.f32 %v10264_v28, %v10367_v41  ;;  %v10435_v61 = vld [vmem:[%s6569_s19 + $0x68] sm:$0xf] }
 0x70e   : > { %v4719_v52 = vrot.slane %v4685_v49, 1  ;;  %v4410_v29 = vadd.f32 %v4402_v45, %v4130_v62  ;;  %v3515_v23 = vadd.f32 %v3507_v55, %v3234_v10  ;;  %v5596_v1 = vrot.slane %v5561_v2, 1  ;;  %v6386_v49 = vld [vmem:[%s6569_s19 + $0xd0] sm:$0xf] }
 0x70f   : > { %v4722_v58 = vrot.slane %v4687_v26, 1  ;;  %v4131_v9 = vadd.f32 %v4123_v18, %v3851_v24  ;;  %v5562_v18 = vmul.f32 %v10319_v11, %v3778_v51  ;;  %v5285_v51 = vmul.f32 %v11951_v43, %v3498_v4 }
 0x710   : > { %v4720_v19 = vsel %vm3815_vm7, %v4718_v3, %v4719_v52  ;;  %v10429_v32 = vunpack.c.l.bf16 %v6383_v30  ;;  %v3793_v41 = vmul.f32 %v11946_v5, %v10346_v21  ;;  %v5595_v56 = vsel %vm3815_vm7, %v5593_v36, %v5594_v63 }
 0x711   : > { %v4723_v8 = vsel %vm3815_vm7, %v4721_v57, %v4722_v58  ;;  %v4411_v46 = vadd.f32 %v4403_v25, %v4131_v9  ;;  %v4746_v42 = vadd.f32 %v4720_v19, %v4410_v29  ;;  %v5597_v45 = vrot.slane %v5562_v18, 1  ;;  %v6387_v57 = vld [vmem:[%s6569_s19 + $0xe0] sm:$0xf]  ;;  %v6388_v29 = vld [vmem:[%s6569_s19 + $0xd8] sm:$0xf] }
 0x712   : > { %v3500_v7 = vunpack.c.l.bf16 %v10435_v61  ;;  %v3794_v4 = vmul.f32 %v11946_v5, %v3779_v53  ;;  %v3828_v10 = vrot.slane %v3791_v16, 1  ;;  %v3516_v60 = vadd.f32 %v3508_v12, %v3235_v22 }
 0x713   : > { %v4747_v48 = vadd.f32 %v4723_v8, %v4411_v46  ;;  %v5019_v39 = vadd.f32 %v5011_v44, %v4746_v42  ;;  %v3780_v40 = vunpack.c.l.bf16 %v10442_v54  ;;  %v3831_v55 = vrot.slane %v3793_v41, 1  ;;  %v6390_v8 = vld [vmem:[%s6569_s19 + $0xd4] sm:$0x1] }
 0x714   : > { %v4115_v6 = vunpack.c.l.bf16 %v6386_v49  ;;  %v5598_v24 = vsel %vm3815_vm7, %v5596_v1, %v5597_v45  ;;  %v3830_v62 = vsel %vm3815_vm7, %v3828_v10, %v3829_v20  ;;  %v3832_v25 = vrot.slane %v3794_v4, 1 }
 0x715   : > { %v5020_v13 = vadd.f32 %v5012_v33, %v4747_v48  ;;  %v5292_v34 = vadd.f32 %v5284_v27, %v5019_v39  ;;  %v3852_v52 = vadd.f32 %v3830_v62, %v3515_v23  ;;  %v4116_v58 = vunpack.c.l.bf16 %v6387_v57  ;;  %v6391_v27 = vld [vmem:[%s6569_s19 + $0xe4] sm:$0x1] }
 0x716   : > { %v4124_v44 = vmul.f32 %v11947_v50, %v4115_v6  ;;  %v3833_v9 = vsel %vm3815_vm7, %v3831_v55, %v3832_v25  ;;  %v4395_v33 = vunpack.c.l.bf16 %v6388_v29  ;;  %v4396_v19 = vunpack.c.l.bf16 %v6389_v15 }
 0x717   : > { %v5293_v26 = vadd.f32 %v5285_v51, %v5020_v13  ;;  %v5621_v3 = vadd.f32 %v5595_v56, %v5292_v34  ;;  %v4675_v14 = vunpack.c.l.bf16 %v6390_v8  ;;  %v3853_v2 = vadd.f32 %v3833_v9, %v3516_v60 }
 0x718   : > { %v4125_v46 = vmul.f32 %v11947_v50, %v4116_v58  ;;  %v4132_v42 = vadd.f32 %v4124_v44, %v3852_v52  ;;  %v4676_v18 = vunpack.c.l.bf16 %v6391_v27  ;;  %v4404_v20 = vmul.f32 %v11948_v35, %v4395_v33 }
 0x719   : > { %v4405_v36 = vmul.f32 %v11948_v35, %v4396_v19  ;;  %v4688_v63 = vmul.f32 %v11949_v47, %v4115_v6  ;;  %v4689_v16 = vmul.f32 %v11949_v47, %v4675_v14  ;;  %v5622_v48 = vadd.f32 %v5598_v24, %v5293_v26 }
 0x71a   : > { %v4133_v39 = vadd.f32 %v4125_v46, %v3853_v2  ;;  %v4690_v22 = vmul.f32 %v11949_v47, %v4116_v58  ;;  %v4691_v12 = vmul.f32 %v11949_v47, %v4676_v18  ;;  %v4412_v51 = vadd.f32 %v4404_v20, %v4132_v42  ;;  %v6392_v20 = vld [vmem:[%s6569_s19 + $0x70] sm:$0xf] }
 0x71b   : > { %v4724_v1 = vrot.slane %v4688_v63, 1  ;;  %v4725_v45 = vrot.slane %v4689_v16, 1  ;;  %v5013_v13 = vmul.f32 %v11950_v17, %v10346_v21  ;;  %v5014_v60 = vmul.f32 %v11950_v17, %v10429_v32  ;;  %v10495_v63 = vld [vmem:[%s6569_s19 + $0x74] sm:$0x1] }
 0x71c   : > { %v4413_v41 = vadd.f32 %v4405_v36, %v4133_v39  ;;  %v4727_v56 = vrot.slane %v4690_v22, 1  ;;  %v4728_v10 = vrot.slane %v4691_v12, 1  ;;  %v5286_v55 = vmul.f32 %v11951_v43, %v3499_v31  ;;  %v10504_v12 = vld [vmem:[%s6569_s19 + $0x78] sm:$0xf] }
 0x71d   : > { %v4726_v4 = vsel %vm3815_vm7, %v4724_v1, %v4725_v45  ;;  %v5563_v24 = vmul.f32 %v10319_v11, %v10346_v21  ;;  %v5564_v52 = vmul.f32 %v10319_v11, %v3779_v53  ;;  %v5565_v37 = vmul.f32 %v10319_v11, %v10429_v32 }
 0x71e   : > { %v4748_v26 = vadd.f32 %v4726_v4, %v4412_v51  ;;  %v4729_v25 = vsel %vm3815_vm7, %v4727_v56, %v4728_v10  ;;  %v5566_v21 = vmul.f32 %v10319_v11, %v3780_v40  ;;  %v10492_v36 = vunpack.c.l.bf16 %v6392_v20 }
 0x71f   : > { %v4749_v57 = vadd.f32 %v4729_v25, %v4413_v41  ;;  %v5599_v58 = vrot.slane %v5563_v24, 1  ;;  %v5600_v0 = vrot.slane %v5564_v52, 1  ;;  %v5602_v44 = vrot.slane %v5565_v37, 1  ;;  %v6399_v37 = vld [vmem:[%s6569_s19 + $0xf8] sm:$0xf] }
 0x720   : > { %v5021_v31 = vadd.f32 %v5013_v13, %v4748_v26  ;;  %v5603_v9 = vrot.slane %v5566_v21, 1  ;;  %v3781_v16 = vunpack.c.l.bf16 %v10495_v63  ;;  %v3225_v39 = vmul.f32 %v11944_v38, %v10429_v32  ;;  %v6398_v26 = vld [vmem:[%s6569_s19 + $0x104] sm:$0x1] }
 0x721   : > { %v5022_v53 = vadd.f32 %v5014_v60, %v4749_v57  ;;  %v5601_v19 = vsel %vm3815_vm7, %v5599_v58, %v5600_v0  ;;  %v3226_v22 = vmul.f32 %v11944_v38, %v10492_v36  ;;  %v3796_v51 = vmul.f32 %v11946_v5, %v3780_v40 }
 0x722   : > { %v5294_v29 = vadd.f32 %v5286_v55, %v5021_v31  ;;  %v5604_v8 = vsel %vm3815_vm7, %v5602_v44, %v5603_v9  ;;  %v3795_v1 = vmul.f32 %v11946_v5, %v10429_v32  ;;  %v3797_v45 = vmul.f32 %v11946_v5, %v10492_v36  ;;  %v6400_v31 = vld [vmem:[%s6569_s19 + $0x108] sm:$0xf] }
 0x723   : > { %v3798_v38 = vmul.f32 %v11946_v5, %v3781_v16  ;;  %v3236_v13 = vadd.f32 %v10264_v28, %v3225_v39  ;;  %v3509_v54 = vmul.f32 %v11945_v59, %v3500_v7  ;;  %v3237_v40 = vadd.f32 %v10264_v28, %v3226_v22  ;;  %v6396_v28 = vld [vmem:[%s6569_s19 + $0x100] sm:$0xf] }
 0x724   : > { %v5623_v46 = vadd.f32 %v5601_v19, %v5294_v29  ;;  %v3837_v41 = vrot.slane %v3797_v45, 1  ;;  %v4118_v55 = vunpack.c.l.bf16 %v6396_v28  ;;  %v4397_v57 = vunpack.c.l.bf16 %v6399_v37  ;;  %v6347_v28 = vld [vmem:[%s10629_s6] ss:$0 sm:$0xff] }
 0x725   : > { %v6330_v23 = vpop.permute.xlu1 %6329  ;;  %v3838_v56 = vrot.slane %v3798_v38, 1  ;;  %v3517_v4 = vadd.f32 %v3509_v54, %v3236_v13  ;;  %v5567_v45 = vmul.f32 %v10319_v11, %v10492_v36  ;;  %v5568_v38 = vmul.f32 %v10319_v11, %v3781_v16 }
 0x726   : > { %v6332_v34 = vunpack.i.h.bf16 %v6330_v23  ;;  %v6331_v30 = vunpack.i.l.bf16 %v6330_v23  ;;  %v3501_v23 = vunpack.c.l.bf16 %v10504_v12  ;;  %v4127_v52 = vmul.f32 %v11947_v50, %v4118_v55 }
 0x727   : > { %v3839_v61 = vsel %vm3815_vm7, %v3837_v41, %v3838_v56  ;;  %v4694_v0 = vmul.f32 %v11949_v47, %v4118_v55  ;;  %v4406_v29 = vmul.f32 %v11948_v35, %v4397_v57  ;;  %v5606_v41 = vrot.slane %v5568_v38, 1 }
 0x728   : > { %v5916_v49 = vsel %vm1951_vm5, %v5621_v3, %v6331_v30  ;;  %v5917_v6 = vsel %vm1951_vm5, %v5622_v48, %v6332_v34  ;;  %v5287_v3 = vmul.f32 %v11951_v43, %v3500_v7  ;;  %v3510_v32 = vmul.f32 %v11945_v59, %v3501_v23  ;;  %v6395_v7 = vld [vmem:[%s6569_s19 + $0xf0] sm:$0xf] }
 0x729   : > { %v5923_v62 = vpack.c.bf16 %v5917_v6, %v5916_v49  ;;  %v3835_v34 = vrot.slane %v3796_v51, 1  ;;  %v3834_v30 = vrot.slane %v3795_v1, 1  ;;  %v4117_v60 = vunpack.c.l.bf16 %v6395_v7  ;;  %v6397_v49 = vld [vmem:[%s6569_s19 + $0xf4] sm:$0x1]  ;;  %v6403_v51 = vld [vmem:[%s6569_s19 + $0x88] sm:$0xf] }
 0x72a   : > { %v5295_v33 = vadd.f32 %v5287_v3, %v5022_v53  ;;  %v3518_v5 = vadd.f32 %v3510_v32, %v3237_v40  ;;  %v4677_v6 = vunpack.c.l.bf16 %v6397_v49  ;;  %v4678_v59 = vunpack.c.l.bf16 %v6398_v26 }
 0x72b   : > { %6189 = vmatmul.msk.bf16.gmra.mxu1 %vm5931_vm8, %v5923_v62  ;;  %v6335_v15 = vpop.permute.xlu2 %6334  ;;  %v3836_v10 = vsel %vm3815_vm7, %v3834_v30, %v3835_v34  ;;  %v4126_v25 = vmul.f32 %v11947_v50, %v4117_v60  ;;  %v4398_v3 = vunpack.c.l.bf16 %v6400_v31  ;;  %v4692_v21 = vmul.f32 %v11949_v47, %v4117_v60 }
 0x72c   : > { %v6337_v14 = vunpack.i.h.bf16 %v6335_v15  ;;  %v6336_v2 = vunpack.i.l.bf16 %v6335_v15  ;;  %v5624_v42 = vadd.f32 %v5604_v8, %v5295_v33  ;;  %v3854_v24 = vadd.f32 %v3836_v10, %v3517_v4 }
 0x72d   : > { %v3855_v62 = vadd.f32 %v3839_v61, %v3518_v5  ;;  %v4693_v58 = vmul.f32 %v11949_v47, %v4677_v6  ;;  %v4695_v44 = vmul.f32 %v11949_v47, %v4678_v59  ;;  %v4407_v50 = vmul.f32 %v11948_v35, %v4398_v3  ;;  %v6402_v47 = vld [vmem:[%s6569_s19 + $0x84] sm:$0x1] }
 0x72e   : > { %v5918_v27 = vsel %vm1951_vm5, %v5623_v46, %v6336_v2  ;;  %v5919_v18 = vsel %vm1951_vm5, %v5624_v42, %v6337_v14  ;;  %v4134_v53 = vadd.f32 %v4126_v25, %v3854_v24  ;;  %v4730_v33 = vrot.slane %v4692_v21, 1  ;;  %v6401_v46 = vld [vmem:[%s6569_s19 + $0x80] sm:$0xf]  ;;  %s269_s19 = sand.u32 1, %s6458_s25  }
 0x72f   : > { %v5924_v48 = vpack.c.bf16 %v5919_v18, %v5918_v27  ;;  %v4135_v9 = vadd.f32 %v4127_v52, %v3855_v62  ;;  %v4731_v15 = vrot.slane %v4693_v58, 1  ;;  %v4733_v19 = vrot.slane %v4694_v0, 1  ;;  %s6075_s20 = sshll.u32 %s269_s19, 6  ;;  %s5994_s14 = scalar_lea.sflag [#allocation3], %s269_s19 }
 0x730   : > { %v4734_v8 = vrot.slane %v4695_v44, 1  ;;  %v4414_v14 = vadd.f32 %v4406_v29, %v4134_v53  ;;  %v5007_v42 = vunpack.c.l.bf16 %v6401_v46  ;;  %v5553_v20 = vunpack.c.l.bf16 %v6402_v47  ;;  %s10571_s21 = scalar_lea.vmem [#allocation2], %s6075_s20 }
 0x731   : > { %v4415_v2 = vadd.f32 %v4407_v50, %v4135_v9  ;;  %v4732_v27 = vsel %vm3815_vm7, %v4730_v33, %v4731_v15  ;;  %v5280_v1 = vunpack.c.l.bf16 %v6403_v51  ;;  %v5288_v34 = vmul.f32 %v11951_v43, %v3501_v23  ;;  %s6006_s9 = sshll.u32 %s10571_s21, 4  ;;  %s6007_s9 = int_to_ptr.vmem [resolvable:$true] %s6006_s9 }
 0x732   : > { %v4735_v18 = vsel %vm3815_vm7, %v4733_v19, %v4734_v8  ;;  %v4750_v39 = vadd.f32 %v4732_v27, %v4414_v14  ;;  %v5016_v22 = vmul.f32 %v11950_v17, %v5007_v42  ;;  %v5569_v13 = vmul.f32 %v10319_v11, %v5007_v42 }
 0x733   : > { %v4751_v35 = vadd.f32 %v4735_v18, %v4415_v2  ;;  %v5570_v54 = vmul.f32 %v10319_v11, %v5553_v20  ;;  %v5605_v30 = vrot.slane %v5567_v45, 1 }
 0x735   : > { %v5024_v32 = vadd.f32 %v5016_v22, %v4751_v35  ;;  %v5609_v56 = vrot.slane %v5570_v54, 1  ;;  %v5607_v4 = vsel %vm3815_vm7, %v5605_v30, %v5606_v41 }
 0x73b   : > { %6190 = vmatmul.msk.bf16.gmra.mxu1 %vm5931_vm8, %v5924_v48  ;;  %v5015_v48 = vmul.f32 %v11950_v17, %v10492_v36  ;;  %v5289_v17 = vmul.f32 %v11951_v43, %v5280_v1  ;;  %v5608_v36 = vrot.slane %v5569_v13, 1 }
 0x73d   : > { %v5023_v40 = vadd.f32 %v5015_v48, %v4750_v39  ;;  %v5297_v16 = vadd.f32 %v5289_v17, %v5024_v32  ;;  %v5610_v11 = vsel %vm3815_vm7, %v5608_v36, %v5609_v56 }
 0x73f   : > { %v5296_v63 = vadd.f32 %v5288_v34, %v5023_v40  ;;  %v5626_v10 = vadd.f32 %v5610_v11, %v5297_v16 }
 0x741   : > { %v5625_v5 = vadd.f32 %v5607_v4, %v5296_v63 }
 0x761   : > { %v6340_v61 = vpop.permute.xlu0 %6339 }
 0x762   : > { %v6342_v12 = vunpack.i.h.bf16 %v6340_v61  ;;  %v6341_v7 = vunpack.i.l.bf16 %v6340_v61 }
 0x764   : > { %v5920_v23 = vsel %vm1951_vm5, %v5625_v5, %v6341_v7  ;;  %v5921_v43 = vsel %vm1951_vm5, %v5626_v10, %v6342_v12 }
 0x765   : > { %v5925_v60 = vpack.c.bf16 %v5921_v43, %v5920_v23 }
 0x767   : > { %6191 = vmatmul.msk.bf16.gmra.mxu1 %vm5931_vm8, %v5925_v60 }
 0x78a   : > { %v5957_v55 = vpop.f32.mrf.mxu1 }
 0x78b   : > { %v5958_v49 = vadd.f32 %v6347_v28, %v5957_v55 }
 0x78d   : > { %v5977_v6 = vmax.f32 %v5958_v49, 0.0 }
 0x78f   : > { %5985 = vst.msk [vmem:[%s10571_s21] sm:$0xff] %vm5931_vm8, %v5977_v6 }
 0x792   : > { %v5959_v26 = vpop.f32.mrf.mxu1 }
 0x793   : > { %v5960_v59 = vadd.f32 %v6347_v28, %v5959_v26 }
 0x795   : > { %v5978_v24 = vmax.f32 %v5960_v59, 0.0 }
 0x797   : > { %5986 = vst.msk [vmem:[%s10571_s21 + $0x8] sm:$0xff] %vm5931_vm8, %v5978_v24 }
 0x7a8   : > { %v5962_v62 = vpop.f32.mrf.mxu1 }
 0x7a9   : > { %v5963_v25 = vadd.f32 %v6347_v28, %v5962_v62 }
 0x7ab   : > { %v5979_v52 = vmax.f32 %v5963_v25, 0.0 }
 0x7ad   : > { %5987 = vst.msk [vmem:[%s10571_s21 + $0x10] sm:$0xff] %vm5931_vm8, %v5979_v52 }
 0x7b0   : > { %v5964_v37 = vpop.f32.mrf.mxu1 }
 0x7b1   : > { %v5965_v57 = vadd.f32 %v6347_v28, %v5964_v37 }
 0x7b3   : > { %v5980_v31 = vmax.f32 %v5965_v57, 0.0 }
 0x7b5   : > { %5988 = vst.msk [vmem:[%s10571_s21 + $0x18] sm:$0xff] %vm5931_vm8, %v5980_v31 }
 0x7b8   : > { %v5967_v3 = vpop.f32.mrf.mxu1 }
 0x7b9   : > { %v5968_v21 = vadd.f32 %v6347_v28, %v5967_v3 }
 0x7bb   : > { %v5981_v58 = vmax.f32 %v5968_v21, 0.0 }
 0x7bd   : > { %5989 = vst.msk [vmem:[%s10571_s21 + $0x20] sm:$0xff] %vm5931_vm8, %v5981_v58 }
 0x7c0   : > { %v5969_v0 = vpop.f32.mrf.mxu1 }
 0x7c1   : > { %v5970_v44 = vadd.f32 %v6347_v28, %v5969_v0 }
 0x7c3   : > { %v5982_v53 = vmax.f32 %v5970_v44, 0.0 }
 0x7c5   : > { %5990 = vst.msk [vmem:[%s10571_s21 + $0x28] sm:$0xff] %vm5931_vm8, %v5982_v53 }
 0x7e4   : > { %v5972_v9 = vpop.f32.mrf.mxu1 }
 0x7e5   : > { %v5973_v29 = vadd.f32 %v6347_v28, %v5972_v9 }
 0x7e7   : > { %v5983_v50 = vmax.f32 %v5973_v29, 0.0 }
 0x7e9   : > { %5991 = vst.msk [vmem:[%s10571_s21 + $0x30] sm:$0xff] %vm5931_vm8, %v5983_v50 }
 0x7ec   : > { %v5974_v33 = vpop.f32.mrf.mxu1 }
 0x7ed   : > { %v5975_v15 = vadd.f32 %v6347_v28, %v5974_v33 }
 0x7ef   : > { %v5984_v19 = vmax.f32 %v5975_v15, 0.0 }
 0x7f1   : > { %5992 = vst.msk [vmem:[%s10571_s21 + $0x38] sm:$0xff] %vm5931_vm8, %v5984_v19 }
 0x7f2   : > { %6431 = shalt.err (!%p6428_p3)
}
 0x7f3   : > { %s6471_s19 = smov 128   ;;  %s6472_s21 = smov 8  }
 0x7f4   : > { %6201 = dma.vmem_to_hbm [thread:$0]  (%p6551_p5), %s6007_s9, 1024, %s6009_s13, %s5994_s14, %s6471_s19, %s6471_s19, %s6472_s21  }
 0x7f5 PF: > { %p6207_p4 = scmp.ge.s32.totalorder %s6466_s27, 2  ;;  %s6023_s23 = sand.u32 1, %s6454_s24  }
 0x7f6   : > { %s6024_s29 = scalar_lea.sflag [#allocation3], %s6023_s23 }
 0x7f7   : > { %p6204_p7 = pnand %p6207_p4, %p6555_p6 }
 0x7f9   : > { %p6205_p8 = pneg %p6204_p7 }
 0x7fb   : > { %6449 = dma.done.wait (%p6205_p8), %s6024_s29, 1024  }
 0x7fc   : > { %6451 = vsyncadd (%p6205_p8), %s6024_s29, 4294966272  ;;  %p17_p9 = scmp.ge.s32.totalorder %s6538_s30, 4   ;;  %s11952_s24 = smov %s6458_s25 }
 0x7fd   : > { %s11953_s25 = smov %s6462_s26  ;;  %s11954_s26 = smov %s6549_s10 }
 0x7fe   : > { %s11955_s27 = smov %s6538_s30  ;;  %19 = sbr.rel (!%p17_p9) target bundleno = 3 (0x3), region = 160 }
 0x803   :  { %6030 = vsyncpa [#allocation3], 1 }
 0x804   :  { %6032 = vsyncpa [#allocation3 + $0x1], 1 }

</bundles_post_ra>
